<compile_context>
chip_gen: v5e
topology: v5e:2x2
jax: 0.10.0
libtpu: 0.0.40
codegen_flags: <defaults>
</compile_context>

<pallas_src>
import functools
import math

import jax
import jax.numpy as jnp
from jax.experimental import pallas as pl
from jax.experimental.pallas import tpu as pltpu

BN_EPS = 1e-5
_MAX_K_TILE = 2048  # backbone K (flat_dim) tile upper bound


# ----------------------------------------------------------------------------
# Tiling / compiler-param helpers
# ----------------------------------------------------------------------------
def _round_up(x, m):
    return ((x + m - 1) // m) * m


def _k_tiling(flat_dim, max_tile=_MAX_K_TILE):
    """Return (tk, padded_flat).

    padded_flat = flat_dim rounded up to a multiple of 128; tk is the largest
    128-multiple <= max_tile that divides padded_flat (128 always works), so
    there is never a full-flat_dim fallback block.
    """
    padded = _round_up(flat_dim, 128)
    tk = 128
    for cand in range(min(max_tile, padded), 127, -128):
        if padded % cand == 0:
            tk = cand
            break
    return tk, padded


@functools.lru_cache(maxsize=1)
def _vmem_limit_bytes():
    """Per-generation VMEM budget (3/4 of physical; conservative fallback)."""
    try:
        cap = int(pltpu.get_tpu_info().vmem_capacity_bytes)
    except Exception:
        cap = 64 * 1024 * 1024  # v7x-sized fallback, safe everywhere
    return max(32 * 1024 * 1024, (cap * 3) // 4)


def _compiler_params():
    return pltpu.CompilerParams(
        dimension_semantics=("arbitrary",),  # single K-reduction grid axis
        vmem_limit_bytes=_vmem_limit_bytes(),
    )


def _resident_spec(shape):
    """Constant-index head-weight block: DMA'd once, single-buffered."""
    index_map = lambda k: (0,) * len(shape)
    try:
        return pl.BlockSpec(shape, index_map, pipeline_mode=pl.Buffered(1))
    except TypeError:  # pallas version without pipeline_mode on BlockSpec
        return pl.BlockSpec(shape, index_map)


# ----------------------------------------------------------------------------
# In-kernel math helpers
# ----------------------------------------------------------------------------
def _head_math(x_f32, w1, gamma, beta, w2, b2):
    """BYOLProjectionHead: Linear(no bias) -> BatchNorm1d(train) -> ReLU -> Linear(+bias).

    Matmul operands bf16 (MXU), accumulation + BN statistics fp32 (VPU/EUP).
    BN uses biased batch statistics over axis 0 (training mode), per view.
    Weight refs may be stored bf16 (online) or fp32 (momentum master); the
    astype(bf16) is a no-op for the former.
    """
    h = jnp.dot(x_f32.astype(jnp.bfloat16), w1.astype(jnp.bfloat16),
                preferred_element_type=jnp.float32)
    mean = jnp.mean(h, axis=0, keepdims=True)
    centered = h - mean
    var = jnp.mean(centered * centered, axis=0, keepdims=True)
    h = centered * jax.lax.rsqrt(var + BN_EPS)
    h = h * gamma.astype(jnp.float32) + beta.astype(jnp.float32)
    h = jnp.maximum(h, 0.0)
    return (jnp.dot(h.astype(jnp.bfloat16), w2.astype(jnp.bfloat16),
                    preferred_element_type=jnp.float32)
            + b2.astype(jnp.float32))


# ----------------------------------------------------------------------------
# Fused kernels
# ----------------------------------------------------------------------------
def _online_kernel(x0_ref, x1_ref, wb_ref,
                   w1_ref, g1_ref, be1_ref, w2_ref, b2_ref,          # projection head
                   w1p_ref, g1p_ref, be1p_ref, w2p_ref, b2p_ref,     # prediction head
                   p_ref, acc_ref, *, batch):
    """Online encoder, both views: backbone (K-tiled, shared weight stream)
    -> per-view projection head -> per-view prediction head."""
    k = pl.program_id(0)

    @pl.when(k == 0)
    def _():
        acc_ref[...] = jnp.zeros_like(acc_ref)

    # Backbone Linear (no bias): one bf16 weight tile feeds BOTH views'
    # activation tiles; fp32 accumulation over the K (flat_dim) grid axis.
    wb = wb_ref[...]
    acc_ref[0:batch, :] += jnp.dot(x0_ref[...], wb,
                                   preferred_element_type=jnp.float32)
    acc_ref[batch:2 * batch, :] += jnp.dot(x1_ref[...], wb,
                                           preferred_element_type=jnp.float32)

    @pl.when(k == pl.num_programs(0) - 1)
    def _():
        # Per-view head math (BatchNorm statistics per view, as in PyTorch,
        # where each _forward sees exactly one view's batch).
        for v in range(2):
            f = acc_ref[v * batch:(v + 1) * batch, :]
            z = _head_math(f, w1_ref[...], g1_ref[...], be1_ref[...],
                           w2_ref[...], b2_ref[...])
            p = _head_math(z, w1p_ref[...], g1p_ref[...], be1p_ref[...],
                           w2p_ref[...], b2p_ref[...])
            p_ref[v, :, :] = p.astype(p_ref.dtype)


def _momentum_kernel(x_ref, wb_ref,
                     w1_ref, g1_ref, be1_ref, w2_ref, b2_ref,
                     z_ref, acc_ref):
    """Momentum encoder (one view): backbone (K-tiled) -> projection head.

    Momentum weights arrive as the fp32 EMA master copies and are cast to bf16
    in VMEM for the MXU (EMA fidelity is preserved in HBM).
    """
    k = pl.program_id(0)

    @pl.when(k == 0)
    def _():
        acc_ref[...] = jnp.zeros_like(acc_ref)

    acc_ref[...] += jnp.dot(x_ref[...], wb_ref[...].astype(jnp.bfloat16),
                            preferred_element_type=jnp.float32)

    @pl.when(k == pl.num_programs(0) - 1)
    def _():
        z = _head_math(acc_ref[...], w1_ref[...], g1_ref[...], be1_ref[...],
                       w2_ref[...], b2_ref[...])
        z_ref[...] = z.astype(z_ref.dtype)


# ----------------------------------------------------------------------------
# pallas_call wrappers
# ----------------------------------------------------------------------------
def online_forward(x0f, x1f, params, tk):
    """x0f/x1f: (B, padded_flat) bf16. Returns p of shape (2, B, out_dim) fp32."""
    B, padded = x0f.shape
    wb = params["backbone"]["w"]
    pj, pr = params["proj"], params["pred"]
    in_dim = wb.shape[1]
    hid = pj["w1"].shape[1]
    out = pj["w2"].shape[1]
    assert padded % tk == 0
    grid = (padded // tk,)

    return pl.pallas_call(
        functools.partial(_online_kernel, batch=B),
        out_shape=jax.ShapeDtypeStruct((2, B, out), jnp.float32),
        grid_spec=pltpu.PrefetchScalarGridSpec(
            num_scalar_prefetch=0,
            grid=grid,
            in_specs=[
                pl.BlockSpec((B, tk), lambda k: (0, k)),        # x0 (bf16)
                pl.BlockSpec((B, tk), lambda k: (0, k)),        # x1 (bf16)
                pl.BlockSpec((tk, in_dim), lambda k: (k, 0)),   # backbone w (K-stream, shared)
                _resident_spec((in_dim, hid)),                  # proj w1
                _resident_spec((1, hid)),                       # proj gamma
                _resident_spec((1, hid)),                       # proj beta
                _resident_spec((hid, out)),                     # proj w2
                _resident_spec((1, out)),                       # proj b2
                _resident_spec((out, hid)),                     # pred w1
                _resident_spec((1, hid)),                       # pred gamma
                _resident_spec((1, hid)),                       # pred beta
                _resident_spec((hid, out)),                     # pred w2
                _resident_spec((1, out)),                       # pred b2
            ],
            out_specs=pl.BlockSpec((2, B, out), lambda k: (0, 0, 0)),
            scratch_shapes=[pltpu.VMEM((2 * B, in_dim), jnp.float32)],
        ),
        compiler_params=_compiler_params(),
    )(x0f, x1f, wb,
      pj["w1"], pj["gamma"], pj["beta"], pj["w2"], pj["b2"],
      pr["w1"], pr["gamma"], pr["beta"], pr["w2"], pr["b2"])


def momentum_forward(xf, mom, tk):
    """xf: (B, padded_flat) bf16; mom: fp32 EMA tree. Returns z (B, out_dim) fp32."""
    B, padded = xf.shape
    wb = mom["backbone"]["w"]
    pj = mom["proj"]
    in_dim = wb.shape[1]
    hid = pj["w1"].shape[1]
    out = pj["w2"].shape[1]
    assert padded % tk == 0
    grid = (padded // tk,)

    return pl.pallas_call(
        _momentum_kernel,
        out_shape=jax.ShapeDtypeStruct((B, out), jnp.float32),
        grid_spec=pltpu.PrefetchScalarGridSpec(
            num_scalar_prefetch=0,
            grid=grid,
            in_specs=[
                pl.BlockSpec((B, tk), lambda k: (0, k)),        # x (bf16)
                pl.BlockSpec((tk, in_dim), lambda k: (k, 0)),   # backbone w (fp32 master, K-stream)
                _resident_spec((in_dim, hid)),                  # proj w1
                _resident_spec((1, hid)),                       # proj gamma
                _resident_spec((1, hid)),                       # proj beta
                _resident_spec((hid, out)),                     # proj w2
                _resident_spec((1, out)),                       # proj b2
            ],
            out_specs=pl.BlockSpec((B, out), lambda k: (0, 0)),
            scratch_shapes=[pltpu.VMEM((B, in_dim), jnp.float32)],
        ),
        compiler_params=_compiler_params(),
    )(xf, wb, pj["w1"], pj["gamma"], pj["beta"], pj["w2"], pj["b2"])


# ----------------------------------------------------------------------------
# Parameters (online matmul weights bf16; momentum tree is an fp32 master copy)
# ----------------------------------------------------------------------------
def _uniform(key, shape, bound, dtype):
    return jax.random.uniform(key, shape, jnp.float32, -bound, bound).astype(dtype)


def init_head_params(key, input_dim, hidden_dim, output_dim):
    k1, k2, k3 = jax.random.split(key, 3)
    bound1 = 1.0 / math.sqrt(input_dim)
    bound2 = 1.0 / math.sqrt(hidden_dim)
    return {
        # nn.Linear stores (out, in); kept as (in, out) for row-major matmul.
        "w1": _uniform(k1, (input_dim, hidden_dim), bound1, jnp.bfloat16),
        "gamma": jnp.ones((1, hidden_dim), jnp.float32),   # BN weight init
        "beta": jnp.zeros((1, hidden_dim), jnp.float32),   # BN bias init
        "w2": _uniform(k2, (hidden_dim, output_dim), bound2, jnp.bfloat16),
        "b2": _uniform(k3, (1, output_dim), bound2, jnp.float32),
    }


def init_byol_params(key, flat_dim, in_dim, hidden_dim, out_dim):
    _, padded = _k_tiling(flat_dim)
    kb, kproj, kpred = jax.random.split(key, 3)
    bound = 1.0 / math.sqrt(flat_dim)
    wb = _uniform(kb, (flat_dim, in_dim), bound, jnp.bfloat16)
    if padded != flat_dim:
        wb = jnp.pad(wb, ((0, padded - flat_dim), (0, 0)))  # zero rows for padded K
    params = {
        "backbone": {"w": wb},
        "proj": init_head_params(kproj, in_dim, hidden_dim, out_dim),
        "pred": init_head_params(kpred, out_dim, hidden_dim, out_dim),
    }
    # Momentum encoder = copy of backbone + projection head, held as fp32 master
    # so EMA increments (1-m)*delta are not lost to bf16 rounding.
    momentum = jax.tree_util.tree_map(
        lambda a: a.astype(jnp.float32),
        {"backbone": params["backbone"], "proj": params["proj"]},
    )
    return params, momentum


# ----------------------------------------------------------------------------
# BYOL forward (mirrors BYOL.forward semantics)
# ----------------------------------------------------------------------------
def _momentum_update(prev, cur, m):
    # prev (fp32 master) = prev*m + cur*(1-m); cur matmul weights are bf16-stored.
    return jax.tree_util.tree_map(
        lambda p, c: p * m + c.astype(jnp.float32) * (1.0 - m), prev, cur)


def _prep_view(x, padded_flat):
    """Flatten, cast to bf16 once in the wrapper (halves x DMA bytes), zero-pad K."""
    xf = x.reshape(x.shape[0], -1).astype(jnp.bfloat16)
    pad = padded_flat - xf.shape[1]
    if pad:
        xf = jnp.pad(xf, ((0, 0), (0, pad)))
    return xf


@functools.partial(jax.jit, static_argnames=("m",))
def byol_forward(params, mom_params, x0, x1, m=0.9):
    """Equivalent of BYOL.forward(x0, x1).

    Returns ((z0, p0), (z1, p1), new_mom_params).  As in the PyTorch module,
    the momentum update runs once per internal _forward, so the second
    momentum branch uses the twice-decayed EMA; the final EMA state is
    returned so it persists across training steps.
    """
    cur = {"backbone": params["backbone"], "proj": params["proj"]}
    mom1 = _momentum_update(mom_params, cur, m)   # EMA state inside _forward(x0, x1)
    mom2 = _momentum_update(mom1, cur, m)         # EMA state inside _forward(x1, x0)

    flat_raw = math.prod(x0.shape[1:])
    tk, padded = _k_tiling(flat_raw)
    assert padded == params["backbone"]["w"].shape[0], (
        "params were initialized for a different image size")

    x0f = _prep_view(x0, padded)
    x1f = _prep_view(x1, padded)

    # Online encoder: both views share weights -> one launch, weight streamed once.
    p = online_forward(x0f, x1f, params, tk)      # p[0]=p0, p[1]=p1

    # Momentum encoder: x1 uses mom1 (first _forward), x0 uses mom2 (second).
    z1 = momentum_forward(x1f, mom1, tk)
    z0 = momentum_forward(x0f, mom2, tk)

    # TODO(synk): BatchNorm1d running_mean/running_var (eval-mode state) is not tracked.
    return (z0, p[0]), (z1, p[1]), mom2


# ----------------------------------------------------------------------------
# Demo
# ----------------------------------------------------------------------------
if __name__ == "__main__":
    # Small shapes consistent with the module (bsz x channels x W x H images).
    B, C, H, W = 8, 4, 16, 16          # flat_dim = 1024 -> single 1024-wide K tile
    IN_DIM, HIDDEN_DIM, OUT_DIM = 256, 512, 128
    M = 0.9

    key = jax.random.PRNGKey(0)
    kp, kx0, kx1 = jax.random.split(key, 3)

    params, mom_params = init_byol_params(kp, C * H * W, IN_DIM, HIDDEN_DIM, OUT_DIM)
    x0 = jax.random.normal(kx0, (B, C, H, W), jnp.float32)
    x1 = jax.random.normal(kx1, (B, C, H, W), jnp.float32)

    (z0, p0), (z1, p1), mom_params = byol_forward(params, mom_params, x0, x1, M)
    jax.block_until_ready((z0, p0, z1, p1, mom_params))

    assert z0.shape == (B, OUT_DIM) and p0.shape == (B, OUT_DIM)
    assert z1.shape == (B, OUT_DIM) and p1.shape == (B, OUT_DIM)
    assert bool(jnp.all(jnp.isfinite(z0)) & jnp.all(jnp.isfinite(p0))
                & jnp.all(jnp.isfinite(z1)) & jnp.all(jnp.isfinite(p1)))
    print("KERNEL_OK")
</pallas_src>

<mosaic_0001>
module attributes {stable_mosaic.version = 11 : i64} {
  func.func @_online_kernel(%arg0: i32, %arg1: memref<8x1024xbf16, #tpu.memory_space<vmem>>, %arg2: memref<8x1024xbf16, #tpu.memory_space<vmem>>, %arg3: memref<1024x256xbf16, #tpu.memory_space<vmem>>, %arg4: memref<256x512xbf16, #tpu.memory_space<vmem>>, %arg5: memref<1x512xf32, #tpu.memory_space<vmem>>, %arg6: memref<1x512xf32, #tpu.memory_space<vmem>>, %arg7: memref<512x128xbf16, #tpu.memory_space<vmem>>, %arg8: memref<1x128xf32, #tpu.memory_space<vmem>>, %arg9: memref<128x512xbf16, #tpu.memory_space<vmem>>, %arg10: memref<1x512xf32, #tpu.memory_space<vmem>>, %arg11: memref<1x512xf32, #tpu.memory_space<vmem>>, %arg12: memref<512x128xbf16, #tpu.memory_space<vmem>>, %arg13: memref<1x128xf32, #tpu.memory_space<vmem>>, %arg14: memref<2x8x128xf32, #tpu.memory_space<vmem>>, %arg15: memref<16x256xf32, #tpu.memory_space<vmem>>) attributes {dimension_semantics = [#tpu.dimension_semantics<arbitrary>], iteration_bounds = array<i64: 1>, scalar_prefetch = 0 : i64, scratch_operands = 1 : i64, tpu.core_type = #tpu.core_type<tc>, window_params = [{transform_indices = @transform_0, window_bounds = array<i64: 8, 1024>}, {transform_indices = @transform_1, window_bounds = array<i64: 8, 1024>}, {transform_indices = @transform_2, window_bounds = array<i64: 1024, 256>}, {pipeline_mode = #tpu.pipeline_mode<synchronous>, transform_indices = @transform_3, window_bounds = array<i64: 256, 512>}, {pipeline_mode = #tpu.pipeline_mode<synchronous>, transform_indices = @transform_4, window_bounds = array<i64: 1, 512>}, {pipeline_mode = #tpu.pipeline_mode<synchronous>, transform_indices = @transform_5, window_bounds = array<i64: 1, 512>}, {pipeline_mode = #tpu.pipeline_mode<synchronous>, transform_indices = @transform_6, window_bounds = array<i64: 512, 128>}, {pipeline_mode = #tpu.pipeline_mode<synchronous>, transform_indices = @transform_7, window_bounds = array<i64: 1, 128>}, {pipeline_mode = #tpu.pipeline_mode<synchronous>, transform_indices = @transform_8, window_bounds = array<i64: 128, 512>}, {pipeline_mode = #tpu.pipeline_mode<synchronous>, transform_indices = @transform_9, window_bounds = array<i64: 1, 512>}, {pipeline_mode = #tpu.pipeline_mode<synchronous>, transform_indices = @transform_10, window_bounds = array<i64: 1, 512>}, {pipeline_mode = #tpu.pipeline_mode<synchronous>, transform_indices = @transform_11, window_bounds = array<i64: 512, 128>}, {pipeline_mode = #tpu.pipeline_mode<synchronous>, transform_indices = @transform_12, window_bounds = array<i64: 1, 128>}, {pipeline_mode = #tpu.pipeline_mode<synchronous>, transform_indices = @transform_13, window_bounds = array<i64: 2, 8, 128>}]} {
    %c0_i32 = arith.constant 0 : i32
    %0 = arith.cmpi eq, %arg0, %c0_i32 : i32
    %1 = arith.extui %0 : i1 to i32
    %c0_i32_0 = arith.constant 0 : i32
    %2 = arith.cmpi ne, %1, %c0_i32_0 : i32
    scf.if %2 {
      %cst_16 = arith.constant 0.000000e+00 : f32
      %17 = vector.broadcast %cst_16 : f32 to vector<16x256xf32>
      %c0_17 = arith.constant 0 : index
      %c0_18 = arith.constant 0 : index
      %18 = vector.load %arg15[%c0_17, %c0_18] : memref<16x256xf32, #tpu.memory_space<vmem>>, vector<16x256xf32>
      tpu.vector_store %arg15[%c0_17, %c0_18], %17 {strides = array<i32>} : memref<16x256xf32, #tpu.memory_space<vmem>>, vector<16x256xf32>,
    } else {
    }
    %c0 = arith.constant 0 : index
    %c0_1 = arith.constant 0 : index
    %3 = vector.load %arg3[%c0, %c0_1] : memref<1024x256xbf16, #tpu.memory_space<vmem>>, vector<1024x256xbf16>
    %c0_2 = arith.constant 0 : index
    %c0_3 = arith.constant 0 : index
    %4 = vector.load %arg15[%c0_2, %c0_3] : memref<16x256xf32, #tpu.memory_space<vmem>>, vector<8x256xf32>
    %c0_4 = arith.constant 0 : index
    %c0_5 = arith.constant 0 : index
    %5 = vector.load %arg1[%c0_4, %c0_5] : memref<8x1024xbf16, #tpu.memory_space<vmem>>, vector<8x1024xbf16>
    %cst = arith.constant dense<0.000000e+00> : vector<8x256xf32>
    %6 = tpu.matmul %5, %3, %cst {dimension_numbers = #tpu.dot_dimension_numbers<[1], [0], [0], [1], [0, 0, 1, 1], [], []>} : vector<8x1024xbf16>, vector<1024x256xbf16>, vector<8x256xf32> -> vector<8x256xf32>
    %7 = arith.addf %4, %6 : vector<8x256xf32>
    %c0_6 = arith.constant 0 : index
    %c0_7 = arith.constant 0 : index
    %8 = vector.load %arg15[%c0_6, %c0_7] : memref<16x256xf32, #tpu.memory_space<vmem>>, vector<8x256xf32>
    tpu.vector_store %arg15[%c0_6, %c0_7], %7 {strides = array<i32>} : memref<16x256xf32, #tpu.memory_space<vmem>>, vector<8x256xf32>,
    %c8 = arith.constant 8 : index
    %c0_8 = arith.constant 0 : index
    %9 = vector.load %arg15[%c8, %c0_8] : memref<16x256xf32, #tpu.memory_space<vmem>>, vector<8x256xf32>
    %c0_9 = arith.constant 0 : index
    %c0_10 = arith.constant 0 : index
    %10 = vector.load %arg2[%c0_9, %c0_10] : memref<8x1024xbf16, #tpu.memory_space<vmem>>, vector<8x1024xbf16>
    %cst_11 = arith.constant dense<0.000000e+00> : vector<8x256xf32>
    %11 = tpu.matmul %10, %3, %cst_11 {dimension_numbers = #tpu.dot_dimension_numbers<[1], [0], [0], [1], [0, 0, 1, 1], [], []>} : vector<8x1024xbf16>, vector<1024x256xbf16>, vector<8x256xf32> -> vector<8x256xf32>
    %12 = arith.addf %9, %11 : vector<8x256xf32>
    %c8_12 = arith.constant 8 : index
    %c0_13 = arith.constant 0 : index
    %13 = vector.load %arg15[%c8_12, %c0_13] : memref<16x256xf32, #tpu.memory_space<vmem>>, vector<8x256xf32>
    tpu.vector_store %arg15[%c8_12, %c0_13], %12 {strides = array<i32>} : memref<16x256xf32, #tpu.memory_space<vmem>>, vector<8x256xf32>,
    %c0_i32_14 = arith.constant 0 : i32
    %14 = arith.cmpi eq, %arg0, %c0_i32_14 : i32
    %15 = arith.extui %14 : i1 to i32
    %c0_i32_15 = arith.constant 0 : i32
    %16 = arith.cmpi ne, %15, %c0_i32_15 : i32
    scf.if %16 {
      %c0_16 = arith.constant 0 : index
      %c0_17 = arith.constant 0 : index
      %17 = vector.load %arg15[%c0_16, %c0_17] : memref<16x256xf32, #tpu.memory_space<vmem>>, vector<8x256xf32>
      %c0_18 = arith.constant 0 : index
      %c0_19 = arith.constant 0 : index
      %18 = vector.load %arg4[%c0_18, %c0_19] : memref<256x512xbf16, #tpu.memory_space<vmem>>, vector<256x512xbf16>
      %c0_20 = arith.constant 0 : index
      %c0_21 = arith.constant 0 : index
      %19 = vector.load %arg5[%c0_20, %c0_21] : memref<1x512xf32, #tpu.memory_space<vmem>>, vector<1x512xf32>
      %c0_22 = arith.constant 0 : index
      %c0_23 = arith.constant 0 : index
      %20 = vector.load %arg6[%c0_22, %c0_23] : memref<1x512xf32, #tpu.memory_space<vmem>>, vector<1x512xf32>
      %c0_24 = arith.constant 0 : index
      %c0_25 = arith.constant 0 : index
      %21 = vector.load %arg7[%c0_24, %c0_25] : memref<512x128xbf16, #tpu.memory_space<vmem>>, vector<512x128xbf16>
      %c0_26 = arith.constant 0 : index
      %c0_27 = arith.constant 0 : index
      %22 = vector.load %arg8[%c0_26, %c0_27] : memref<1x128xf32, #tpu.memory_space<vmem>>, vector<1x128xf32>
      %23 = arith.truncf %17 : vector<8x256xf32> to vector<8x256xbf16>
      %cst_28 = arith.constant dense<0.000000e+00> : vector<8x512xf32>
      %24 = tpu.matmul %23, %18, %cst_28 {dimension_numbers = #tpu.dot_dimension_numbers<[1], [0], [0], [1], [0, 0, 1, 1], [], []>} : vector<8x256xbf16>, vector<256x512xbf16>, vector<8x512xf32> -> vector<8x512xf32>
      %cst_29 = arith.constant dense<0.000000e+00> : vector<512xf32>
      %25 = vector.multi_reduction <add>, %24, %cst_29 [0] : vector<8x512xf32> to vector<512xf32>
      %26 = vector.shape_cast %25 : vector<512xf32> to vector<1x512xf32>
      %cst_30 = arith.constant 8.000000e+00 : f32
      %27 = vector.broadcast %cst_30 : f32 to vector<1x512xf32>
      %28 = arith.divf %26, %27 : vector<1x512xf32>
      %29 = vector.broadcast %28 : vector<1x512xf32> to vector<8x512xf32>
      %30 = arith.subf %24, %29 : vector<8x512xf32>
      %31 = arith.mulf %30, %30 : vector<8x512xf32>
      %cst_31 = arith.constant dense<0.000000e+00> : vector<512xf32>
      %32 = vector.multi_reduction <add>, %31, %cst_31 [0] : vector<8x512xf32> to vector<512xf32>
      %33 = vector.shape_cast %32 : vector<512xf32> to vector<1x512xf32>
      %cst_32 = arith.constant 8.000000e+00 : f32
      %34 = vector.broadcast %cst_32 : f32 to vector<1x512xf32>
      %35 = arith.divf %33, %34 : vector<1x512xf32>
      %cst_33 = arith.constant 9.99999974E-6 : f32
      %36 = vector.broadcast %cst_33 : f32 to vector<1x512xf32>
      %37 = arith.addf %35, %36 : vector<1x512xf32>
      %38 = math.rsqrt %37 : vector<1x512xf32>
      %39 = vector.broadcast %38 : vector<1x512xf32> to vector<8x512xf32>
      %40 = arith.mulf %30, %39 : vector<8x512xf32>
      %41 = vector.broadcast %19 : vector<1x512xf32> to vector<8x512xf32>
      %42 = arith.mulf %40, %41 : vector<8x512xf32>
      %43 = vector.broadcast %20 : vector<1x512xf32> to vector<8x512xf32>
      %44 = arith.addf %42, %43 : vector<8x512xf32>
      %cst_34 = arith.constant 0.000000e+00 : f32
      %45 = vector.broadcast %cst_34 : f32 to vector<8x512xf32>
      %46 = arith.maximumf %44, %45 : vector<8x512xf32>
      %47 = arith.truncf %46 : vector<8x512xf32> to vector<8x512xbf16>
      %cst_35 = arith.constant dense<0.000000e+00> : vector<8x128xf32>
      %48 = tpu.matmul %47, %21, %cst_35 {dimension_numbers = #tpu.dot_dimension_numbers<[1], [0], [0], [1], [0, 0, 1, 1], [], []>} : vector<8x512xbf16>, vector<512x128xbf16>, vector<8x128xf32> -> vector<8x128xf32>
      %49 = vector.broadcast %22 : vector<1x128xf32> to vector<8x128xf32>
      %50 = arith.addf %48, %49 : vector<8x128xf32>
      %c0_36 = arith.constant 0 : index
      %c0_37 = arith.constant 0 : index
      %51 = vector.load %arg9[%c0_36, %c0_37] : memref<128x512xbf16, #tpu.memory_space<vmem>>, vector<128x512xbf16>
      %c0_38 = arith.constant 0 : index
      %c0_39 = arith.constant 0 : index
      %52 = vector.load %arg10[%c0_38, %c0_39] : memref<1x512xf32, #tpu.memory_space<vmem>>, vector<1x512xf32>
      %c0_40 = arith.constant 0 : index
      %c0_41 = arith.constant 0 : index
      %53 = vector.load %arg11[%c0_40, %c0_41] : memref<1x512xf32, #tpu.memory_space<vmem>>, vector<1x512xf32>
      %c0_42 = arith.constant 0 : index
      %c0_43 = arith.constant 0 : index
      %54 = vector.load %arg12[%c0_42, %c0_43] : memref<512x128xbf16, #tpu.memory_space<vmem>>, vector<512x128xbf16>
      %c0_44 = arith.constant 0 : index
      %c0_45 = arith.constant 0 : index
      %55 = vector.load %arg13[%c0_44, %c0_45] : memref<1x128xf32, #tpu.memory_space<vmem>>, vector<1x128xf32>
      %56 = arith.truncf %50 : vector<8x128xf32> to vector<8x128xbf16>
      %cst_46 = arith.constant dense<0.000000e+00> : vector<8x512xf32>
      %57 = tpu.matmul %56, %51, %cst_46 {dimension_numbers = #tpu.dot_dimension_numbers<[1], [0], [0], [1], [0, 0, 1, 1], [], []>} : vector<8x128xbf16>, vector<128x512xbf16>, vector<8x512xf32> -> vector<8x512xf32>
      %cst_47 = arith.constant dense<0.000000e+00> : vector<512xf32>
      %58 = vector.multi_reduction <add>, %57, %cst_47 [0] : vector<8x512xf32> to vector<512xf32>
      %59 = vector.shape_cast %58 : vector<512xf32> to vector<1x512xf32>
      %cst_48 = arith.constant 8.000000e+00 : f32
      %60 = vector.broadcast %cst_48 : f32 to vector<1x512xf32>
      %61 = arith.divf %59, %60 : vector<1x512xf32>
      %62 = vector.broadcast %61 : vector<1x512xf32> to vector<8x512xf32>
      %63 = arith.subf %57, %62 : vector<8x512xf32>
      %64 = arith.mulf %63, %63 : vector<8x512xf32>
      %cst_49 = arith.constant dense<0.000000e+00> : vector<512xf32>
      %65 = vector.multi_reduction <add>, %64, %cst_49 [0] : vector<8x512xf32> to vector<512xf32>
      %66 = vector.shape_cast %65 : vector<512xf32> to vector<1x512xf32>
      %cst_50 = arith.constant 8.000000e+00 : f32
      %67 = vector.broadcast %cst_50 : f32 to vector<1x512xf32>
      %68 = arith.divf %66, %67 : vector<1x512xf32>
      %cst_51 = arith.constant 9.99999974E-6 : f32
      %69 = vector.broadcast %cst_51 : f32 to vector<1x512xf32>
      %70 = arith.addf %68, %69 : vector<1x512xf32>
      %71 = math.rsqrt %70 : vector<1x512xf32>
      %72 = vector.broadcast %71 : vector<1x512xf32> to vector<8x512xf32>
      %73 = arith.mulf %63, %72 : vector<8x512xf32>
      %74 = vector.broadcast %52 : vector<1x512xf32> to vector<8x512xf32>
      %75 = arith.mulf %73, %74 : vector<8x512xf32>
      %76 = vector.broadcast %53 : vector<1x512xf32> to vector<8x512xf32>
      %77 = arith.addf %75, %76 : vector<8x512xf32>
      %cst_52 = arith.constant 0.000000e+00 : f32
      %78 = vector.broadcast %cst_52 : f32 to vector<8x512xf32>
      %79 = arith.maximumf %77, %78 : vector<8x512xf32>
      %80 = arith.truncf %79 : vector<8x512xf32> to vector<8x512xbf16>
      %cst_53 = arith.constant dense<0.000000e+00> : vector<8x128xf32>
      %81 = tpu.matmul %80, %54, %cst_53 {dimension_numbers = #tpu.dot_dimension_numbers<[1], [0], [0], [1], [0, 0, 1, 1], [], []>} : vector<8x512xbf16>, vector<512x128xbf16>, vector<8x128xf32> -> vector<8x128xf32>
      %82 = vector.broadcast %55 : vector<1x128xf32> to vector<8x128xf32>
      %83 = arith.addf %81, %82 : vector<8x128xf32>
      %c0_54 = arith.constant 0 : index
      %c0_55 = arith.constant 0 : index
      %c0_56 = arith.constant 0 : index
      %84 = vector.load %arg14[%c0_54, %c0_55, %c0_56] : memref<2x8x128xf32, #tpu.memory_space<vmem>>, vector<1x8x128xf32>
      %85 = vector.shape_cast %84 : vector<1x8x128xf32> to vector<8x128xf32>
      %86 = vector.shape_cast %83 : vector<8x128xf32> to vector<1x8x128xf32>
      tpu.vector_store %arg14[%c0_54, %c0_55, %c0_56], %86 {strides = array<i32>} : memref<2x8x128xf32, #tpu.memory_space<vmem>>, vector<1x8x128xf32>,
      %c8_57 = arith.constant 8 : index
      %c0_58 = arith.constant 0 : index
      %87 = vector.load %arg15[%c8_57, %c0_58] : memref<16x256xf32, #tpu.memory_space<vmem>>, vector<8x256xf32>
      %c0_59 = arith.constant 0 : index
      %c0_60 = arith.constant 0 : index
      %88 = vector.load %arg4[%c0_59, %c0_60] : memref<256x512xbf16, #tpu.memory_space<vmem>>, vector<256x512xbf16>
      %c0_61 = arith.constant 0 : index
      %c0_62 = arith.constant 0 : index
      %89 = vector.load %arg5[%c0_61, %c0_62] : memref<1x512xf32, #tpu.memory_space<vmem>>, vector<1x512xf32>
      %c0_63 = arith.constant 0 : index
      %c0_64 = arith.constant 0 : index
      %90 = vector.load %arg6[%c0_63, %c0_64] : memref<1x512xf32, #tpu.memory_space<vmem>>, vector<1x512xf32>
      %c0_65 = arith.constant 0 : index
      %c0_66 = arith.constant 0 : index
      %91 = vector.load %arg7[%c0_65, %c0_66] : memref<512x128xbf16, #tpu.memory_space<vmem>>, vector<512x128xbf16>
      %c0_67 = arith.constant 0 : index
      %c0_68 = arith.constant 0 : index
      %92 = vector.load %arg8[%c0_67, %c0_68] : memref<1x128xf32, #tpu.memory_space<vmem>>, vector<1x128xf32>
      %93 = arith.truncf %87 : vector<8x256xf32> to vector<8x256xbf16>
      %cst_69 = arith.constant dense<0.000000e+00> : vector<8x512xf32>
      %94 = tpu.matmul %93, %88, %cst_69 {dimension_numbers = #tpu.dot_dimension_numbers<[1], [0], [0], [1], [0, 0, 1, 1], [], []>} : vector<8x256xbf16>, vector<256x512xbf16>, vector<8x512xf32> -> vector<8x512xf32>
      %cst_70 = arith.constant dense<0.000000e+00> : vector<512xf32>
      %95 = vector.multi_reduction <add>, %94, %cst_70 [0] : vector<8x512xf32> to vector<512xf32>
      %96 = vector.shape_cast %95 : vector<512xf32> to vector<1x512xf32>
      %cst_71 = arith.constant 8.000000e+00 : f32
      %97 = vector.broadcast %cst_71 : f32 to vector<1x512xf32>
      %98 = arith.divf %96, %97 : vector<1x512xf32>
      %99 = vector.broadcast %98 : vector<1x512xf32> to vector<8x512xf32>
      %100 = arith.subf %94, %99 : vector<8x512xf32>
      %101 = arith.mulf %100, %100 : vector<8x512xf32>
      %cst_72 = arith.constant dense<0.000000e+00> : vector<512xf32>
      %102 = vector.multi_reduction <add>, %101, %cst_72 [0] : vector<8x512xf32> to vector<512xf32>
      %103 = vector.shape_cast %102 : vector<512xf32> to vector<1x512xf32>
      %cst_73 = arith.constant 8.000000e+00 : f32
      %104 = vector.broadcast %cst_73 : f32 to vector<1x512xf32>
      %105 = arith.divf %103, %104 : vector<1x512xf32>
      %cst_74 = arith.constant 9.99999974E-6 : f32
      %106 = vector.broadcast %cst_74 : f32 to vector<1x512xf32>
      %107 = arith.addf %105, %106 : vector<1x512xf32>
      %108 = math.rsqrt %107 : vector<1x512xf32>
      %109 = vector.broadcast %108 : vector<1x512xf32> to vector<8x512xf32>
      %110 = arith.mulf %100, %109 : vector<8x512xf32>
      %111 = vector.broadcast %89 : vector<1x512xf32> to vector<8x512xf32>
      %112 = arith.mulf %110, %111 : vector<8x512xf32>
      %113 = vector.broadcast %90 : vector<1x512xf32> to vector<8x512xf32>
      %114 = arith.addf %112, %113 : vector<8x512xf32>
      %cst_75 = arith.constant 0.000000e+00 : f32
      %115 = vector.broadcast %cst_75 : f32 to vector<8x512xf32>
      %116 = arith.maximumf %114, %115 : vector<8x512xf32>
      %117 = arith.truncf %116 : vector<8x512xf32> to vector<8x512xbf16>
      %cst_76 = arith.constant dense<0.000000e+00> : vector<8x128xf32>
      %118 = tpu.matmul %117, %91, %cst_76 {dimension_numbers = #tpu.dot_dimension_numbers<[1], [0], [0], [1], [0, 0, 1, 1], [], []>} : vector<8x512xbf16>, vector<512x128xbf16>, vector<8x128xf32> -> vector<8x128xf32>
      %119 = vector.broadcast %92 : vector<1x128xf32> to vector<8x128xf32>
      %120 = arith.addf %118, %119 : vector<8x128xf32>
      %c0_77 = arith.constant 0 : index
      %c0_78 = arith.constant 0 : index
      %121 = vector.load %arg9[%c0_77, %c0_78] : memref<128x512xbf16, #tpu.memory_space<vmem>>, vector<128x512xbf16>
      %c0_79 = arith.constant 0 : index
      %c0_80 = arith.constant 0 : index
      %122 = vector.load %arg10[%c0_79, %c0_80] : memref<1x512xf32, #tpu.memory_space<vmem>>, vector<1x512xf32>
      %c0_81 = arith.constant 0 : index
      %c0_82 = arith.constant 0 : index
      %123 = vector.load %arg11[%c0_81, %c0_82] : memref<1x512xf32, #tpu.memory_space<vmem>>, vector<1x512xf32>
      %c0_83 = arith.constant 0 : index
      %c0_84 = arith.constant 0 : index
      %124 = vector.load %arg12[%c0_83, %c0_84] : memref<512x128xbf16, #tpu.memory_space<vmem>>, vector<512x128xbf16>
      %c0_85 = arith.constant 0 : index
      %c0_86 = arith.constant 0 : index
      %125 = vector.load %arg13[%c0_85, %c0_86] : memref<1x128xf32, #tpu.memory_space<vmem>>, vector<1x128xf32>
      %126 = arith.truncf %120 : vector<8x128xf32> to vector<8x128xbf16>
      %cst_87 = arith.constant dense<0.000000e+00> : vector<8x512xf32>
      %127 = tpu.matmul %126, %121, %cst_87 {dimension_numbers = #tpu.dot_dimension_numbers<[1], [0], [0], [1], [0, 0, 1, 1], [], []>} : vector<8x128xbf16>, vector<128x512xbf16>, vector<8x512xf32> -> vector<8x512xf32>
      %cst_88 = arith.constant dense<0.000000e+00> : vector<512xf32>
      %128 = vector.multi_reduction <add>, %127, %cst_88 [0] : vector<8x512xf32> to vector<512xf32>
      %129 = vector.shape_cast %128 : vector<512xf32> to vector<1x512xf32>
      %cst_89 = arith.constant 8.000000e+00 : f32
      %130 = vector.broadcast %cst_89 : f32 to vector<1x512xf32>
      %131 = arith.divf %129, %130 : vector<1x512xf32>
      %132 = vector.broadcast %131 : vector<1x512xf32> to vector<8x512xf32>
      %133 = arith.subf %127, %132 : vector<8x512xf32>
      %134 = arith.mulf %133, %133 : vector<8x512xf32>
      %cst_90 = arith.constant dense<0.000000e+00> : vector<512xf32>
      %135 = vector.multi_reduction <add>, %134, %cst_90 [0] : vector<8x512xf32> to vector<512xf32>
      %136 = vector.shape_cast %135 : vector<512xf32> to vector<1x512xf32>
      %cst_91 = arith.constant 8.000000e+00 : f32
      %137 = vector.broadcast %cst_91 : f32 to vector<1x512xf32>
      %138 = arith.divf %136, %137 : vector<1x512xf32>
      %cst_92 = arith.constant 9.99999974E-6 : f32
      %139 = vector.broadcast %cst_92 : f32 to vector<1x512xf32>
      %140 = arith.addf %138, %139 : vector<1x512xf32>
      %141 = math.rsqrt %140 : vector<1x512xf32>
      %142 = vector.broadcast %141 : vector<1x512xf32> to vector<8x512xf32>
      %143 = arith.mulf %133, %142 : vector<8x512xf32>
      %144 = vector.broadcast %122 : vector<1x512xf32> to vector<8x512xf32>
      %145 = arith.mulf %143, %144 : vector<8x512xf32>
      %146 = vector.broadcast %123 : vector<1x512xf32> to vector<8x512xf32>
      %147 = arith.addf %145, %146 : vector<8x512xf32>
      %cst_93 = arith.constant 0.000000e+00 : f32
      %148 = vector.broadcast %cst_93 : f32 to vector<8x512xf32>
      %149 = arith.maximumf %147, %148 : vector<8x512xf32>
      %150 = arith.truncf %149 : vector<8x512xf32> to vector<8x512xbf16>
      %cst_94 = arith.constant dense<0.000000e+00> : vector<8x128xf32>
      %151 = tpu.matmul %150, %124, %cst_94 {dimension_numbers = #tpu.dot_dimension_numbers<[1], [0], [0], [1], [0, 0, 1, 1], [], []>} : vector<8x512xbf16>, vector<512x128xbf16>, vector<8x128xf32> -> vector<8x128xf32>
      %152 = vector.broadcast %125 : vector<1x128xf32> to vector<8x128xf32>
      %153 = arith.addf %151, %152 : vector<8x128xf32>
      %c1 = arith.constant 1 : index
      %c0_95 = arith.constant 0 : index
      %c0_96 = arith.constant 0 : index
      %154 = vector.load %arg14[%c1, %c0_95, %c0_96] : memref<2x8x128xf32, #tpu.memory_space<vmem>>, vector<1x8x128xf32>
      %155 = vector.shape_cast %154 : vector<1x8x128xf32> to vector<8x128xf32>
      %156 = vector.shape_cast %153 : vector<8x128xf32> to vector<1x8x128xf32>
      tpu.vector_store %arg14[%c1, %c0_95, %c0_96], %156 {strides = array<i32>} : memref<2x8x128xf32, #tpu.memory_space<vmem>>, vector<1x8x128xf32>,
    } else {
    }
    return
  }
  func.func @transform_0(%arg0: i32) -> (i32, i32) {
    %c0_i32 = arith.constant 0 : i32
    %c0_i32_0 = arith.constant 0 : i32
    return %c0_i32, %arg0 : i32, i32
  }
  func.func @transform_1(%arg0: i32) -> (i32, i32) {
    %c0_i32 = arith.constant 0 : i32
    %c0_i32_0 = arith.constant 0 : i32
    return %c0_i32, %arg0 : i32, i32
  }
  func.func @transform_2(%arg0: i32) -> (i32, i32) {
    %c0_i32 = arith.constant 0 : i32
    %c0_i32_0 = arith.constant 0 : i32
    return %arg0, %c0_i32 : i32, i32
  }
  func.func @transform_3(%arg0: i32) -> (i32, i32) {
    %c0_i32 = arith.constant 0 : i32
    %c0_i32_0 = arith.constant 0 : i32
    %c0_i32_1 = arith.constant 0 : i32
    return %c0_i32, %c0_i32_0 : i32, i32
  }
  func.func @transform_4(%arg0: i32) -> (i32, i32) {
    %c0_i32 = arith.constant 0 : i32
    %c0_i32_0 = arith.constant 0 : i32
    %c0_i32_1 = arith.constant 0 : i32
    return %c0_i32, %c0_i32_0 : i32, i32
  }
  func.func @transform_5(%arg0: i32) -> (i32, i32) {
    %c0_i32 = arith.constant 0 : i32
    %c0_i32_0 = arith.constant 0 : i32
    %c0_i32_1 = arith.constant 0 : i32
    return %c0_i32, %c0_i32_0 : i32, i32
  }
  func.func @transform_6(%arg0: i32) -> (i32, i32) {
    %c0_i32 = arith.constant 0 : i32
    %c0_i32_0 = arith.constant 0 : i32
    %c0_i32_1 = arith.constant 0 : i32
    return %c0_i32, %c0_i32_0 : i32, i32
  }
  func.func @transform_7(%arg0: i32) -> (i32, i32) {
    %c0_i32 = arith.constant 0 : i32
    %c0_i32_0 = arith.constant 0 : i32
    %c0_i32_1 = arith.constant 0 : i32
    return %c0_i32, %c0_i32_0 : i32, i32
  }
  func.func @transform_8(%arg0: i32) -> (i32, i32) {
    %c0_i32 = arith.constant 0 : i32
    %c0_i32_0 = arith.constant 0 : i32
    %c0_i32_1 = arith.constant 0 : i32
    return %c0_i32, %c0_i32_0 : i32, i32
  }
  func.func @transform_9(%arg0: i32) -> (i32, i32) {
    %c0_i32 = arith.constant 0 : i32
    %c0_i32_0 = arith.constant 0 : i32
    %c0_i32_1 = arith.constant 0 : i32
    return %c0_i32, %c0_i32_0 : i32, i32
  }
  func.func @transform_10(%arg0: i32) -> (i32, i32) {
    %c0_i32 = arith.constant 0 : i32
    %c0_i32_0 = arith.constant 0 : i32
    %c0_i32_1 = arith.constant 0 : i32
    return %c0_i32, %c0_i32_0 : i32, i32
  }
  func.func @transform_11(%arg0: i32) -> (i32, i32) {
    %c0_i32 = arith.constant 0 : i32
    %c0_i32_0 = arith.constant 0 : i32
    %c0_i32_1 = arith.constant 0 : i32
    return %c0_i32, %c0_i32_0 : i32, i32
  }
  func.func @transform_12(%arg0: i32) -> (i32, i32) {
    %c0_i32 = arith.constant 0 : i32
    %c0_i32_0 = arith.constant 0 : i32
    %c0_i32_1 = arith.constant 0 : i32
    return %c0_i32, %c0_i32_0 : i32, i32
  }
  func.func @transform_13(%arg0: i32) -> (i32, i32, i32) {
    %c0_i32 = arith.constant 0 : i32
    %c0_i32_0 = arith.constant 0 : i32
    %c0_i32_1 = arith.constant 0 : i32
    %c0_i32_2 = arith.constant 0 : i32
    return %c0_i32, %c0_i32_0, %c0_i32_1 : i32, i32, i32
  }
}

module attributes {stable_mosaic.version = 11 : i64} {
  func.func @_momentum_kernel(%arg0: i32, %arg1: memref<8x1024xbf16, #tpu.memory_space<vmem>>, %arg2: memref<1024x256xf32, #tpu.memory_space<vmem>>, %arg3: memref<256x512xf32, #tpu.memory_space<vmem>>, %arg4: memref<1x512xf32, #tpu.memory_space<vmem>>, %arg5: memref<1x512xf32, #tpu.memory_space<vmem>>, %arg6: memref<512x128xf32, #tpu.memory_space<vmem>>, %arg7: memref<1x128xf32, #tpu.memory_space<vmem>>, %arg8: memref<8x128xf32, #tpu.memory_space<vmem>>, %arg9: memref<8x256xf32, #tpu.memory_space<vmem>>) attributes {dimension_semantics = [#tpu.dimension_semantics<arbitrary>], iteration_bounds = array<i64: 1>, scalar_prefetch = 0 : i64, scratch_operands = 1 : i64, tpu.core_type = #tpu.core_type<tc>, window_params = [{transform_indices = @transform_0, window_bounds = array<i64: 8, 1024>}, {transform_indices = @transform_1, window_bounds = array<i64: 1024, 256>}, {pipeline_mode = #tpu.pipeline_mode<synchronous>, transform_indices = @transform_2, window_bounds = array<i64: 256, 512>}, {pipeline_mode = #tpu.pipeline_mode<synchronous>, transform_indices = @transform_3, window_bounds = array<i64: 1, 512>}, {pipeline_mode = #tpu.pipeline_mode<synchronous>, transform_indices = @transform_4, window_bounds = array<i64: 1, 512>}, {pipeline_mode = #tpu.pipeline_mode<synchronous>, transform_indices = @transform_5, window_bounds = array<i64: 512, 128>}, {pipeline_mode = #tpu.pipeline_mode<synchronous>, transform_indices = @transform_6, window_bounds = array<i64: 1, 128>}, {pipeline_mode = #tpu.pipeline_mode<synchronous>, transform_indices = @transform_7, window_bounds = array<i64: 8, 128>}]} {
    %c0_i32 = arith.constant 0 : i32
    %0 = arith.cmpi eq, %arg0, %c0_i32 : i32
    %1 = arith.extui %0 : i1 to i32
    %c0_i32_0 = arith.constant 0 : i32
    %2 = arith.cmpi ne, %1, %c0_i32_0 : i32
    scf.if %2 {
      %cst_10 = arith.constant 0.000000e+00 : f32
      %13 = vector.broadcast %cst_10 : f32 to vector<8x256xf32>
      %c0_11 = arith.constant 0 : index
      %c0_12 = arith.constant 0 : index
      %14 = vector.load %arg9[%c0_11, %c0_12] : memref<8x256xf32, #tpu.memory_space<vmem>>, vector<8x256xf32>
      tpu.vector_store %arg9[%c0_11, %c0_12], %13 {strides = array<i32>} : memref<8x256xf32, #tpu.memory_space<vmem>>, vector<8x256xf32>,
    } else {
    }
    %c0 = arith.constant 0 : index
    %c0_1 = arith.constant 0 : index
    %3 = vector.load %arg9[%c0, %c0_1] : memref<8x256xf32, #tpu.memory_space<vmem>>, vector<8x256xf32>
    %c0_2 = arith.constant 0 : index
    %c0_3 = arith.constant 0 : index
    %4 = vector.load %arg1[%c0_2, %c0_3] : memref<8x1024xbf16, #tpu.memory_space<vmem>>, vector<8x1024xbf16>
    %c0_4 = arith.constant 0 : index
    %c0_5 = arith.constant 0 : index
    %5 = vector.load %arg2[%c0_4, %c0_5] : memref<1024x256xf32, #tpu.memory_space<vmem>>, vector<1024x256xf32>
    %6 = arith.truncf %5 : vector<1024x256xf32> to vector<1024x256xbf16>
    %cst = arith.constant dense<0.000000e+00> : vector<8x256xf32>
    %7 = tpu.matmul %4, %6, %cst {dimension_numbers = #tpu.dot_dimension_numbers<[1], [0], [0], [1], [0, 0, 1, 1], [], []>} : vector<8x1024xbf16>, vector<1024x256xbf16>, vector<8x256xf32> -> vector<8x256xf32>
    %8 = arith.addf %3, %7 : vector<8x256xf32>
    %c0_6 = arith.constant 0 : index
    %c0_7 = arith.constant 0 : index
    %9 = vector.load %arg9[%c0_6, %c0_7] : memref<8x256xf32, #tpu.memory_space<vmem>>, vector<8x256xf32>
    tpu.vector_store %arg9[%c0_6, %c0_7], %8 {strides = array<i32>} : memref<8x256xf32, #tpu.memory_space<vmem>>, vector<8x256xf32>,
    %c0_i32_8 = arith.constant 0 : i32
    %10 = arith.cmpi eq, %arg0, %c0_i32_8 : i32
    %11 = arith.extui %10 : i1 to i32
    %c0_i32_9 = arith.constant 0 : i32
    %12 = arith.cmpi ne, %11, %c0_i32_9 : i32
    scf.if %12 {
      %c0_10 = arith.constant 0 : index
      %c0_11 = arith.constant 0 : index
      %13 = vector.load %arg9[%c0_10, %c0_11] : memref<8x256xf32, #tpu.memory_space<vmem>>, vector<8x256xf32>
      %c0_12 = arith.constant 0 : index
      %c0_13 = arith.constant 0 : index
      %14 = vector.load %arg3[%c0_12, %c0_13] : memref<256x512xf32, #tpu.memory_space<vmem>>, vector<256x512xf32>
      %c0_14 = arith.constant 0 : index
      %c0_15 = arith.constant 0 : index
      %15 = vector.load %arg4[%c0_14, %c0_15] : memref<1x512xf32, #tpu.memory_space<vmem>>, vector<1x512xf32>
      %c0_16 = arith.constant 0 : index
      %c0_17 = arith.constant 0 : index
      %16 = vector.load %arg5[%c0_16, %c0_17] : memref<1x512xf32, #tpu.memory_space<vmem>>, vector<1x512xf32>
      %c0_18 = arith.constant 0 : index
      %c0_19 = arith.constant 0 : index
      %17 = vector.load %arg6[%c0_18, %c0_19] : memref<512x128xf32, #tpu.memory_space<vmem>>, vector<512x128xf32>
      %c0_20 = arith.constant 0 : index
      %c0_21 = arith.constant 0 : index
      %18 = vector.load %arg7[%c0_20, %c0_21] : memref<1x128xf32, #tpu.memory_space<vmem>>, vector<1x128xf32>
      %19 = arith.truncf %13 : vector<8x256xf32> to vector<8x256xbf16>
      %20 = arith.truncf %14 : vector<256x512xf32> to vector<256x512xbf16>
      %cst_22 = arith.constant dense<0.000000e+00> : vector<8x512xf32>
      %21 = tpu.matmul %19, %20, %cst_22 {dimension_numbers = #tpu.dot_dimension_numbers<[1], [0], [0], [1], [0, 0, 1, 1], [], []>} : vector<8x256xbf16>, vector<256x512xbf16>, vector<8x512xf32> -> vector<8x512xf32>
      %cst_23 = arith.constant dense<0.000000e+00> : vector<512xf32>
      %22 = vector.multi_reduction <add>, %21, %cst_23 [0] : vector<8x512xf32> to vector<512xf32>
      %23 = vector.shape_cast %22 : vector<512xf32> to vector<1x512xf32>
      %cst_24 = arith.constant 8.000000e+00 : f32
      %24 = vector.broadcast %cst_24 : f32 to vector<1x512xf32>
      %25 = arith.divf %23, %24 : vector<1x512xf32>
      %26 = vector.broadcast %25 : vector<1x512xf32> to vector<8x512xf32>
      %27 = arith.subf %21, %26 : vector<8x512xf32>
      %28 = arith.mulf %27, %27 : vector<8x512xf32>
      %cst_25 = arith.constant dense<0.000000e+00> : vector<512xf32>
      %29 = vector.multi_reduction <add>, %28, %cst_25 [0] : vector<8x512xf32> to vector<512xf32>
      %30 = vector.shape_cast %29 : vector<512xf32> to vector<1x512xf32>
      %cst_26 = arith.constant 8.000000e+00 : f32
      %31 = vector.broadcast %cst_26 : f32 to vector<1x512xf32>
      %32 = arith.divf %30, %31 : vector<1x512xf32>
      %cst_27 = arith.constant 9.99999974E-6 : f32
      %33 = vector.broadcast %cst_27 : f32 to vector<1x512xf32>
      %34 = arith.addf %32, %33 : vector<1x512xf32>
      %35 = math.rsqrt %34 : vector<1x512xf32>
      %36 = vector.broadcast %35 : vector<1x512xf32> to vector<8x512xf32>
      %37 = arith.mulf %27, %36 : vector<8x512xf32>
      %38 = vector.broadcast %15 : vector<1x512xf32> to vector<8x512xf32>
      %39 = arith.mulf %37, %38 : vector<8x512xf32>
      %40 = vector.broadcast %16 : vector<1x512xf32> to vector<8x512xf32>
      %41 = arith.addf %39, %40 : vector<8x512xf32>
      %cst_28 = arith.constant 0.000000e+00 : f32
      %42 = vector.broadcast %cst_28 : f32 to vector<8x512xf32>
      %43 = arith.maximumf %41, %42 : vector<8x512xf32>
      %44 = arith.truncf %43 : vector<8x512xf32> to vector<8x512xbf16>
      %45 = arith.truncf %17 : vector<512x128xf32> to vector<512x128xbf16>
      %cst_29 = arith.constant dense<0.000000e+00> : vector<8x128xf32>
      %46 = tpu.matmul %44, %45, %cst_29 {dimension_numbers = #tpu.dot_dimension_numbers<[1], [0], [0], [1], [0, 0, 1, 1], [], []>} : vector<8x512xbf16>, vector<512x128xbf16>, vector<8x128xf32> -> vector<8x128xf32>
      %47 = vector.broadcast %18 : vector<1x128xf32> to vector<8x128xf32>
      %48 = arith.addf %46, %47 : vector<8x128xf32>
      %c0_30 = arith.constant 0 : index
      %c0_31 = arith.constant 0 : index
      %49 = vector.load %arg8[%c0_30, %c0_31] : memref<8x128xf32, #tpu.memory_space<vmem>>, vector<8x128xf32>
      tpu.vector_store %arg8[%c0_30, %c0_31], %48 {strides = array<i32>} : memref<8x128xf32, #tpu.memory_space<vmem>>, vector<8x128xf32>,
    } else {
    }
    return
  }
  func.func @transform_0(%arg0: i32) -> (i32, i32) {
    %c0_i32 = arith.constant 0 : i32
    %c0_i32_0 = arith.constant 0 : i32
    return %c0_i32, %arg0 : i32, i32
  }
  func.func @transform_1(%arg0: i32) -> (i32, i32) {
    %c0_i32 = arith.constant 0 : i32
    %c0_i32_0 = arith.constant 0 : i32
    return %arg0, %c0_i32 : i32, i32
  }
  func.func @transform_2(%arg0: i32) -> (i32, i32) {
    %c0_i32 = arith.constant 0 : i32
    %c0_i32_0 = arith.constant 0 : i32
    %c0_i32_1 = arith.constant 0 : i32
    return %c0_i32, %c0_i32_0 : i32, i32
  }
  func.func @transform_3(%arg0: i32) -> (i32, i32) {
    %c0_i32 = arith.constant 0 : i32
    %c0_i32_0 = arith.constant 0 : i32
    %c0_i32_1 = arith.constant 0 : i32
    return %c0_i32, %c0_i32_0 : i32, i32
  }
  func.func @transform_4(%arg0: i32) -> (i32, i32) {
    %c0_i32 = arith.constant 0 : i32
    %c0_i32_0 = arith.constant 0 : i32
    %c0_i32_1 = arith.constant 0 : i32
    return %c0_i32, %c0_i32_0 : i32, i32
  }
  func.func @transform_5(%arg0: i32) -> (i32, i32) {
    %c0_i32 = arith.constant 0 : i32
    %c0_i32_0 = arith.constant 0 : i32
    %c0_i32_1 = arith.constant 0 : i32
    return %c0_i32, %c0_i32_0 : i32, i32
  }
  func.func @transform_6(%arg0: i32) -> (i32, i32) {
    %c0_i32 = arith.constant 0 : i32
    %c0_i32_0 = arith.constant 0 : i32
    %c0_i32_1 = arith.constant 0 : i32
    return %c0_i32, %c0_i32_0 : i32, i32
  }
  func.func @transform_7(%arg0: i32) -> (i32, i32) {
    %c0_i32 = arith.constant 0 : i32
    %c0_i32_0 = arith.constant 0 : i32
    %c0_i32_1 = arith.constant 0 : i32
    return %c0_i32, %c0_i32_0 : i32, i32
  }
}

</mosaic_0001>

<bundles_post_ra>
// kernel: byol_forward.5
= control target key start
LH: loop header
LB: loop body
LE: loop exit
PB: predicated region body
PF: predicated region fallthrough
CT: control target
= control target key end

     0   :  { %s2841_s0 = inlined_call_operand.vmem [shape: bf16[8,1024], index: 0, kind: input, shape index: {}]   ;;  %s2842_s1 = inlined_call_operand.vmem [shape: f32[1024,256], index: 1, kind: input, shape index: {}]   ;;  %s2843_s2 = inlined_call_operand.vmem [shape: f32[256,512], index: 2, kind: input, shape index: {}]   ;;  %s2844_s3 = inlined_call_operand.vmem [shape: f32[1,512], index: 3, kind: input, shape index: {}]   ;;  %s2845_s4 = inlined_call_operand.vmem [shape: f32[1,512], index: 4, kind: input, shape index: {}]   ;;  %s2846_s5 = inlined_call_operand.vmem [shape: f32[512,128], index: 5, kind: input, shape index: {}]   ;;  %s2847_s6 = inlined_call_operand.vmem [shape: f32[1,128], index: 6, kind: input, shape index: {}]   ;;  %s2848_s7 = inlined_call_operand.hbm [shape: f32[8,128], index: 7, kind: output, shape index: {}]  }
   0x1   :  { %v67_v0 = vld [vmem:[%s2842_s1 + $0xe0] sm:$0xff]  ;;  %v69_v1 = vld [vmem:[%s2842_s1 + $0xf0] sm:$0xff] }
   0x2   :  { %v99_v2 = vld [vmem:[%s2842_s1 + $0x1e0] sm:$0xff]  ;;  %v309_v3 = vpack.c.bf16 %v69_v1, %v67_v0  ;;  %v101_v4 = vld [vmem:[%s2842_s1 + $0x1f0] sm:$0xff] }
   0x3   :  { %v131_v5 = vld [vmem:[%s2842_s1 + $0x2e0] sm:$0xff]  ;;  %v133_v6 = vld [vmem:[%s2842_s1 + $0x2f0] sm:$0xff]  ;;  %v325_v7 = vpack.c.bf16 %v101_v4, %v99_v2 }
   0x4   :  { %v341_v8 = vpack.c.bf16 %v133_v6, %v131_v5  ;;  %v163_v9 = vld [vmem:[%s2842_s1 + $0x3e0] sm:$0xff]  ;;  %v165_v10 = vld [vmem:[%s2842_s1 + $0x3f0] sm:$0xff]  ;;  %451 = vmatpush.bf16.msra.mxu0 %v309_v3 }
   0x5   :  { %v63_v11 = vld [vmem:[%s2842_s1 + $0xc0] sm:$0xff]  ;;  %v357_v12 = vpack.c.bf16 %v165_v10, %v163_v9  ;;  %v65_v13 = vld [vmem:[%s2842_s1 + $0xd0] sm:$0xff]  ;;  %464 = vmatpush.bf16.msra.mxu1 %v325_v7 }
   0x6   :  { %v95_v14 = vld [vmem:[%s2842_s1 + $0x1c0] sm:$0xff]  ;;  %v97_v15 = vld [vmem:[%s2842_s1 + $0x1d0] sm:$0xff]  ;;  %477 = vmatpush.bf16.msra.mxu2 %v341_v8  ;;  %v307_v16 = vpack.c.bf16 %v65_v13, %v63_v11 }
   0x7   :  { %v323_v17 = vpack.c.bf16 %v97_v15, %v95_v14  ;;  %v127_v18 = vld [vmem:[%s2842_s1 + $0x2c0] sm:$0xff]  ;;  %v129_v19 = vld [vmem:[%s2842_s1 + $0x2d0] sm:$0xff]  ;;  %490 = vmatpush.bf16.msra.mxu3 %v357_v12 }
   0x8   :  { %v159_v20 = vld [vmem:[%s2842_s1 + $0x3c0] sm:$0xff]  ;;  %v339_v21 = vpack.c.bf16 %v129_v19, %v127_v18  ;;  %v161_v22 = vld [vmem:[%s2842_s1 + $0x3d0] sm:$0xff]  ;;  %452 = vmatpush.bf16.msra.mxu0 %v307_v16 }
   0x9   :  { %v59_v23 = vld [vmem:[%s2842_s1 + $0xa0] sm:$0xff]  ;;  %v61_v24 = vld [vmem:[%s2842_s1 + $0xb0] sm:$0xff]  ;;  %v355_v25 = vpack.c.bf16 %v161_v22, %v159_v20  ;;  %465 = vmatpush.bf16.msra.mxu1 %v323_v17 }
   0xa   :  { %v91_v26 = vld [vmem:[%s2842_s1 + $0x1a0] sm:$0xff]  ;;  %v93_v27 = vld [vmem:[%s2842_s1 + $0x1b0] sm:$0xff]  ;;  %v305_v29 = vpack.c.bf16 %v61_v24, %v59_v23  ;;  %478 = vmatpush.bf16.msra.mxu2 %v339_v21 }
   0xb   :  { %v123_v28 = vld [vmem:[%s2842_s1 + $0x2a0] sm:$0xff]  ;;  %v125_v30 = vld [vmem:[%s2842_s1 + $0x2b0] sm:$0xff]  ;;  %v321_v33 = vpack.c.bf16 %v93_v27, %v91_v26  ;;  %491 = vmatpush.bf16.msra.mxu3 %v355_v25 }
   0xc   :  { %v155_v31 = vld [vmem:[%s2842_s1 + $0x3a0] sm:$0xff]  ;;  %v157_v32 = vld [vmem:[%s2842_s1 + $0x3b0] sm:$0xff]  ;;  %v337_v34 = vpack.c.bf16 %v125_v30, %v123_v28  ;;  %453 = vmatpush.bf16.msra.mxu0 %v305_v29 }
   0xd   :  { %v55_v35 = vld [vmem:[%s2842_s1 + $0x80] sm:$0xff]  ;;  %v57_v36 = vld [vmem:[%s2842_s1 + $0x90] sm:$0xff]  ;;  %v353_v38 = vpack.c.bf16 %v157_v32, %v155_v31  ;;  %466 = vmatpush.bf16.msra.mxu1 %v321_v33 }
   0xe   :  { %v87_v37 = vld [vmem:[%s2842_s1 + $0x180] sm:$0xff]  ;;  %v89_v39 = vld [vmem:[%s2842_s1 + $0x190] sm:$0xff]  ;;  %v303_v44 = vpack.c.bf16 %v57_v36, %v55_v35  ;;  %479 = vmatpush.bf16.msra.mxu2 %v337_v34 }
   0xf   :  { %v119_v40 = vld [vmem:[%s2842_s1 + $0x280] sm:$0xff]  ;;  %v121_v41 = vld [vmem:[%s2842_s1 + $0x290] sm:$0xff]  ;;  %v319_v45 = vpack.c.bf16 %v89_v39, %v87_v37  ;;  %492 = vmatpush.bf16.msra.mxu3 %v353_v38 }
  0x10   :  { %v151_v42 = vld [vmem:[%s2842_s1 + $0x380] sm:$0xff]  ;;  %v153_v43 = vld [vmem:[%s2842_s1 + $0x390] sm:$0xff]  ;;  %v335_v46 = vpack.c.bf16 %v121_v41, %v119_v40  ;;  %454 = vmatpush.bf16.msra.mxu0 %v303_v44 }
  0x11   :  { %v51_v47 = vld [vmem:[%s2842_s1 + $0x60] sm:$0xff]  ;;  %v53_v48 = vld [vmem:[%s2842_s1 + $0x70] sm:$0xff]  ;;  %v351_v50 = vpack.c.bf16 %v153_v43, %v151_v42  ;;  %467 = vmatpush.bf16.msra.mxu1 %v319_v45 }
  0x12   :  { %v83_v49 = vld [vmem:[%s2842_s1 + $0x160] sm:$0xff]  ;;  %v85_v51 = vld [vmem:[%s2842_s1 + $0x170] sm:$0xff]  ;;  %v301_v56 = vpack.c.bf16 %v53_v48, %v51_v47  ;;  %480 = vmatpush.bf16.msra.mxu2 %v335_v46 }
  0x13   :  { %v115_v52 = vld [vmem:[%s2842_s1 + $0x260] sm:$0xff]  ;;  %v117_v53 = vld [vmem:[%s2842_s1 + $0x270] sm:$0xff]  ;;  %v317_v57 = vpack.c.bf16 %v85_v51, %v83_v49  ;;  %493 = vmatpush.bf16.msra.mxu3 %v351_v50 }
  0x14   :  { %v147_v54 = vld [vmem:[%s2842_s1 + $0x360] sm:$0xff]  ;;  %v149_v55 = vld [vmem:[%s2842_s1 + $0x370] sm:$0xff]  ;;  %v333_v58 = vpack.c.bf16 %v117_v53, %v115_v52  ;;  %455 = vmatpush.bf16.msra.mxu0 %v301_v56  ;;  %v36_v52 = vld [vmem:[%s2841_s0 + $0x8] sm:$0xff] }
  0x15   :  { %v47_v59 = vld [vmem:[%s2842_s1 + $0x40] sm:$0xff]  ;;  %v49_v60 = vld [vmem:[%s2842_s1 + $0x50] sm:$0xff]  ;;  %v349_v62 = vpack.c.bf16 %v149_v55, %v147_v54  ;;  %468 = vmatpush.bf16.msra.mxu1 %v317_v57  ;;  %v429_v55 = vunpack.c.l.b16 %v36_v52  ;;  %v430_v56 = vunpack.c.h.b16 %v36_v52 }
  0x16   :  { %v79_v61 = vld [vmem:[%s2842_s1 + $0x140] sm:$0xff]  ;;  %v81_v63 = vld [vmem:[%s2842_s1 + $0x150] sm:$0xff]  ;;  %v299_v4 = vpack.c.bf16 %v49_v60, %v47_v59  ;;  %481 = vmatpush.bf16.msra.mxu2 %v333_v58 }
  0x17   :  { %v111_v0 = vld [vmem:[%s2842_s1 + $0x240] sm:$0xff]  ;;  %v113_v1 = vld [vmem:[%s2842_s1 + $0x250] sm:$0xff]  ;;  %v315_v5 = vpack.c.bf16 %v81_v63, %v79_v61  ;;  %494 = vmatpush.bf16.msra.mxu3 %v349_v62 }
  0x18   :  { %v143_v2 = vld [vmem:[%s2842_s1 + $0x340] sm:$0xff]  ;;  %v145_v3 = vld [vmem:[%s2842_s1 + $0x350] sm:$0xff]  ;;  %v331_v6 = vpack.c.bf16 %v113_v1, %v111_v0  ;;  %456 = vmatpush.bf16.msra.mxu0 %v299_v4  ;;  %v1632_v1 = vpack.c.b16 %v429_v55, %v429_v55 }
  0x19   :  { %v43_v7 = vld [vmem:[%s2842_s1 + $0x20] sm:$0xff]  ;;  %v45_v8 = vld [vmem:[%s2842_s1 + $0x30] sm:$0xff]  ;;  %v347_v10 = vpack.c.bf16 %v145_v3, %v143_v2  ;;  %469 = vmatpush.bf16.msra.mxu1 %v315_v5 }
  0x1a   :  { %v75_v9 = vld [vmem:[%s2842_s1 + $0x120] sm:$0xff]  ;;  %v77_v11 = vld [vmem:[%s2842_s1 + $0x130] sm:$0xff]  ;;  %v297_v16 = vpack.c.bf16 %v45_v8, %v43_v7  ;;  %482 = vmatpush.bf16.msra.mxu2 %v331_v6  ;;  %v1643_v6 = vpack.c.b16 %v430_v56, %v430_v56 }
  0x1b   :  { %v107_v12 = vld [vmem:[%s2842_s1 + $0x220] sm:$0xff]  ;;  %v109_v13 = vld [vmem:[%s2842_s1 + $0x230] sm:$0xff]  ;;  %v313_v19 = vpack.c.bf16 %v77_v11, %v75_v9  ;;  %495 = vmatpush.bf16.msra.mxu3 %v347_v10 }
  0x1c   :  { %v139_v14 = vld [vmem:[%s2842_s1 + $0x320] sm:$0xff]  ;;  %v141_v15 = vld [vmem:[%s2842_s1 + $0x330] sm:$0xff]  ;;  %v329_v20 = vpack.c.bf16 %v109_v13, %v107_v12  ;;  %457 = vmatpush.bf16.msra.mxu0 %v297_v16 }
  0x1d   :  { %v39_v17 = vld [vmem:[%s2842_s1] sm:$0xff]  ;;  %v41_v18 = vld [vmem:[%s2842_s1 + $0x10] sm:$0xff]  ;;  %v345_v24 = vpack.c.bf16 %v141_v15, %v139_v14  ;;  %470 = vmatpush.bf16.msra.mxu1 %v313_v19 }
  0x1e   :  { %v71_v21 = vld [vmem:[%s2842_s1 + $0x100] sm:$0xff]  ;;  %v73_v22 = vld [vmem:[%s2842_s1 + $0x110] sm:$0xff]  ;;  %v295_v31 = vpack.c.bf16 %v41_v18, %v39_v17  ;;  %483 = vmatpush.bf16.msra.mxu2 %v329_v20 }
  0x1f   :  { %v103_v23 = vld [vmem:[%s2842_s1 + $0x200] sm:$0xff]  ;;  %v105_v25 = vld [vmem:[%s2842_s1 + $0x210] sm:$0xff]  ;;  %v311_v35 = vpack.c.bf16 %v73_v22, %v71_v21  ;;  %496 = vmatpush.bf16.msra.mxu3 %v345_v24 }
  0x20   :  { %v135_v26 = vld [vmem:[%s2842_s1 + $0x300] sm:$0xff]  ;;  %v137_v27 = vld [vmem:[%s2842_s1 + $0x310] sm:$0xff]  ;;  %v327_v36 = vpack.c.bf16 %v105_v25, %v103_v23  ;;  %458 = vmatpush.bf16.msra.mxu0 %v295_v31 }
  0x21   :  { %v195_v28 = vld [vmem:[%s2842_s1 + $0x4e0] sm:$0xff]  ;;  %v197_v29 = vld [vmem:[%s2842_s1 + $0x4f0] sm:$0xff]  ;;  %v343_v39 = vpack.c.bf16 %v137_v27, %v135_v26  ;;  %471 = vmatpush.bf16.msra.mxu1 %v311_v35 }
  0x22   :  { %v227_v30 = vld [vmem:[%s2842_s1 + $0x5e0] sm:$0xff]  ;;  %v229_v32 = vld [vmem:[%s2842_s1 + $0x5f0] sm:$0xff]  ;;  %v373_v40 = vpack.c.bf16 %v197_v29, %v195_v28  ;;  %484 = vmatpush.bf16.msra.mxu2 %v327_v36 }
  0x23   :  { %v259_v33 = vld [vmem:[%s2842_s1 + $0x6e0] sm:$0xff]  ;;  %v261_v34 = vld [vmem:[%s2842_s1 + $0x6f0] sm:$0xff]  ;;  %v389_v41 = vpack.c.bf16 %v229_v32, %v227_v30  ;;  %497 = vmatpush.bf16.msra.mxu3 %v343_v39 }
  0x24   :  { %v291_v37 = vld [vmem:[%s2842_s1 + $0x7e0] sm:$0xff]  ;;  %v293_v38 = vld [vmem:[%s2842_s1 + $0x7f0] sm:$0xff]  ;;  %v405_v42 = vpack.c.bf16 %v261_v34, %v259_v33  ;;  %503 = vmatpush.bf16.msrb.mxu0 %v373_v40 }
  0x25   :  { %v191_v43 = vld [vmem:[%s2842_s1 + $0x4c0] sm:$0xff]  ;;  %v193_v44 = vld [vmem:[%s2842_s1 + $0x4d0] sm:$0xff]  ;;  %v421_v46 = vpack.c.bf16 %v293_v38, %v291_v37  ;;  %516 = vmatpush.bf16.msrb.mxu1 %v389_v41  ;;  %485 = vmatmul.bf16.vlgmr.msra.gmra.mxu2 %v1632_v1 }
  0x26   :  { %v223_v45 = vld [vmem:[%s2842_s1 + $0x5c0] sm:$0xff]  ;;  %v225_v47 = vld [vmem:[%s2842_s1 + $0x5d0] sm:$0xff]  ;;  %v371_v53 = vpack.c.bf16 %v193_v44, %v191_v43  ;;  %529 = vmatpush.bf16.msrb.mxu2 %v405_v42  ;;  %498 = vmatmul.bf16.vlgmr.msra.gmra.mxu3 %v1643_v6 }
  0x27   :  { %v255_v48 = vld [vmem:[%s2842_s1 + $0x6c0] sm:$0xff]  ;;  %v257_v49 = vld [vmem:[%s2842_s1 + $0x6d0] sm:$0xff]  ;;  %v387_v57 = vpack.c.bf16 %v225_v47, %v223_v45  ;;  %542 = vmatpush.bf16.msrb.mxu3 %v421_v46 }
  0x28   :  { %v287_v50 = vld [vmem:[%s2842_s1 + $0x7c0] sm:$0xff]  ;;  %v289_v51 = vld [vmem:[%s2842_s1 + $0x7d0] sm:$0xff]  ;;  %v403_v58 = vpack.c.bf16 %v257_v49, %v255_v48  ;;  %504 = vmatpush.bf16.msrb.mxu0 %v371_v53 }
  0x29   :  { %v187_v54 = vld [vmem:[%s2842_s1 + $0x4a0] sm:$0xff]  ;;  %v189_v59 = vld [vmem:[%s2842_s1 + $0x4b0] sm:$0xff]  ;;  %v419_v62 = vpack.c.bf16 %v289_v51, %v287_v50  ;;  %517 = vmatpush.bf16.msrb.mxu1 %v387_v57 }
  0x2a   :  { %v219_v60 = vld [vmem:[%s2842_s1 + $0x5a0] sm:$0xff]  ;;  %v221_v61 = vld [vmem:[%s2842_s1 + $0x5b0] sm:$0xff]  ;;  %v369_v8 = vpack.c.bf16 %v189_v59, %v187_v54  ;;  %530 = vmatpush.bf16.msrb.mxu2 %v403_v58 }
  0x2b   :  { %v251_v63 = vld [vmem:[%s2842_s1 + $0x6a0] sm:$0xff]  ;;  %v253_v0 = vld [vmem:[%s2842_s1 + $0x6b0] sm:$0xff]  ;;  %v385_v9 = vpack.c.bf16 %v221_v61, %v219_v60  ;;  %543 = vmatpush.bf16.msrb.mxu3 %v419_v62 }
  0x2c   :  { %v35_v2 = vld [vmem:[%s2841_s0] sm:$0xff]  ;;  %v285_v4 = vld [vmem:[%s2842_s1 + $0x7b0] sm:$0xff]  ;;  %v401_v10 = vpack.c.bf16 %v253_v0, %v251_v63  ;;  %505 = vmatpush.bf16.msrb.mxu0 %v369_v8 }
  0x2d   :  { %v283_v3 = vld [vmem:[%s2842_s1 + $0x7a0] sm:$0xff]  ;;  %v427_v5 = vunpack.c.l.b16 %v35_v2  ;;  %v428_v7 = vunpack.c.h.b16 %v35_v2  ;;  %v185_v12 = vld [vmem:[%s2842_s1 + $0x490] sm:$0xff]  ;;  %518 = vmatpush.bf16.msrb.mxu1 %v385_v9 }
  0x2e   :  { %v183_v11 = vld [vmem:[%s2842_s1 + $0x480] sm:$0xff]  ;;  %v417_v16 = vpack.c.bf16 %v285_v4, %v283_v3  ;;  %v217_v17 = vld [vmem:[%s2842_s1 + $0x590] sm:$0xff]  ;;  %531 = vmatpush.bf16.msrb.mxu2 %v401_v10  ;;  %v38_v4 = vld [vmem:[%s2841_s0 + $0x18] sm:$0xff] }
  0x2f   :  { %v215_v13 = vld [vmem:[%s2842_s1 + $0x580] sm:$0xff]  ;;  %v1655_v14 = vpack.c.b16 %v427_v5, %v427_v5  ;;  %v1657_v15 = vpack.c.b16 %v428_v7, %v428_v7  ;;  %v249_v19 = vld [vmem:[%s2842_s1 + $0x690] sm:$0xff]  ;;  %v367_v22 = vpack.c.bf16 %v185_v12, %v183_v11  ;;  %v68_v10 = vld [vmem:[%s2842_s1 + $0xe8] sm:$0xff] }
  0x30   :  { %v247_v18 = vld [vmem:[%s2842_s1 + $0x680] sm:$0xff]  ;;  %v281_v21 = vld [vmem:[%s2842_s1 + $0x790] sm:$0xff]  ;;  %v383_v23 = vpack.c.bf16 %v217_v17, %v215_v13  ;;  %544 = vmatpush.bf16.msrb.mxu3 %v417_v16  ;;  %v70_v11 = vld [vmem:[%s2842_s1 + $0xf8] sm:$0xff] }
  0x31   :  { %v279_v20 = vld [vmem:[%s2842_s1 + $0x780] sm:$0xff]  ;;  %459 = vmatmul.bf16.vlgmr.msra.gmra.mxu0 %v1655_v14  ;;  %472 = vmatmul.bf16.vlgmr.msra.gmra.mxu1 %v1657_v15  ;;  %v399_v24 = vpack.c.bf16 %v249_v19, %v247_v18  ;;  %v181_v26 = vld [vmem:[%s2842_s1 + $0x470] sm:$0xff]  ;;  %v100_v12 = vld [vmem:[%s2842_s1 + $0x1e8] sm:$0xff]  ;;  %v433_v19 = vunpack.c.l.b16 %v38_v4 }
  0x32   :  { %v179_v25 = vld [vmem:[%s2842_s1 + $0x460] sm:$0xff]  ;;  %v415_v28 = vpack.c.bf16 %v281_v21, %v279_v20  ;;  %v213_v29 = vld [vmem:[%s2842_s1 + $0x570] sm:$0xff]  ;;  %506 = vmatpush.bf16.msrb.mxu0 %v367_v22  ;;  %519 = vmatpush.bf16.msrb.mxu1 %v383_v23  ;;  %v102_v16 = vld [vmem:[%s2842_s1 + $0x1f8] sm:$0xff] }
  0x33   :  { %v211_v27 = vld [vmem:[%s2842_s1 + $0x560] sm:$0xff]  ;;  %v245_v31 = vld [vmem:[%s2842_s1 + $0x670] sm:$0xff]  ;;  %v365_v34 = vpack.c.bf16 %v181_v26, %v179_v25  ;;  %532 = vmatpush.bf16.msrb.mxu2 %v399_v24  ;;  %v132_v17 = vld [vmem:[%s2842_s1 + $0x2e8] sm:$0xff]  ;;  %v434_v25 = vunpack.c.h.b16 %v38_v4 }
  0x34   :  { %v243_v30 = vld [vmem:[%s2842_s1 + $0x660] sm:$0xff]  ;;  %v277_v33 = vld [vmem:[%s2842_s1 + $0x770] sm:$0xff]  ;;  %v381_v35 = vpack.c.bf16 %v213_v29, %v211_v27  ;;  %545 = vmatpush.bf16.msrb.mxu3 %v415_v28  ;;  %v134_v18 = vld [vmem:[%s2842_s1 + $0x2f8] sm:$0xff]  ;;  %v310_v27 = vpack.c.bf16 %v70_v11, %v68_v10  ;;  %v326_v29 = vpack.c.bf16 %v102_v16, %v100_v12 }
  0x35   :  { %v275_v32 = vld [vmem:[%s2842_s1 + $0x760] sm:$0xff]  ;;  %v397_v36 = vpack.c.bf16 %v245_v31, %v243_v30  ;;  %v177_v38 = vld [vmem:[%s2842_s1 + $0x450] sm:$0xff]  ;;  %v164_v22 = vld [vmem:[%s2842_s1 + $0x3e8] sm:$0xff]  ;;  %v342_v30 = vpack.c.bf16 %v134_v18, %v132_v17 }
  0x36   :  { %v175_v37 = vld [vmem:[%s2842_s1 + $0x440] sm:$0xff]  ;;  %v413_v40 = vpack.c.bf16 %v277_v33, %v275_v32  ;;  %v209_v41 = vld [vmem:[%s2842_s1 + $0x550] sm:$0xff]  ;;  %507 = vmatpush.bf16.msrb.mxu0 %v365_v34  ;;  %520 = vmatpush.bf16.msrb.mxu1 %v381_v35  ;;  %v166_v23 = vld [vmem:[%s2842_s1 + $0x3f8] sm:$0xff]  ;;  %v1812_v35 = vpack.c.b16 %v433_v19, %v433_v19 }
  0x37   :  { %v207_v39 = vld [vmem:[%s2842_s1 + $0x540] sm:$0xff]  ;;  %v241_v43 = vld [vmem:[%s2842_s1 + $0x650] sm:$0xff]  ;;  %v363_v46 = vpack.c.bf16 %v177_v38, %v175_v37  ;;  %533 = vmatpush.bf16.msrb.mxu2 %v397_v36  ;;  %v64_v31 = vld [vmem:[%s2842_s1 + $0xc8] sm:$0xff]  ;;  %v358_v34 = vpack.c.bf16 %v166_v23, %v164_v22 }
  0x38   :  { %v239_v42 = vld [vmem:[%s2842_s1 + $0x640] sm:$0xff]  ;;  %v273_v45 = vld [vmem:[%s2842_s1 + $0x750] sm:$0xff]  ;;  %v379_v47 = vpack.c.bf16 %v209_v41, %v207_v39  ;;  %546 = vmatpush.bf16.msrb.mxu3 %v413_v40  ;;  %v66_v32 = vld [vmem:[%s2842_s1 + $0xd8] sm:$0xff]  ;;  %v1825_v40 = vpack.c.b16 %v434_v25, %v434_v25 }
  0x39   :  { %v271_v44 = vld [vmem:[%s2842_s1 + $0x740] sm:$0xff]  ;;  %v395_v48 = vpack.c.bf16 %v241_v43, %v239_v42  ;;  %v173_v50 = vld [vmem:[%s2842_s1 + $0x430] sm:$0xff]  ;;  %v96_v33 = vld [vmem:[%s2842_s1 + $0x1c8] sm:$0xff]  ;;  %v308_v43 = vpack.c.bf16 %v66_v32, %v64_v31 }
  0x3a   :  { %v171_v49 = vld [vmem:[%s2842_s1 + $0x420] sm:$0xff]  ;;  %v411_v52 = vpack.c.bf16 %v273_v45, %v271_v44  ;;  %v205_v53 = vld [vmem:[%s2842_s1 + $0x530] sm:$0xff]  ;;  %508 = vmatpush.bf16.msrb.mxu0 %v363_v46  ;;  %521 = vmatpush.bf16.msrb.mxu1 %v379_v47  ;;  %v98_v36 = vld [vmem:[%s2842_s1 + $0x1d8] sm:$0xff] }
  0x3b   :  { %v203_v51 = vld [vmem:[%s2842_s1 + $0x520] sm:$0xff]  ;;  %v237_v55 = vld [vmem:[%s2842_s1 + $0x630] sm:$0xff]  ;;  %v361_v59 = vpack.c.bf16 %v173_v50, %v171_v49  ;;  %534 = vmatpush.bf16.msrb.mxu2 %v395_v48  ;;  %v128_v37 = vld [vmem:[%s2842_s1 + $0x2c8] sm:$0xff]  ;;  %v324_v45 = vpack.c.bf16 %v98_v36, %v96_v33 }
  0x3c   :  { %v235_v54 = vld [vmem:[%s2842_s1 + $0x620] sm:$0xff]  ;;  %v269_v57 = vld [vmem:[%s2842_s1 + $0x730] sm:$0xff]  ;;  %v377_v63 = vpack.c.bf16 %v205_v53, %v203_v51  ;;  %547 = vmatpush.bf16.msrb.mxu3 %v411_v52  ;;  %v130_v38 = vld [vmem:[%s2842_s1 + $0x2d8] sm:$0xff] }
  0x3d   :  { %v267_v56 = vld [vmem:[%s2842_s1 + $0x720] sm:$0xff]  ;;  %v169_v60 = vld [vmem:[%s2842_s1 + $0x410] sm:$0xff]  ;;  %v393_v0 = vpack.c.bf16 %v237_v55, %v235_v54  ;;  %v160_v41 = vld [vmem:[%s2842_s1 + $0x3c8] sm:$0xff]  ;;  %v340_v46 = vpack.c.bf16 %v130_v38, %v128_v37 }
  0x3e   :  { %v167_v58 = vld [vmem:[%s2842_s1 + $0x400] sm:$0xff]  ;;  %v201_v62 = vld [vmem:[%s2842_s1 + $0x510] sm:$0xff]  ;;  %v409_v5 = vpack.c.bf16 %v269_v57, %v267_v56  ;;  %509 = vmatpush.bf16.msrb.mxu0 %v361_v59  ;;  %522 = vmatpush.bf16.msrb.mxu1 %v377_v63  ;;  %v162_v42 = vld [vmem:[%s2842_s1 + $0x3d8] sm:$0xff] }
  0x3f   :  { %v199_v61 = vld [vmem:[%s2842_s1 + $0x500] sm:$0xff]  ;;  %v233_v3 = vld [vmem:[%s2842_s1 + $0x610] sm:$0xff]  ;;  %v359_v13 = vpack.c.bf16 %v169_v60, %v167_v58  ;;  %535 = vmatpush.bf16.msrb.mxu2 %v393_v0  ;;  %v60_v47 = vld [vmem:[%s2842_s1 + $0xa8] sm:$0xff]  ;;  %v356_v50 = vpack.c.bf16 %v162_v42, %v160_v41 }
  0x40   :  { %v231_v2 = vld [vmem:[%s2842_s1 + $0x600] sm:$0xff]  ;;  %v265_v8 = vld [vmem:[%s2842_s1 + $0x710] sm:$0xff]  ;;  %v375_v20 = vpack.c.bf16 %v201_v62, %v199_v61  ;;  %548 = vmatpush.bf16.msrb.mxu3 %v409_v5  ;;  %v62_v48 = vld [vmem:[%s2842_s1 + $0xb8] sm:$0xff] }
  0x41   :  { %v263_v7 = vld [vmem:[%s2842_s1 + $0x700] sm:$0xff]  ;;  %v37_v9 = vld [vmem:[%s2841_s0 + $0x10] sm:$0xff]  ;;  %v391_v21 = vpack.c.bf16 %v233_v3, %v231_v2  ;;  %v92_v49 = vld [vmem:[%s2842_s1 + $0x1a8] sm:$0xff]  ;;  %v306_v56 = vpack.c.bf16 %v62_v48, %v60_v47 }
  0x42   :  { %v431_v24 = vunpack.c.l.b16 %v37_v9  ;;  %v407_v26 = vpack.c.bf16 %v265_v8, %v263_v7  ;;  %v432_v28 = vunpack.c.h.b16 %v37_v9  ;;  %510 = vmatpush.bf16.msrb.mxu0 %v359_v13  ;;  %523 = vmatpush.bf16.msrb.mxu1 %v375_v20  ;;  %v94_v51 = vld [vmem:[%s2842_s1 + $0x1b8] sm:$0xff]  ;;  %v124_v52 = vld [vmem:[%s2842_s1 + $0x2a8] sm:$0xff] }
  0x43   :  { %536 = vmatpush.bf16.msrb.mxu2 %v391_v21  ;;  %v126_v53 = vld [vmem:[%s2842_s1 + $0x2b8] sm:$0xff]  ;;  %v156_v54 = vld [vmem:[%s2842_s1 + $0x3a8] sm:$0xff]  ;;  %v322_v57 = vpack.c.bf16 %v94_v51, %v92_v49 }
  0x44   :  { %v1823_v39 = vpack.c.b16 %v431_v24, %v431_v24  ;;  %549 = vmatpush.bf16.msrb.mxu3 %v407_v26  ;;  %v1833_v44 = vpack.c.b16 %v432_v28, %v432_v28  ;;  %v158_v55 = vld [vmem:[%s2842_s1 + $0x3b8] sm:$0xff]  ;;  %v338_v58 = vpack.c.bf16 %v126_v53, %v124_v52  ;;  %v56_v59 = vld [vmem:[%s2842_s1 + $0x88] sm:$0xff] }
  0x45   :  { %v58_v60 = vld [vmem:[%s2842_s1 + $0x98] sm:$0xff]  ;;  %v88_v61 = vld [vmem:[%s2842_s1 + $0x188] sm:$0xff]  ;;  %v354_v62 = vpack.c.bf16 %v158_v55, %v156_v54 }
  0x46   :  { %555 = vmatpush.bf16.msra.mxu0 %v310_v27  ;;  %568 = vmatpush.bf16.msra.mxu1 %v326_v29  ;;  %v90_v63 = vld [vmem:[%s2842_s1 + $0x198] sm:$0xff]  ;;  %v120_v0 = vld [vmem:[%s2842_s1 + $0x288] sm:$0xff]  ;;  %v304_v5 = vpack.c.bf16 %v58_v60, %v56_v59 }
  0x47   :  { %581 = vmatpush.bf16.msra.mxu2 %v342_v30  ;;  %511 = vmatmul.bf16.vlgmr.msrb.gmra.mxu0 %v1823_v39  ;;  %v122_v2 = vld [vmem:[%s2842_s1 + $0x298] sm:$0xff]  ;;  %v152_v3 = vld [vmem:[%s2842_s1 + $0x388] sm:$0xff]  ;;  %v320_v7 = vpack.c.bf16 %v90_v63, %v88_v61 }
  0x48   :  { %594 = vmatpush.bf16.msra.mxu3 %v358_v34  ;;  %537 = vmatmul.bf16.vlgmr.msrb.gmra.mxu2 %v1812_v35  ;;  %v154_v4 = vld [vmem:[%s2842_s1 + $0x398] sm:$0xff]  ;;  %v336_v8 = vpack.c.bf16 %v122_v2, %v120_v0  ;;  %v52_v9 = vld [vmem:[%s2842_s1 + $0x68] sm:$0xff] }
  0x49   :  { %550 = vmatmul.bf16.vlgmr.msrb.gmra.mxu3 %v1825_v40  ;;  %524 = vmatmul.bf16.vlgmr.msrb.gmra.mxu1 %v1833_v44  ;;  %v54_v10 = vld [vmem:[%s2842_s1 + $0x78] sm:$0xff]  ;;  %v84_v11 = vld [vmem:[%s2842_s1 + $0x168] sm:$0xff]  ;;  %v352_v12 = vpack.c.bf16 %v154_v4, %v152_v3 }
  0x4a   :  { %556 = vmatpush.bf16.msra.mxu0 %v308_v43  ;;  %569 = vmatpush.bf16.msra.mxu1 %v324_v45  ;;  %v86_v13 = vld [vmem:[%s2842_s1 + $0x178] sm:$0xff]  ;;  %v116_v16 = vld [vmem:[%s2842_s1 + $0x268] sm:$0xff]  ;;  %v302_v20 = vpack.c.bf16 %v54_v10, %v52_v9 }
  0x4b   :  { %582 = vmatpush.bf16.msra.mxu2 %v340_v46  ;;  %v118_v17 = vld [vmem:[%s2842_s1 + $0x278] sm:$0xff]  ;;  %v148_v18 = vld [vmem:[%s2842_s1 + $0x368] sm:$0xff]  ;;  %v318_v21 = vpack.c.bf16 %v86_v13, %v84_v11 }
  0x4c   :  { %595 = vmatpush.bf16.msra.mxu3 %v356_v50  ;;  %v150_v19 = vld [vmem:[%s2842_s1 + $0x378] sm:$0xff]  ;;  %v334_v22 = vpack.c.bf16 %v118_v17, %v116_v16  ;;  %v48_v23 = vld [vmem:[%s2842_s1 + $0x48] sm:$0xff] }
  0x4d   :  { %v50_v24 = vld [vmem:[%s2842_s1 + $0x58] sm:$0xff]  ;;  %v80_v25 = vld [vmem:[%s2842_s1 + $0x148] sm:$0xff]  ;;  %v350_v26 = vpack.c.bf16 %v150_v19, %v148_v18 }
  0x4e   :  { %557 = vmatpush.bf16.msra.mxu0 %v306_v56  ;;  %570 = vmatpush.bf16.msra.mxu1 %v322_v57  ;;  %v82_v27 = vld [vmem:[%s2842_s1 + $0x158] sm:$0xff]  ;;  %v112_v28 = vld [vmem:[%s2842_s1 + $0x248] sm:$0xff]  ;;  %v300_v32 = vpack.c.bf16 %v50_v24, %v48_v23 }
  0x4f   :  { %583 = vmatpush.bf16.msra.mxu2 %v338_v58  ;;  %v114_v29 = vld [vmem:[%s2842_s1 + $0x258] sm:$0xff]  ;;  %v144_v30 = vld [vmem:[%s2842_s1 + $0x348] sm:$0xff] }
  0x50   :  { %596 = vmatpush.bf16.msra.mxu3 %v354_v62  ;;  %v146_v31 = vld [vmem:[%s2842_s1 + $0x358] sm:$0xff] }
  0x52   :  { %558 = vmatpush.bf16.msra.mxu0 %v304_v5  ;;  %571 = vmatpush.bf16.msra.mxu1 %v320_v7 }
  0x53   :  { %584 = vmatpush.bf16.msra.mxu2 %v336_v8 }
  0x54   :  { %597 = vmatpush.bf16.msra.mxu3 %v352_v12 }
  0x56   :  { %559 = vmatpush.bf16.msra.mxu0 %v302_v20 }
  0x57   :  { %12 = vsyncpa [#allocation4], 0  ;;  %572 = vmatpush.bf16.msra.mxu1 %v318_v21  ;;  %585 = vmatpush.bf16.msra.mxu2 %v334_v22  ;;  %v316_v33 = vpack.c.bf16 %v82_v27, %v80_v25  ;;  %v332_v34 = vpack.c.bf16 %v114_v29, %v112_v28  ;;  %v44_v36 = vld [vmem:[%s2842_s1 + $0x28] sm:$0xff]  ;;  %v46_v37 = vld [vmem:[%s2842_s1 + $0x38] sm:$0xff]  ;;  %v348_v41 = vpack.c.bf16 %v146_v31, %v144_v30  ;;  %s1281_s13 = sshll.u32 %s2848_s7, 4  ;;  %s1282_s13 = int_to_ptr.hbm [resolvable:$true] %s1281_s13 }
  0x58   :  { %v76_v38 = vld [vmem:[%s2842_s1 + $0x128] sm:$0xff]  ;;  %598 = vmatpush.bf16.msra.mxu3 %v350_v26  ;;  %v78_v42 = vld [vmem:[%s2842_s1 + $0x138] sm:$0xff]  ;;  %v298_v48 = vpack.c.bf16 %v46_v37, %v44_v36 }
  0x59   :  { %v108_v43 = vld [vmem:[%s2842_s1 + $0x228] sm:$0xff]  ;;  %v110_v45 = vld [vmem:[%s2842_s1 + $0x238] sm:$0xff]  ;;  %v314_v51 = vpack.c.bf16 %v78_v42, %v76_v38 }
  0x5a   :  { %v140_v46 = vld [vmem:[%s2842_s1 + $0x328] sm:$0xff]  ;;  %v142_v47 = vld [vmem:[%s2842_s1 + $0x338] sm:$0xff]  ;;  %560 = vmatpush.bf16.msra.mxu0 %v300_v32  ;;  %v330_v52 = vpack.c.bf16 %v110_v45, %v108_v43 }
  0x5b   :  { %v40_v49 = vld [vmem:[%s2842_s1 + $0x8] sm:$0xff]  ;;  %v42_v50 = vld [vmem:[%s2842_s1 + $0x18] sm:$0xff]  ;;  %573 = vmatpush.bf16.msra.mxu1 %v316_v33  ;;  %586 = vmatpush.bf16.msra.mxu2 %v332_v34  ;;  %v346_v56 = vpack.c.bf16 %v142_v47, %v140_v46 }
  0x5c   :  { %v72_v53 = vld [vmem:[%s2842_s1 + $0x108] sm:$0xff]  ;;  %v74_v54 = vld [vmem:[%s2842_s1 + $0x118] sm:$0xff]  ;;  %599 = vmatpush.bf16.msra.mxu3 %v348_v41  ;;  %v296_v63 = vpack.c.bf16 %v42_v50, %v40_v49 }
  0x5d   :  { %v104_v55 = vld [vmem:[%s2842_s1 + $0x208] sm:$0xff]  ;;  %v106_v57 = vld [vmem:[%s2842_s1 + $0x218] sm:$0xff]  ;;  %v312_v4 = vpack.c.bf16 %v74_v54, %v72_v53 }
  0x5e   :  { %v136_v58 = vld [vmem:[%s2842_s1 + $0x308] sm:$0xff]  ;;  %v138_v59 = vld [vmem:[%s2842_s1 + $0x318] sm:$0xff]  ;;  %561 = vmatpush.bf16.msra.mxu0 %v298_v48  ;;  %v328_v5 = vpack.c.bf16 %v106_v57, %v104_v55 }
  0x5f   :  { %v196_v60 = vld [vmem:[%s2842_s1 + $0x4e8] sm:$0xff]  ;;  %v198_v61 = vld [vmem:[%s2842_s1 + $0x4f8] sm:$0xff]  ;;  %574 = vmatpush.bf16.msra.mxu1 %v314_v51  ;;  %587 = vmatpush.bf16.msra.mxu2 %v330_v52  ;;  %v344_v9 = vpack.c.bf16 %v138_v59, %v136_v58 }
  0x60   :  { %v228_v62 = vld [vmem:[%s2842_s1 + $0x5e8] sm:$0xff]  ;;  %v230_v0 = vld [vmem:[%s2842_s1 + $0x5f8] sm:$0xff]  ;;  %600 = vmatpush.bf16.msra.mxu3 %v346_v56  ;;  %v374_v10 = vpack.c.bf16 %v198_v61, %v196_v60 }
  0x61   :  { %v260_v2 = vld [vmem:[%s2842_s1 + $0x6e8] sm:$0xff]  ;;  %v262_v3 = vld [vmem:[%s2842_s1 + $0x6f8] sm:$0xff]  ;;  %v390_v11 = vpack.c.bf16 %v230_v0, %v228_v62 }
  0x62   :  { %v292_v7 = vld [vmem:[%s2842_s1 + $0x7e8] sm:$0xff]  ;;  %v294_v8 = vld [vmem:[%s2842_s1 + $0x7f8] sm:$0xff]  ;;  %v406_v12 = vpack.c.bf16 %v262_v3, %v260_v2  ;;  %562 = vmatpush.bf16.msra.mxu0 %v296_v63 }
  0x63   :  { %v192_v13 = vld [vmem:[%s2842_s1 + $0x4c8] sm:$0xff]  ;;  %v194_v16 = vld [vmem:[%s2842_s1 + $0x4d8] sm:$0xff]  ;;  %v422_v18 = vpack.c.bf16 %v294_v8, %v292_v7  ;;  %575 = vmatpush.bf16.msra.mxu1 %v312_v4  ;;  %588 = vmatpush.bf16.msra.mxu2 %v328_v5 }
  0x64   :  { %v224_v17 = vld [vmem:[%s2842_s1 + $0x5c8] sm:$0xff]  ;;  %v226_v19 = vld [vmem:[%s2842_s1 + $0x5d8] sm:$0xff]  ;;  %601 = vmatpush.bf16.msra.mxu3 %v344_v9  ;;  %v372_v24 = vpack.c.bf16 %v194_v16, %v192_v13 }
  0x65   :  { %v256_v20 = vld [vmem:[%s2842_s1 + $0x6c8] sm:$0xff]  ;;  %v258_v21 = vld [vmem:[%s2842_s1 + $0x6d8] sm:$0xff]  ;;  %v388_v25 = vpack.c.bf16 %v226_v19, %v224_v17  ;;  %563 = vmatmul.bf16.vlgmr.msra.gmra.mxu0 %v1655_v14 }
  0x66   :  { %v288_v22 = vld [vmem:[%s2842_s1 + $0x7c8] sm:$0xff]  ;;  %v290_v23 = vld [vmem:[%s2842_s1 + $0x7d8] sm:$0xff]  ;;  %607 = vmatpush.bf16.msrb.mxu0 %v374_v10  ;;  %v404_v26 = vpack.c.bf16 %v258_v21, %v256_v20  ;;  %589 = vmatmul.bf16.vlgmr.msra.gmra.mxu2 %v1632_v1 }
  0x67   :  { %620 = vmatpush.bf16.msrb.mxu1 %v390_v11  ;;  %633 = vmatpush.bf16.msrb.mxu2 %v406_v12  ;;  %v188_v27 = vld [vmem:[%s2842_s1 + $0x4a8] sm:$0xff]  ;;  %v190_v28 = vld [vmem:[%s2842_s1 + $0x4b8] sm:$0xff]  ;;  %v420_v30 = vpack.c.bf16 %v290_v23, %v288_v22 }
  0x68   :  { %v220_v29 = vld [vmem:[%s2842_s1 + $0x5a8] sm:$0xff]  ;;  %646 = vmatpush.bf16.msrb.mxu3 %v422_v18  ;;  %v222_v31 = vld [vmem:[%s2842_s1 + $0x5b8] sm:$0xff]  ;;  %v370_v36 = vpack.c.bf16 %v190_v28, %v188_v27  ;;  %576 = vmatmul.bf16.vlgmr.msra.gmra.mxu1 %v1657_v15 }
  0x69   :  { %v252_v32 = vld [vmem:[%s2842_s1 + $0x6a8] sm:$0xff]  ;;  %v254_v33 = vld [vmem:[%s2842_s1 + $0x6b8] sm:$0xff]  ;;  %602 = vmatmul.bf16.vlgmr.msra.gmra.mxu3 %v1643_v6  ;;  %v386_v37 = vpack.c.bf16 %v222_v31, %v220_v29 }
  0x6a   :  { %v284_v34 = vld [vmem:[%s2842_s1 + $0x7a8] sm:$0xff]  ;;  %v286_v1 = vld [vmem:[%s2842_s1 + $0x7b8] sm:$0xff]  ;;  %608 = vmatpush.bf16.msrb.mxu0 %v372_v24  ;;  %v402_v38 = vpack.c.bf16 %v254_v33, %v252_v32 }
  0x6b   :  { %621 = vmatpush.bf16.msrb.mxu1 %v388_v25  ;;  %634 = vmatpush.bf16.msrb.mxu2 %v404_v26  ;;  %v184_v41 = vld [vmem:[%s2842_s1 + $0x488] sm:$0xff]  ;;  %v186_v42 = vld [vmem:[%s2842_s1 + $0x498] sm:$0xff]  ;;  %v418_v14 = vpack.c.bf16 %v286_v1, %v284_v34 }
  0x6c   :  { %v216_v6 = vld [vmem:[%s2842_s1 + $0x588] sm:$0xff]  ;;  %647 = vmatpush.bf16.msrb.mxu3 %v420_v30  ;;  %v218_v15 = vld [vmem:[%s2842_s1 + $0x598] sm:$0xff]  ;;  %v368_v48 = vpack.c.bf16 %v186_v42, %v184_v41 }
  0x6d   :  { %v248_v43 = vld [vmem:[%s2842_s1 + $0x688] sm:$0xff]  ;;  %v250_v45 = vld [vmem:[%s2842_s1 + $0x698] sm:$0xff]  ;;  %v384_v49 = vpack.c.bf16 %v218_v15, %v216_v6 }
  0x6e   :  { %v280_v46 = vld [vmem:[%s2842_s1 + $0x788] sm:$0xff]  ;;  %v282_v47 = vld [vmem:[%s2842_s1 + $0x798] sm:$0xff]  ;;  %609 = vmatpush.bf16.msrb.mxu0 %v370_v36  ;;  %v400_v50 = vpack.c.bf16 %v250_v45, %v248_v43  ;;  %v724_v36 = vld [vmem:[%s2843_s2 + $0x1c0] sm:$0xff] }
  0x6f   :  { %622 = vmatpush.bf16.msrb.mxu1 %v386_v37  ;;  %635 = vmatpush.bf16.msrb.mxu2 %v402_v38  ;;  %v180_v51 = vld [vmem:[%s2842_s1 + $0x468] sm:$0xff]  ;;  %v182_v52 = vld [vmem:[%s2842_s1 + $0x478] sm:$0xff]  ;;  %v416_v54 = vpack.c.bf16 %v282_v47, %v280_v46  ;;  %v728_v37 = vld [vmem:[%s2843_s2 + $0x1e0] sm:$0xff] }
  0x70   :  { %v212_v53 = vld [vmem:[%s2842_s1 + $0x568] sm:$0xff]  ;;  %648 = vmatpush.bf16.msrb.mxu3 %v418_v14  ;;  %v214_v55 = vld [vmem:[%s2842_s1 + $0x578] sm:$0xff]  ;;  %v366_v60 = vpack.c.bf16 %v182_v52, %v180_v51  ;;  %v893_v43 = vpack.c.bf16 %v728_v37, %v724_v36  ;;  %v716_v46 = vld [vmem:[%s2843_s2 + $0x180] sm:$0xff] }
  0x71   :  { %v244_v56 = vld [vmem:[%s2842_s1 + $0x668] sm:$0xff]  ;;  %v246_v57 = vld [vmem:[%s2842_s1 + $0x678] sm:$0xff]  ;;  %v382_v61 = vpack.c.bf16 %v214_v55, %v212_v53  ;;  %v720_v47 = vld [vmem:[%s2843_s2 + $0x1a0] sm:$0xff] }
  0x72   :  { %v276_v58 = vld [vmem:[%s2842_s1 + $0x768] sm:$0xff]  ;;  %v278_v59 = vld [vmem:[%s2842_s1 + $0x778] sm:$0xff]  ;;  %610 = vmatpush.bf16.msrb.mxu0 %v368_v48  ;;  %v398_v62 = vpack.c.bf16 %v246_v57, %v244_v56  ;;  %v708_v52 = vld [vmem:[%s2843_s2 + $0x140] sm:$0xff] }
  0x73   :  { %623 = vmatpush.bf16.msrb.mxu1 %v384_v49  ;;  %636 = vmatpush.bf16.msrb.mxu2 %v400_v50  ;;  %v176_v63 = vld [vmem:[%s2842_s1 + $0x448] sm:$0xff]  ;;  %v178_v0 = vld [vmem:[%s2842_s1 + $0x458] sm:$0xff]  ;;  %v414_v3 = vpack.c.bf16 %v278_v59, %v276_v58  ;;  %v889_v50 = vpack.c.bf16 %v720_v47, %v716_v46  ;;  %v712_v53 = vld [vmem:[%s2843_s2 + $0x160] sm:$0xff] }
  0x74   :  { %v208_v2 = vld [vmem:[%s2842_s1 + $0x548] sm:$0xff]  ;;  %649 = vmatpush.bf16.msrb.mxu3 %v416_v54  ;;  %v210_v4 = vld [vmem:[%s2842_s1 + $0x558] sm:$0xff]  ;;  %v364_v10 = vpack.c.bf16 %v178_v0, %v176_v63  ;;  %v885_v55 = vpack.c.bf16 %v712_v53, %v708_v52  ;;  %v710_v36 = vld [vmem:[%s2843_s2 + $0x150] sm:$0xff] }
  0x75   :  { %v240_v5 = vld [vmem:[%s2842_s1 + $0x648] sm:$0xff]  ;;  %v242_v7 = vld [vmem:[%s2842_s1 + $0x658] sm:$0xff]  ;;  %v380_v11 = vpack.c.bf16 %v210_v4, %v208_v2  ;;  %v688_v4 = vld [vmem:[%s2843_s2 + $0xa0] sm:$0xff] }
  0x76   :  { %v272_v8 = vld [vmem:[%s2842_s1 + $0x748] sm:$0xff]  ;;  %v274_v9 = vld [vmem:[%s2842_s1 + $0x758] sm:$0xff]  ;;  %611 = vmatpush.bf16.msrb.mxu0 %v366_v60  ;;  %v396_v12 = vpack.c.bf16 %v242_v7, %v240_v5  ;;  %v692_v60 = vld [vmem:[%s2843_s2 + $0xc0] sm:$0xff] }
  0x77   :  { %624 = vmatpush.bf16.msrb.mxu1 %v382_v61  ;;  %637 = vmatpush.bf16.msrb.mxu2 %v398_v62  ;;  %v172_v13 = vld [vmem:[%s2842_s1 + $0x428] sm:$0xff]  ;;  %v174_v16 = vld [vmem:[%s2842_s1 + $0x438] sm:$0xff]  ;;  %v412_v18 = vpack.c.bf16 %v274_v9, %v272_v8  ;;  %v696_v61 = vld [vmem:[%s2843_s2 + $0xe0] sm:$0xff] }
  0x78   :  { %v204_v17 = vld [vmem:[%s2842_s1 + $0x528] sm:$0xff]  ;;  %650 = vmatpush.bf16.msrb.mxu3 %v414_v3  ;;  %v206_v19 = vld [vmem:[%s2842_s1 + $0x538] sm:$0xff]  ;;  %v362_v24 = vpack.c.bf16 %v174_v16, %v172_v13  ;;  %v877_v0 = vpack.c.bf16 %v696_v61, %v692_v60  ;;  %v684_v3 = vld [vmem:[%s2843_s2 + $0x80] sm:$0xff] }
  0x79   :  { %v236_v20 = vld [vmem:[%s2842_s1 + $0x628] sm:$0xff]  ;;  %v238_v21 = vld [vmem:[%s2842_s1 + $0x638] sm:$0xff]  ;;  %v378_v26 = vpack.c.bf16 %v206_v19, %v204_v17  ;;  %v873_v8 = vpack.c.bf16 %v688_v4, %v684_v3  ;;  %v672_v19 = vld [vmem:[%s2843_s2 + $0x20] sm:$0xff] }
  0x7a   :  { %v268_v22 = vld [vmem:[%s2842_s1 + $0x728] sm:$0xff]  ;;  %v270_v23 = vld [vmem:[%s2842_s1 + $0x738] sm:$0xff]  ;;  %612 = vmatpush.bf16.msrb.mxu0 %v364_v10  ;;  %v394_v27 = vpack.c.bf16 %v238_v21, %v236_v20  ;;  %v676_v10 = vld [vmem:[%s2843_s2 + $0x40] sm:$0xff] }
  0x7b   :  { %v168_v25 = vld [vmem:[%s2842_s1 + $0x408] sm:$0xff]  ;;  %625 = vmatpush.bf16.msrb.mxu1 %v380_v11  ;;  %638 = vmatpush.bf16.msrb.mxu2 %v396_v12  ;;  %v170_v28 = vld [vmem:[%s2842_s1 + $0x418] sm:$0xff]  ;;  %v410_v31 = vpack.c.bf16 %v270_v23, %v268_v22  ;;  %v680_v11 = vld [vmem:[%s2843_s2 + $0x60] sm:$0xff] }
  0x7c   :  { %v200_v29 = vld [vmem:[%s2842_s1 + $0x508] sm:$0xff]  ;;  %v202_v30 = vld [vmem:[%s2842_s1 + $0x518] sm:$0xff]  ;;  %651 = vmatpush.bf16.msrb.mxu3 %v412_v18  ;;  %v360_v38 = vpack.c.bf16 %v170_v28, %v168_v25  ;;  %v869_v16 = vpack.c.bf16 %v680_v11, %v676_v10  ;;  %v668_v18 = vld [vmem:[%s2843_s2] sm:$0xff] }
  0x7d   :  { %v232_v32 = vld [vmem:[%s2842_s1 + $0x608] sm:$0xff]  ;;  %v234_v33 = vld [vmem:[%s2842_s1 + $0x618] sm:$0xff]  ;;  %v376_v6 = vpack.c.bf16 %v202_v30, %v200_v29  ;;  %v726_v22 = vld [vmem:[%s2843_s2 + $0x1d0] sm:$0xff] }
  0x7e   :  { %v264_v34 = vld [vmem:[%s2842_s1 + $0x708] sm:$0xff]  ;;  %v266_v1 = vld [vmem:[%s2842_s1 + $0x718] sm:$0xff]  ;;  %613 = vmatpush.bf16.msrb.mxu0 %v362_v24  ;;  %v392_v14 = vpack.c.bf16 %v234_v33, %v232_v32  ;;  %v730_v23 = vld [vmem:[%s2843_s2 + $0x1f0] sm:$0xff] }
  0x7f   :  { %v725_v41 = vld [vmem:[%s2843_s2 + $0x1c8] sm:$0xff]  ;;  %626 = vmatpush.bf16.msrb.mxu1 %v378_v26  ;;  %639 = vmatpush.bf16.msrb.mxu2 %v394_v27  ;;  %v408_v15 = vpack.c.bf16 %v266_v1, %v264_v34  ;;  %v727_v24 = vld [vmem:[%s2843_s2 + $0x1d8] sm:$0xff]  ;;  %v865_v26 = vpack.c.bf16 %v672_v19, %v668_v18  ;;  %v895_v28 = vpack.c.bf16 %v730_v23, %v726_v22  ;;  %v718_v30 = vld [vmem:[%s2843_s2 + $0x190] sm:$0xff] }
  0x80   :  { %v729_v42 = vld [vmem:[%s2843_s2 + $0x1e8] sm:$0xff]  ;;  %652 = vmatpush.bf16.msrb.mxu3 %v410_v31  ;;  %v731_v25 = vld [vmem:[%s2843_s2 + $0x1f8] sm:$0xff]  ;;  %v722_v31 = vld [vmem:[%s2843_s2 + $0x1b0] sm:$0xff] }
  0x81   :  { %v894_v45 = vpack.c.bf16 %v729_v42, %v725_v41  ;;  %v717_v48 = vld [vmem:[%s2843_s2 + $0x188] sm:$0xff]  ;;  %v896_v29 = vpack.c.bf16 %v731_v25, %v727_v24  ;;  %v719_v32 = vld [vmem:[%s2843_s2 + $0x198] sm:$0xff]  ;;  %v891_v33 = vpack.c.bf16 %v722_v31, %v718_v30  ;;  %v714_v37 = vld [vmem:[%s2843_s2 + $0x170] sm:$0xff] }
  0x82   :  { %614 = vmatpush.bf16.msrb.mxu0 %v360_v38  ;;  %v721_v49 = vld [vmem:[%s2843_s2 + $0x1a8] sm:$0xff]  ;;  %v723_v34 = vld [vmem:[%s2843_s2 + $0x1b8] sm:$0xff]  ;;  %v887_v42 = vpack.c.bf16 %v714_v37, %v710_v36  ;;  %v706_v46 = vld [vmem:[%s2843_s2 + $0x130] sm:$0xff] }
  0x83   :  { %627 = vmatpush.bf16.msrb.mxu1 %v376_v6  ;;  %640 = vmatpush.bf16.msrb.mxu2 %v392_v14  ;;  %v890_v51 = vpack.c.bf16 %v721_v49, %v717_v48  ;;  %v709_v54 = vld [vmem:[%s2843_s2 + $0x148] sm:$0xff]  ;;  %v892_v1 = vpack.c.bf16 %v723_v34, %v719_v32  ;;  %v711_v38 = vld [vmem:[%s2843_s2 + $0x158] sm:$0xff]  ;;  %v694_v52 = vld [vmem:[%s2843_s2 + $0xd0] sm:$0xff] }
  0x84   :  { %653 = vmatpush.bf16.msrb.mxu3 %v408_v15  ;;  %v701_v57 = vld [vmem:[%s2843_s2 + $0x108] sm:$0xff]  ;;  %v715_v6 = vld [vmem:[%s2843_s2 + $0x178] sm:$0xff]  ;;  %v698_v53 = vld [vmem:[%s2843_s2 + $0xf0] sm:$0xff] }
  0x85   :  { %615 = vmatmul.bf16.vlgmr.msrb.gmra.mxu0 %v1823_v39  ;;  %v713_v39 = vld [vmem:[%s2843_s2 + $0x168] sm:$0xff]  ;;  %v888_v15 = vpack.c.bf16 %v715_v6, %v711_v38  ;;  %v703_v47 = vld [vmem:[%s2843_s2 + $0x118] sm:$0xff]  ;;  %v678_v61 = vld [vmem:[%s2843_s2 + $0x50] sm:$0xff] }
  0x86   :  { %929 = vmatpush.bf16.msra.mxu0 %v893_v43  ;;  %628 = vmatmul.bf16.vlgmr.msrb.gmra.mxu1 %v1833_v44  ;;  %v886_v56 = vpack.c.bf16 %v713_v39, %v709_v54  ;;  %v700_v44 = vld [vmem:[%s2843_s2 + $0x100] sm:$0xff]  ;;  %v693_v62 = vld [vmem:[%s2843_s2 + $0xc8] sm:$0xff]  ;;  %v707_v49 = vld [vmem:[%s2843_s2 + $0x138] sm:$0xff]  ;;  %v879_v39 = vpack.c.bf16 %v698_v53, %v694_v52 }
  0x87   :  { %955 = vmatpush.bf16.msra.mxu2 %v894_v45  ;;  %654 = vmatmul.bf16.vlgmr.msrb.gmra.mxu3 %v1825_v40  ;;  %v705_v40 = vld [vmem:[%s2843_s2 + $0x128] sm:$0xff]  ;;  %v702_v45 = vld [vmem:[%s2843_s2 + $0x110] sm:$0xff]  ;;  %v695_v54 = vld [vmem:[%s2843_s2 + $0xd8] sm:$0xff] }
  0x88   :  { %641 = vmatmul.bf16.vlgmr.msrb.gmra.mxu2 %v1812_v35  ;;  %v704_v35 = vld [vmem:[%s2843_s2 + $0x120] sm:$0xff]  ;;  %v882_v59 = vpack.c.bf16 %v705_v40, %v701_v57  ;;  %v697_v63 = vld [vmem:[%s2843_s2 + $0xe8] sm:$0xff]  ;;  %v883_v48 = vpack.c.bf16 %v706_v46, %v702_v45  ;;  %v687_v40 = vld [vmem:[%s2843_s2 + $0x98] sm:$0xff] }
  0x89   :  { %v881_v58 = vpack.c.bf16 %v704_v35, %v700_v44  ;;  %v878_v2 = vpack.c.bf16 %v697_v63, %v693_v62  ;;  %v685_v5 = vld [vmem:[%s2843_s2 + $0x88] sm:$0xff]  ;;  %v690_v44 = vld [vmem:[%s2843_s2 + $0xb0] sm:$0xff]  ;;  %v788_v3 = vld [vmem:[%s2843_s2 + $0x3c0] sm:$0xff] }
  0x8a   :  { %930 = vmatpush.bf16.msra.mxu0 %v889_v50  ;;  %v689_v7 = vld [vmem:[%s2843_s2 + $0xa8] sm:$0xff]  ;;  %v884_v50 = vpack.c.bf16 %v707_v49, %v703_v47  ;;  %v682_v62 = vld [vmem:[%s2843_s2 + $0x70] sm:$0xff]  ;;  %v792_v4 = vld [vmem:[%s2843_s2 + $0x3e0] sm:$0xff] }
  0x8b   :  { %956 = vmatpush.bf16.msra.mxu2 %v890_v51  ;;  %v874_v9 = vpack.c.bf16 %v689_v7, %v685_v5  ;;  %v677_v12 = vld [vmem:[%s2843_s2 + $0x48] sm:$0xff]  ;;  %v683_v5 = vld [vmem:[%s2843_s2 + $0x78] sm:$0xff]  ;;  %v925_v7 = vpack.c.bf16 %v792_v4, %v788_v3  ;;  %v674_v18 = vld [vmem:[%s2843_s2 + $0x30] sm:$0xff] }
  0x8c   :  { %v681_v13 = vld [vmem:[%s2843_s2 + $0x68] sm:$0xff]  ;;  %v671_v19 = vld [vmem:[%s2843_s2 + $0x18] sm:$0xff]  ;;  %v780_v24 = vld [vmem:[%s2843_s2 + $0x380] sm:$0xff] }
  0x8d   :  { %v870_v17 = vpack.c.bf16 %v681_v13, %v677_v12  ;;  %v669_v20 = vld [vmem:[%s2843_s2 + $0x8] sm:$0xff]  ;;  %v871_v12 = vpack.c.bf16 %v682_v62, %v678_v61  ;;  %942 = vmatpush.bf16.msra.mxu1 %v925_v7  ;;  %v784_v25 = vld [vmem:[%s2843_s2 + $0x3a0] sm:$0xff] }
  0x8e   :  { %931 = vmatpush.bf16.msra.mxu0 %v885_v55  ;;  %v673_v21 = vld [vmem:[%s2843_s2 + $0x28] sm:$0xff]  ;;  %v699_v55 = vld [vmem:[%s2843_s2 + $0xf8] sm:$0xff]  ;;  %v772_v30 = vld [vmem:[%s2843_s2 + $0x340] sm:$0xff] }
  0x8f   :  { %957 = vmatpush.bf16.msra.mxu2 %v886_v56  ;;  %v866_v27 = vpack.c.bf16 %v673_v21, %v669_v20  ;;  %v686_v56 = vld [vmem:[%s2843_s2 + $0x90] sm:$0xff]  ;;  %v880_v57 = vpack.c.bf16 %v699_v55, %v695_v54  ;;  %v675_v20 = vld [vmem:[%s2843_s2 + $0x38] sm:$0xff]  ;;  %v776_v31 = vld [vmem:[%s2843_s2 + $0x360] sm:$0xff] }
  0x90   :  { %v875_v60 = vpack.c.bf16 %v690_v44, %v686_v56  ;;  %v868_v23 = vpack.c.bf16 %v675_v20, %v671_v19  ;;  %v777_v34 = vld [vmem:[%s2843_s2 + $0x368] sm:$0xff]  ;;  %v764_v38 = vld [vmem:[%s2843_s2 + $0x300] sm:$0xff] }
  0x91   :  { %v757_v52 = vld [vmem:[%s2843_s2 + $0x2c8] sm:$0xff]  ;;  %v748_v56 = vld [vmem:[%s2843_s2 + $0x280] sm:$0xff] }
  0x92   :  { %932 = vmatpush.bf16.msra.mxu0 %v881_v58  ;;  %v691_v58 = vld [vmem:[%s2843_s2 + $0xb8] sm:$0xff]  ;;  %v761_v54 = vld [vmem:[%s2843_s2 + $0x2e8] sm:$0xff]  ;;  %v752_v44 = vld [vmem:[%s2843_s2 + $0x2a0] sm:$0xff] }
  0x93   :  { %958 = vmatpush.bf16.msra.mxu2 %v882_v59  ;;  %v740_v61 = vld [vmem:[%s2843_s2 + $0x240] sm:$0xff]  ;;  %v741_v3 = vld [vmem:[%s2843_s2 + $0x248] sm:$0xff] }
  0x94   :  { %v744_v62 = vld [vmem:[%s2843_s2 + $0x260] sm:$0xff]  ;;  %v745_v4 = vld [vmem:[%s2843_s2 + $0x268] sm:$0xff] }
  0x95   :  { %v732_v7 = vld [vmem:[%s2843_s2 + $0x200] sm:$0xff] }
  0x96   :  { %933 = vmatpush.bf16.msra.mxu0 %v877_v0  ;;  %v876_v0 = vpack.c.bf16 %v691_v58, %v687_v40  ;;  %v749_v58 = vld [vmem:[%s2843_s2 + $0x288] sm:$0xff] }
  0x97   :  { %959 = vmatpush.bf16.msra.mxu2 %v878_v2  ;;  %v679_v2 = vld [vmem:[%s2843_s2 + $0x58] sm:$0xff] }
  0x9a   :  { %934 = vmatpush.bf16.msra.mxu0 %v873_v8  ;;  %v789_v8 = vld [vmem:[%s2843_s2 + $0x3c8] sm:$0xff] }
  0x9b   :  { %960 = vmatpush.bf16.msra.mxu2 %v874_v9  ;;  %v793_v9 = vld [vmem:[%s2843_s2 + $0x3e8] sm:$0xff] }
  0x9c   :  { %v926_v10 = vpack.c.bf16 %v793_v9, %v789_v8  ;;  %v736_v8 = vld [vmem:[%s2843_s2 + $0x220] sm:$0xff]  ;;  %v902_v9 = vpack.c.bf16 %v745_v4, %v741_v3 }
  0x9e   :  { %935 = vmatpush.bf16.msra.mxu0 %v869_v16  ;;  %v872_v16 = vpack.c.bf16 %v683_v5, %v679_v2  ;;  %968 = vmatpush.bf16.msra.mxu3 %v926_v10  ;;  %v901_v5 = vpack.c.bf16 %v744_v62, %v740_v61  ;;  %v790_v10 = vld [vmem:[%s2843_s2 + $0x3d0] sm:$0xff] }
  0x9f   :  { %961 = vmatpush.bf16.msra.mxu2 %v870_v17  ;;  %v670_v17 = vld [vmem:[%s2843_s2 + $0x10] sm:$0xff] }
  0xa0   :  { %v867_v21 = vpack.c.bf16 %v674_v18, %v670_v17  ;;  %v791_v17 = vld [vmem:[%s2843_s2 + $0x3d8] sm:$0xff]  ;;  %v734_v62 = vld [vmem:[%s2843_s2 + $0x210] sm:$0xff] }
  0xa1   :  { %v795_v18 = vld [vmem:[%s2843_s2 + $0x3f8] sm:$0xff] }
  0xa2   :  { %936 = vmatpush.bf16.msra.mxu0 %v865_v26  ;;  %v781_v26 = vld [vmem:[%s2843_s2 + $0x388] sm:$0xff] }
  0xa3   :  { %962 = vmatpush.bf16.msra.mxu2 %v866_v27 }
  0xa6   :  { %981 = vmatpush.bf16.msrb.mxu0 %v895_v28  ;;  %v921_v28 = vpack.c.bf16 %v784_v25, %v780_v24  ;;  %v783_v24 = vld [vmem:[%s2843_s2 + $0x398] sm:$0xff] }
  0xa7   :  { %1007 = vmatpush.bf16.msrb.mxu2 %v896_v29  ;;  %v785_v29 = vld [vmem:[%s2843_s2 + $0x3a8] sm:$0xff] }
  0xa8   :  { %v486_v43 = vpop.f32.mrf.mxu2  ;;  %v922_v32 = vpack.c.bf16 %v785_v29, %v781_v26  ;;  %943 = vmatpush.bf16.msra.mxu1 %v921_v28  ;;  %v787_v26 = vld [vmem:[%s2843_s2 + $0x3b8] sm:$0xff] }
  0xa9   :  { %v499_v51 = vpop.f32.mrf.mxu3 }
  0xaa   :  { %982 = vmatpush.bf16.msrb.mxu0 %v891_v33  ;;  %v773_v33 = vld [vmem:[%s2843_s2 + $0x348] sm:$0xff]  ;;  %969 = vmatpush.bf16.msra.mxu3 %v922_v32  ;;  %v775_v32 = vld [vmem:[%s2843_s2 + $0x358] sm:$0xff] }
  0xab   :  { %1008 = vmatpush.bf16.msrb.mxu2 %v892_v1  ;;  %v917_v1 = vpack.c.bf16 %v776_v31, %v772_v30  ;;  %v918_v37 = vpack.c.bf16 %v777_v34, %v773_v33  ;;  %v774_v30 = vld [vmem:[%s2843_s2 + $0x350] sm:$0xff]  ;;  %v779_v34 = vld [vmem:[%s2843_s2 + $0x378] sm:$0xff] }
  0xac   :  { %v778_v31 = vld [vmem:[%s2843_s2 + $0x370] sm:$0xff] }
  0xad   :  { %944 = vmatpush.bf16.msra.mxu1 %v917_v1  ;;  %v919_v33 = vpack.c.bf16 %v778_v31, %v774_v30  ;;  %v920_v1 = vpack.c.bf16 %v779_v34, %v775_v32  ;;  %v1329_v32 = vmov 8.0  }
  0xae   :  { %v460_v41 = vpop.f32.mrf.mxu0  ;;  %v473_v14 = vpop.f32.mrf.mxu1  ;;  %983 = vmatpush.bf16.msrb.mxu0 %v887_v42  ;;  %970 = vmatpush.bf16.msra.mxu3 %v918_v37  ;;  %v766_v37 = vld [vmem:[%s2843_s2 + $0x310] sm:$0xff]  ;;  %1293 = vrcp.f32 %v1329_v32 }
  0xaf   :  { %1009 = vmatpush.bf16.msrb.mxu2 %v888_v15  ;;  %v474_v13 = vadd.f32 %v473_v14, %v460_v41  ;;  %v768_v41 = vld [vmem:[%s2843_s2 + $0x320] sm:$0xff]  ;;  %v765_v14 = vld [vmem:[%s2843_s2 + $0x308] sm:$0xff] }
  0xb0   :  { %v488_v63 = vpop.f32.mrf.mxu2  ;;  %v769_v15 = vld [vmem:[%s2843_s2 + $0x328] sm:$0xff]  ;;  %v913_v45 = vpack.c.bf16 %v768_v41, %v764_v38  ;;  %v770_v38 = vld [vmem:[%s2843_s2 + $0x330] sm:$0xff]  ;;  %v767_v41 = vld [vmem:[%s2843_s2 + $0x318] sm:$0xff] }
  0xb1   :  { %v501_v11 = vpop.f32.mrf.mxu3  ;;  %v487_v22 = vadd.f32 %v486_v43, %v474_v13  ;;  %v914_v46 = vpack.c.bf16 %v769_v15, %v765_v14  ;;  %v737_v13 = vld [vmem:[%s2843_s2 + $0x228] sm:$0xff]  ;;  %v771_v14 = vld [vmem:[%s2843_s2 + $0x338] sm:$0xff] }
  0xb2   :  { %984 = vmatpush.bf16.msrb.mxu0 %v883_v48  ;;  %945 = vmatpush.bf16.msra.mxu1 %v913_v45  ;;  %v794_v11 = vld [vmem:[%s2843_s2 + $0x3f0] sm:$0xff]  ;;  %v916_v15 = vpack.c.bf16 %v771_v14, %v767_v41  ;;  %v813_v41 = vld [vmem:[%s2846_s5 + $0x78] sm:$0xff] }
  0xb3   :  { %1010 = vmatpush.bf16.msrb.mxu2 %v884_v50  ;;  %v500_v27 = vadd.f32 %v499_v51, %v487_v22  ;;  %v756_v50 = vld [vmem:[%s2843_s2 + $0x2c0] sm:$0xff]  ;;  %971 = vmatpush.bf16.msra.mxu3 %v914_v46  ;;  %v927_v19 = vpack.c.bf16 %v794_v11, %v790_v10  ;;  %v782_v22 = vld [vmem:[%s2843_s2 + $0x390] sm:$0xff] }
  0xb4   :  { %v760_v51 = vld [vmem:[%s2843_s2 + $0x2e0] sm:$0xff]  ;;  %v758_v46 = vld [vmem:[%s2843_s2 + $0x2d0] sm:$0xff] }
  0xb5   :  { %v909_v53 = vpack.c.bf16 %v760_v51, %v756_v50  ;;  %v763_v50 = vld [vmem:[%s2843_s2 + $0x2f8] sm:$0xff] }
  0xb6   :  { %v462_v35 = vpop.f32.mrf.mxu0  ;;  %v475_v59 = vpop.f32.mrf.mxu1  ;;  %985 = vmatpush.bf16.msrb.mxu0 %v879_v39 }
  0xb7   :  { %1011 = vmatpush.bf16.msrb.mxu2 %v880_v57  ;;  %v910_v57 = vpack.c.bf16 %v761_v54, %v757_v52  ;;  %v753_v59 = vld [vmem:[%s2843_s2 + $0x2a8] sm:$0xff]  ;;  %946 = vmatpush.bf16.msra.mxu1 %v909_v53  ;;  %v750_v52 = vld [vmem:[%s2843_s2 + $0x290] sm:$0xff]  ;;  %v751_v54 = vld [vmem:[%s2843_s2 + $0x298] sm:$0xff] }
  0xb8   :  { %v754_v53 = vld [vmem:[%s2843_s2 + $0x2b0] sm:$0xff] }
  0xb9   :  { %972 = vmatpush.bf16.msra.mxu3 %v910_v57 }
  0xba   :  { %986 = vmatpush.bf16.msrb.mxu0 %v875_v60  ;;  %v905_v60 = vpack.c.bf16 %v752_v44, %v748_v56  ;;  %v755_v56 = vld [vmem:[%s2843_s2 + $0x2b8] sm:$0xff]  ;;  %v742_v44 = vld [vmem:[%s2843_s2 + $0x250] sm:$0xff] }
  0xbb   :  { %1012 = vmatpush.bf16.msrb.mxu2 %v876_v0  ;;  %v906_v0 = vpack.c.bf16 %v753_v59, %v749_v58  ;;  %v743_v58 = vld [vmem:[%s2843_s2 + $0x258] sm:$0xff] }
  0xbc   :  { %947 = vmatpush.bf16.msra.mxu1 %v905_v60  ;;  %v747_v59 = vld [vmem:[%s2843_s2 + $0x278] sm:$0xff] }
  0xbd   :  { %973 = vmatpush.bf16.msra.mxu3 %v906_v0  ;;  %v904_v61 = vpack.c.bf16 %v747_v59, %v743_v58  ;;  %v735_v0 = vld [vmem:[%s2843_s2 + $0x218] sm:$0xff]  ;;  %v826_v58 = vld [vmem:[%s2846_s5 + $0xe0] sm:$0xff]  ;;  %v827_v59 = vld [vmem:[%s2846_s5 + $0xe8] sm:$0xff] }
  0xbe   :  { %987 = vmatpush.bf16.msrb.mxu0 %v871_v12  ;;  %v733_v12 = vld [vmem:[%s2843_s2 + $0x208] sm:$0xff] }
  0xbf   :  { %1013 = vmatpush.bf16.msrb.mxu2 %v872_v16  ;;  %v897_v16 = vpack.c.bf16 %v736_v8, %v732_v7  ;;  %v898_v20 = vpack.c.bf16 %v737_v13, %v733_v12 }
  0xc0   :  { %948 = vmatpush.bf16.msra.mxu1 %v901_v5 }
  0xc1   :  { %974 = vmatpush.bf16.msra.mxu3 %v902_v9 }
  0xc2   :  { %988 = vmatpush.bf16.msrb.mxu0 %v867_v21  ;;  %v928_v21 = vpack.c.bf16 %v795_v18, %v791_v17 }
  0xc3   :  { %1014 = vmatpush.bf16.msrb.mxu2 %v868_v23  ;;  %v786_v23 = vld [vmem:[%s2843_s2 + $0x3b0] sm:$0xff] }
  0xc4   :  { %v512_v36 = vpop.f32.mrf.mxu0  ;;  %949 = vmatpush.bf16.msra.mxu1 %v897_v16  ;;  %v923_v25 = vpack.c.bf16 %v786_v23, %v782_v22 }
  0xc5   :  { %v513_v42 = vadd.f32 %v512_v36, %v500_v27  ;;  %975 = vmatpush.bf16.msra.mxu3 %v898_v20  ;;  %v924_v27 = vpack.c.bf16 %v787_v26, %v783_v24 }
  0xc6   :  { %v525_v6 = vpop.f32.mrf.mxu1 }
  0xc7   :  { %v526_v43 = vadd.f32 %v525_v6, %v513_v42  ;;  %v915_v6 = vpack.c.bf16 %v770_v38, %v766_v37  ;;  %v812_v38 = vld [vmem:[%s2846_s5 + $0x70] sm:$0xff] }
  0xc8   :  { %994 = vmatpush.bf16.msrb.mxu1 %v927_v19 }
  0xc9   :  { %1020 = vmatpush.bf16.msrb.mxu3 %v928_v21 }
  0xcb   :  { %v538_v47 = vpop.f32.mrf.mxu2 }
  0xcc   :  { %v539_v48 = vadd.f32 %v538_v47, %v526_v43  ;;  %v551_v49 = vpop.f32.mrf.mxu3  ;;  %v514_v55 = vpop.f32.mrf.mxu0  ;;  %995 = vmatpush.bf16.msrb.mxu1 %v923_v25  ;;  %v762_v47 = vld [vmem:[%s2843_s2 + $0x2f0] sm:$0xff] }
  0xcd   :  { %1021 = vmatpush.bf16.msrb.mxu3 %v924_v27  ;;  %v907_v55 = vpack.c.bf16 %v754_v53, %v750_v52 }
  0xce   :  { %v552_v39 = vadd.f32 %v551_v49, %v539_v48  ;;  %v527_v35 = vpop.f32.mrf.mxu1  ;;  %v759_v48 = vld [vmem:[%s2843_s2 + $0x2d8] sm:$0xff]  ;;  %v911_v49 = vpack.c.bf16 %v762_v47, %v758_v46 }
  0xcf   :  { %v912_v51 = vpack.c.bf16 %v763_v50, %v759_v48  ;;  %v746_v35 = vld [vmem:[%s2843_s2 + $0x270] sm:$0xff] }
  0xd0   :  { %v863_v40 = vpack.c.bf16 %v552_v39, %v552_v39  ;;  %996 = vmatpush.bf16.msrb.mxu1 %v919_v33  ;;  %v903_v60 = vpack.c.bf16 %v746_v35, %v742_v44  ;;  %v1294_v33 = vpop.eup %1293  ;;  %v828_v50 = vld [vmem:[%s2846_s5 + $0xf0] sm:$0xff]  ;;  %v809_v44 = vld [vmem:[%s2846_s5 + $0x58] sm:$0xff] }
  0xd1   :  { %1022 = vmatpush.bf16.msrb.mxu3 %v920_v1  ;;  %v1058_v34 = vmul.f32 8.0, %v1294_v33  ;;  %vm1062_vm0 = vweird.f32 %v1294_v33 }
  0xd2   :  { %937 = vmatmul.bf16.vlgmr.msra.gmra.mxu0 %v863_v40  ;;  %963 = vmatmul.bf16.vlgmr.msra.gmra.mxu2 %v863_v40 }
  0xd3   :  { %v540_v63 = vpop.f32.mrf.mxu2 }
  0xd4   :  { %v553_v2 = vpop.f32.mrf.mxu3  ;;  %997 = vmatpush.bf16.msrb.mxu1 %v915_v6  ;;  %v738_v63 = vld [vmem:[%s2843_s2 + $0x230] sm:$0xff] }
  0xd5   :  { %1023 = vmatpush.bf16.msrb.mxu3 %v916_v15  ;;  %v739_v2 = vld [vmem:[%s2843_s2 + $0x238] sm:$0xff]  ;;  %v899_v4 = vpack.c.bf16 %v738_v63, %v734_v62 }
  0xd6   :  { %v900_v5 = vpack.c.bf16 %v739_v2, %v735_v0  ;;  %v806_v0 = vld [vmem:[%s2846_s5 + $0x40] sm:$0xff]  ;;  %v807_v2 = vld [vmem:[%s2846_s5 + $0x48] sm:$0xff] }
  0xd8   :  { %998 = vmatpush.bf16.msrb.mxu1 %v911_v49 }
  0xd9   :  { %1024 = vmatpush.bf16.msrb.mxu3 %v912_v51  ;;  %v829_v51 = vld [vmem:[%s2846_s5 + $0xf8] sm:$0xff] }
  0xdc   :  { %999 = vmatpush.bf16.msrb.mxu1 %v907_v55 }
  0xe0   :  { %1000 = vmatpush.bf16.msrb.mxu1 %v903_v60 }
  0xe2   :  { %989 = vmatmul.bf16.vlgmr.msrb.gmra.mxu0 %v863_v40  ;;  %1015 = vmatmul.bf16.vlgmr.msrb.gmra.mxu2 %v863_v40  ;;  %v564_v28 = vpop.f32.mrf.mxu0  ;;  %v908_v40 = vpack.c.bf16 %v755_v56, %v751_v54  ;;  %v1201_v54 = vpack.c.bf16 %v829_v51, %v828_v50  ;;  %v808_v56 = vld [vmem:[%s2846_s5 + $0x50] sm:$0xff] }
  0xe3   :  { %v1191_v35 = vpack.c.bf16 %v809_v44, %v808_v56  ;;  %v841_v44 = vld [vmem:[%s2846_s5 + $0x158] sm:$0xff] }
  0xe4   :  { %1025 = vmatpush.bf16.msrb.mxu3 %v908_v40  ;;  %1001 = vmatpush.bf16.msrb.mxu1 %v899_v4  ;;  %v1190_v4 = vpack.c.bf16 %v807_v2, %v806_v0  ;;  %v859_v2 = vld [vmem:[%s2846_s5 + $0x1e8] sm:$0xff] }
  0xe5   :  { %v577_v29 = vpop.f32.mrf.mxu1 }
  0xe6   :  { %v578_v3 = vadd.f32 %v577_v29, %v564_v28 }
  0xe8   :  { %1026 = vmatpush.bf16.msrb.mxu3 %v904_v61  ;;  %v1200_v61 = vpack.c.bf16 %v827_v59, %v826_v58  ;;  %v818_v59 = vld [vmem:[%s2846_s5 + $0xa0] sm:$0xff] }
  0xe9   :  { %v590_v36 = vpop.f32.mrf.mxu2 }
  0xea   :  { %v566_v43 = vpop.f32.mrf.mxu0  ;;  %v591_v7 = vadd.f32 %v590_v36, %v578_v3  ;;  %v1059_v36 = vsub.f32 1.0, %v1058_v34  ;;  %v803_v34 = vld [vmem:[%s2846_s5 + $0x28] sm:$0xff] }
  0xeb   :  { %v810_v43 = vld [vmem:[%s2846_s5 + $0x60] sm:$0xff] }
  0xec   :  { %v603_v42 = vpop.f32.mrf.mxu3  ;;  %1027 = vmatpush.bf16.msrb.mxu3 %v900_v5  ;;  %v1060_v14 = vmul.f32 %v1294_v33, %v1059_v36 }
  0xed   :  { %v579_v45 = vpop.f32.mrf.mxu1  ;;  %v604_v8 = vadd.f32 %v603_v42, %v591_v7  ;;  %v1193_v42 = vpack.c.bf16 %v813_v41, %v812_v38  ;;  %v843_v38 = vld [vmem:[%s2846_s5 + $0x168] sm:$0xff] }
  0xee   :  { %v811_v45 = vld [vmem:[%s2846_s5 + $0x68] sm:$0xff]  ;;  %v1061_v52 = vadd.f32 %v1294_v33, %v1060_v14  ;;  %v820_v14 = vld [vmem:[%s2846_s5 + $0xb0] sm:$0xff] }
  0xef   :  { %1221 = vmatpush.bf16.msra.mxu0 %v1193_v42  ;;  %v1192_v47 = vpack.c.bf16 %v811_v45, %v810_v43  ;;  %v860_v43 = vld [vmem:[%s2846_s5 + $0x1f0] sm:$0xff] }
  0xf0   :  { %v2603_v60 = vsel %vm1062_vm0, %v1294_v33, %v1061_v52  ;;  %v802_v33 = vld [vmem:[%s2846_s5 + $0x20] sm:$0xff] }
  0xf1   :  { %v592_v39 = vpop.f32.mrf.mxu2 }
  0xf3   :  { %1222 = vmatpush.bf16.msra.mxu0 %v1192_v47 }
  0xf4   :  { %v605_v57 = vpop.f32.mrf.mxu3 }
  0xf7   :  { %1223 = vmatpush.bf16.msra.mxu0 %v1191_v35 }
  0xfb   :  { %1224 = vmatpush.bf16.msra.mxu0 %v1190_v4 }
 0x102   :  { %v616_v9 = vpop.f32.mrf.mxu0 }
 0x103   :  { %v629_v10 = vpop.f32.mrf.mxu1  ;;  %v617_v11 = vadd.f32 %v616_v9, %v604_v8  ;;  %v824_v8 = vld [vmem:[%s2846_s5 + $0xd0] sm:$0xff]  ;;  %v825_v9 = vld [vmem:[%s2846_s5 + $0xd8] sm:$0xff] }
 0x105   :  { %v630_v12 = vadd.f32 %v629_v10, %v617_v11  ;;  %v1199_v11 = vpack.c.bf16 %v825_v9, %v824_v8  ;;  %v799_v8 = vld [vmem:[%s2846_s5 + $0x8] sm:$0xff]  ;;  %v838_v9 = vld [vmem:[%s2846_s5 + $0x140] sm:$0xff] }
 0x10a   :  { %v655_v17 = vpop.f32.mrf.mxu3  ;;  %v618_v18 = vpop.f32.mrf.mxu0 }
 0x10b   :  { %v642_v13 = vpop.f32.mrf.mxu2  ;;  %v631_v19 = vpop.f32.mrf.mxu1  ;;  %v805_v18 = vld [vmem:[%s2846_s5 + $0x38] sm:$0xff] }
 0x10c   :  { %v643_v16 = vadd.f32 %v642_v13, %v630_v12  ;;  %v844_v19 = vld [vmem:[%s2846_s5 + $0x170] sm:$0xff] }
 0x10e   :  { %v656_v20 = vadd.f32 %v655_v17, %v643_v16  ;;  %v804_v17 = vld [vmem:[%s2846_s5 + $0x30] sm:$0xff] }
 0x110   :  { %v864_v21 = vpack.c.bf16 %v656_v20, %v656_v20  ;;  %v1189_v20 = vpack.c.bf16 %v805_v18, %v804_v17  ;;  %v839_v18 = vld [vmem:[%s2846_s5 + $0x148] sm:$0xff] }
 0x112   :  { %950 = vmatmul.bf16.vlgmr.msra.gmra.mxu1 %v864_v21  ;;  %976 = vmatmul.bf16.vlgmr.msra.gmra.mxu3 %v864_v21  ;;  %v657_v23 = vpop.f32.mrf.mxu3 }
 0x113   :  { %v644_v22 = vpop.f32.mrf.mxu2  ;;  %1234 = vmatpush.bf16.msra.mxu1 %v1201_v54  ;;  %1225 = vmatpush.bf16.msra.mxu0 %v1189_v20  ;;  %v800_v54 = vld [vmem:[%s2846_s5 + $0x10] sm:$0xff] }
 0x117   :  { %1235 = vmatpush.bf16.msra.mxu1 %v1200_v61  ;;  %v819_v61 = vld [vmem:[%s2846_s5 + $0xa8] sm:$0xff] }
 0x118   :  { %v1196_v0 = vpack.c.bf16 %v819_v61, %v818_v59  ;;  %v833_v59 = vld [vmem:[%s2846_s5 + $0x118] sm:$0xff] }
 0x11b   :  { %1236 = vmatpush.bf16.msra.mxu1 %v1199_v11 }
 0x122   :  { %1002 = vmatmul.bf16.vlgmr.msrb.gmra.mxu1 %v864_v21  ;;  %1028 = vmatmul.bf16.vlgmr.msrb.gmra.mxu3 %v864_v21  ;;  %v845_v21 = vld [vmem:[%s2846_s5 + $0x178] sm:$0xff] }
 0x14f   :  { %v938_v24 = vpop.f32.mrf.mxu0 }
 0x155   :  { %v964_v25 = vpop.f32.mrf.mxu2 }
 0x157   :  { %v940_v26 = vpop.f32.mrf.mxu0 }
 0x158   :  { %v822_v26 = vld [vmem:[%s2846_s5 + $0xc0] sm:$0xff] }
 0x15d   :  { %v966_v27 = vpop.f32.mrf.mxu2 }
 0x15e   :  { %v823_v27 = vld [vmem:[%s2846_s5 + $0xc8] sm:$0xff] }
 0x15f   :  { %v990_v28 = vpop.f32.mrf.mxu0 }
 0x165   :  { %v2567_v29 = vpop.f32.mrf.mxu2 }
 0x167   :  { %v992_v30 = vpop.f32.mrf.mxu0 }
 0x16d   :  { %v1018_v31 = vpop.f32.mrf.mxu2 }
 0x18f   :  { %v951_v1 = vpop.f32.mrf.mxu1 }
 0x190   :  { %v952_v37 = vadd.f32 %v951_v1, %v938_v24  ;;  %v842_v1 = vld [vmem:[%s2846_s5 + $0x160] sm:$0xff] }
 0x191   :  { %v1208_v47 = vpack.c.bf16 %v843_v38, %v842_v1  ;;  %v837_v1 = vld [vmem:[%s2846_s5 + $0x138] sm:$0xff] }
 0x192   :  { %v1033_v6 = vrot.slane %v952_v37, 4 }
 0x194   :  { %v1034_v15 = vadd.f32 %v1033_v6, %v952_v37 }
 0x195   :  { %v977_v46 = vpop.f32.mrf.mxu3 }
 0x196   :  { %v1035_v48 = vrot.slane %v1034_v15, 2  ;;  %v2581_v49 = vadd.f32 %v977_v46, %v964_v25  ;;  %v1209_v25 = vpack.c.bf16 %v845_v21, %v844_v19 }
 0x197   :  { %v953_v53 = vpop.f32.mrf.mxu1 }
 0x198   :  { %v1036_v39 = vadd.f32 %v1035_v48, %v1034_v15  ;;  %v1039_v55 = vrot.slane %v2581_v49, 4  ;;  %1247 = vmatpush.bf16.msra.mxu2 %v1209_v25  ;;  %v821_v15 = vld [vmem:[%s2846_s5 + $0xb8] sm:$0xff]  ;;  %v856_v25 = vld [vmem:[%s2846_s5 + $0x1d0] sm:$0xff] }
 0x199   :  { %v1197_v48 = vpack.c.bf16 %v821_v15, %v820_v14  ;;  %v815_v14 = vld [vmem:[%s2846_s5 + $0x88] sm:$0xff]  ;;  %v854_v15 = vld [vmem:[%s2846_s5 + $0x1c0] sm:$0xff] }
 0x19a   :  { %v1037_v57 = vrot.slane %v1036_v39, 1  ;;  %v1040_v40 = vadd.f32 %v1039_v55, %v2581_v49 }
 0x19c   :  { %v1038_v62 = vadd.f32 %v1037_v57, %v1036_v39  ;;  %v1041_v63 = vrot.slane %v1040_v40, 2  ;;  %v840_v39 = vld [vmem:[%s2846_s5 + $0x150] sm:$0xff]  ;;  %1248 = vmatpush.bf16.msra.mxu2 %v1208_v47  ;;  %v855_v47 = vld [vmem:[%s2846_s5 + $0x1c8] sm:$0xff] }
 0x19d   :  { %v979_v3 = vpop.f32.mrf.mxu3  ;;  %v1207_v58 = vpack.c.bf16 %v841_v44, %v840_v39 }
 0x19e   :  { %v1064_v5 = vmul.f32 %v2603_v60, %v1038_v62  ;;  %v1042_v7 = vadd.f32 %v1041_v63, %v1040_v40  ;;  %v858_v62 = vld [vmem:[%s2846_s5 + $0x1e0] sm:$0xff] }
 0x19f   :  { %v1003_v10 = vpop.f32.mrf.mxu1 }
 0x1a0   :  { %v2618_v12 = vsub.f32 %v952_v37, %v1064_v5  ;;  %v1043_v13 = vrot.slane %v1042_v7, 1  ;;  %v2620_v16 = vadd.f32 %v1003_v10, %v990_v28  ;;  %v1198_v28 = vpack.c.bf16 %v823_v27, %v822_v26  ;;  %1249 = vmatpush.bf16.msra.mxu2 %v1207_v58  ;;  %v832_v58 = vld [vmem:[%s2846_s5 + $0x110] sm:$0xff] }
 0x1a1   :  { %v1188_v37 = vpack.c.bf16 %v803_v34, %v802_v33  ;;  %v836_v34 = vld [vmem:[%s2846_s5 + $0x130] sm:$0xff] }
 0x1a2   :  { %v1072_v22 = vmul.f32 %v2618_v12, %v2618_v12  ;;  %v1044_v23 = vadd.f32 %v1043_v13, %v1042_v7  ;;  %v1045_v24 = vrot.slane %v2620_v16, 4  ;;  %1237 = vmatpush.bf16.msra.mxu1 %v1198_v28  ;;  %v798_v7 = vld [vmem:[%s2846_s5] sm:$0xff]  ;;  %v1216_v13 = vpack.c.bf16 %v859_v2, %v858_v62  ;;  %v857_v28 = vld [vmem:[%s2846_s5 + $0x1d8] sm:$0xff]  ;;  %v851_v2 = vld [vmem:[%s2846_s5 + $0x1a8] sm:$0xff] }
 0x1a3   :  { %1226 = vmatpush.bf16.msra.mxu0 %v1188_v37  ;;  %v1186_v17 = vpack.c.bf16 %v799_v8, %v798_v7  ;;  %v1215_v33 = vpack.c.bf16 %v857_v28, %v856_v25  ;;  %v1205_v37 = vpack.c.bf16 %v837_v1, %v836_v34  ;;  %v1203_v62 = vpack.c.bf16 %v833_v59, %v832_v58  ;;  %v830_v8 = vld [vmem:[%s2846_s5 + $0x100] sm:$0xff] }
 0x1a4   :  { %v1076_v30 = vrot.slane %v1072_v22, 4  ;;  %v1065_v31 = vmul.f32 %v2603_v60, %v1044_v23  ;;  %v1046_v32 = vadd.f32 %v1045_v24, %v2620_v16  ;;  %v816_v23 = vld [vmem:[%s2846_s5 + $0x90] sm:$0xff]  ;;  %v817_v24 = vld [vmem:[%s2846_s5 + $0x98] sm:$0xff]  ;;  %v846_v25 = vld [vmem:[%s2846_s5 + $0x180] sm:$0xff] }
 0x1a5   :  { %v1029_v36 = vpop.f32.mrf.mxu3  ;;  %v1195_v27 = vpack.c.bf16 %v817_v24, %v816_v23 }
 0x1a6   :  { %v1077_v41 = vadd.f32 %v1076_v30, %v1072_v22  ;;  %v2658_v42 = vsub.f32 %v2581_v49, %v1065_v31  ;;  %v1047_v6 = vrot.slane %v1046_v32, 2  ;;  %v2670_v45 = vadd.f32 %v1029_v36, %v2567_v29  ;;  %v861_v49 = vld [vmem:[%s2846_s5 + $0x1f8] sm:$0xff]  ;;  %1238 = vmatpush.bf16.msra.mxu1 %v1197_v48 }
 0x1a7   :  { %v1005_v46 = vpop.f32.mrf.mxu1  ;;  %v1217_v53 = vpack.c.bf16 %v861_v49, %v860_v43  ;;  %v801_v29 = vld [vmem:[%s2846_s5 + $0x18] sm:$0xff]  ;;  %v1206_v22 = vpack.c.bf16 %v839_v18, %v838_v9  ;;  %v831_v9 = vld [vmem:[%s2846_s5 + $0x108] sm:$0xff]  ;;  %v848_v18 = vld [vmem:[%s2846_s5 + $0x190] sm:$0xff] }
 0x1a8   :  { %v1078_v50 = vrot.slane %v1077_v41, 2  ;;  %v1073_v51 = vmul.f32 %v2658_v42, %v2658_v42  ;;  %v1048_v52 = vadd.f32 %v1047_v6, %v1046_v32  ;;  %v1051_v55 = vrot.slane %v2670_v45, 4  ;;  %v814_v6 = vld [vmem:[%s2846_s5 + $0x80] sm:$0xff] }
 0x1a9   :  { %v1187_v56 = vpack.c.bf16 %v801_v29, %v800_v54  ;;  %1260 = vmatpush.bf16.msra.mxu3 %v1217_v53  ;;  %1250 = vmatpush.bf16.msra.mxu2 %v1206_v22  ;;  %v1194_v46 = vpack.c.bf16 %v815_v14, %v814_v6  ;;  %v1214_v53 = vpack.c.bf16 %v855_v47, %v854_v15 }
 0x1aa   :  { %v1079_v35 = vadd.f32 %v1078_v50, %v1077_v41  ;;  %v1082_v57 = vrot.slane %v1073_v51, 4  ;;  %v1049_v40 = vrot.slane %v1048_v52, 1  ;;  %v1052_v63 = vadd.f32 %v1051_v55, %v2670_v45  ;;  %1239 = vmatpush.bf16.msra.mxu1 %v1196_v0  ;;  %v834_v50 = vld [vmem:[%s2846_s5 + $0x120] sm:$0xff]  ;;  %v852_v55 = vld [vmem:[%s2846_s5 + $0x1b0] sm:$0xff] }
 0x1ab   :  { %1227 = vmatpush.bf16.msra.mxu0 %v1187_v56  ;;  %v853_v56 = vld [vmem:[%s2846_s5 + $0x1b8] sm:$0xff]  ;;  %v850_v0 = vld [vmem:[%s2846_s5 + $0x1a0] sm:$0xff] }
 0x1ac   :  { %v1080_v3 = vrot.slane %v1079_v35, 1  ;;  %v1083_v4 = vadd.f32 %v1082_v57, %v1073_v51  ;;  %v1050_v5 = vadd.f32 %v1049_v40, %v1048_v52  ;;  %v1053_v10 = vrot.slane %v1052_v63, 2  ;;  %v835_v51 = vld [vmem:[%s2846_s5 + $0x128] sm:$0xff] }
 0x1ad   :  { %v1031_v11 = vpop.f32.mrf.mxu3  ;;  %1261 = vmatpush.bf16.msra.mxu3 %v1216_v13  ;;  %1251 = vmatpush.bf16.msra.mxu2 %v1205_v37  ;;  %v1204_v54 = vpack.c.bf16 %v835_v51, %v834_v50  ;;  %v1202_v13 = vpack.c.bf16 %v831_v9, %v830_v8  ;;  %v2819_v37 = vld [vmem:[%s2845_s4] sm:$0xf] }
 0x1ae   :  { %v1081_v19 = vadd.f32 %v1080_v3, %v1079_v35  ;;  %v1084_v20 = vrot.slane %v1083_v4, 2  ;;  %v1066_v21 = vmul.f32 %v2603_v60, %v1050_v5  ;;  %v1054_v26 = vadd.f32 %v1053_v10, %v1052_v63  ;;  %1240 = vmatpush.bf16.msra.mxu1 %v1195_v27  ;;  %v2812_v27 = vld [vmem:[%s2844_s3] sm:$0xf] }
 0x1af   :  { %1228 = vmatpush.bf16.msra.mxu0 %v1186_v17  ;;  %v1213_v35 = vpack.c.bf16 %v853_v56, %v852_v55  ;;  %v1212_v5 = vpack.c.bf16 %v851_v2, %v850_v0  ;;  %v1167_v55 = vperm.slane %v2819_v37, 1 }
 0x1b0   :  { %v1100_v30 = vmul.f32 %v1081_v19, %v2603_v60  ;;  %v1085_v31 = vadd.f32 %v1084_v20, %v1083_v4  ;;  %v2730_v32 = vsub.f32 %v2620_v16, %v1066_v21  ;;  %v1055_v36 = vrot.slane %v1054_v26, 1  ;;  %v849_v19 = vld [vmem:[%s2846_s5 + $0x198] sm:$0xff] }
 0x1b1   :  { %1262 = vmatpush.bf16.msra.mxu3 %v1215_v33  ;;  %1252 = vmatpush.bf16.msra.mxu2 %v1204_v54  ;;  %v1211_v22 = vpack.c.bf16 %v849_v19, %v848_v18  ;;  %v1169_v19 = vperm.slane %v2819_v37, 3 }
 0x1b2   :  { %v2738_v38 = vadd.f32 1e-05, %v1100_v30  ;;  %v1086_v41 = vrot.slane %v1085_v31, 1  ;;  %v1074_v16 = vmul.f32 %v2730_v32, %v2730_v32  ;;  %v1056_v43 = vadd.f32 %v1055_v36, %v1054_v26  ;;  %1241 = vmatpush.bf16.msra.mxu1 %v1194_v46  ;;  %v847_v26 = vld [vmem:[%s2846_s5 + $0x188] sm:$0xff]  ;;  %s1330_s5 = smov [#allocation3]  }
 0x1b3   :  { %s1279_s11 = sshll.u32 %s1330_s5, 4  ;;  %s1280_s11 = int_to_ptr.vmem [resolvable:$true] %s1279_s11 }
 0x1b4   :  { %1295 = vrsqrt.f32 %v2738_v38  ;;  %v1087_v48 = vadd.f32 %v1086_v41, %v1085_v31  ;;  %v1088_v49 = vrot.slane %v1074_v16, 4  ;;  %v1067_v52 = vmul.f32 %v2603_v60, %v1056_v43 }
 0x1b5   :  { %1263 = vmatpush.bf16.msra.mxu3 %v1214_v53  ;;  %1253 = vmatpush.bf16.msra.mxu2 %v1203_v62  ;;  %vm1114_vm2 = vweird.f32 %v2738_v38  ;;  %v1210_v41 = vpack.c.bf16 %v847_v26, %v846_v25  ;;  %v1166_v43 = vperm.slane %v2819_v37, 0 }
 0x1b6   :  { %v1101_v29 = vmul.f32 %v1087_v48, %v2603_v60  ;;  %v1089_v39 = vadd.f32 %v1088_v49, %v1074_v16  ;;  %v2770_v44 = vsub.f32 %v2670_v45, %v1067_v52  ;;  %v1153_v16 = vperm.slane %v2812_v27, 0 }
 0x1b7   :  { %v1154_v52 = vperm.slane %v2812_v27, 1 }
 0x1b8   :  { %v2772_v57 = vadd.f32 1e-05, %v1101_v29  ;;  %v1090_v40 = vrot.slane %v1089_v39, 2  ;;  %v1075_v61 = vmul.f32 %v2770_v44, %v2770_v44 }
 0x1b9   :  { %1264 = vmatpush.bf16.msra.mxu3 %v1213_v35  ;;  %1254 = vmatpush.bf16.msra.mxu2 %v1202_v13 }
 0x1ba   :  { %v1296_v45 = vpop.eup %1295  ;;  %1297 = vrsqrt.f32 %v2772_v57  ;;  %v1091_v63 = vadd.f32 %v1090_v40, %v1089_v39  ;;  %v1094_v4 = vrot.slane %v1075_v61, 4  ;;  %vm1124_vm5 = vweird.f32 %v2772_v57 }
 0x1bb   :  { %v1109_v3 = vmul.f32 %v1296_v45, %v2738_v38  ;;  %vm1115_vm1 = vweird.f32 %v1296_v45 }
 0x1bc   :  { %v1092_v7 = vrot.slane %v1091_v63, 1  ;;  %v1095_v11 = vadd.f32 %v1094_v4, %v1075_v61  ;;  %vm1116_vm3 = vmor %vm1114_vm2, %vm1115_vm1 }
 0x1bd   :  { %v1110_v10 = vmul.f32 %v1296_v45, %v1109_v3  ;;  %1265 = vmatpush.bf16.msra.mxu3 %v1212_v5  ;;  %v1168_v5 = vperm.slane %v2819_v37, 2 }
 0x1be   :  { %v1093_v17 = vadd.f32 %v1092_v7, %v1091_v63  ;;  %v1096_v21 = vrot.slane %v1095_v11, 2  ;;  %v1155_v63 = vperm.slane %v2812_v27, 2 }
 0x1bf   :  { %v1111_v20 = vmul.f32 0.5, %v1110_v10 }
 0x1c0   :  { %v1298_v23 = vpop.eup %1297  ;;  %v1102_v24 = vmul.f32 %v1093_v17, %v2603_v60  ;;  %v1097_v31 = vadd.f32 %v1096_v21, %v1095_v11  ;;  %v1156_v11 = vperm.slane %v2812_v27, 3  ;;  %v1292_v27 = vld [vmem:[%s2847_s6] ss:$0 sm:$0xff] }
 0x1c1   :  { %v1112_v28 = vsub.f32 1.5, %v1111_v20  ;;  %v1119_v30 = vmul.f32 %v1298_v23, %v2772_v57  ;;  %1266 = vmatpush.bf16.msra.mxu3 %v1211_v22  ;;  %vm1125_vm4 = vweird.f32 %v1298_v23 }
 0x1c2   :  { %v1106_v33 = vadd.f32 1e-05, %v1102_v24  ;;  %v1098_v36 = vrot.slane %v1097_v31, 1  ;;  %vm1126_vm6 = vmor %vm1124_vm5, %vm1125_vm4 }
 0x1c3   :  { %v1113_v34 = vmul.f32 %v1296_v45, %v1112_v28  ;;  %v1120_v1 = vmul.f32 %v1298_v23, %v1119_v30 }
 0x1c4   :  { %1299 = vrsqrt.f32 %v1106_v33  ;;  %v1099_v15 = vadd.f32 %v1098_v36, %v1097_v31  ;;  %vm1134_vm8 = vweird.f32 %v1106_v33 }
 0x1c5   :  { %v1117_v6 = vsel %vm1116_vm3, %v1296_v45, %v1113_v34  ;;  %v1121_v14 = vmul.f32 0.5, %v1120_v1  ;;  %1267 = vmatpush.bf16.msra.mxu3 %v1210_v41 }
 0x1c6   :  { %v1148_v38 = vmul.f32 %v1117_v6, %v2618_v12  ;;  %v1103_v47 = vmul.f32 %v1099_v15, %v2603_v60 }
 0x1c7   :  { %v1122_v46 = vsub.f32 1.5, %v1121_v14 }
 0x1c8   :  { %v1161_v48 = vmul.f32 %v1153_v16, %v1148_v38  ;;  %v1107_v50 = vadd.f32 1e-05, %v1103_v47 }
 0x1c9   :  { %v1123_v49 = vmul.f32 %v1298_v23, %v1122_v46 }
 0x1ca   :  { %v1300_v51 = vpop.eup %1299  ;;  %v1174_v53 = vadd.f32 %v1166_v43, %v1161_v48  ;;  %1301 = vrsqrt.f32 %v1107_v50  ;;  %vm1144_vm11 = vweird.f32 %v1107_v50 }
 0x1cb   :  { %v1127_v54 = vsel %vm1126_vm6, %v1298_v23, %v1123_v49  ;;  %v1129_v29 = vmul.f32 %v1300_v51, %v1106_v33  ;;  %vm1135_vm7 = vweird.f32 %v1300_v51 }
 0x1cc   :  { %v1149_v12 = vmul.f32 %v1127_v54, %v2658_v42  ;;  %v1178_v39 = vmax.f32 %v1174_v53, 0.0  ;;  %vm1136_vm9 = vmor %vm1134_vm8, %vm1135_vm7 }
 0x1cd   :  { %v1130_v60 = vmul.f32 %v1300_v51, %v1129_v29 }
 0x1ce   :  { %v1162_v56 = vmul.f32 %v1154_v52, %v1149_v12  ;;  %v1182_v35 = vpack.c.bf16 %v1178_v39, %v1178_v39 }
 0x1cf   :  { %v1131_v40 = vmul.f32 0.5, %v1130_v60 }
 0x1d0   :  { %1229 = vmatmul.bf16.vlgmr.msra.gmra.mxu0 %v1182_v35  ;;  %v1175_v57 = vadd.f32 %v1167_v55, %v1162_v56  ;;  %v1302_v58 = vpop.eup %1301 }
 0x1d1   :  { %v1132_v59 = vsub.f32 1.5, %v1131_v40  ;;  %v1139_v61 = vmul.f32 %v1302_v58, %v1107_v50  ;;  %vm1145_vm10 = vweird.f32 %v1302_v58 }
 0x1d2   :  { %v1179_v62 = vmax.f32 %v1175_v57, 0.0  ;;  %vm1146_vm12 = vmor %vm1144_vm11, %vm1145_vm10 }
 0x1d3   :  { %v1133_v45 = vmul.f32 %v1300_v51, %v1132_v59  ;;  %v1140_v42 = vmul.f32 %v1302_v58, %v1139_v61 }
 0x1d4   :  { %v1183_v0 = vpack.c.bf16 %v1179_v62, %v1179_v62 }
 0x1d5   :  { %v1137_v2 = vsel %vm1136_vm9, %v1300_v51, %v1133_v45  ;;  %v1141_v4 = vmul.f32 0.5, %v1140_v42 }
 0x1d6   :  { %v1150_v3 = vmul.f32 %v1137_v2, %v2730_v32  ;;  %1242 = vmatmul.bf16.vlgmr.msra.gmra.mxu1 %v1183_v0 }
 0x1d7   :  { %v1142_v8 = vsub.f32 1.5, %v1141_v4 }
 0x1d8   :  { %v1163_v7 = vmul.f32 %v1155_v63, %v1150_v3 }
 0x1d9   :  { %v1143_v9 = vmul.f32 %v1302_v58, %v1142_v8 }
 0x1da   :  { %v1176_v10 = vadd.f32 %v1168_v5, %v1163_v7 }
 0x1db   :  { %v1147_v13 = vsel %vm1146_vm12, %v1302_v58, %v1143_v9 }
 0x1dc   :  { %v1180_v17 = vmax.f32 %v1176_v10, 0.0  ;;  %v1151_v18 = vmul.f32 %v1147_v13, %v2770_v44 }
 0x1de   :  { %v1184_v32 = vpack.c.bf16 %v1180_v17, %v1180_v17  ;;  %v1164_v20 = vmul.f32 %v1156_v11, %v1151_v18 }
 0x1e0   :  { %1255 = vmatmul.bf16.vlgmr.msra.gmra.mxu2 %v1184_v32  ;;  %v1177_v21 = vadd.f32 %v1169_v19, %v1164_v20 }
 0x1e2   :  { %v1181_v22 = vmax.f32 %v1177_v21, 0.0 }
 0x1e4   :  { %v1185_v23 = vpack.c.bf16 %v1181_v22, %v1181_v22 }
 0x1e6   :  { %1268 = vmatmul.bf16.vlgmr.msra.gmra.mxu3 %v1185_v23 }
 0x24d   :  { %v1230_v24 = vpop.f32.mrf.mxu0 }
 0x24e   :  { %v1231_v31 = vadd.f32 %v1292_v27, %v1230_v24 }
 0x253   :  { %v1243_v25 = vpop.f32.mrf.mxu1 }
 0x254   :  { %v1244_v44 = vadd.f32 %v1243_v25, %v1231_v31 }
 0x255   :  { %v1232_v26 = vpop.f32.mrf.mxu0 }
 0x25b   :  { %v1245_v28 = vpop.f32.mrf.mxu1 }
 0x263   :  { %v1256_v30 = vpop.f32.mrf.mxu2 }
 0x264   :  { %v1257_v33 = vadd.f32 %v1256_v30, %v1244_v44 }
 0x269   :  { %v1269_v34 = vpop.f32.mrf.mxu3 }
 0x26a   :  { %v1270_v1 = vadd.f32 %v1269_v34, %v1257_v33 }
 0x26b   :  { %v1258_v36 = vpop.f32.mrf.mxu2 }
 0x26c   :  { %1273 = vst [vmem:[#allocation3] sm:$0xff] %v1270_v1 }
 0x26d   :  { %1284 = dma.vmem_to_hbm [thread:$0]  %s1280_s11, 128, %s1282_s13, [#allocation4]  }
 0x271   :  { %v1271_v37 = vpop.f32.mrf.mxu3 }
 0x272   :  { %1327 = dma.done.wait [#allocation4], 128  }
 0x273   :  { %1328 = vsyncadd [#allocation4], 4294967168 }
 0x274   :  { %1289 = vsyncpa [#allocation4], 1 }

// kernel: byol_forward.3
= control target key start
LH: loop header
LB: loop body
LE: loop exit
PB: predicated region body
PF: predicated region fallthrough
CT: control target
= control target key end

     0   :  { %18 = vsyncpa [#allocation4], 0  ;;  %s9544_s0 = inlined_call_operand.vmem [shape: bf16[8,1024], index: 0, kind: input, shape index: {}]   ;;  %s9545_s1 = inlined_call_operand.vmem [shape: bf16[8,1024], index: 1, kind: input, shape index: {}]   ;;  %s9546_s2 = inlined_call_operand.vmem [shape: bf16[1024,256], index: 2, kind: input, shape index: {}]   ;;  %s9547_s3 = inlined_call_operand.vmem [shape: bf16[256,512], index: 3, kind: input, shape index: {}]   ;;  %s9548_s4 = inlined_call_operand.vmem [shape: f32[1,512], index: 4, kind: input, shape index: {}]   ;;  %s9549_s5 = inlined_call_operand.vmem [shape: f32[1,512], index: 5, kind: input, shape index: {}]   ;;  %s9550_s6 = inlined_call_operand.hbm [shape: bf16[512,128], index: 6, kind: input, shape index: {}]   ;;  %s9551_s7 = inlined_call_operand.vmem [shape: f32[1,128], index: 7, kind: input, shape index: {}]   ;;  %s9552_s8 = inlined_call_operand.hbm [shape: bf16[128,512], index: 8, kind: input, shape index: {}]   ;;  %s9553_s9 = inlined_call_operand.vmem [shape: f32[1,512], index: 9, kind: input, shape index: {}]   ;;  %s9554_s10 = inlined_call_operand.vmem [shape: f32[1,512], index: 10, kind: input, shape index: {}]   ;;  %s9555_s11 = inlined_call_operand.hbm [shape: bf16[512,128], index: 11, kind: input, shape index: {}]   ;;  %s9556_s12 = inlined_call_operand.vmem [shape: f32[1,128], index: 12, kind: input, shape index: {}]   ;;  %s9557_s13 = inlined_call_operand.vmem [shape: f32[2,8,128], index: 13, kind: output, shape index: {}]  }
   0x1   :  { %19 = vsyncpa [#allocation6], 0  ;;  %s51_s27 = sshll.u32 %s9552_s8, 4  ;;  %s7055_s28 = smov [#allocation5]   ;;  %s52_s27 = int_to_ptr.hbm [resolvable:$true] %s51_s27 }
   0x2   :  { %s53_s29 = sshll.u32 %s7055_s28, 4  ;;  %s36_s15 = sshll.u32 %s9550_s6, 4  ;;  %s54_s29 = int_to_ptr.vmem [resolvable:$true] %s53_s29  ;;  %s37_s15 = int_to_ptr.hbm [resolvable:$true] %s36_s15 }
   0x3   :  { %s7056_s16 = smov 256   ;;  %s7057_s17 = smov 16  }
   0x4   :  { %59 = dma.hbm_to_vmem [thread:$0]  %s52_s27, 4096, %s54_s29, [#allocation6], %s7056_s16, %s7056_s16, %s7057_s17  }
   0x5   :  { %s7058_s18 = smov [#allocation3]   ;;  %s7059_s20 = smov 64  }
   0x6   :  { %s38_s19 = sshll.u32 %s7058_s18, 4  ;;  %s7060_s21 = smov 4   ;;  %s39_s19 = int_to_ptr.vmem [resolvable:$true] %s38_s19 }
   0x7   :  { %44 = dma.hbm_to_vmem [thread:$0]  %s37_s15, 4096, %s39_s19, [#allocation4], %s7059_s20, %s7059_s20, %s7060_s21  }
   0x8   :  { %s68_s23 = sshll.u32 %s9555_s11, 4  ;;  %s7061_s24 = smov [#allocation7]   ;;  %s69_s23 = int_to_ptr.hbm [resolvable:$true] %s68_s23 }
   0x9   :  { %s70_s25 = sshll.u32 %s7061_s24, 4  ;;  %s71_s25 = int_to_ptr.vmem [resolvable:$true] %s70_s25 }
   0xa   :  { %76 = dma.hbm_to_vmem [thread:$0]  %s69_s23, 4096, %s71_s25, [#allocation6], %s7059_s20, %s7059_s20, %s7060_s21  }
   0xb   :  { %7051 = dma.done.wait [#allocation4], 4096  }
   0xc   :  { %7052 = vsyncadd [#allocation4], 4294963200 }
   0xd   :  { %7053 = dma.done.wait [#allocation6], 8192  }
   0xe   :  { %7054 = vsyncadd [#allocation6], 4294959104  ;;  %v4750_v0 = vld [vmem:[%s9546_s2 + $0x70] sm:$0xf]  ;;  %v6500_v1 = vld [vmem:[%s9546_s2 + $0x74] sm:$0xf0] }
   0xf   :  { %v4814_v2 = vld [vmem:[%s9546_s2 + $0xf0] sm:$0xf]  ;;  %v7151_v3 = vor.u32 %v6500_v1, %v4750_v0  ;;  %v6516_v4 = vld [vmem:[%s9546_s2 + $0xf4] sm:$0xf0]  ;;  %v4742_v11 = vld [vmem:[%s9546_s2 + $0x60] sm:$0xf] }
  0x10   :  { %v4878_v5 = vld [vmem:[%s9546_s2 + $0x170] sm:$0xf]  ;;  %v6532_v6 = vld [vmem:[%s9546_s2 + $0x174] sm:$0xf0]  ;;  %v7162_v7 = vor.u32 %v6516_v4, %v4814_v2  ;;  %v6498_v13 = vld [vmem:[%s9546_s2 + $0x64] sm:$0xf0] }
  0x11   :  { %v7164_v8 = vor.u32 %v6532_v6, %v4878_v5  ;;  %v4942_v9 = vld [vmem:[%s9546_s2 + $0x1f0] sm:$0xf]  ;;  %v6548_v10 = vld [vmem:[%s9546_s2 + $0x1f4] sm:$0xf0]  ;;  %901 = vmatpush.bf16.msra.mxu0 %v7151_v3  ;;  %v4806_v14 = vld [vmem:[%s9546_s2 + $0xe0] sm:$0xf]  ;;  %v7189_v16 = vor.u32 %v6498_v13, %v4742_v11 }
  0x12   :  { %v7176_v12 = vor.u32 %v6548_v10, %v4942_v9  ;;  %v6514_v15 = vld [vmem:[%s9546_s2 + $0xe4] sm:$0xf0]  ;;  %914 = vmatpush.bf16.msra.mxu1 %v7162_v7  ;;  %v4870_v18 = vld [vmem:[%s9546_s2 + $0x160] sm:$0xf]  ;;  %v4734_v23 = vld [vmem:[%s9546_s2 + $0x50] sm:$0xf] }
  0x13   :  { %927 = vmatpush.bf16.msra.mxu2 %v7164_v8  ;;  %v7191_v17 = vor.u32 %v6514_v15, %v4806_v14  ;;  %v6530_v19 = vld [vmem:[%s9546_s2 + $0x164] sm:$0xf0]  ;;  %v4934_v20 = vld [vmem:[%s9546_s2 + $0x1e0] sm:$0xf]  ;;  %v6496_v24 = vld [vmem:[%s9546_s2 + $0x54] sm:$0xf0] }
  0x14   :  { %940 = vmatpush.bf16.msra.mxu3 %v7176_v12  ;;  %v7203_v21 = vor.u32 %v6530_v19, %v4870_v18  ;;  %v6546_v22 = vld [vmem:[%s9546_s2 + $0x1e4] sm:$0xf0]  ;;  %v4798_v26 = vld [vmem:[%s9546_s2 + $0xd0] sm:$0xf]  ;;  %v6512_v27 = vld [vmem:[%s9546_s2 + $0xd4] sm:$0xf0]  ;;  %v7226_v29 = vor.u32 %v6496_v24, %v4734_v23 }
  0x15   :  { %v7214_v25 = vor.u32 %v6546_v22, %v4934_v20  ;;  %v4862_v28 = vld [vmem:[%s9546_s2 + $0x150] sm:$0xf]  ;;  %902 = vmatpush.bf16.msra.mxu0 %v7189_v16  ;;  %v6528_v30 = vld [vmem:[%s9546_s2 + $0x154] sm:$0xf0]  ;;  %v7239_v33 = vor.u32 %v6512_v27, %v4798_v26  ;;  %v4726_v35 = vld [vmem:[%s9546_s2 + $0x40] sm:$0xf] }
  0x16   :  { %v4926_v31 = vld [vmem:[%s9546_s2 + $0x1d0] sm:$0xf]  ;;  %v6544_v32 = vld [vmem:[%s9546_s2 + $0x1d4] sm:$0xf0]  ;;  %915 = vmatpush.bf16.msra.mxu1 %v7191_v17  ;;  %v7241_v34 = vor.u32 %v6528_v30, %v4862_v28  ;;  %v6494_v36 = vld [vmem:[%s9546_s2 + $0x44] sm:$0xf0] }
  0x17   :  { %928 = vmatpush.bf16.msra.mxu2 %v7203_v21  ;;  %v4790_v37 = vld [vmem:[%s9546_s2 + $0xc0] sm:$0xf]  ;;  %v7253_v38 = vor.u32 %v6544_v32, %v4926_v31  ;;  %v6510_v39 = vld [vmem:[%s9546_s2 + $0xc4] sm:$0xf0]  ;;  %v7271_v44 = vor.u32 %v6494_v36, %v4726_v35  ;;  %v4718_v47 = vld [vmem:[%s9546_s2 + $0x30] sm:$0xf] }
  0x18   :  { %941 = vmatpush.bf16.msra.mxu3 %v7214_v25  ;;  %v4854_v40 = vld [vmem:[%s9546_s2 + $0x140] sm:$0xf]  ;;  %v6526_v41 = vld [vmem:[%s9546_s2 + $0x144] sm:$0xf0]  ;;  %v7275_v45 = vor.u32 %v6510_v39, %v4790_v37  ;;  %v6492_v48 = vld [vmem:[%s9546_s2 + $0x34] sm:$0xf0] }
  0x19   :  { %v4918_v42 = vld [vmem:[%s9546_s2 + $0x1c0] sm:$0xf]  ;;  %v6542_v43 = vld [vmem:[%s9546_s2 + $0x1c4] sm:$0xf0]  ;;  %903 = vmatpush.bf16.msra.mxu0 %v7226_v29  ;;  %v7277_v46 = vor.u32 %v6526_v41, %v4854_v40  ;;  %v4782_v49 = vld [vmem:[%s9546_s2 + $0xb0] sm:$0xf]  ;;  %v7307_v56 = vor.u32 %v6492_v48, %v4718_v47 }
  0x1a   :  { %916 = vmatpush.bf16.msra.mxu1 %v7239_v33  ;;  %v7289_v50 = vor.u32 %v6542_v43, %v4918_v42  ;;  %v6508_v51 = vld [vmem:[%s9546_s2 + $0xb4] sm:$0xf0]  ;;  %v4846_v52 = vld [vmem:[%s9546_s2 + $0x130] sm:$0xf]  ;;  %v4710_v59 = vld [vmem:[%s9546_s2 + $0x20] sm:$0xf] }
  0x1b   :  { %929 = vmatpush.bf16.msra.mxu2 %v7241_v34  ;;  %v6524_v53 = vld [vmem:[%s9546_s2 + $0x134] sm:$0xf0]  ;;  %v4910_v54 = vld [vmem:[%s9546_s2 + $0x1b0] sm:$0xf]  ;;  %v7311_v57 = vor.u32 %v6508_v51, %v4782_v49  ;;  %v6490_v60 = vld [vmem:[%s9546_s2 + $0x24] sm:$0xf0] }
  0x1c   :  { %942 = vmatpush.bf16.msra.mxu3 %v7253_v38  ;;  %v6540_v55 = vld [vmem:[%s9546_s2 + $0x1b4] sm:$0xf0]  ;;  %v7313_v58 = vor.u32 %v6524_v53, %v4846_v52  ;;  %v4774_v61 = vld [vmem:[%s9546_s2 + $0xa0] sm:$0xf]  ;;  %v6506_v63 = vld [vmem:[%s9546_s2 + $0xa4] sm:$0xf0]  ;;  %v7343_v5 = vor.u32 %v6490_v60, %v4710_v59 }
  0x1d   :  { %904 = vmatpush.bf16.msra.mxu0 %v7271_v44  ;;  %v7325_v62 = vor.u32 %v6540_v55, %v4910_v54  ;;  %v4838_v0 = vld [vmem:[%s9546_s2 + $0x120] sm:$0xf]  ;;  %v6522_v1 = vld [vmem:[%s9546_s2 + $0x124] sm:$0xf0]  ;;  %v7347_v6 = vor.u32 %v6506_v63, %v4774_v61  ;;  %v4702_v10 = vld [vmem:[%s9546_s2 + $0x10] sm:$0xf] }
  0x1e   :  { %917 = vmatpush.bf16.msra.mxu1 %v7275_v45  ;;  %v4902_v2 = vld [vmem:[%s9546_s2 + $0x1a0] sm:$0xf]  ;;  %v6538_v4 = vld [vmem:[%s9546_s2 + $0x1a4] sm:$0xf0]  ;;  %v7349_v9 = vor.u32 %v6522_v1, %v4838_v0  ;;  %v6488_v11 = vld [vmem:[%s9546_s2 + $0x14] sm:$0xf0] }
  0x1f   :  { %930 = vmatpush.bf16.msra.mxu2 %v7277_v46  ;;  %v4766_v13 = vld [vmem:[%s9546_s2 + $0x90] sm:$0xf]  ;;  %v7361_v14 = vor.u32 %v6538_v4, %v4902_v2  ;;  %v6504_v15 = vld [vmem:[%s9546_s2 + $0x94] sm:$0xf0]  ;;  %v7379_v23 = vor.u32 %v6488_v11, %v4702_v10  ;;  %v4694_v24 = vld [vmem:[%s9546_s2] sm:$0xf] }
  0x20   :  { %943 = vmatpush.bf16.msra.mxu3 %v7289_v50  ;;  %v4830_v18 = vld [vmem:[%s9546_s2 + $0x110] sm:$0xf]  ;;  %v6520_v19 = vld [vmem:[%s9546_s2 + $0x114] sm:$0xf0]  ;;  %v6486_v26 = vld [vmem:[%s9546_s2 + $0x4] sm:$0xf0]  ;;  %v7389_v27 = vor.u32 %v6504_v15, %v4766_v13 }
  0x21   :  { %905 = vmatpush.bf16.msra.mxu0 %v7307_v56  ;;  %v4894_v20 = vld [vmem:[%s9546_s2 + $0x190] sm:$0xf]  ;;  %v6536_v22 = vld [vmem:[%s9546_s2 + $0x194] sm:$0xf0]  ;;  %v7391_v28 = vor.u32 %v6520_v19, %v4830_v18  ;;  %v4758_v30 = vld [vmem:[%s9546_s2 + $0x80] sm:$0xf]  ;;  %v7424_v43 = vor.u32 %v6486_v26, %v4694_v24 }
  0x22   :  { %918 = vmatpush.bf16.msra.mxu1 %v7311_v57  ;;  %v6502_v31 = vld [vmem:[%s9546_s2 + $0x84] sm:$0xf0]  ;;  %v4822_v32 = vld [vmem:[%s9546_s2 + $0x100] sm:$0xf]  ;;  %v7403_v35 = vor.u32 %v6536_v22, %v4894_v20  ;;  %v5006_v40 = vld [vmem:[%s9546_s2 + $0x270] sm:$0xf] }
  0x23   :  { %931 = vmatpush.bf16.msra.mxu2 %v7313_v58  ;;  %v6518_v36 = vld [vmem:[%s9546_s2 + $0x104] sm:$0xf0]  ;;  %v4886_v37 = vld [vmem:[%s9546_s2 + $0x180] sm:$0xf]  ;;  %v6564_v41 = vld [vmem:[%s9546_s2 + $0x274] sm:$0xf0]  ;;  %v7437_v51 = vor.u32 %v6502_v31, %v4758_v30 }
  0x24   :  { %944 = vmatpush.bf16.msra.mxu3 %v7325_v62  ;;  %v6534_v39 = vld [vmem:[%s9546_s2 + $0x184] sm:$0xf0]  ;;  %v5070_v42 = vld [vmem:[%s9546_s2 + $0x2f0] sm:$0xf]  ;;  %v6580_v47 = vld [vmem:[%s9546_s2 + $0x2f4] sm:$0xf0]  ;;  %v7439_v52 = vor.u32 %v6518_v36, %v4822_v32  ;;  %v7450_v59 = vor.u32 %v6564_v41, %v5006_v40 }
  0x25   :  { %906 = vmatpush.bf16.msra.mxu0 %v7343_v5  ;;  %v5134_v48 = vld [vmem:[%s9546_s2 + $0x370] sm:$0xf]  ;;  %v6596_v49 = vld [vmem:[%s9546_s2 + $0x374] sm:$0xf0]  ;;  %v7448_v55 = vor.u32 %v6534_v39, %v4886_v37  ;;  %v7452_v60 = vor.u32 %v6580_v47, %v5070_v42  ;;  %v4998_v63 = vld [vmem:[%s9546_s2 + $0x260] sm:$0xf] }
  0x26   :  { %919 = vmatpush.bf16.msra.mxu1 %v7347_v6  ;;  %v5198_v53 = vld [vmem:[%s9546_s2 + $0x3f0] sm:$0xf]  ;;  %v6612_v54 = vld [vmem:[%s9546_s2 + $0x3f4] sm:$0xf0]  ;;  %v7454_v61 = vor.u32 %v6596_v49, %v5134_v48  ;;  %v6562_v0 = vld [vmem:[%s9546_s2 + $0x264] sm:$0xf0] }
  0x27   :  { %932 = vmatpush.bf16.msra.mxu2 %v7349_v9  ;;  %v5062_v1 = vld [vmem:[%s9546_s2 + $0x2e0] sm:$0xf]  ;;  %v7466_v2 = vor.u32 %v6612_v54, %v5198_v53  ;;  %v6578_v4 = vld [vmem:[%s9546_s2 + $0x2e4] sm:$0xf0]  ;;  %v7487_v18 = vor.u32 %v6562_v0, %v4998_v63  ;;  %v4990_v19 = vld [vmem:[%s9546_s2 + $0x250] sm:$0xf] }
  0x28   :  { %945 = vmatpush.bf16.msra.mxu3 %v7361_v14  ;;  %9634 = vst [vmem:[#allocation10_spill] sm:$0xff] %v7454_v61  ;;  %v5126_v10 = vld [vmem:[%s9546_s2 + $0x360] sm:$0xf]  ;;  %v6594_v11 = vld [vmem:[%s9546_s2 + $0x364] sm:$0xf0]  ;;  %v7494_v20 = vor.u32 %v6578_v4, %v5062_v1 }
  0x29   :  { %907 = vmatpush.bf16.msra.mxu0 %v7379_v23  ;;  %9635 = vst [vmem:[#allocation11_spill] sm:$0xff] %v7466_v2  ;;  %v5190_v13 = vld [vmem:[%s9546_s2 + $0x3e0] sm:$0xf]  ;;  %v6610_v15 = vld [vmem:[%s9546_s2 + $0x3e4] sm:$0xf0]  ;;  %v7496_v22 = vor.u32 %v6594_v11, %v5126_v10 }
  0x2a   :  { %920 = vmatpush.bf16.msra.mxu1 %v7389_v27  ;;  %9636 = vst [vmem:[#allocation12_spill] sm:$0xff] %v7487_v18  ;;  %v6560_v24 = vld [vmem:[%s9546_s2 + $0x254] sm:$0xf0]  ;;  %v5054_v26 = vld [vmem:[%s9546_s2 + $0x2d0] sm:$0xf]  ;;  %v230_v30 = vld [vmem:[%s9544_s0 + $0x8] sm:$0xff]  ;;  %v7508_v31 = vor.u32 %v6610_v15, %v5190_v13 }
  0x2b   :  { %933 = vmatpush.bf16.msra.mxu2 %v7391_v28  ;;  %9637 = vst [vmem:[#allocation13_spill] sm:$0xff] %v7494_v20  ;;  %v6576_v32 = vld [vmem:[%s9546_s2 + $0x2d4] sm:$0xf0]  ;;  %v5118_v36 = vld [vmem:[%s9546_s2 + $0x350] sm:$0xf]  ;;  %v239_v39 = vunpack.c.l.b16 %v230_v30  ;;  %v240_v40 = vunpack.c.h.b16 %v230_v30  ;;  %v7526_v47 = vor.u32 %v6560_v24, %v4990_v19  ;;  %v229_v49 = vld [vmem:[%s9544_s0] sm:$0xff] }
  0x2c   :  { %946 = vmatpush.bf16.msra.mxu3 %v7403_v35  ;;  %9638 = vst [vmem:[#allocation14_spill] sm:$0xff] %v7496_v22  ;;  %v6592_v37 = vld [vmem:[%s9546_s2 + $0x354] sm:$0xf0]  ;;  %v5182_v41 = vld [vmem:[%s9546_s2 + $0x3d0] sm:$0xf]  ;;  %v7537_v54 = vor.u32 %v6576_v32, %v5054_v26  ;;  %v237_v10 = vunpack.c.l.b16 %v229_v49  ;;  %v238_v11 = vunpack.c.h.b16 %v229_v49 }
  0x2d   :  { %908 = vmatpush.bf16.msra.mxu0 %v7424_v43  ;;  %9639 = vst [vmem:[#allocation15_spill] sm:$0xff] %v7508_v31  ;;  %v6608_v42 = vld [vmem:[%s9546_s2 + $0x3d4] sm:$0xf0]  ;;  %v7528_v48 = vpack.c.b16 %v239_v39, %v239_v39  ;;  %v7533_v53 = vpack.c.b16 %v240_v40, %v240_v40  ;;  %v7539_v63 = vor.u32 %v6592_v37, %v5118_v36  ;;  %v4982_v0 = vld [vmem:[%s9546_s2 + $0x240] sm:$0xf] }
  0x2e   :  { %921 = vmatpush.bf16.msra.mxu1 %v7437_v51  ;;  %9640 = vst [vmem:[#allocation16_spill] sm:$0xff] %v7526_v47  ;;  %v6558_v1 = vld [vmem:[%s9546_s2 + $0x244] sm:$0xf0]  ;;  %v5046_v4 = vld [vmem:[%s9546_s2 + $0x2c0] sm:$0xf]  ;;  %v7551_v13 = vor.u32 %v6608_v42, %v5182_v41  ;;  %v7569_v32 = vpack.c.b16 %v237_v10, %v237_v10  ;;  %v7572_v36 = vpack.c.b16 %v238_v11, %v238_v11 }
  0x2f   :  { %934 = vmatpush.bf16.msra.mxu2 %v7439_v52  ;;  %9641 = vst [vmem:[#allocation17_spill] sm:$0xff] %v7537_v54  ;;  %v6574_v15 = vld [vmem:[%s9546_s2 + $0x2c4] sm:$0xf0]  ;;  %v5110_v19 = vld [vmem:[%s9546_s2 + $0x340] sm:$0xf]  ;;  %v7575_v37 = vor.u32 %v6558_v1, %v4982_v0 }
  0x30   :  { %947 = vmatpush.bf16.msra.mxu3 %v7448_v55  ;;  %9642 = vst [vmem:[#allocation18_spill] sm:$0xff] %v7539_v63  ;;  %v6590_v24 = vld [vmem:[%s9546_s2 + $0x344] sm:$0xf0]  ;;  %v5174_v26 = vld [vmem:[%s9546_s2 + $0x3c0] sm:$0xf]  ;;  %v7579_v39 = vor.u32 %v6574_v15, %v5046_v4  ;;  %909 = vmatmul.bf16.vlgmr.msra.gmra.mxu0 %v7569_v32 }
  0x31   :  { %953 = vmatpush.bf16.msrb.mxu0 %v7450_v59  ;;  %9643 = vst [vmem:[#allocation19_spill] sm:$0xff] %v7551_v13  ;;  %v6606_v30 = vld [vmem:[%s9546_s2 + $0x3c4] sm:$0xf0]  ;;  %v7581_v40 = vor.u32 %v6590_v24, %v5110_v19  ;;  %v4974_v41 = vld [vmem:[%s9546_s2 + $0x230] sm:$0xf]  ;;  %922 = vmatmul.bf16.vlgmr.msra.gmra.mxu1 %v7572_v36 }
  0x32   :  { %966 = vmatpush.bf16.msrb.mxu1 %v7452_v60  ;;  %935 = vmatmul.bf16.vlgmr.msra.gmra.mxu2 %v7528_v48  ;;  %9644 = vst [vmem:[#allocation20_spill] sm:$0xff] %v7575_v37  ;;  %v6556_v42 = vld [vmem:[%s9546_s2 + $0x234] sm:$0xf0]  ;;  %v5038_v49 = vld [vmem:[%s9546_s2 + $0x2b0] sm:$0xf]  ;;  %v7593_v0 = vor.u32 %v6606_v30, %v5174_v26 }
  0x33   :  { %979 = vmatpush.bf16.msrb.mxu2 %v7454_v61  ;;  %948 = vmatmul.bf16.vlgmr.msra.gmra.mxu3 %v7533_v53  ;;  %9645 = vst [vmem:[#allocation21_spill] sm:$0xff] %v7579_v39  ;;  %v6572_v1 = vld [vmem:[%s9546_s2 + $0x2b4] sm:$0xf0]  ;;  %v5102_v4 = vld [vmem:[%s9546_s2 + $0x330] sm:$0xf]  ;;  %v7613_v19 = vor.u32 %v6556_v42, %v4974_v41 }
  0x34   :  { %992 = vmatpush.bf16.msrb.mxu3 %v7466_v2  ;;  %9646 = vst [vmem:[#allocation22_spill] sm:$0xff] %v7581_v40  ;;  %v6588_v10 = vld [vmem:[%s9546_s2 + $0x334] sm:$0xf0]  ;;  %v5166_v11 = vld [vmem:[%s9546_s2 + $0x3b0] sm:$0xf]  ;;  %v7617_v24 = vor.u32 %v6572_v1, %v5038_v49 }
  0x35   :  { %954 = vmatpush.bf16.msrb.mxu0 %v7487_v18  ;;  %9647 = vst [vmem:[#allocation23_spill] sm:$0xff] %v7593_v0  ;;  %v6604_v15 = vld [vmem:[%s9546_s2 + $0x3b4] sm:$0xf0]  ;;  %v7619_v26 = vor.u32 %v6588_v10, %v5102_v4  ;;  %v4966_v30 = vld [vmem:[%s9546_s2 + $0x220] sm:$0xf] }
  0x36   :  { %967 = vmatpush.bf16.msrb.mxu1 %v7494_v20  ;;  %9648 = vst [vmem:[#allocation24_spill] sm:$0xff] %v7613_v19  ;;  %v5030_v41 = vld [vmem:[%s9546_s2 + $0x2a0] sm:$0xf]  ;;  %v7631_v42 = vor.u32 %v6604_v15, %v5166_v11  ;;  %v6570_v49 = vld [vmem:[%s9546_s2 + $0x2a4] sm:$0xf0] }
  0x37   :  { %980 = vmatpush.bf16.msrb.mxu2 %v7496_v22  ;;  %9649 = vst [vmem:[#allocation25_spill] sm:$0xff] %v7617_v24  ;;  %v5094_v1 = vld [vmem:[%s9546_s2 + $0x320] sm:$0xf]  ;;  %v6586_v4 = vld [vmem:[%s9546_s2 + $0x324] sm:$0xf0] }
  0x38   :  { %993 = vmatpush.bf16.msrb.mxu3 %v7508_v31  ;;  %9650 = vst [vmem:[#allocation26_spill] sm:$0xff] %v7619_v26  ;;  %v5158_v10 = vld [vmem:[%s9546_s2 + $0x3a0] sm:$0xf]  ;;  %v6602_v11 = vld [vmem:[%s9546_s2 + $0x3a4] sm:$0xf0] }
  0x39   :  { %955 = vmatpush.bf16.msrb.mxu0 %v7526_v47  ;;  %9651 = vst [vmem:[#allocation27_spill] sm:$0xff] %v7631_v42  ;;  %v6531_v47 = vld [vmem:[%s9546_s2 + $0x174] sm:$0xf]  ;;  %v4880_v31 = vld [vmem:[%s9546_s2 + $0x178] sm:$0xf0] }
  0x3a   :  { %968 = vmatpush.bf16.msrb.mxu1 %v7537_v54  ;;  %v232_v54 = vld [vmem:[%s9544_s0 + $0x18] sm:$0xff] }
  0x3b   :  { %981 = vmatpush.bf16.msrb.mxu2 %v7539_v63  ;;  %v243_v22 = vunpack.c.l.b16 %v232_v54  ;;  %v4944_v20 = vld [vmem:[%s9546_s2 + $0x1f8] sm:$0xf0]  ;;  %v244_v2 = vunpack.c.h.b16 %v232_v54  ;;  %v6513_v54 = vld [vmem:[%s9546_s2 + $0xe4] sm:$0xf] }
  0x3c   :  { %994 = vmatpush.bf16.msrb.mxu3 %v7551_v13  ;;  %v6554_v13 = vld [vmem:[%s9546_s2 + $0x224] sm:$0xf0] }
  0x3d   :  { %956 = vmatpush.bf16.msrb.mxu0 %v7575_v37  ;;  %v7649_v15 = vor.u32 %v6554_v13, %v4966_v30  ;;  %v6552_v37 = vld [vmem:[%s9546_s2 + $0x214] sm:$0xf0]  ;;  %v5022_v13 = vld [vmem:[%s9546_s2 + $0x290] sm:$0xf]  ;;  %v7667_v30 = vor.u32 %v6602_v11, %v5158_v10  ;;  %v4950_v11 = vld [vmem:[%s9546_s2 + $0x200] sm:$0xf] }
  0x3e   :  { %969 = vmatpush.bf16.msrb.mxu1 %v7579_v39  ;;  %v4958_v39 = vld [vmem:[%s9546_s2 + $0x210] sm:$0xf]  ;;  %v6600_v10 = vld [vmem:[%s9546_s2 + $0x394] sm:$0xf0] }
  0x3f   :  { %982 = vmatpush.bf16.msrb.mxu2 %v7581_v40  ;;  %9652 = vst [vmem:[#allocation28_spill] sm:$0xff] %v7649_v15  ;;  %v7655_v40 = vor.u32 %v6586_v4, %v5094_v1  ;;  %v6584_v1 = vld [vmem:[%s9546_s2 + $0x314] sm:$0xf0]  ;;  %v5150_v4 = vld [vmem:[%s9546_s2 + $0x390] sm:$0xf] }
  0x40   :  { %995 = vmatpush.bf16.msrb.mxu3 %v7593_v0  ;;  %v7653_v0 = vor.u32 %v6570_v49, %v5030_v41  ;;  %9655 = vst [vmem:[#allocation31_spill] sm:$0xff] %v7667_v30  ;;  %v6568_v41 = vld [vmem:[%s9546_s2 + $0x294] sm:$0xf0]  ;;  %v5086_v49 = vld [vmem:[%s9546_s2 + $0x310] sm:$0xf] }
  0x41   :  { %957 = vmatpush.bf16.msrb.mxu0 %v7613_v19  ;;  %9654 = vst [vmem:[#allocation30_spill] sm:$0xff] %v7655_v40  ;;  %v6566_v19 = vld [vmem:[%s9546_s2 + $0x284] sm:$0xf0]  ;;  %v7701_v63 = vor.u32 %v6568_v41, %v5022_v13  ;;  %v5142_v13 = vld [vmem:[%s9546_s2 + $0x380] sm:$0xf] }
  0x42   :  { %970 = vmatpush.bf16.msrb.mxu1 %v7617_v24  ;;  %9653 = vst [vmem:[#allocation29_spill] sm:$0xff] %v7653_v0  ;;  %v5014_v24 = vld [vmem:[%s9546_s2 + $0x280] sm:$0xf]  ;;  %v6598_v41 = vld [vmem:[%s9546_s2 + $0x384] sm:$0xf0] }
  0x43   :  { %983 = vmatpush.bf16.msrb.mxu2 %v7619_v26  ;;  %v6550_v26 = vld [vmem:[%s9546_s2 + $0x204] sm:$0xf0]  ;;  %9657 = vst [vmem:[#allocation33_spill] sm:$0xff] %v7701_v63  ;;  %v7760_v61 = vor.u32 %v6598_v41, %v5142_v13  ;;  %v7789_v41 = vpack.c.b16 %v243_v22, %v243_v22 }
  0x44   :  { %996 = vmatpush.bf16.msrb.mxu3 %v7631_v42  ;;  %v7688_v42 = vor.u32 %v6552_v37, %v4958_v39  ;;  %v7703_v37 = vor.u32 %v6584_v1, %v5086_v49  ;;  %v5078_v39 = vld [vmem:[%s9546_s2 + $0x300] sm:$0xf]  ;;  %v231_v49 = vld [vmem:[%s9544_s0 + $0x10] sm:$0xff] }
  0x45   :  { %958 = vmatpush.bf16.msrb.mxu0 %v7649_v15  ;;  %v6582_v15 = vld [vmem:[%s9546_s2 + $0x304] sm:$0xf0]  ;;  %v6499_v1 = vld [vmem:[%s9546_s2 + $0x74] sm:$0xf]  ;;  %v241_v18 = vunpack.c.l.b16 %v231_v49  ;;  %9663 = vst [vmem:[#allocation39_spill] sm:$0xff] %v7760_v61 }
  0x46   :  { %9656 = vst [vmem:[#allocation32_spill] sm:$0xff] %v7688_v42  ;;  %971 = vmatpush.bf16.msrb.mxu1 %v7653_v0  ;;  %v7715_v0 = vor.u32 %v6600_v10, %v5150_v4  ;;  %v4752_v4 = vld [vmem:[%s9546_s2 + $0x78] sm:$0xf0]  ;;  %v6515_v10 = vld [vmem:[%s9546_s2 + $0xf4] sm:$0xf] }
  0x47   :  { %984 = vmatpush.bf16.msrb.mxu2 %v7655_v40  ;;  %9658 = vst [vmem:[#allocation34_spill] sm:$0xff] %v7703_v37  ;;  %v4816_v40 = vld [vmem:[%s9546_s2 + $0xf8] sm:$0xf0] }
  0x48   :  { %997 = vmatpush.bf16.msrb.mxu3 %v7667_v30  ;;  %9659 = vst [vmem:[#allocation35_spill] sm:$0xff] %v7715_v0  ;;  %v7736_v30 = vor.u32 %v6550_v26, %v4950_v11  ;;  %v7751_v26 = vor.u32 %v6582_v15, %v5078_v39  ;;  %v6547_v11 = vld [vmem:[%s9546_s2 + $0x1f4] sm:$0xf]  ;;  %v7766_v15 = vor.u32 %v6531_v47, %v4880_v31  ;;  %v6497_v39 = vld [vmem:[%s9546_s2 + $0x64] sm:$0xf] }
  0x49   :  { %959 = vmatpush.bf16.msrb.mxu0 %v7688_v42  ;;  %v7749_v42 = vor.u32 %v6566_v19, %v5014_v24  ;;  %v242_v19 = vunpack.c.h.b16 %v231_v49  ;;  %v7764_v24 = vor.u32 %v6515_v10, %v4816_v40  ;;  %v7778_v13 = vor.u32 %v6547_v11, %v4944_v20  ;;  %v4808_v31 = vld [vmem:[%s9546_s2 + $0xe8] sm:$0xf0]  ;;  %v6529_v47 = vld [vmem:[%s9546_s2 + $0x164] sm:$0xf] }
  0x4a   :  { %9660 = vst [vmem:[#allocation36_spill] sm:$0xff] %v7736_v30  ;;  %972 = vmatpush.bf16.msrb.mxu1 %v7701_v63  ;;  %v7762_v63 = vor.u32 %v6499_v1, %v4752_v4  ;;  %v4872_v40 = vld [vmem:[%s9546_s2 + $0x168] sm:$0xf0]  ;;  %v6545_v20 = vld [vmem:[%s9546_s2 + $0x1e4] sm:$0xf]  ;;  %v7799_v1 = vpack.c.b16 %v241_v18, %v241_v18  ;;  %v7801_v4 = vpack.c.b16 %v244_v2, %v244_v2 }
  0x4b   :  { %985 = vmatpush.bf16.msrb.mxu2 %v7703_v37  ;;  %9661 = vst [vmem:[#allocation37_spill] sm:$0xff] %v7749_v42  ;;  %v4744_v37 = vld [vmem:[%s9546_s2 + $0x68] sm:$0xf0]  ;;  %v7807_v10 = vpack.c.b16 %v242_v19, %v242_v19  ;;  %v7811_v11 = vor.u32 %v6513_v54, %v4808_v31  ;;  %v6495_v2 = vld [vmem:[%s9546_s2 + $0x54] sm:$0xf] }
  0x4c   :  { %9662 = vst [vmem:[#allocation38_spill] sm:$0xff] %v7751_v26  ;;  %998 = vmatpush.bf16.msrb.mxu3 %v7715_v0  ;;  %v4936_v49 = vld [vmem:[%s9546_s2 + $0x1e8] sm:$0xf0]  ;;  %v7805_v22 = vor.u32 %v6497_v39, %v4744_v37  ;;  %v4736_v18 = vld [vmem:[%s9546_s2 + $0x58] sm:$0xf0] }
  0x4d   :  { %9664 = vst [vmem:[#allocation40_spill] sm:$0xff] %v7762_v63  ;;  %960 = vmatpush.bf16.msrb.mxu0 %v7736_v30  ;;  %v6511_v37 = vld [vmem:[%s9546_s2 + $0xd4] sm:$0xf]  ;;  %v7825_v19 = vor.u32 %v6545_v20, %v4936_v49  ;;  %v4800_v39 = vld [vmem:[%s9546_s2 + $0xd8] sm:$0xf0]  ;;  %v7846_v20 = vor.u32 %v6495_v2, %v4736_v18 }
  0x4e   :  { %9665 = vst [vmem:[#allocation41_spill] sm:$0xff] %v7764_v24  ;;  %973 = vmatpush.bf16.msrb.mxu1 %v7749_v42  ;;  %v6527_v54 = vld [vmem:[%s9546_s2 + $0x154] sm:$0xf]  ;;  %v4864_v31 = vld [vmem:[%s9546_s2 + $0x158] sm:$0xf0]  ;;  %v7851_v49 = vor.u32 %v6511_v37, %v4800_v39 }
  0x4f   :  { %9666 = vst [vmem:[#allocation42_spill] sm:$0xff] %v7766_v15  ;;  %986 = vmatpush.bf16.msrb.mxu2 %v7751_v26  ;;  %v7813_v26 = vor.u32 %v6529_v47, %v4872_v40  ;;  %v6543_v47 = vld [vmem:[%s9546_s2 + $0x1d4] sm:$0xf]  ;;  %v4928_v40 = vld [vmem:[%s9546_s2 + $0x1d8] sm:$0xf0] }
  0x50   :  { %9667 = vst [vmem:[#allocation43_spill] sm:$0xff] %v7778_v13  ;;  %999 = vmatpush.bf16.msrb.mxu3 %v7760_v61  ;;  %961 = vmatmul.bf16.vlgmr.msrb.gmra.mxu0 %v7799_v1  ;;  %v6509_v2 = vld [vmem:[%s9546_s2 + $0xc4] sm:$0xf]  ;;  %v7865_v18 = vor.u32 %v6543_v47, %v4928_v40  ;;  %v4792_v37 = vld [vmem:[%s9546_s2 + $0xc8] sm:$0xf0] }
  0x51   :  { %1005 = vmatpush.bf16.msra.mxu0 %v7762_v63  ;;  %9668 = vst [vmem:[#allocation44_spill] sm:$0xff] %v7805_v22  ;;  %974 = vmatmul.bf16.vlgmr.msrb.gmra.mxu1 %v7807_v10  ;;  %v6525_v39 = vld [vmem:[%s9546_s2 + $0x144] sm:$0xf]  ;;  %v4920_v47 = vld [vmem:[%s9546_s2 + $0x1c8] sm:$0xf0] }
  0x52   :  { %1018 = vmatpush.bf16.msra.mxu1 %v7764_v24  ;;  %9669 = vst [vmem:[#allocation45_spill] sm:$0xff] %v7811_v11  ;;  %987 = vmatmul.bf16.vlgmr.msrb.gmra.mxu2 %v7789_v41  ;;  %v4720_v24 = vld [vmem:[%s9546_s2 + $0x38] sm:$0xf0]  ;;  %v6595_v63 = vld [vmem:[%s9546_s2 + $0x374] sm:$0xf] }
  0x53   :  { %1031 = vmatpush.bf16.msra.mxu2 %v7766_v15  ;;  %9670 = vst [vmem:[#allocation46_spill] sm:$0xff] %v7813_v26  ;;  %1000 = vmatmul.bf16.vlgmr.msrb.gmra.mxu3 %v7801_v4  ;;  %v6493_v15 = vld [vmem:[%s9546_s2 + $0x44] sm:$0xf]  ;;  %v5136_v61 = vld [vmem:[%s9546_s2 + $0x378] sm:$0xf0] }
  0x54   :  { %1044 = vmatpush.bf16.msra.mxu3 %v7778_v13  ;;  %9671 = vst [vmem:[#allocation47_spill] sm:$0xff] %v7825_v19  ;;  %v7853_v13 = vor.u32 %v6527_v54, %v4864_v31  ;;  %v4856_v54 = vld [vmem:[%s9546_s2 + $0x148] sm:$0xf0]  ;;  %v6541_v31 = vld [vmem:[%s9546_s2 + $0x1c4] sm:$0xf] }
  0x55   :  { %1006 = vmatpush.bf16.msra.mxu0 %v7805_v22  ;;  %9672 = vst [vmem:[#allocation48_spill] sm:$0xff] %v7846_v20  ;;  %v4728_v22 = vld [vmem:[%s9546_s2 + $0x48] sm:$0xf0] }
  0x56   :  { %1019 = vmatpush.bf16.msra.mxu1 %v7811_v11  ;;  %9673 = vst [vmem:[#allocation49_spill] sm:$0xff] %v7851_v49  ;;  %v7883_v40 = vor.u32 %v6493_v15, %v4728_v22  ;;  %v6491_v11 = vld [vmem:[%s9546_s2 + $0x34] sm:$0xf]  ;;  %v7901_v22 = vor.u32 %v6541_v31, %v4920_v47  ;;  %v4912_v31 = vld [vmem:[%s9546_s2 + $0x1b8] sm:$0xf0] }
  0x57   :  { %1032 = vmatpush.bf16.msra.mxu2 %v7813_v26  ;;  %9674 = vst [vmem:[#allocation50_spill] sm:$0xff] %v7853_v13  ;;  %v7889_v26 = vor.u32 %v6525_v39, %v4856_v54  ;;  %v6507_v15 = vld [vmem:[%s9546_s2 + $0xb4] sm:$0xf]  ;;  %v4848_v39 = vld [vmem:[%s9546_s2 + $0x138] sm:$0xf0]  ;;  %v7919_v47 = vor.u32 %v6491_v11, %v4720_v24 }
  0x58   :  { %1045 = vmatpush.bf16.msra.mxu3 %v7825_v19  ;;  %9675 = vst [vmem:[#allocation51_spill] sm:$0xff] %v7865_v18  ;;  %v7887_v19 = vor.u32 %v6509_v2, %v4792_v37  ;;  %v4784_v2 = vld [vmem:[%s9546_s2 + $0xb8] sm:$0xf0]  ;;  %v6523_v37 = vld [vmem:[%s9546_s2 + $0x134] sm:$0xf] }
  0x59   :  { %1007 = vmatpush.bf16.msra.mxu0 %v7846_v20  ;;  %9676 = vst [vmem:[#allocation52_spill] sm:$0xff] %v7883_v40  ;;  %v6539_v54 = vld [vmem:[%s9546_s2 + $0x1b4] sm:$0xf]  ;;  %v4712_v20 = vld [vmem:[%s9546_s2 + $0x28] sm:$0xf0] }
  0x5a   :  { %1020 = vmatpush.bf16.msra.mxu1 %v7851_v49  ;;  %9677 = vst [vmem:[#allocation53_spill] sm:$0xff] %v7887_v19  ;;  %v6489_v49 = vld [vmem:[%s9546_s2 + $0x24] sm:$0xf]  ;;  %v7937_v11 = vor.u32 %v6539_v54, %v4912_v31  ;;  %v4904_v54 = vld [vmem:[%s9546_s2 + $0x1a8] sm:$0xf0] }
  0x5b   :  { %1033 = vmatpush.bf16.msra.mxu2 %v7853_v13  ;;  %9678 = vst [vmem:[#allocation54_spill] sm:$0xff] %v7889_v26  ;;  %v7925_v13 = vor.u32 %v6523_v37, %v4848_v39  ;;  %v6505_v24 = vld [vmem:[%s9546_s2 + $0xa4] sm:$0xf]  ;;  %v4840_v37 = vld [vmem:[%s9546_s2 + $0x128] sm:$0xf0]  ;;  %v7955_v31 = vor.u32 %v6489_v49, %v4712_v20 }
  0x5c   :  { %1046 = vmatpush.bf16.msra.mxu3 %v7865_v18  ;;  %9679 = vst [vmem:[#allocation55_spill] sm:$0xff] %v7901_v22  ;;  %v7923_v18 = vor.u32 %v6507_v15, %v4784_v2  ;;  %v4776_v15 = vld [vmem:[%s9546_s2 + $0xa8] sm:$0xf0]  ;;  %v6521_v2 = vld [vmem:[%s9546_s2 + $0x124] sm:$0xf] }
  0x5d   :  { %1008 = vmatpush.bf16.msra.mxu0 %v7883_v40  ;;  %9680 = vst [vmem:[#allocation56_spill] sm:$0xff] %v7919_v47  ;;  %v6537_v39 = vld [vmem:[%s9546_s2 + $0x1a4] sm:$0xf]  ;;  %v4704_v40 = vld [vmem:[%s9546_s2 + $0x18] sm:$0xf0] }
  0x5e   :  { %1021 = vmatpush.bf16.msra.mxu1 %v7887_v19  ;;  %9681 = vst [vmem:[#allocation57_spill] sm:$0xff] %v7923_v18  ;;  %v7964_v19 = vor.u32 %v6521_v2, %v4840_v37  ;;  %v6503_v20 = vld [vmem:[%s9546_s2 + $0x94] sm:$0xf]  ;;  %v4768_v49 = vld [vmem:[%s9546_s2 + $0x98] sm:$0xf0] }
  0x5f   :  { %1034 = vmatpush.bf16.msra.mxu2 %v7889_v26  ;;  %9682 = vst [vmem:[#allocation58_spill] sm:$0xff] %v7925_v13  ;;  %v7962_v26 = vor.u32 %v6505_v24, %v4776_v15  ;;  %v6519_v24 = vld [vmem:[%s9546_s2 + $0x114] sm:$0xf]  ;;  %v4832_v15 = vld [vmem:[%s9546_s2 + $0x118] sm:$0xf0] }
  0x60   :  { %1047 = vmatpush.bf16.msra.mxu3 %v7901_v22  ;;  %9683 = vst [vmem:[#allocation59_spill] sm:$0xff] %v7937_v11  ;;  %v6487_v22 = vld [vmem:[%s9546_s2 + $0x14] sm:$0xf]  ;;  %v4896_v37 = vld [vmem:[%s9546_s2 + $0x198] sm:$0xf0] }
  0x61   :  { %1009 = vmatpush.bf16.msra.mxu0 %v7919_v47  ;;  %9684 = vst [vmem:[#allocation60_spill] sm:$0xff] %v7955_v31  ;;  %v6535_v2 = vld [vmem:[%s9546_s2 + $0x194] sm:$0xf]  ;;  %v8003_v47 = vor.u32 %v6519_v24, %v4832_v15  ;;  %v4888_v24 = vld [vmem:[%s9546_s2 + $0x188] sm:$0xf0] }
  0x62   :  { %1022 = vmatpush.bf16.msra.mxu1 %v7923_v18  ;;  %9685 = vst [vmem:[#allocation61_spill] sm:$0xff] %v7962_v26  ;;  %v7976_v18 = vor.u32 %v6537_v39, %v4904_v54  ;;  %v7991_v39 = vor.u32 %v6487_v22, %v4704_v40  ;;  %v6485_v54 = vld [vmem:[%s9546_s2 + $0x4] sm:$0xf]  ;;  %v4760_v22 = vld [vmem:[%s9546_s2 + $0x88] sm:$0xf0] }
  0x63   :  { %1035 = vmatpush.bf16.msra.mxu2 %v7925_v13  ;;  %9686 = vst [vmem:[#allocation62_spill] sm:$0xff] %v7964_v19  ;;  %v8001_v13 = vor.u32 %v6503_v20, %v4768_v49  ;;  %v6501_v40 = vld [vmem:[%s9546_s2 + $0x84] sm:$0xf]  ;;  %v4824_v20 = vld [vmem:[%s9546_s2 + $0x108] sm:$0xf0] }
  0x64   :  { %1048 = vmatpush.bf16.msra.mxu3 %v7937_v11  ;;  %9687 = vst [vmem:[#allocation63_spill] sm:$0xff] %v7976_v18  ;;  %v4696_v11 = vld [vmem:[%s9546_s2 + $0x8] sm:$0xf0]  ;;  %v6533_v49 = vld [vmem:[%s9546_s2 + $0x184] sm:$0xf]  ;;  %v8049_v42 = vor.u32 %v6501_v40, %v4760_v22  ;;  %v8066_v40 = vor.u32 %v6595_v63, %v5136_v61 }
  0x65   :  { %1010 = vmatpush.bf16.msra.mxu0 %v7955_v31  ;;  %9688 = vst [vmem:[#allocation64_spill] sm:$0xff] %v7991_v39  ;;  %v6517_v31 = vld [vmem:[%s9546_s2 + $0x104] sm:$0xf]  ;;  %v6563_v15 = vld [vmem:[%s9546_s2 + $0x274] sm:$0xf]  ;;  %v8060_v30 = vor.u32 %v6533_v49, %v4888_v24 }
  0x66   :  { %1023 = vmatpush.bf16.msra.mxu1 %v7962_v26  ;;  %9689 = vst [vmem:[#allocation65_spill] sm:$0xff] %v8001_v13  ;;  %v8015_v26 = vor.u32 %v6535_v2, %v4896_v37  ;;  %v5008_v2 = vld [vmem:[%s9546_s2 + $0x278] sm:$0xf0]  ;;  %v6579_v37 = vld [vmem:[%s9546_s2 + $0x2f4] sm:$0xf] }
  0x67   :  { %1036 = vmatpush.bf16.msra.mxu2 %v7964_v19  ;;  %v5072_v19 = vld [vmem:[%s9546_s2 + $0x2f8] sm:$0xf0]  ;;  %9690 = vst [vmem:[#allocation66_spill] sm:$0xff] %v8060_v30  ;;  %v8062_v0 = vor.u32 %v6563_v15, %v5008_v2  ;;  %v5000_v22 = vld [vmem:[%s9546_s2 + $0x268] sm:$0xf0] }
  0x68   :  { %1049 = vmatpush.bf16.msra.mxu3 %v7976_v18  ;;  %v8036_v18 = vor.u32 %v6485_v54, %v4696_v11  ;;  %v8051_v11 = vor.u32 %v6517_v31, %v4824_v20  ;;  %v6611_v54 = vld [vmem:[%s9546_s2 + $0x3f4] sm:$0xf]  ;;  %v6561_v31 = vld [vmem:[%s9546_s2 + $0x264] sm:$0xf]  ;;  %v5064_v61 = vld [vmem:[%s9546_s2 + $0x2e8] sm:$0xf0] }
  0x69   :  { %1011 = vmatpush.bf16.msra.mxu0 %v7991_v39  ;;  %v5200_v39 = vld [vmem:[%s9546_s2 + $0x3f8] sm:$0xf0]  ;;  %v6577_v20 = vld [vmem:[%s9546_s2 + $0x2e4] sm:$0xf]  ;;  %v5192_v24 = vld [vmem:[%s9546_s2 + $0x3e8] sm:$0xf0]  ;;  %v8099_v15 = vor.u32 %v6561_v31, %v5000_v22 }
  0x6a   :  { %1024 = vmatpush.bf16.msra.mxu1 %v8001_v13  ;;  %v8064_v13 = vor.u32 %v6579_v37, %v5072_v19  ;;  %v8078_v49 = vor.u32 %v6611_v54, %v5200_v39  ;;  %v6593_v63 = vld [vmem:[%s9546_s2 + $0x364] sm:$0xf]  ;;  %v5128_v19 = vld [vmem:[%s9546_s2 + $0x368] sm:$0xf0]  ;;  %v8103_v2 = vor.u32 %v6577_v20, %v5064_v61  ;;  %v6559_v54 = vld [vmem:[%s9546_s2 + $0x254] sm:$0xf] }
  0x6b   :  { %1037 = vmatpush.bf16.msra.mxu2 %v8003_v47  ;;  %v6609_v39 = vld [vmem:[%s9546_s2 + $0x3e4] sm:$0xf]  ;;  %v8105_v37 = vor.u32 %v6593_v63, %v5128_v19  ;;  %v6575_v31 = vld [vmem:[%s9546_s2 + $0x2d4] sm:$0xf]  ;;  %v5056_v20 = vld [vmem:[%s9546_s2 + $0x2d8] sm:$0xf0] }
  0x6c   :  { %1050 = vmatpush.bf16.msra.mxu3 %v8015_v26  ;;  %9691 = vst [vmem:[#allocation67_spill] sm:$0xff] %v8078_v49  ;;  %v8117_v22 = vor.u32 %v6609_v39, %v5192_v24  ;;  %v6591_v61 = vld [vmem:[%s9546_s2 + $0x354] sm:$0xf]  ;;  %v5120_v63 = vld [vmem:[%s9546_s2 + $0x358] sm:$0xf0] }
  0x6d   :  { %1012 = vmatpush.bf16.msra.mxu0 %v8036_v18  ;;  %9692 = vst [vmem:[#allocation68_spill] sm:$0xff] %v8103_v2  ;;  %v6607_v19 = vld [vmem:[%s9546_s2 + $0x3d4] sm:$0xf]  ;;  %v5184_v39 = vld [vmem:[%s9546_s2 + $0x3d8] sm:$0xf0] }
  0x6e   :  { %1025 = vmatpush.bf16.msra.mxu1 %v8049_v42  ;;  %9693 = vst [vmem:[#allocation69_spill] sm:$0xff] %v8105_v37 }
  0x6f   :  { %1038 = vmatpush.bf16.msra.mxu2 %v8051_v11  ;;  %9694 = vst [vmem:[#allocation70_spill] sm:$0xff] %v8117_v22 }
  0x70   :  { %1051 = vmatpush.bf16.msra.mxu3 %v8060_v30  ;;  %v4992_v30 = vld [vmem:[%s9546_s2 + $0x258] sm:$0xf0]  ;;  %1013 = vmatmul.bf16.vlgmr.msra.gmra.mxu0 %v7569_v32  ;;  %v6557_v32 = vld [vmem:[%s9546_s2 + $0x244] sm:$0xf] }
  0x71   :  { %1057 = vmatpush.bf16.msrb.mxu0 %v8062_v0  ;;  %v8138_v24 = vor.u32 %v6559_v54, %v4992_v30  ;;  %1026 = vmatmul.bf16.vlgmr.msra.gmra.mxu1 %v7572_v36  ;;  %v6573_v36 = vld [vmem:[%s9546_s2 + $0x2c4] sm:$0xf]  ;;  %v8157_v30 = vor.u32 %v6607_v19, %v5184_v39  ;;  %v5048_v54 = vld [vmem:[%s9546_s2 + $0x2c8] sm:$0xf0] }
  0x72   :  { %1070 = vmatpush.bf16.msrb.mxu1 %v8064_v13  ;;  %1039 = vmatmul.bf16.vlgmr.msra.gmra.mxu2 %v7528_v48  ;;  %v8143_v48 = vor.u32 %v6575_v31, %v5056_v20  ;;  %v6589_v31 = vld [vmem:[%s9546_s2 + $0x344] sm:$0xf]  ;;  %v5112_v20 = vld [vmem:[%s9546_s2 + $0x348] sm:$0xf0]  ;;  %v8179_v39 = vor.u32 %v6573_v36, %v5048_v54  ;;  %v5040_v36 = vld [vmem:[%s9546_s2 + $0x2b8] sm:$0xf0] }
  0x73   :  { %1083 = vmatpush.bf16.msrb.mxu2 %v8066_v40  ;;  %1052 = vmatmul.bf16.vlgmr.msra.gmra.mxu3 %v7533_v53  ;;  %9695 = vst [vmem:[#allocation71_spill] sm:$0xff] %v8138_v24  ;;  %v4984_v53 = vld [vmem:[%s9546_s2 + $0x248] sm:$0xf0]  ;;  %v6587_v54 = vld [vmem:[%s9546_s2 + $0x334] sm:$0xf] }
  0x74   :  { %1096 = vmatpush.bf16.msrb.mxu3 %v8078_v49  ;;  %9696 = vst [vmem:[#allocation72_spill] sm:$0xff] %v8143_v48  ;;  %v8145_v49 = vor.u32 %v6591_v61, %v5120_v63  ;;  %v6605_v61 = vld [vmem:[%s9546_s2 + $0x3c4] sm:$0xf]  ;;  %v5176_v63 = vld [vmem:[%s9546_s2 + $0x3c8] sm:$0xf0]  ;;  %v8175_v19 = vor.u32 %v6557_v32, %v4984_v53 }
  0x75   :  { %1058 = vmatpush.bf16.msrb.mxu0 %v8099_v15  ;;  %9698 = vst [vmem:[#allocation74_spill] sm:$0xff] %v8157_v30  ;;  %v6571_v32 = vld [vmem:[%s9546_s2 + $0x2b4] sm:$0xf]  ;;  %v8193_v53 = vor.u32 %v6605_v61, %v5176_v63  ;;  %v5168_v61 = vld [vmem:[%s9546_s2 + $0x3b8] sm:$0xf0] }
  0x76   :  { %1071 = vmatpush.bf16.msrb.mxu1 %v8103_v2  ;;  %9697 = vst [vmem:[#allocation73_spill] sm:$0xff] %v8145_v49  ;;  %v4976_v2 = vld [vmem:[%s9546_s2 + $0x238] sm:$0xf0] }
  0x77   :  { %1084 = vmatpush.bf16.msrb.mxu2 %v8105_v37  ;;  %9699 = vst [vmem:[#allocation75_spill] sm:$0xff] %v8175_v19  ;;  %v6555_v37 = vld [vmem:[%s9546_s2 + $0x234] sm:$0xf] }
  0x78   :  { %1097 = vmatpush.bf16.msrb.mxu3 %v8117_v22  ;;  %9700 = vst [vmem:[#allocation76_spill] sm:$0xff] %v8179_v39  ;;  %v8181_v22 = vor.u32 %v6589_v31, %v5112_v20  ;;  %v5104_v31 = vld [vmem:[%s9546_s2 + $0x338] sm:$0xf0]  ;;  %v6603_v20 = vld [vmem:[%s9546_s2 + $0x3b4] sm:$0xf]  ;;  %v8211_v63 = vor.u32 %v6555_v37, %v4976_v2 }
  0x79   :  { %1059 = vmatpush.bf16.msrb.mxu0 %v8138_v24  ;;  %9702 = vst [vmem:[#allocation78_spill] sm:$0xff] %v8193_v53  ;;  %v4968_v24 = vld [vmem:[%s9546_s2 + $0x228] sm:$0xf0]  ;;  %v6569_v2 = vld [vmem:[%s9546_s2 + $0x2a4] sm:$0xf]  ;;  %v8229_v37 = vor.u32 %v6603_v20, %v5168_v61 }
  0x7a   :  { %1072 = vmatpush.bf16.msrb.mxu1 %v8143_v48  ;;  %9701 = vst [vmem:[#allocation77_spill] sm:$0xff] %v8181_v22  ;;  %v6553_v48 = vld [vmem:[%s9546_s2 + $0x224] sm:$0xf]  ;;  %v5160_v20 = vld [vmem:[%s9546_s2 + $0x3a8] sm:$0xf0] }
  0x7b   :  { %1085 = vmatpush.bf16.msrb.mxu2 %v8145_v49  ;;  %9703 = vst [vmem:[#allocation79_spill] sm:$0xff] %v8211_v63  ;;  %v8217_v49 = vor.u32 %v6587_v54, %v5104_v31  ;;  %v5096_v54 = vld [vmem:[%s9546_s2 + $0x328] sm:$0xf0]  ;;  %v6601_v31 = vld [vmem:[%s9546_s2 + $0x3a4] sm:$0xf]  ;;  %v8247_v61 = vor.u32 %v6553_v48, %v4968_v24 }
  0x7c   :  { %1098 = vmatpush.bf16.msrb.mxu3 %v8157_v30  ;;  %v8215_v30 = vor.u32 %v6571_v32, %v5040_v36  ;;  %9706 = vst [vmem:[#allocation82_spill] sm:$0xff] %v8229_v37  ;;  %v5032_v32 = vld [vmem:[%s9546_s2 + $0x2a8] sm:$0xf0]  ;;  %v6585_v36 = vld [vmem:[%s9546_s2 + $0x324] sm:$0xf]  ;;  %v8265_v48 = vor.u32 %v6601_v31, %v5160_v20 }
  0x7d   :  { %1060 = vmatpush.bf16.msrb.mxu0 %v8175_v19  ;;  %9705 = vst [vmem:[#allocation81_spill] sm:$0xff] %v8217_v49  ;;  %v4960_v19 = vld [vmem:[%s9546_s2 + $0x218] sm:$0xf0]  ;;  %v6567_v24 = vld [vmem:[%s9546_s2 + $0x294] sm:$0xf] }
  0x7e   :  { %1073 = vmatpush.bf16.msrb.mxu1 %v8179_v39  ;;  %9704 = vst [vmem:[#allocation80_spill] sm:$0xff] %v8215_v30  ;;  %v6551_v39 = vld [vmem:[%s9546_s2 + $0x214] sm:$0xf]  ;;  %v5152_v31 = vld [vmem:[%s9546_s2 + $0x398] sm:$0xf0] }
  0x7f   :  { %1086 = vmatpush.bf16.msrb.mxu2 %v8181_v22  ;;  %v8253_v22 = vor.u32 %v6585_v36, %v5096_v54  ;;  %9709 = vst [vmem:[#allocation85_spill] sm:$0xff] %v8265_v48  ;;  %v5088_v36 = vld [vmem:[%s9546_s2 + $0x318] sm:$0xf0]  ;;  %v6599_v54 = vld [vmem:[%s9546_s2 + $0x394] sm:$0xf]  ;;  %v8283_v20 = vor.u32 %v6551_v39, %v4960_v19 }
  0x80   :  { %1099 = vmatpush.bf16.msrb.mxu3 %v8193_v53  ;;  %v8251_v53 = vor.u32 %v6569_v2, %v5032_v32  ;;  %v5024_v2 = vld [vmem:[%s9546_s2 + $0x298] sm:$0xf0]  ;;  %v6583_v32 = vld [vmem:[%s9546_s2 + $0x314] sm:$0xf]  ;;  %v6565_v19 = vld [vmem:[%s9546_s2 + $0x284] sm:$0xf]  ;;  %v8301_v39 = vor.u32 %v6599_v54, %v5152_v31 }
  0x81   :  { %1061 = vmatpush.bf16.msrb.mxu0 %v8211_v63  ;;  %9708 = vst [vmem:[#allocation84_spill] sm:$0xff] %v8253_v22  ;;  %v4952_v63 = vld [vmem:[%s9546_s2 + $0x208] sm:$0xf0] }
  0x82   :  { %1074 = vmatpush.bf16.msrb.mxu1 %v8215_v30  ;;  %9707 = vst [vmem:[#allocation83_spill] sm:$0xff] %v8251_v53  ;;  %v6549_v30 = vld [vmem:[%s9546_s2 + $0x204] sm:$0xf]  ;;  %v5144_v54 = vld [vmem:[%s9546_s2 + $0x388] sm:$0xf0] }
  0x83   :  { %1087 = vmatpush.bf16.msrb.mxu2 %v8217_v49  ;;  %v8289_v49 = vor.u32 %v6583_v32, %v5088_v36  ;;  %v5080_v32 = vld [vmem:[%s9546_s2 + $0x308] sm:$0xf0]  ;;  %v6597_v36 = vld [vmem:[%s9546_s2 + $0x384] sm:$0xf]  ;;  %v8319_v31 = vor.u32 %v6549_v30, %v4952_v63 }
  0x84   :  { %1100 = vmatpush.bf16.msrb.mxu3 %v8229_v37  ;;  %v8287_v37 = vor.u32 %v6567_v24, %v5024_v2  ;;  %v5016_v24 = vld [vmem:[%s9546_s2 + $0x288] sm:$0xf0]  ;;  %v6581_v2 = vld [vmem:[%s9546_s2 + $0x304] sm:$0xf] }
  0x85   :  { %1062 = vmatpush.bf16.msrb.mxu0 %v8247_v61  ;;  %v9731_v63 = vld [vmem:[#allocation31_spill] sm:$0xff] }
  0x86   :  { %1075 = vmatpush.bf16.msrb.mxu1 %v8251_v53  ;;  %v8328_v53 = vor.u32 %v6597_v36, %v5144_v54  ;;  %v9733_v54 = vld [vmem:[#allocation33_spill] sm:$0xff] }
  0x87   :  { %1088 = vmatpush.bf16.msrb.mxu2 %v8253_v22  ;;  %v8325_v22 = vor.u32 %v6581_v2, %v5080_v32  ;;  %v9732_v2 = vld [vmem:[#allocation32_spill] sm:$0xff] }
  0x88   :  { %1101 = vmatpush.bf16.msrb.mxu3 %v8265_v48  ;;  %v8323_v48 = vor.u32 %v6565_v19, %v5016_v24  ;;  %v1117_v19 = vld [vmem:[%s9545_s1 + $0x10] sm:$0xff] }
  0x89   :  { %1063 = vmatpush.bf16.msrb.mxu0 %v8283_v20 }
  0x8a   :  { %1076 = vmatpush.bf16.msrb.mxu1 %v8287_v37 }
  0x8b   :  { %1089 = vmatpush.bf16.msrb.mxu2 %v8289_v49 }
  0x8c   :  { %1102 = vmatpush.bf16.msrb.mxu3 %v8301_v39 }
  0x8d   :  { %1064 = vmatpush.bf16.msrb.mxu0 %v8319_v31 }
  0x8e   :  { %1077 = vmatpush.bf16.msrb.mxu1 %v8323_v48 }
  0x8f   :  { %1090 = vmatpush.bf16.msrb.mxu2 %v8325_v22 }
  0x90   :  { %1103 = vmatpush.bf16.msrb.mxu3 %v8328_v53  ;;  %1065 = vmatmul.bf16.vlgmr.msrb.gmra.mxu0 %v7799_v1  ;;  %v9729_v1 = vld [vmem:[#allocation29_spill] sm:$0xff] }
  0x91   :  { %1147 = vmatpush.bf16.msra.mxu0 %v7151_v3  ;;  %1078 = vmatmul.bf16.vlgmr.msrb.gmra.mxu1 %v7807_v10  ;;  %v1116_v3 = vld [vmem:[%s9545_s1 + $0x8] sm:$0xff]  ;;  %v1118_v10 = vld [vmem:[%s9545_s1 + $0x18] sm:$0xff] }
  0x92   :  { %1160 = vmatpush.bf16.msra.mxu1 %v7162_v7  ;;  %1091 = vmatmul.bf16.vlgmr.msrb.gmra.mxu2 %v7789_v41  ;;  %v1115_v7 = vld [vmem:[%s9545_s1] sm:$0xff]  ;;  %v9728_v41 = vld [vmem:[#allocation28_spill] sm:$0xff]  ;;  %v1129_v32 = vunpack.c.l.b16 %v1118_v10 }
  0x93   :  { %1173 = vmatpush.bf16.msra.mxu2 %v7164_v8  ;;  %1104 = vmatmul.bf16.vlgmr.msrb.gmra.mxu3 %v7801_v4  ;;  %v1125_v8 = vunpack.c.l.b16 %v1116_v3  ;;  %v9730_v4 = vld [vmem:[#allocation30_spill] sm:$0xff] }
  0x94   :  { %1186 = vmatpush.bf16.msra.mxu3 %v7176_v12  ;;  %v1123_v12 = vunpack.c.l.b16 %v1115_v7 }
  0x95   :  { %1148 = vmatpush.bf16.msra.mxu0 %v7189_v16  ;;  %v1126_v16 = vunpack.c.h.b16 %v1116_v3  ;;  %v9734_v3 = vld [vmem:[#allocation34_spill] sm:$0xff] }
  0x96   :  { %1161 = vmatpush.bf16.msra.mxu1 %v7191_v17  ;;  %v1124_v17 = vunpack.c.h.b16 %v1115_v7  ;;  %v1127_v7 = vunpack.c.l.b16 %v1117_v19 }
  0x97   :  { %1174 = vmatpush.bf16.msra.mxu2 %v7203_v21  ;;  %v8373_v21 = vpack.c.b16 %v1125_v8, %v1125_v8  ;;  %v1130_v8 = vunpack.c.h.b16 %v1118_v10  ;;  %v9754_v10 = vld [vmem:[#allocation54_spill] sm:$0xff] }
  0x98   :  { %1187 = vmatpush.bf16.msra.mxu3 %v7214_v25  ;;  %v8377_v25 = vpack.c.b16 %v1123_v12, %v1123_v12 }
  0x99   :  { %1149 = vmatpush.bf16.msra.mxu0 %v7226_v29  ;;  %v8379_v29 = vpack.c.b16 %v1126_v16, %v1126_v16  ;;  %v9735_v16 = vld [vmem:[#allocation35_spill] sm:$0xff] }
  0x9a   :  { %1162 = vmatpush.bf16.msra.mxu1 %v7239_v33  ;;  %v8383_v33 = vpack.c.b16 %v1124_v17, %v1124_v17  ;;  %v1128_v17 = vunpack.c.h.b16 %v1117_v19  ;;  %v9755_v19 = vld [vmem:[#allocation55_spill] sm:$0xff] }
  0x9b   :  { %1175 = vmatpush.bf16.msra.mxu2 %v7241_v34  ;;  %v9710_v34 = vld [vmem:[#allocation10_spill] sm:$0xff] }
  0x9c   :  { %1188 = vmatpush.bf16.msra.mxu3 %v7253_v38  ;;  %v9711_v38 = vld [vmem:[#allocation11_spill] sm:$0xff] }
  0x9d   :  { %1150 = vmatpush.bf16.msra.mxu0 %v7271_v44  ;;  %v9712_v44 = vld [vmem:[#allocation12_spill] sm:$0xff] }
  0x9e   :  { %1163 = vmatpush.bf16.msra.mxu1 %v7275_v45  ;;  %v9713_v45 = vld [vmem:[#allocation13_spill] sm:$0xff] }
  0x9f   :  { %1176 = vmatpush.bf16.msra.mxu2 %v7277_v46  ;;  %v9714_v46 = vld [vmem:[#allocation14_spill] sm:$0xff] }
  0xa0   :  { %1189 = vmatpush.bf16.msra.mxu3 %v7289_v50  ;;  %v9715_v50 = vld [vmem:[#allocation15_spill] sm:$0xff] }
  0xa1   :  { %1151 = vmatpush.bf16.msra.mxu0 %v7307_v56  ;;  %v9716_v56 = vld [vmem:[#allocation16_spill] sm:$0xff] }
  0xa2   :  { %1164 = vmatpush.bf16.msra.mxu1 %v7311_v57  ;;  %v9717_v57 = vld [vmem:[#allocation17_spill] sm:$0xff] }
  0xa3   :  { %1177 = vmatpush.bf16.msra.mxu2 %v7313_v58  ;;  %v9718_v58 = vld [vmem:[#allocation18_spill] sm:$0xff] }
  0xa4   :  { %1190 = vmatpush.bf16.msra.mxu3 %v7325_v62  ;;  %v9719_v62 = vld [vmem:[#allocation19_spill] sm:$0xff] }
  0xa5   :  { %1152 = vmatpush.bf16.msra.mxu0 %v7343_v5  ;;  %v9720_v5 = vld [vmem:[#allocation20_spill] sm:$0xff] }
  0xa6   :  { %1165 = vmatpush.bf16.msra.mxu1 %v7347_v6  ;;  %v9721_v6 = vld [vmem:[#allocation21_spill] sm:$0xff] }
  0xa7   :  { %1178 = vmatpush.bf16.msra.mxu2 %v7349_v9  ;;  %v9722_v9 = vld [vmem:[#allocation22_spill] sm:$0xff] }
  0xa8   :  { %1191 = vmatpush.bf16.msra.mxu3 %v7361_v14  ;;  %v9723_v14 = vld [vmem:[#allocation23_spill] sm:$0xff] }
  0xa9   :  { %1153 = vmatpush.bf16.msra.mxu0 %v7379_v23 }
  0xaa   :  { %1166 = vmatpush.bf16.msra.mxu1 %v7389_v27  ;;  %v9724_v27 = vld [vmem:[#allocation24_spill] sm:$0xff] }
  0xab   :  { %1179 = vmatpush.bf16.msra.mxu2 %v7391_v28 }
  0xac   :  { %1192 = vmatpush.bf16.msra.mxu3 %v7403_v35  ;;  %v9725_v35 = vld [vmem:[#allocation25_spill] sm:$0xff] }
  0xad   :  { %1154 = vmatpush.bf16.msra.mxu0 %v7424_v43  ;;  %v910_v23 = vpop.f32.mrf.mxu0  ;;  %v9726_v43 = vld [vmem:[#allocation26_spill] sm:$0xff] }
  0xae   :  { %1167 = vmatpush.bf16.msra.mxu1 %v7437_v51  ;;  %v923_v28 = vpop.f32.mrf.mxu1 }
  0xaf   :  { %1180 = vmatpush.bf16.msra.mxu2 %v7439_v52  ;;  %v924_v51 = vadd.f32 %v923_v28, %v910_v23  ;;  %v9745_v23 = vld [vmem:[#allocation45_spill] sm:$0xff]  ;;  %v9747_v28 = vld [vmem:[#allocation47_spill] sm:$0xff] }
  0xb0   :  { %1193 = vmatpush.bf16.msra.mxu3 %v7448_v55  ;;  %1155 = vmatmul.bf16.vlgmr.msra.gmra.mxu0 %v8377_v25  ;;  %v9727_v55 = vld [vmem:[#allocation27_spill] sm:$0xff] }
  0xb1   :  { %1199 = vmatpush.bf16.msrb.mxu0 %v7450_v59  ;;  %1168 = vmatmul.bf16.vlgmr.msra.gmra.mxu1 %v8383_v33 }
  0xb2   :  { %1212 = vmatpush.bf16.msrb.mxu1 %v7452_v60  ;;  %1181 = vmatmul.bf16.vlgmr.msra.gmra.mxu2 %v8373_v21 }
  0xb3   :  { %1225 = vmatpush.bf16.msrb.mxu2 %v9710_v34  ;;  %1194 = vmatmul.bf16.vlgmr.msra.gmra.mxu3 %v8379_v29 }
  0xb4   :  { %1238 = vmatpush.bf16.msrb.mxu3 %v9711_v38  ;;  %v9736_v38 = vld [vmem:[#allocation36_spill] sm:$0xff] }
  0xb5   :  { %1200 = vmatpush.bf16.msrb.mxu0 %v9712_v44  ;;  %v936_v52 = vpop.f32.mrf.mxu2  ;;  %v912_v24 = vpop.f32.mrf.mxu0  ;;  %v8423_v44 = vpack.c.b16 %v1129_v32, %v1129_v32  ;;  %v9756_v32 = vld [vmem:[#allocation56_spill] sm:$0xff] }
  0xb6   :  { %1213 = vmatpush.bf16.msrb.mxu1 %v9713_v45  ;;  %v949_v59 = vpop.f32.mrf.mxu3  ;;  %v937_v60 = vadd.f32 %v936_v52, %v924_v51  ;;  %v925_v36 = vpop.f32.mrf.mxu1  ;;  %v9737_v45 = vld [vmem:[#allocation37_spill] sm:$0xff]  ;;  %v9750_v52 = vld [vmem:[#allocation50_spill] sm:$0xff] }
  0xb7   :  { %1226 = vmatpush.bf16.msrb.mxu2 %v9714_v46  ;;  %v9738_v46 = vld [vmem:[#allocation38_spill] sm:$0xff]  ;;  %v9749_v51 = vld [vmem:[#allocation49_spill] sm:$0xff] }
  0xb8   :  { %1239 = vmatpush.bf16.msrb.mxu3 %v9715_v50  ;;  %v950_v30 = vadd.f32 %v949_v59, %v937_v60  ;;  %v8427_v50 = vpack.c.b16 %v1127_v7, %v1127_v7  ;;  %v9751_v60 = vld [vmem:[#allocation51_spill] sm:$0xff] }
  0xb9   :  { %1201 = vmatpush.bf16.msrb.mxu0 %v9716_v56  ;;  %v8429_v56 = vpack.c.b16 %v1130_v8, %v1130_v8  ;;  %v9759_v8 = vld [vmem:[#allocation59_spill] sm:$0xff] }
  0xba   :  { %1214 = vmatpush.bf16.msrb.mxu1 %v9717_v57  ;;  %v9739_v57 = vld [vmem:[#allocation39_spill] sm:$0xff] }
  0xbb   :  { %1227 = vmatpush.bf16.msrb.mxu2 %v9718_v58  ;;  %v9740_v58 = vld [vmem:[#allocation40_spill] sm:$0xff] }
  0xbc   :  { %1240 = vmatpush.bf16.msrb.mxu3 %v9719_v62  ;;  %v8433_v62 = vpack.c.b16 %v1128_v17, %v1128_v17  ;;  %v9762_v17 = vld [vmem:[#allocation62_spill] sm:$0xff] }
  0xbd   :  { %1202 = vmatpush.bf16.msrb.mxu0 %v9720_v5  ;;  %v938_v12 = vpop.f32.mrf.mxu2  ;;  %v9741_v5 = vld [vmem:[#allocation41_spill] sm:$0xff] }
  0xbe   :  { %1215 = vmatpush.bf16.msrb.mxu1 %v9721_v6  ;;  %v951_v34 = vpop.f32.mrf.mxu3  ;;  %v9742_v6 = vld [vmem:[#allocation42_spill] sm:$0xff]  ;;  %v9760_v12 = vld [vmem:[#allocation60_spill] sm:$0xff] }
  0xbf   :  { %1228 = vmatpush.bf16.msrb.mxu2 %v9722_v9  ;;  %v9743_v9 = vld [vmem:[#allocation43_spill] sm:$0xff] }
  0xc0   :  { %1241 = vmatpush.bf16.msrb.mxu3 %v9723_v14  ;;  %v9744_v14 = vld [vmem:[#allocation44_spill] sm:$0xff] }
  0xc1   :  { %1203 = vmatpush.bf16.msrb.mxu0 %v9724_v27  ;;  %v9746_v27 = vld [vmem:[#allocation46_spill] sm:$0xff] }
  0xc2   :  { %1216 = vmatpush.bf16.msrb.mxu1 %v9725_v35  ;;  %v9748_v35 = vld [vmem:[#allocation48_spill] sm:$0xff] }
  0xc3   :  { %1229 = vmatpush.bf16.msrb.mxu2 %v9726_v43 }
  0xc4   :  { %1242 = vmatpush.bf16.msrb.mxu3 %v9727_v55 }
  0xc5   :  { %1204 = vmatpush.bf16.msrb.mxu0 %v9728_v41 }
  0xc6   :  { %1217 = vmatpush.bf16.msrb.mxu1 %v9729_v1  ;;  %v9752_v1 = vld [vmem:[#allocation52_spill] sm:$0xff] }
  0xc7   :  { %1230 = vmatpush.bf16.msrb.mxu2 %v9730_v4  ;;  %v9753_v4 = vld [vmem:[#allocation53_spill] sm:$0xff] }
  0xc8   :  { %1243 = vmatpush.bf16.msrb.mxu3 %v9731_v63 }
  0xc9   :  { %1205 = vmatpush.bf16.msrb.mxu0 %v9732_v2 }
  0xca   :  { %1218 = vmatpush.bf16.msrb.mxu1 %v9733_v54  ;;  %v9757_v54 = vld [vmem:[#allocation57_spill] sm:$0xff] }
  0xcb   :  { %1231 = vmatpush.bf16.msrb.mxu2 %v9734_v3  ;;  %v9758_v3 = vld [vmem:[#allocation58_spill] sm:$0xff] }
  0xcc   :  { %1244 = vmatpush.bf16.msrb.mxu3 %v9735_v16  ;;  %v9761_v16 = vld [vmem:[#allocation61_spill] sm:$0xff] }
  0xcd   :  { %1206 = vmatpush.bf16.msrb.mxu0 %v9736_v38  ;;  %v962_v43 = vpop.f32.mrf.mxu0  ;;  %v9763_v38 = vld [vmem:[#allocation63_spill] sm:$0xff] }
  0xce   :  { %1219 = vmatpush.bf16.msrb.mxu1 %v9737_v45  ;;  %v963_v55 = vadd.f32 %v962_v43, %v950_v30  ;;  %v975_v59 = vpop.f32.mrf.mxu1  ;;  %v9782_v43 = vld [vmem:[#allocation82_spill] sm:$0xff] }
  0xcf   :  { %1232 = vmatpush.bf16.msrb.mxu2 %v9738_v46  ;;  %v9764_v46 = vld [vmem:[#allocation64_spill] sm:$0xff] }
  0xd0   :  { %1245 = vmatpush.bf16.msrb.mxu3 %v9739_v57  ;;  %1207 = vmatmul.bf16.vlgmr.msrb.gmra.mxu0 %v8427_v50  ;;  %v976_v41 = vadd.f32 %v975_v59, %v963_v55  ;;  %v9765_v57 = vld [vmem:[#allocation65_spill] sm:$0xff] }
  0xd1   :  { %1251 = vmatpush.bf16.msra.mxu0 %v9740_v58  ;;  %1220 = vmatmul.bf16.vlgmr.msrb.gmra.mxu1 %v8433_v62  ;;  %v9766_v58 = vld [vmem:[#allocation66_spill] sm:$0xff]  ;;  %v9785_v59 = vld [vmem:[#allocation85_spill] sm:$0xff] }
  0xd2   :  { %1264 = vmatpush.bf16.msra.mxu1 %v9741_v5  ;;  %1233 = vmatmul.bf16.vlgmr.msrb.gmra.mxu2 %v8423_v44  ;;  %v9767_v5 = vld [vmem:[#allocation67_spill] sm:$0xff] }
  0xd3   :  { %1277 = vmatpush.bf16.msra.mxu2 %v9742_v6  ;;  %1246 = vmatmul.bf16.vlgmr.msrb.gmra.mxu3 %v8429_v56  ;;  %v9778_v6 = vld [vmem:[#allocation78_spill] sm:$0xff] }
  0xd4   :  { %1290 = vmatpush.bf16.msra.mxu3 %v9743_v9 }
  0xd5   :  { %1252 = vmatpush.bf16.msra.mxu0 %v9744_v14  ;;  %v988_v63 = vpop.f32.mrf.mxu2  ;;  %v964_v30 = vpop.f32.mrf.mxu0  ;;  %v9779_v14 = vld [vmem:[#allocation79_spill] sm:$0xff] }
  0xd6   :  { %1265 = vmatpush.bf16.msra.mxu1 %v9745_v23  ;;  %v989_v24 = vadd.f32 %v988_v63, %v976_v41  ;;  %v1001_v2 = vpop.f32.mrf.mxu3  ;;  %v977_v7 = vpop.f32.mrf.mxu1  ;;  %v5318_v41 = vld [vmem:[%s9547_s3 + $0xe0] sm:$0xf]  ;;  %v5320_v63 = vld [vmem:[%s9547_s3 + $0xf0] sm:$0xf0] }
  0xd7   :  { %1278 = vmatpush.bf16.msra.mxu2 %v9746_v27  ;;  %v9780_v27 = vld [vmem:[#allocation80_spill] sm:$0xff]  ;;  %v5302_v30 = vld [vmem:[%s9547_s3 + $0xc0] sm:$0xf] }
  0xd8   :  { %1291 = vmatpush.bf16.msra.mxu3 %v9747_v28  ;;  %v8455_v36 = vadd.f32 %v1001_v2, %v989_v24  ;;  %v9781_v28 = vld [vmem:[#allocation81_spill] sm:$0xff]  ;;  %v5304_v7 = vld [vmem:[%s9547_s3 + $0xd0] sm:$0xf0] }
  0xd9   :  { %1253 = vmatpush.bf16.msra.mxu0 %v9748_v35 }
  0xda   :  { %1266 = vmatpush.bf16.msra.mxu1 %v9749_v51  ;;  %v9783_v51 = vld [vmem:[#allocation83_spill] sm:$0xff] }
  0xdb   :  { %1279 = vmatpush.bf16.msra.mxu2 %v9750_v52  ;;  %v9784_v52 = vld [vmem:[#allocation84_spill] sm:$0xff] }
  0xdc   :  { %1292 = vmatpush.bf16.msra.mxu3 %v9751_v60 }
  0xdd   :  { %1254 = vmatpush.bf16.msra.mxu0 %v9752_v1  ;;  %v990_v34 = vpop.f32.mrf.mxu2  ;;  %v6643_v1 = vld [vmem:[%s9547_s3 + $0xec] sm:$0xf0] }
  0xde   :  { %1267 = vmatpush.bf16.msra.mxu1 %v9753_v4  ;;  %v1003_v45 = vpop.f32.mrf.mxu3  ;;  %v6675_v4 = vld [vmem:[%s9547_s3 + $0x1ec] sm:$0xf0]  ;;  %v5319_v24 = vor.u32 %v6643_v1, %v5318_v41  ;;  %v5414_v34 = vld [vmem:[%s9547_s3 + $0x1a0] sm:$0xf] }
  0xdf   :  { %1280 = vmatpush.bf16.msra.mxu2 %v9754_v10  ;;  %v6641_v10 = vld [vmem:[%s9547_s3 + $0xe4] sm:$0xf] }
  0xe0   :  { %1293 = vmatpush.bf16.msra.mxu3 %v9755_v19  ;;  %v5448_v19 = vld [vmem:[%s9547_s3 + $0x1f0] sm:$0xf0]  ;;  %v6633_v45 = vld [vmem:[%s9547_s3 + $0xa4] sm:$0xf] }
  0xe1   :  { %1255 = vmatpush.bf16.msra.mxu0 %v9756_v32  ;;  %v5323_v32 = vor.u32 %v6641_v10, %v5320_v63 }
  0xe2   :  { %1268 = vmatpush.bf16.msra.mxu1 %v9757_v54 }
  0xe3   :  { %1281 = vmatpush.bf16.msra.mxu2 %v9758_v3  ;;  %v6637_v3 = vld [vmem:[%s9547_s3 + $0xc4] sm:$0xf] }
  0xe4   :  { %1294 = vmatpush.bf16.msra.mxu3 %v9759_v8  ;;  %v5432_v8 = vld [vmem:[%s9547_s3 + $0x1d0] sm:$0xf0] }
  0xe5   :  { %1256 = vmatpush.bf16.msra.mxu0 %v9760_v12 }
  0xe6   :  { %1269 = vmatpush.bf16.msra.mxu1 %v9761_v16 }
  0xe7   :  { %1282 = vmatpush.bf16.msra.mxu2 %v9762_v17  ;;  %v5307_v17 = vor.u32 %v6637_v3, %v5304_v7  ;;  %v5222_v7 = vld [vmem:[%s9547_s3 + $0x20] sm:$0xf] }
  0xe8   :  { %1295 = vmatpush.bf16.msra.mxu3 %v9763_v38  ;;  %v6667_v38 = vld [vmem:[%s9547_s3 + $0x1ac] sm:$0xf0] }
  0xe9   :  { %1257 = vmatpush.bf16.msra.mxu0 %v9764_v46  ;;  %v5288_v46 = vld [vmem:[%s9547_s3 + $0xb0] sm:$0xf0] }
  0xea   :  { %1270 = vmatpush.bf16.msra.mxu1 %v9765_v57 }
  0xeb   :  { %1283 = vmatpush.bf16.msra.mxu2 %v8003_v47  ;;  %v9772_v47 = vld [vmem:[#allocation72_spill] sm:$0xff] }
  0xec   :  { %1296 = vmatpush.bf16.msra.mxu3 %v8015_v26  ;;  %v9769_v26 = vld [vmem:[#allocation69_spill] sm:$0xff] }
  0xed   :  { %1258 = vmatpush.bf16.msra.mxu0 %v8036_v18  ;;  %v8485_v18 = vpop.f32.mrf.mxu0 }
  0xee   :  { %1271 = vmatpush.bf16.msra.mxu1 %v8049_v42  ;;  %v9768_v42 = vld [vmem:[#allocation68_spill] sm:$0xff] }
  0xef   :  { %1284 = vmatpush.bf16.msra.mxu2 %v8051_v11  ;;  %v9773_v11 = vld [vmem:[#allocation73_spill] sm:$0xff] }
  0xf0   :  { %1297 = vmatpush.bf16.msra.mxu3 %v9766_v58  ;;  %1259 = vmatmul.bf16.vlgmr.msra.gmra.mxu0 %v8377_v25  ;;  %v9776_v25 = vld [vmem:[#allocation76_spill] sm:$0xff] }
  0xf1   :  { %1303 = vmatpush.bf16.msrb.mxu0 %v8062_v0  ;;  %1272 = vmatmul.bf16.vlgmr.msra.gmra.mxu1 %v8383_v33  ;;  %v9770_v0 = vld [vmem:[#allocation70_spill] sm:$0xff]  ;;  %v5416_v58 = vld [vmem:[%s9547_s3 + $0x1b0] sm:$0xf0] }
  0xf2   :  { %1316 = vmatpush.bf16.msrb.mxu1 %v8064_v13  ;;  %1285 = vmatmul.bf16.vlgmr.msra.gmra.mxu2 %v8373_v21  ;;  %v9771_v13 = vld [vmem:[#allocation71_spill] sm:$0xff]  ;;  %v9774_v21 = vld [vmem:[#allocation74_spill] sm:$0xff] }
  0xf3   :  { %1329 = vmatpush.bf16.msrb.mxu2 %v8066_v40  ;;  %1298 = vmatmul.bf16.vlgmr.msra.gmra.mxu3 %v8379_v29  ;;  %v8489_v40 = vpop.f32.mrf.mxu1  ;;  %v9777_v29 = vld [vmem:[#allocation77_spill] sm:$0xff] }
  0xf4   :  { %1342 = vmatpush.bf16.msrb.mxu3 %v9767_v5  ;;  %v1028_v57 = vadd.f32 %v8489_v40, %v8485_v18  ;;  %v6629_v18 = vld [vmem:[%s9547_s3 + $0x84] sm:$0xf] }
  0xf5   :  { %1304 = vmatpush.bf16.msrb.mxu0 %v8099_v15  ;;  %v9775_v15 = vld [vmem:[#allocation75_spill] sm:$0xff]  ;;  %v8495_v33 = vpop.f32.mrf.mxu2  ;;  %v1016_v23 = vpop.f32.mrf.mxu0  ;;  %v6661_v40 = vld [vmem:[%s9547_s3 + $0x184] sm:$0xf] }
  0xf6   :  { %1317 = vmatpush.bf16.msrb.mxu1 %v9768_v42  ;;  %v8498_v9 = vpop.f32.mrf.mxu3  ;;  %v5415_v42 = vor.u32 %v6667_v38, %v5414_v34  ;;  %v5382_v23 = vld [vmem:[%s9547_s3 + $0x160] sm:$0xf]  ;;  %v5352_v38 = vld [vmem:[%s9547_s3 + $0x130] sm:$0xf0] }
  0xf7   :  { %1330 = vmatpush.bf16.msrb.mxu2 %v9769_v26  ;;  %v5291_v26 = vor.u32 %v6633_v45, %v5288_v46  ;;  %v5206_v46 = vld [vmem:[%s9547_s3] sm:$0xf] }
  0xf8   :  { %1343 = vmatpush.bf16.msrb.mxu3 %v9770_v0  ;;  %v5398_v0 = vld [vmem:[%s9547_s3 + $0x180] sm:$0xf] }
  0xf9   :  { %1305 = vmatpush.bf16.msrb.mxu0 %v9771_v13 }
  0xfa   :  { %1318 = vmatpush.bf16.msrb.mxu1 %v9772_v47  ;;  %v5272_v47 = vld [vmem:[%s9547_s3 + $0x90] sm:$0xf0] }
  0xfb   :  { %1331 = vmatpush.bf16.msrb.mxu2 %v9773_v11  ;;  %v1029_v35 = vpop.f32.mrf.mxu1  ;;  %v1041_v11 = vadd.f32 %v8495_v33, %v1028_v57  ;;  %v6627_v33 = vld [vmem:[%s9547_s3 + $0x6c] sm:$0xf0] }
  0xfc   :  { %1344 = vmatpush.bf16.msrb.mxu3 %v9774_v21  ;;  %v5400_v21 = vld [vmem:[%s9547_s3 + $0x190] sm:$0xf0]  ;;  %v6659_v35 = vld [vmem:[%s9547_s3 + $0x16c] sm:$0xf0] }
  0xfd   :  { %1306 = vmatpush.bf16.msrb.mxu0 %v9775_v15  ;;  %v1042_v55 = vpop.f32.mrf.mxu2  ;;  %v5383_v41 = vor.u32 %v6659_v35, %v5382_v23  ;;  %v6615_v57 = vld [vmem:[%s9547_s3 + $0xc] sm:$0xf0]  ;;  %v6674_v23 = vld [vmem:[%s9547_s3 + $0x1ec] sm:$0xf] }
  0xfe   :  { %1319 = vmatpush.bf16.msrb.mxu1 %v9776_v25  ;;  %v1055_v60 = vpop.f32.mrf.mxu3  ;;  %v6657_v55 = vld [vmem:[%s9547_s3 + $0x164] sm:$0xf] }
  0xff   :  { %1332 = vmatpush.bf16.msrb.mxu2 %v9777_v29 }
 0x100   :  { %1345 = vmatpush.bf16.msrb.mxu3 %v9778_v6  ;;  %v5275_v6 = vor.u32 %v6629_v18, %v5272_v47 }
 0x101   :  { %1307 = vmatpush.bf16.msrb.mxu0 %v9779_v14  ;;  %v5254_v14 = vld [vmem:[%s9547_s3 + $0x60] sm:$0xf] }
 0x102   :  { %1320 = vmatpush.bf16.msrb.mxu1 %v9780_v27  ;;  %v5255_v60 = vor.u32 %v6627_v33, %v5254_v14 }
 0x103   :  { %1333 = vmatpush.bf16.msrb.mxu2 %v9781_v28  ;;  %v5403_v28 = vor.u32 %v6661_v40, %v5400_v21  ;;  %v6644_v40 = vld [vmem:[%s9547_s3 + $0xf4] sm:$0xf0]  ;;  %v5454_v21 = vld [vmem:[%s9547_s3 + $0x1e8] sm:$0xf] }
 0x104   :  { %1346 = vmatpush.bf16.msrb.mxu3 %v9782_v43  ;;  %v6625_v43 = vld [vmem:[%s9547_s3 + $0x64] sm:$0xf] }
 0x105   :  { %1308 = vmatpush.bf16.msrb.mxu0 %v8247_v61  ;;  %v5446_v61 = vld [vmem:[%s9547_s3 + $0x1e0] sm:$0xf] }
 0x106   :  { %1321 = vmatpush.bf16.msrb.mxu1 %v9783_v51  ;;  %v5447_v2 = vor.u32 %v6675_v4, %v5446_v61  ;;  %v5256_v51 = vld [vmem:[%s9547_s3 + $0x70] sm:$0xf0]  ;;  %v5238_v61 = vld [vmem:[%s9547_s3 + $0x40] sm:$0xf] }
 0x107   :  { %1334 = vmatpush.bf16.msrb.mxu2 %v9784_v52  ;;  %v1054_v52 = vadd.f32 %v8498_v9, %v1041_v11  ;;  %v5259_v1 = vor.u32 %v6625_v43, %v5256_v51  ;;  %v6623_v9 = vld [vmem:[%s9547_s3 + $0x4c] sm:$0xf0]  ;;  %v5366_v4 = vld [vmem:[%s9547_s3 + $0x140] sm:$0xf]  ;;  %v5326_v11 = vld [vmem:[%s9547_s3 + $0xe8] sm:$0xf] }
 0x108   :  { %1347 = vmatpush.bf16.msrb.mxu3 %v9785_v59  ;;  %v5384_v59 = vld [vmem:[%s9547_s3 + $0x170] sm:$0xf0]  ;;  %v5327_v35 = vor.u32 %v6644_v40, %v5326_v11  ;;  %v6658_v11 = vld [vmem:[%s9547_s3 + $0x16c] sm:$0xf]  ;;  %v5392_v40 = vld [vmem:[%s9547_s3 + $0x178] sm:$0xf0] }
 0x109   :  { %1309 = vmatpush.bf16.msrb.mxu0 %v8283_v20  ;;  %v6673_v20 = vld [vmem:[%s9547_s3 + $0x1e4] sm:$0xf]  ;;  %v5387_v63 = vor.u32 %v6657_v55, %v5384_v59  ;;  %v5310_v55 = vld [vmem:[%s9547_s3 + $0xc8] sm:$0xf]  ;;  %v6640_v59 = vld [vmem:[%s9547_s3 + $0xd4] sm:$0xf0] }
 0x10a   :  { %1322 = vmatpush.bf16.msrb.mxu1 %v8287_v37  ;;  %v5430_v37 = vld [vmem:[%s9547_s3 + $0x1c0] sm:$0xf]  ;;  %v5451_v54 = vor.u32 %v6673_v20, %v5448_v19  ;;  %v6655_v20 = vld [vmem:[%s9547_s3 + $0x14c] sm:$0xf0]  ;;  %v6621_v19 = vld [vmem:[%s9547_s3 + $0x44] sm:$0xf] }
 0x10b   :  { %1335 = vmatpush.bf16.msrb.mxu2 %v8289_v49  ;;  %v6639_v49 = vld [vmem:[%s9547_s3 + $0xcc] sm:$0xf0] }
 0x10c   :  { %1348 = vmatpush.bf16.msrb.mxu3 %v8301_v39  ;;  %v6671_v39 = vld [vmem:[%s9547_s3 + $0x1cc] sm:$0xf0]  ;;  %v5303_v12 = vor.u32 %v6639_v49, %v5302_v30  ;;  %v6653_v30 = vld [vmem:[%s9547_s3 + $0x144] sm:$0xf]  ;;  %v5368_v49 = vld [vmem:[%s9547_s3 + $0x150] sm:$0xf0] }
 0x10d   :  { %1310 = vmatpush.bf16.msrb.mxu0 %v8319_v31  ;;  %v6669_v31 = vld [vmem:[%s9547_s3 + $0x1c4] sm:$0xf]  ;;  %v5431_v16 = vor.u32 %v6671_v39, %v5430_v37  ;;  %v1066_v25 = vpop.f32.mrf.mxu0  ;;  %v5239_v37 = vor.u32 %v6623_v9, %v5238_v61  ;;  %v5367_v39 = vor.u32 %v6655_v20, %v5366_v4  ;;  %v6638_v61 = vld [vmem:[%s9547_s3 + $0xcc] sm:$0xf]  ;;  %v5312_v9 = vld [vmem:[%s9547_s3 + $0xd8] sm:$0xf0]  ;;  %v5311_v20 = vor.u32 %v6640_v59, %v5310_v55 }
 0x10e   :  { %1323 = vmatpush.bf16.msrb.mxu1 %v8323_v48  ;;  %v6635_v48 = vld [vmem:[%s9547_s3 + $0xac] sm:$0xf0]  ;;  %v1079_v27 = vpop.f32.mrf.mxu1  ;;  %v6670_v4 = vld [vmem:[%s9547_s3 + $0x1cc] sm:$0xf]  ;;  %v5376_v55 = vld [vmem:[%s9547_s3 + $0x158] sm:$0xf0] }
 0x10f   :  { %1336 = vmatpush.bf16.msrb.mxu2 %v8325_v22  ;;  %v5286_v22 = vld [vmem:[%s9547_s3 + $0xa0] sm:$0xf] }
 0x110   :  { %1349 = vmatpush.bf16.msrb.mxu3 %v8328_v53  ;;  %v5435_v53 = vor.u32 %v6669_v31, %v5432_v8  ;;  %1311 = vmatmul.bf16.vlgmr.msrb.gmra.mxu0 %v8427_v50  ;;  %v5287_v5 = vor.u32 %v6635_v48, %v5286_v22  ;;  %v5270_v50 = vld [vmem:[%s9547_s3 + $0x80] sm:$0xf]  ;;  %v6619_v31 = vld [vmem:[%s9547_s3 + $0x2c] sm:$0xf0]  ;;  %v6617_v22 = vld [vmem:[%s9547_s3 + $0x24] sm:$0xf] }
 0x111   :  { %1817 = vmatpush.bf16.msra.mxu0 %v5319_v24  ;;  %1324 = vmatmul.bf16.vlgmr.msrb.gmra.mxu1 %v8433_v62  ;;  %v6663_v62 = vld [vmem:[%s9547_s3 + $0x18c] sm:$0xf0]  ;;  %v5240_v24 = vld [vmem:[%s9547_s3 + $0x50] sm:$0xf0]  ;;  %v5350_v8 = vld [vmem:[%s9547_s3 + $0x120] sm:$0xf]  ;;  %v5223_v45 = vor.u32 %v6619_v31, %v5222_v7 }
 0x112   :  { %1830 = vmatpush.bf16.msra.mxu1 %v5447_v2  ;;  %1337 = vmatmul.bf16.vlgmr.msrb.gmra.mxu2 %v8423_v44  ;;  %v6665_v44 = vld [vmem:[%s9547_s3 + $0x1a4] sm:$0xf]  ;;  %v5399_v29 = vor.u32 %v6663_v62, %v5398_v0  ;;  %v5243_v3 = vor.u32 %v6621_v19, %v5240_v24  ;;  %v5224_v48 = vld [vmem:[%s9547_s3 + $0x30] sm:$0xf0]  ;;  %v5424_v7 = vld [vmem:[%s9547_s3 + $0x1b8] sm:$0xf0] }
 0x113   :  { %1843 = vmatpush.bf16.msra.mxu2 %v5323_v32  ;;  %1350 = vmatmul.bf16.vlgmr.msrb.gmra.mxu3 %v8429_v56  ;;  %v6631_v56 = vld [vmem:[%s9547_s3 + $0x8c] sm:$0xf0]  ;;  %v5419_v13 = vor.u32 %v6665_v44, %v5416_v58  ;;  %v1067_v32 = vadd.f32 %v1066_v25, %v1054_v52  ;;  %v5227_v58 = vor.u32 %v6617_v22, %v5224_v48  ;;  %v5208_v0 = vld [vmem:[%s9547_s3 + $0x10] sm:$0xf0]  ;;  %v6676_v25 = vld [vmem:[%s9547_s3 + $0x1f4] sm:$0xf0] }
 0x114   :  { %1856 = vmatpush.bf16.msra.mxu3 %v5451_v54  ;;  %v5271_v15 = vor.u32 %v6631_v56, %v5270_v50  ;;  %v5336_v62 = vld [vmem:[%s9547_s3 + $0x110] sm:$0xf0]  ;;  %v5455_v51 = vor.u32 %v6676_v25, %v5454_v21  ;;  %v5406_v22 = vld [vmem:[%s9547_s3 + $0x188] sm:$0xf] }
 0x115   :  { %1818 = vmatpush.bf16.msra.mxu0 %v5303_v12  ;;  %v1092_v10 = vpop.f32.mrf.mxu2  ;;  %v1068_v54 = vpop.f32.mrf.mxu0  ;;  %v1080_v34 = vadd.f32 %v1079_v27, %v1067_v32  ;;  %v5456_v27 = vld [vmem:[%s9547_s3 + $0x1f8] sm:$0xf0]  ;;  %v5294_v32 = vld [vmem:[%s9547_s3 + $0xa8] sm:$0xf] }
 0x116   :  { %1831 = vmatpush.bf16.msra.mxu1 %v5431_v16  ;;  %v1105_v2 = vpop.f32.mrf.mxu3  ;;  %v1081_v12 = vpop.f32.mrf.mxu1  ;;  %v5371_v16 = vor.u32 %v6653_v30, %v5368_v49  ;;  %v6636_v30 = vld [vmem:[%s9547_s3 + $0xb4] sm:$0xf0]  ;;  %v6634_v54 = vld [vmem:[%s9547_s3 + $0xac] sm:$0xf] }
 0x117   :  { %1844 = vmatpush.bf16.msra.mxu2 %v5307_v17  ;;  %v6651_v17 = vld [vmem:[%s9547_s3 + $0x12c] sm:$0xf0]  ;;  %v1093_v47 = vadd.f32 %v1092_v10, %v1080_v34  ;;  %v5440_v10 = vld [vmem:[%s9547_s3 + $0x1d8] sm:$0xf0]  ;;  %v5295_v31 = vor.u32 %v6636_v30, %v5294_v32  ;;  %v6664_v34 = vld [vmem:[%s9547_s3 + $0x194] sm:$0xf0] }
 0x118   :  { %1857 = vmatpush.bf16.msra.mxu3 %v5435_v53  ;;  %v6649_v53 = vld [vmem:[%s9547_s3 + $0x124] sm:$0xf]  ;;  %v5351_v44 = vor.u32 %v6651_v17, %v5350_v8  ;;  %v5443_v49 = vor.u32 %v6670_v4, %v5440_v10  ;;  %v6632_v17 = vld [vmem:[%s9547_s3 + $0x94] sm:$0xf0]  ;;  %v5358_v10 = vld [vmem:[%s9547_s3 + $0x128] sm:$0xf] }
 0x119   :  { %1819 = vmatpush.bf16.msra.mxu0 %v5287_v5  ;;  %v5334_v5 = vld [vmem:[%s9547_s3 + $0x100] sm:$0xf]  ;;  %v5355_v56 = vor.u32 %v6649_v53, %v5352_v38  ;;  %v1106_v43 = vadd.f32 %v1105_v2, %v1093_v47  ;;  %v5315_v2 = vor.u32 %v6638_v61, %v5312_v9  ;;  %v6630_v53 = vld [vmem:[%s9547_s3 + $0x8c] sm:$0xf]  ;;  %v5280_v38 = vld [vmem:[%s9547_s3 + $0x98] sm:$0xf0] }
 0x11a   :  { %1832 = vmatpush.bf16.msra.mxu1 %v5415_v42  ;;  %v6647_v42 = vld [vmem:[%s9547_s3 + $0x10c] sm:$0xf0]  ;;  %v5230_v9 = vld [vmem:[%s9547_s3 + $0x28] sm:$0xf]  ;;  %v6620_v4 = vld [vmem:[%s9547_s3 + $0x34] sm:$0xf0] }
 0x11b   :  { %1845 = vmatpush.bf16.msra.mxu2 %v5291_v26  ;;  %v6613_v26 = vld [vmem:[%s9547_s3 + $0x4] sm:$0xf]  ;;  %v5335_v14 = vor.u32 %v6647_v42, %v5334_v5  ;;  %v8768_v19 = vpack.c.bf16 %v1106_v43, %v1106_v43  ;;  %v5283_v5 = vor.u32 %v6630_v53, %v5280_v38  ;;  %v5262_v42 = vld [vmem:[%s9547_s3 + $0x68] sm:$0xf]  ;;  %v6618_v32 = vld [vmem:[%s9547_s3 + $0x2c] sm:$0xf] }
 0x11c   :  { %1858 = vmatpush.bf16.msra.mxu3 %v5419_v13  ;;  %v6645_v13 = vld [vmem:[%s9547_s3 + $0x104] sm:$0xf]  ;;  %v5211_v33 = vor.u32 %v6613_v26, %v5208_v0  ;;  %v6628_v26 = vld [vmem:[%s9547_s3 + $0x74] sm:$0xf0]  ;;  %v5232_v30 = vld [vmem:[%s9547_s3 + $0x38] sm:$0xf0] }
 0x11d   :  { %1820 = vmatpush.bf16.msra.mxu0 %v5271_v15  ;;  %v1094_v50 = vpop.f32.mrf.mxu2  ;;  %v5207_v15 = vor.u32 %v6615_v57, %v5206_v46  ;;  %v5408_v46 = vld [vmem:[%s9547_s3 + $0x198] sm:$0xf0]  ;;  %v5263_v21 = vor.u32 %v6628_v26, %v5262_v42 }
 0x11e   :  { %1833 = vmatpush.bf16.msra.mxu1 %v5399_v29  ;;  %v1107_v18 = vpop.f32.mrf.mxu3  ;;  %v6642_v29 = vld [vmem:[%s9547_s3 + $0xec] sm:$0xf]  ;;  %v5390_v50 = vld [vmem:[%s9547_s3 + $0x168] sm:$0xf]  ;;  %v5344_v53 = vld [vmem:[%s9547_s3 + $0x118] sm:$0xf0] }
 0x11f   :  { %1846 = vmatpush.bf16.msra.mxu2 %v5275_v6  ;;  %v5328_v6 = vld [vmem:[%s9547_s3 + $0xf8] sm:$0xf0] }
 0x120   :  { %1859 = vmatpush.bf16.msra.mxu3 %v5403_v28  ;;  %v5339_v28 = vor.u32 %v6645_v13, %v5336_v62  ;;  %v5331_v52 = vor.u32 %v6642_v29, %v5328_v6  ;;  %v6660_v13 = vld [vmem:[%s9547_s3 + $0x174] sm:$0xf0]  ;;  %v6626_v62 = vld [vmem:[%s9547_s3 + $0x6c] sm:$0xf]  ;;  %v5264_v18 = vld [vmem:[%s9547_s3 + $0x78] sm:$0xf0] }
 0x121   :  { %1821 = vmatpush.bf16.msra.mxu0 %v5255_v60  ;;  %v5438_v60 = vld [vmem:[%s9547_s3 + $0x1c8] sm:$0xf]  ;;  %v5267_v25 = vor.u32 %v6626_v62, %v5264_v18  ;;  %v6624_v6 = vld [vmem:[%s9547_s3 + $0x54] sm:$0xf0] }
 0x122   :  { %1834 = vmatpush.bf16.msra.mxu1 %v5383_v41  ;;  %v5459_v41 = vor.u32 %v6674_v23, %v5456_v27  ;;  %v5246_v29 = vld [vmem:[%s9547_s3 + $0x48] sm:$0xf]  ;;  %v5395_v23 = vor.u32 %v6658_v11, %v5392_v40  ;;  %v6656_v27 = vld [vmem:[%s9547_s3 + $0x154] sm:$0xf0] }
 0x123   :  { %1847 = vmatpush.bf16.msra.mxu2 %v5259_v1  ;;  %v6672_v1 = vld [vmem:[%s9547_s3 + $0x1d4] sm:$0xf0]  ;;  %v5247_v59 = vor.u32 %v6624_v6, %v5246_v29 }
 0x124   :  { %1860 = vmatpush.bf16.msra.mxu3 %v5387_v63  ;;  %v8766_v63 = vpack.c.bf16 %v8455_v36, %v8455_v36  ;;  %v5439_v24 = vor.u32 %v6672_v1, %v5438_v60  ;;  %v5422_v36 = vld [vmem:[%s9547_s3 + $0x1a8] sm:$0xf] }
 0x125   :  { %1822 = vmatpush.bf16.msra.mxu0 %v5239_v37  ;;  %v6668_v37 = vld [vmem:[%s9547_s3 + $0x1b4] sm:$0xf0] }
 0x126   :  { %1835 = vmatpush.bf16.msra.mxu1 %v5367_v39  ;;  %v5296_v39 = vld [vmem:[%s9547_s3 + $0xb8] sm:$0xf0]  ;;  %v5423_v8 = vor.u32 %v6668_v37, %v5422_v36  ;;  %v6650_v36 = vld [vmem:[%s9547_s3 + $0x12c] sm:$0xf]  ;;  %v5231_v37 = vor.u32 %v6620_v4, %v5230_v9 }
 0x127   :  { %1848 = vmatpush.bf16.msra.mxu2 %v5243_v3  ;;  %v6666_v3 = vld [vmem:[%s9547_s3 + $0x1ac] sm:$0xf]  ;;  %v5299_v12 = vor.u32 %v6634_v54, %v5296_v39  ;;  %v5235_v39 = vor.u32 %v6618_v32, %v5232_v30  ;;  %v6684_v32 = vld [vmem:[#allocation3 + $0x38] sm:$0xff] }
 0x128   :  { %1861 = vmatpush.bf16.msra.mxu3 %v5371_v16  ;;  %v5278_v16 = vld [vmem:[%s9547_s3 + $0x88] sm:$0xf]  ;;  %v5427_v48 = vor.u32 %v6666_v3, %v5424_v7  ;;  %v6616_v7 = vld [vmem:[%s9547_s3 + $0x14] sm:$0xf0] }
 0x129   :  { %1823 = vmatpush.bf16.msra.mxu0 %v5223_v45  ;;  %v6662_v45 = vld [vmem:[%s9547_s3 + $0x18c] sm:$0xf]  ;;  %v5279_v57 = vor.u32 %v6632_v17, %v5278_v16  ;;  %v5214_v3 = vld [vmem:[%s9547_s3 + $0x8] sm:$0xf]  ;;  %v6648_v16 = vld [vmem:[%s9547_s3 + $0x114] sm:$0xf0] }
 0x12a   :  { %1836 = vmatpush.bf16.msra.mxu1 %v5351_v44  ;;  %v5411_v0 = vor.u32 %v6662_v45, %v5408_v46  ;;  %v6614_v17 = vld [vmem:[%s9547_s3 + $0xc] sm:$0xf]  ;;  %v5215_v38 = vor.u32 %v6616_v7, %v5214_v3 }
 0x12b   :  { %1849 = vmatpush.bf16.msra.mxu2 %v5227_v58  ;;  %v5407_v58 = vor.u32 %v6664_v34, %v5406_v22  ;;  %v5216_v22 = vld [vmem:[%s9547_s3 + $0x18] sm:$0xf0]  ;;  %v6646_v34 = vld [vmem:[%s9547_s3 + $0x10c] sm:$0xf] }
 0x12c   :  { %1862 = vmatpush.bf16.msra.mxu3 %v5355_v56  ;;  %v5219_v46 = vor.u32 %v6614_v17, %v5216_v22  ;;  %v6682_v22 = vld [vmem:[#allocation3 + $0x28] sm:$0xff] }
 0x12d   :  { %1824 = vmatpush.bf16.msra.mxu0 %v5207_v15  ;;  %v1156_v44 = vpop.f32.mrf.mxu0  ;;  %v5391_v15 = vor.u32 %v6660_v13, %v5390_v50 }
 0x12e   :  { %1837 = vmatpush.bf16.msra.mxu1 %v5335_v14  ;;  %v1169_v56 = vpop.f32.mrf.mxu1  ;;  %v5374_v14 = vld [vmem:[%s9547_s3 + $0x148] sm:$0xf] }
 0x12f   :  { %1850 = vmatpush.bf16.msra.mxu2 %v5211_v33  ;;  %v1170_v47 = vadd.f32 %v1169_v56, %v1156_v44  ;;  %v5375_v1 = vor.u32 %v6656_v27, %v5374_v14 }
 0x130   :  { %1863 = vmatpush.bf16.msra.mxu3 %v5339_v28  ;;  %1825 = vmatmul.bf16.vlgmr.msra.gmra.mxu0 %v8766_v63  ;;  %v6622_v28 = vld [vmem:[%s9547_s3 + $0x4c] sm:$0xf] }
 0x131   :  { %1869 = vmatpush.bf16.msrb.mxu0 %v5327_v35  ;;  %1838 = vmatmul.bf16.vlgmr.msra.gmra.mxu1 %v8768_v19  ;;  %v5248_v35 = vld [vmem:[%s9547_s3 + $0x58] sm:$0xf0] }
 0x132   :  { %1882 = vmatpush.bf16.msrb.mxu1 %v5455_v51  ;;  %1851 = vmatmul.bf16.vlgmr.msra.gmra.mxu2 %v8766_v63  ;;  %v5251_v61 = vor.u32 %v6622_v28, %v5248_v35 }
 0x133   :  { %1895 = vmatpush.bf16.msrb.mxu2 %v5331_v52  ;;  %1864 = vmatmul.bf16.vlgmr.msra.gmra.mxu3 %v8768_v19  ;;  %v6654_v52 = vld [vmem:[%s9547_s3 + $0x14c] sm:$0xf] }
 0x134   :  { %1908 = vmatpush.bf16.msrb.mxu3 %v5459_v41 }
 0x135   :  { %1870 = vmatpush.bf16.msrb.mxu0 %v5311_v20  ;;  %v1182_v33 = vpop.f32.mrf.mxu2  ;;  %v1158_v41 = vpop.f32.mrf.mxu0 }
 0x136   :  { %1883 = vmatpush.bf16.msrb.mxu1 %v5439_v24  ;;  %v1183_v43 = vadd.f32 %v1182_v33, %v1170_v47  ;;  %v1195_v51 = vpop.f32.mrf.mxu3  ;;  %v1171_v20 = vpop.f32.mrf.mxu1  ;;  %v5379_v24 = vor.u32 %v6654_v52, %v5376_v55 }
 0x137   :  { %1896 = vmatpush.bf16.msrb.mxu2 %v5315_v2  ;;  %v6652_v2 = vld [vmem:[%s9547_s3 + $0x134] sm:$0xf0] }
 0x138   :  { %1909 = vmatpush.bf16.msrb.mxu3 %v5443_v49  ;;  %v1196_v60 = vadd.f32 %v1195_v51, %v1183_v43  ;;  %v5360_v49 = vld [vmem:[%s9547_s3 + $0x138] sm:$0xf0]  ;;  %v5359_v54 = vor.u32 %v6652_v2, %v5358_v10 }
 0x139   :  { %1871 = vmatpush.bf16.msrb.mxu0 %v5295_v31  ;;  %v5342_v31 = vld [vmem:[%s9547_s3 + $0x108] sm:$0xf] }
 0x13a   :  { %1884 = vmatpush.bf16.msrb.mxu1 %v5423_v8  ;;  %v5343_v45 = vor.u32 %v6648_v16, %v5342_v31  ;;  %v6692_v31 = vld [vmem:[#allocation3 + $0x78] sm:$0xff] }
 0x13b   :  { %1897 = vmatpush.bf16.msrb.mxu2 %v5299_v12  ;;  %v5363_v12 = vor.u32 %v6650_v36, %v5360_v49 }
 0x13c   :  { %1910 = vmatpush.bf16.msrb.mxu3 %v5427_v48 }
 0x13d   :  { %1872 = vmatpush.bf16.msrb.mxu0 %v5279_v57  ;;  %v1184_v8 = vpop.f32.mrf.mxu2  ;;  %v5347_v57 = vor.u32 %v6646_v34, %v5344_v53  ;;  %v6691_v53 = vld [vmem:[#allocation3 + $0x70] sm:$0xff] }
 0x13e   :  { %1885 = vmatpush.bf16.msrb.mxu1 %v5407_v58  ;;  %v1197_v48 = vpop.f32.mrf.mxu3 }
 0x13f   :  { %1898 = vmatpush.bf16.msrb.mxu2 %v5283_v5 }
 0x140   :  { %1911 = vmatpush.bf16.msrb.mxu3 %v5411_v0 }
 0x141   :  { %1873 = vmatpush.bf16.msrb.mxu0 %v5263_v21 }
 0x142   :  { %1886 = vmatpush.bf16.msrb.mxu1 %v5391_v15 }
 0x143   :  { %1899 = vmatpush.bf16.msrb.mxu2 %v5267_v25 }
 0x144   :  { %1912 = vmatpush.bf16.msrb.mxu3 %v5395_v23 }
 0x145   :  { %1874 = vmatpush.bf16.msrb.mxu0 %v5247_v59 }
 0x146   :  { %1887 = vmatpush.bf16.msrb.mxu1 %v5375_v1 }
 0x147   :  { %1900 = vmatpush.bf16.msrb.mxu2 %v5251_v61  ;;  %v7062_v61 = vmov 8.0  }
 0x148   :  { %1913 = vmatpush.bf16.msrb.mxu3 %v5379_v24  ;;  %6945 = vrcp.f32 %v7062_v61 }
 0x149   :  { %1875 = vmatpush.bf16.msrb.mxu0 %v5231_v37  ;;  %v6683_v37 = vld [vmem:[#allocation3 + $0x30] sm:$0xff] }
 0x14a   :  { %1888 = vmatpush.bf16.msrb.mxu1 %v5359_v54 }
 0x14b   :  { %1901 = vmatpush.bf16.msrb.mxu2 %v5235_v39 }
 0x14c   :  { %1914 = vmatpush.bf16.msrb.mxu3 %v5363_v12 }
 0x14d   :  { %1876 = vmatpush.bf16.msrb.mxu0 %v5215_v38  ;;  %v1208_v44 = vpop.f32.mrf.mxu0 }
 0x14e   :  { %1889 = vmatpush.bf16.msrb.mxu1 %v5343_v45  ;;  %v1209_v58 = vadd.f32 %v1208_v44, %v1196_v60  ;;  %v1221_v5 = vpop.f32.mrf.mxu1  ;;  %v6946_v9 = vpop.eup %6945 }
 0x14f   :  { %1902 = vmatpush.bf16.msrb.mxu2 %v5219_v46  ;;  %v1946_v4 = vmul.f32 8.0, %v6946_v9  ;;  %vm1950_vm0 = vweird.f32 %v6946_v9 }
 0x150   :  { %1915 = vmatpush.bf16.msrb.mxu3 %v5347_v57  ;;  %1877 = vmatmul.bf16.vlgmr.msrb.gmra.mxu0 %v8766_v63  ;;  %v1222_v42 = vadd.f32 %v1221_v5, %v1209_v58  ;;  %v6681_v57 = vld [vmem:[#allocation3 + $0x20] sm:$0xff] }
 0x151   :  { %1890 = vmatmul.bf16.vlgmr.msrb.gmra.mxu1 %v8768_v19  ;;  %v1947_v24 = vsub.f32 1.0, %v1946_v4  ;;  %2269 = vmatpush.bf16.msra.mxu0 %v6684_v32 }
 0x152   :  { %1903 = vmatmul.bf16.vlgmr.msrb.gmra.mxu2 %v8766_v63  ;;  %2282 = vmatpush.bf16.msra.mxu1 %v6692_v31 }
 0x153   :  { %1916 = vmatmul.bf16.vlgmr.msrb.gmra.mxu3 %v8768_v19  ;;  %v1948_v36 = vmul.f32 %v6946_v9, %v1947_v24  ;;  %v6699_v24 = vld [vmem:[#allocation3 + $0xb0] sm:$0xff] }
 0x155   :  { %v1234_v26 = vpop.f32.mrf.mxu2  ;;  %v1210_v13 = vpop.f32.mrf.mxu0  ;;  %2270 = vmatpush.bf16.msra.mxu0 %v6683_v37  ;;  %v1949_v8 = vadd.f32 %v6946_v9, %v1948_v36 }
 0x156   :  { %v1235_v50 = vadd.f32 %v1234_v26, %v1222_v42  ;;  %v1247_v56 = vpop.f32.mrf.mxu3  ;;  %v1223_v62 = vpop.f32.mrf.mxu1  ;;  %2283 = vmatpush.bf16.msra.mxu1 %v6691_v53  ;;  %v6690_v26 = vld [vmem:[#allocation3 + $0x68] sm:$0xff]  ;;  %v6680_v13 = vld [vmem:[#allocation3 + $0x18] sm:$0xff] }
 0x157   :  { %v8926_v38 = vsel %vm1950_vm0, %v6946_v9, %v1949_v8 }
 0x158   :  { %v8922_v0 = vadd.f32 %v1247_v56, %v1235_v50 }
 0x159   :  { %2271 = vmatpush.bf16.msra.mxu0 %v6682_v22 }
 0x15a   :  { %2284 = vmatpush.bf16.msra.mxu1 %v6690_v26  ;;  %v6706_v26 = vld [vmem:[#allocation3 + $0xe8] sm:$0xff] }
 0x15d   :  { %v1236_v18 = vpop.f32.mrf.mxu2  ;;  %2272 = vmatpush.bf16.msra.mxu0 %v6681_v57 }
 0x15e   :  { %v1249_v47 = vpop.f32.mrf.mxu3 }
 0x15f   :  { %v6689_v47 = vld [vmem:[#allocation3 + $0x60] sm:$0xff] }
 0x160   :  { %2285 = vmatpush.bf16.msra.mxu1 %v6689_v47 }
 0x161   :  { %2273 = vmatpush.bf16.msra.mxu0 %v6680_v13 }
 0x16d   :  { %v1260_v11 = vpop.f32.mrf.mxu0 }
 0x16e   :  { %v1273_v40 = vpop.f32.mrf.mxu1 }
 0x16f   :  { %v1274_v21 = vadd.f32 %v1273_v40, %v1260_v11 }
 0x175   :  { %v1286_v15 = vpop.f32.mrf.mxu2  ;;  %v1262_v29 = vpop.f32.mrf.mxu0 }
 0x176   :  { %v1287_v63 = vadd.f32 %v1286_v15, %v1274_v21  ;;  %v1299_v25 = vpop.f32.mrf.mxu3  ;;  %v1275_v6 = vpop.f32.mrf.mxu1  ;;  %v6679_v21 = vld [vmem:[#allocation3 + $0x10] sm:$0xff] }
 0x177   :  { %2274 = vmatpush.bf16.msra.mxu0 %v6679_v21  ;;  %v6678_v6 = vld [vmem:[#allocation3 + $0x8] sm:$0xff]  ;;  %v6705_v21 = vld [vmem:[#allocation3 + $0xe0] sm:$0xff] }
 0x178   :  { %v1300_v19 = vadd.f32 %v1299_v25, %v1287_v63  ;;  %v6688_v25 = vld [vmem:[#allocation3 + $0x58] sm:$0xff] }
 0x179   :  { %2286 = vmatpush.bf16.msra.mxu1 %v6688_v25 }
 0x17b   :  { %2275 = vmatpush.bf16.msra.mxu0 %v6678_v6 }
 0x17d   :  { %v1288_v14 = vpop.f32.mrf.mxu2 }
 0x17e   :  { %v1301_v33 = vpop.f32.mrf.mxu3 }
 0x18d   :  { %v1312_v23 = vpop.f32.mrf.mxu0 }
 0x18e   :  { %v1313_v27 = vadd.f32 %v1312_v23, %v1300_v19  ;;  %v1325_v28 = vpop.f32.mrf.mxu1  ;;  %v6687_v23 = vld [vmem:[#allocation3 + $0x50] sm:$0xff] }
 0x18f   :  { %2287 = vmatpush.bf16.msra.mxu1 %v6687_v23 }
 0x190   :  { %v1326_v35 = vadd.f32 %v1325_v28, %v1313_v27 }
 0x195   :  { %v1338_v43 = vpop.f32.mrf.mxu2  ;;  %v1314_v59 = vpop.f32.mrf.mxu0 }
 0x196   :  { %v1339_v51 = vadd.f32 %v1338_v43, %v1326_v35  ;;  %v1351_v52 = vpop.f32.mrf.mxu3  ;;  %v1327_v60 = vpop.f32.mrf.mxu1 }
 0x197   :  { %v6700_v60 = vld [vmem:[#allocation3 + $0xb8] sm:$0xff] }
 0x198   :  { %v8924_v55 = vadd.f32 %v1351_v52, %v1339_v51  ;;  %v6677_v51 = vld [vmem:[#allocation3] sm:$0xff]  ;;  %2295 = vmatpush.bf16.msra.mxu2 %v6700_v60 }
 0x199   :  { %2276 = vmatpush.bf16.msra.mxu0 %v6677_v51  ;;  %v8961_v60 = vld [vmem:[%s9549_s5] sm:$0xf] }
 0x19c   :  { %2296 = vmatpush.bf16.msra.mxu2 %v6699_v24  ;;  %v6703_v24 = vld [vmem:[#allocation3 + $0xd0] sm:$0xff] }
 0x19d   :  { %v1340_v41 = vpop.f32.mrf.mxu2 }
 0x19e   :  { %v1353_v1 = vpop.f32.mrf.mxu3 }
 0x19f   :  { %v6686_v1 = vld [vmem:[#allocation3 + $0x48] sm:$0xff] }
 0x1a0   :  { %2288 = vmatpush.bf16.msra.mxu1 %v6686_v1  ;;  %v6694_v1 = vld [vmem:[#allocation3 + $0x88] sm:$0xff] }
 0x1ad   :  { %v1826_v10 = vpop.f32.mrf.mxu0 }
 0x1ae   :  { %v1839_v20 = vpop.f32.mrf.mxu1 }
 0x1af   :  { %v1840_v2 = vadd.f32 %v1839_v20, %v1826_v10 }
 0x1b1   :  { %v1921_v30 = vrot.slane %v1840_v2, 4 }
 0x1b3   :  { %v1922_v49 = vadd.f32 %v1921_v30, %v1840_v2  ;;  %v6685_v30 = vld [vmem:[#allocation3 + $0x40] sm:$0xff] }
 0x1b4   :  { %2289 = vmatpush.bf16.msra.mxu1 %v6685_v30 }
 0x1b5   :  { %v1852_v54 = vpop.f32.mrf.mxu2  ;;  %v1923_v39 = vrot.slane %v1922_v49, 2  ;;  %v1828_v7 = vpop.f32.mrf.mxu0 }
 0x1b6   :  { %v1865_v3 = vpop.f32.mrf.mxu3  ;;  %v1841_v16 = vpop.f32.mrf.mxu1 }
 0x1b7   :  { %v1866_v12 = vadd.f32 %v1865_v3, %v1852_v54  ;;  %v1924_v17 = vadd.f32 %v1923_v39, %v1922_v49  ;;  %v6708_v39 = vld [vmem:[#allocation3 + $0xf8] sm:$0xff] }
 0x1b8   :  { %2308 = vmatpush.bf16.msra.mxu3 %v6708_v39 }
 0x1b9   :  { %v1927_v48 = vrot.slane %v1866_v12, 4  ;;  %v1925_v34 = vrot.slane %v1924_v17, 1 }
 0x1bb   :  { %v1928_v45 = vadd.f32 %v1927_v48, %v1866_v12  ;;  %v1926_v46 = vadd.f32 %v1925_v34, %v1924_v17  ;;  %v6707_v48 = vld [vmem:[#allocation3 + $0xf0] sm:$0xff] }
 0x1bc   :  { %2309 = vmatpush.bf16.msra.mxu3 %v6707_v48 }
 0x1bd   :  { %v1929_v44 = vrot.slane %v1928_v45, 2  ;;  %v1854_v58 = vpop.f32.mrf.mxu2  ;;  %v1952_v5 = vmul.f32 %v8926_v38, %v1926_v46  ;;  %v6697_v46 = vld [vmem:[#allocation3 + $0xa0] sm:$0xff] }
 0x1be   :  { %v1867_v42 = vpop.f32.mrf.mxu3 }
 0x1bf   :  { %v1930_v50 = vadd.f32 %v1929_v44, %v1928_v45  ;;  %v8929_v56 = vsub.f32 %v1840_v2, %v1952_v5 }
 0x1c0   :  { %2310 = vmatpush.bf16.msra.mxu3 %v6706_v26 }
 0x1c1   :  { %v1931_v62 = vrot.slane %v1930_v50, 1  ;;  %v1960_v18 = vmul.f32 %v8929_v56, %v8929_v56 }
 0x1c3   :  { %v1932_v11 = vadd.f32 %v1931_v62, %v1930_v50  ;;  %v1964_v40 = vrot.slane %v1960_v18, 4 }
 0x1c4   :  { %2311 = vmatpush.bf16.msra.mxu3 %v6705_v21 }
 0x1c5   :  { %v1953_v15 = vmul.f32 %v8926_v38, %v1932_v11  ;;  %v1965_v63 = vadd.f32 %v1964_v40, %v1960_v18  ;;  %v6696_v18 = vld [vmem:[#allocation3 + $0x98] sm:$0xff] }
 0x1c7   :  { %v8934_v19 = vsub.f32 %v1866_v12, %v1953_v15  ;;  %v1966_v29 = vrot.slane %v1965_v63, 2  ;;  %v6698_v12 = vld [vmem:[#allocation3 + $0xa8] sm:$0xff] }
 0x1c8   :  { %2297 = vmatpush.bf16.msra.mxu2 %v6698_v12 }
 0x1c9   :  { %v1961_v14 = vmul.f32 %v8934_v19, %v8934_v19  ;;  %v1967_v33 = vadd.f32 %v1966_v29, %v1965_v63  ;;  %v8951_v29 = vld [vmem:[%s9548_s4] sm:$0xf] }
 0x1ca   :  { %v2042_v39 = vperm.slane %v8951_v29, 1 }
 0x1cb   :  { %v1970_v27 = vrot.slane %v1961_v14, 4  ;;  %v1968_v35 = vrot.slane %v1967_v33, 1 }
 0x1cc   :  { %2298 = vmatpush.bf16.msra.mxu2 %v6697_v46 }
 0x1cd   :  { %v1878_v28 = vpop.f32.mrf.mxu0  ;;  %v1971_v52 = vadd.f32 %v1970_v27, %v1961_v14  ;;  %v1969_v41 = vadd.f32 %v1968_v35, %v1967_v33  ;;  %v6695_v14 = vld [vmem:[#allocation3 + $0x90] sm:$0xff]  ;;  %v6704_v35 = vld [vmem:[#allocation3 + $0xd8] sm:$0xff] }
 0x1ce   :  { %v1891_v43 = vpop.f32.mrf.mxu1  ;;  %2312 = vmatpush.bf16.msra.mxu3 %v6704_v35 }
 0x1cf   :  { %v1892_v59 = vadd.f32 %v1891_v43, %v1878_v28  ;;  %v1972_v61 = vrot.slane %v1971_v52, 2  ;;  %v1988_v4 = vmul.f32 %v1969_v41, %v8926_v38  ;;  %v2041_v43 = vperm.slane %v8951_v29, 0 }
 0x1d0   :  { %2299 = vmatpush.bf16.msra.mxu2 %v6696_v18 }
 0x1d1   :  { %v1933_v9 = vrot.slane %v1892_v59, 4  ;;  %v1973_v10 = vadd.f32 %v1972_v61, %v1971_v52  ;;  %v1992_v2 = vadd.f32 1e-05, %v1988_v4 }
 0x1d2   :  { %2313 = vmatpush.bf16.msra.mxu3 %v6703_v24 }
 0x1d3   :  { %v1934_v20 = vadd.f32 %v1933_v9, %v1892_v59  ;;  %v1974_v36 = vrot.slane %v1973_v10, 1  ;;  %6947 = vrsqrt.f32 %v1992_v2  ;;  %vm2002_vm2 = vweird.f32 %v1992_v2 }
 0x1d4   :  { %2300 = vmatpush.bf16.msra.mxu2 %v6695_v14 }
 0x1d5   :  { %v1904_v32 = vpop.f32.mrf.mxu2  ;;  %v1935_v49 = vrot.slane %v1934_v20, 2  ;;  %v1880_v54 = vpop.f32.mrf.mxu0  ;;  %v1975_v31 = vadd.f32 %v1974_v36, %v1973_v10 }
 0x1d6   :  { %v1917_v37 = vpop.f32.mrf.mxu3  ;;  %v1893_v7 = vpop.f32.mrf.mxu1 }
 0x1d7   :  { %v1918_v3 = vadd.f32 %v1917_v37, %v1904_v32  ;;  %v1936_v8 = vadd.f32 %v1935_v49, %v1934_v20  ;;  %v1989_v17 = vmul.f32 %v1975_v31, %v8926_v38  ;;  %v2054_v20 = vperm.slane %v8961_v60, 0  ;;  %v6693_v49 = vld [vmem:[#allocation3 + $0x80] sm:$0xff]  ;;  %v6702_v7 = vld [vmem:[#allocation3 + $0xc8] sm:$0xff] }
 0x1d8   :  { %2301 = vmatpush.bf16.msra.mxu2 %v6694_v1  ;;  %2314 = vmatpush.bf16.msra.mxu3 %v6702_v7  ;;  %v6735_v7 = vld [vmem:[#allocation5 + $0xcc] sm:$0xf0] }
 0x1d9   :  { %v1939_v16 = vrot.slane %v1918_v3, 4  ;;  %v1937_v22 = vrot.slane %v1936_v8, 1  ;;  %v8940_v53 = vadd.f32 1e-05, %v1989_v17  ;;  %v6948_v57 = vpop.eup %6947 }
 0x1da   :  { %v1997_v5 = vmul.f32 %v6948_v57, %v1992_v2  ;;  %vm2003_vm1 = vweird.f32 %v6948_v57 }
 0x1db   :  { %v1940_v34 = vadd.f32 %v1939_v16, %v1918_v3  ;;  %v1938_v45 = vadd.f32 %v1937_v22, %v1936_v8  ;;  %6949 = vrsqrt.f32 %v8940_v53  ;;  %vm2004_vm3 = vmor %vm2002_vm2, %vm2003_vm1  ;;  %vm2012_vm5 = vweird.f32 %v8940_v53 }
 0x1dc   :  { %v1998_v62 = vmul.f32 %v6948_v57, %v1997_v5  ;;  %2302 = vmatpush.bf16.msra.mxu2 %v6693_v49  ;;  %v2055_v22 = vperm.slane %v8961_v60, 1  ;;  %v5704_v49 = vld [vmem:[#allocation5 + $0xf0] sm:$0xf0] }
 0x1dd   :  { %v1941_v44 = vrot.slane %v1940_v34, 2  ;;  %v1906_v58 = vpop.f32.mrf.mxu2  ;;  %v1954_v50 = vmul.f32 %v8926_v38, %v1938_v45 }
 0x1de   :  { %v1919_v42 = vpop.f32.mrf.mxu3  ;;  %v1999_v40 = vmul.f32 0.5, %v1998_v62 }
 0x1df   :  { %v1942_v13 = vadd.f32 %v1941_v44, %v1940_v34  ;;  %v8944_v47 = vsub.f32 %v1892_v59, %v1954_v50 }
 0x1e0   :  { %v2000_v6 = vsub.f32 1.5, %v1999_v40 }
 0x1e1   :  { %v1943_v11 = vrot.slane %v1942_v13, 1  ;;  %v1962_v15 = vmul.f32 %v8944_v47, %v8944_v47  ;;  %v6950_v25 = vpop.eup %6949 }
 0x1e2   :  { %v2007_v33 = vmul.f32 %v6950_v25, %v8940_v53  ;;  %v2001_v28 = vmul.f32 %v6948_v57, %v2000_v6  ;;  %vm2013_vm4 = vweird.f32 %v6950_v25  ;;  %v6701_v53 = vld [vmem:[#allocation3 + $0xc0] sm:$0xff]  ;;  %v2043_v6 = vperm.slane %v8951_v29, 2 }
 0x1e3   :  { %v1944_v63 = vadd.f32 %v1943_v11, %v1942_v13  ;;  %v1976_v23 = vrot.slane %v1962_v15, 4  ;;  %vm2014_vm6 = vmor %vm2012_vm5, %vm2013_vm4  ;;  %2315 = vmatpush.bf16.msra.mxu3 %v6701_v53  ;;  %v5696_v53 = vld [vmem:[#allocation5 + $0xd8] sm:$0xf0] }
 0x1e4   :  { %v2008_v51 = vmul.f32 %v6950_v25, %v2007_v33  ;;  %v2005_v41 = vsel %vm2004_vm3, %v6948_v57, %v2001_v28 }
 0x1e5   :  { %v1955_v27 = vmul.f32 %v8926_v38, %v1944_v63  ;;  %v1977_v52 = vadd.f32 %v1976_v23, %v1962_v15  ;;  %v2036_v61 = vmul.f32 %v2005_v41, %v8929_v56 }
 0x1e6   :  { %v2009_v9 = vmul.f32 0.5, %v2008_v51  ;;  %v2044_v51 = vperm.slane %v8951_v29, 3  ;;  %v5710_v29 = vld [vmem:[#allocation5 + $0xe8] sm:$0xf] }
 0x1e7   :  { %v8956_v59 = vsub.f32 %v1918_v3, %v1955_v27  ;;  %v1978_v4 = vrot.slane %v1977_v52, 2  ;;  %v2049_v2 = vmul.f32 %v2041_v43, %v2036_v61  ;;  %v2056_v27 = vperm.slane %v8961_v60, 2 }
 0x1e8   :  { %v2010_v32 = vsub.f32 1.5, %v2009_v9  ;;  %v2057_v9 = vperm.slane %v8961_v60, 3 }
 0x1e9   :  { %v1963_v10 = vmul.f32 %v8956_v59, %v8956_v59  ;;  %v1979_v30 = vadd.f32 %v1978_v4, %v1977_v52  ;;  %v2062_v3 = vadd.f32 %v2054_v20, %v2049_v2  ;;  %v5702_v2 = vld [vmem:[#allocation5 + $0xe0] sm:$0xf] }
 0x1ea   :  { %v2011_v37 = vmul.f32 %v6950_v25, %v2010_v32  ;;  %v6739_v32 = vld [vmem:[#allocation5 + $0xec] sm:$0xf0] }
 0x1eb   :  { %v1982_v36 = vrot.slane %v1963_v10, 4  ;;  %v1980_v56 = vrot.slane %v1979_v30, 1  ;;  %v2066_v17 = vmax.f32 %v2062_v3, 0.0  ;;  %v5686_v3 = vld [vmem:[#allocation5 + $0xc0] sm:$0xf] }
 0x1ec   :  { %v2015_v31 = vsel %vm2014_vm6, %v6950_v25, %v2011_v37  ;;  %v6740_v37 = vld [vmem:[#allocation5 + $0xf4] sm:$0xf0] }
 0x1ed   :  { %v1983_v54 = vadd.f32 %v1982_v36, %v1963_v10  ;;  %v1981_v8 = vadd.f32 %v1980_v56, %v1979_v30  ;;  %v2037_v16 = vmul.f32 %v2015_v31, %v8934_v19  ;;  %v2070_v46 = vpack.c.bf16 %v2066_v17, %v2066_v17  ;;  %v6737_v30 = vld [vmem:[#allocation5 + $0xe4] sm:$0xf]  ;;  %v5694_v17 = vld [vmem:[#allocation5 + $0xc8] sm:$0xf] }
 0x1ee   :  { %v5703_v36 = vor.u32 %v6739_v32, %v5702_v2  ;;  %v5707_v56 = vor.u32 %v6737_v30, %v5704_v49  ;;  %v6733_v31 = vld [vmem:[#allocation5 + $0xc4] sm:$0xf]  ;;  %v5622_v2 = vld [vmem:[#allocation5 + $0x40] sm:$0xf]  ;;  %v6719_v32 = vld [vmem:[#allocation5 + $0x4c] sm:$0xf0] }
 0x1ef   :  { %v1984_v12 = vrot.slane %v1983_v54, 2  ;;  %v1990_v48 = vmul.f32 %v1981_v8, %v8926_v38  ;;  %v2050_v45 = vmul.f32 %v2042_v39, %v2037_v16  ;;  %2277 = vmatmul.bf16.vlgmr.msra.gmra.mxu0 %v2070_v46  ;;  %v5712_v39 = vld [vmem:[#allocation5 + $0xf8] sm:$0xf0]  ;;  %v5688_v8 = vld [vmem:[#allocation5 + $0xd0] sm:$0xf0] }
 0x1f0   :  { %2581 = vmatpush.bf16.msrb.mxu0 %v5703_v36  ;;  %2594 = vmatpush.bf16.msrb.mxu1 %v5707_v56  ;;  %v5691_v16 = vor.u32 %v6733_v31, %v5688_v8  ;;  %v6731_v46 = vld [vmem:[#allocation5 + $0xac] sm:$0xf0]  ;;  %v6717_v30 = vld [vmem:[#allocation5 + $0x44] sm:$0xf]  ;;  %v5623_v36 = vor.u32 %v6719_v32, %v5622_v2  ;;  %v5624_v49 = vld [vmem:[#allocation5 + $0x50] sm:$0xf0] }
 0x1f1   :  { %v1985_v34 = vadd.f32 %v1984_v12, %v1983_v54  ;;  %v1994_v57 = vadd.f32 1e-05, %v1990_v48  ;;  %v2063_v58 = vadd.f32 %v2055_v22, %v2050_v45  ;;  %v5711_v54 = vor.u32 %v6740_v37, %v5710_v29  ;;  %v6736_v22 = vld [vmem:[#allocation5 + $0xd4] sm:$0xf0]  ;;  %v6734_v48 = vld [vmem:[#allocation5 + $0xcc] sm:$0xf] }
 0x1f2   :  { %v5687_v12 = vor.u32 %v6735_v7, %v5686_v3  ;;  %v5670_v45 = vld [vmem:[#allocation5 + $0xa0] sm:$0xf]  ;;  %v5630_v29 = vld [vmem:[#allocation5 + $0x48] sm:$0xf]  ;;  %v6720_v37 = vld [vmem:[#allocation5 + $0x54] sm:$0xf0]  ;;  %v5627_v56 = vor.u32 %v6717_v30, %v5624_v49 }
 0x1f3   :  { %v1986_v44 = vrot.slane %v1985_v34, 1  ;;  %6951 = vrsqrt.f32 %v1994_v57  ;;  %v2067_v42 = vmax.f32 %v2063_v58, 0.0  ;;  %vm2022_vm8 = vweird.f32 %v1994_v57  ;;  %2607 = vmatpush.bf16.msrb.mxu2 %v5711_v54  ;;  %v5672_v58 = vld [vmem:[#allocation5 + $0xb0] sm:$0xf0]  ;;  %v6715_v7 = vld [vmem:[#allocation5 + $0x2c] sm:$0xf0] }
 0x1f4   :  { %2582 = vmatpush.bf16.msrb.mxu0 %v5687_v12  ;;  %2595 = vmatpush.bf16.msrb.mxu1 %v5691_v16  ;;  %v5631_v54 = vor.u32 %v6720_v37, %v5630_v29  ;;  %v6713_v31 = vld [vmem:[#allocation5 + $0x24] sm:$0xf]  ;;  %v5608_v12 = vld [vmem:[#allocation5 + $0x30] sm:$0xf0]  ;;  %v5614_v16 = vld [vmem:[#allocation5 + $0x28] sm:$0xf] }
 0x1f5   :  { %v1987_v5 = vadd.f32 %v1986_v44, %v1985_v34  ;;  %v2071_v26 = vpack.c.bf16 %v2067_v42, %v2067_v42  ;;  %v5695_v34 = vor.u32 %v6736_v22, %v5694_v17  ;;  %v6729_v44 = vld [vmem:[#allocation5 + $0xa4] sm:$0xf]  ;;  %v5671_v42 = vor.u32 %v6731_v46, %v5670_v45  ;;  %v6716_v17 = vld [vmem:[#allocation5 + $0x34] sm:$0xf0]  ;;  %v5616_v45 = vld [vmem:[#allocation5 + $0x38] sm:$0xf0] }
 0x1f6   :  { %v6762_v2 = vld [vmem:[#allocation7 + $0xa8] sm:$0xff]  ;;  %v6744_v30 = vld [vmem:[#allocation7 + $0x18] sm:$0xff]  ;;  %v6761_v49 = vld [vmem:[#allocation7 + $0xa0] sm:$0xff] }
 0x1f7   :  { %v1991_v19 = vmul.f32 %v1987_v5, %v8926_v38  ;;  %2290 = vmatmul.bf16.vlgmr.msra.gmra.mxu1 %v2071_v26  ;;  %v5678_v5 = vld [vmem:[#allocation5 + $0xa8] sm:$0xf]  ;;  %v6730_v26 = vld [vmem:[#allocation5 + $0xac] sm:$0xf]  ;;  %2608 = vmatpush.bf16.msrb.mxu2 %v5695_v34  ;;  %v5615_v34 = vor.u32 %v6716_v17, %v5614_v16  ;;  %v6769_v29 = vld [vmem:[#allocation7 + $0xe0] sm:$0xff] }
 0x1f8   :  { %2583 = vmatpush.bf16.msrb.mxu0 %v5671_v42  ;;  %v6770_v32 = vld [vmem:[#allocation7 + $0xe8] sm:$0xff]  ;;  %v6743_v37 = vld [vmem:[#allocation7 + $0x10] sm:$0xff]  ;;  %v6741_v17 = vld [vmem:[#allocation7] sm:$0xff] }
 0x1f9   :  { %v1995_v50 = vadd.f32 1e-05, %v1991_v19  ;;  %v6952_v13 = vpop.eup %6951  ;;  %v6732_v19 = vld [vmem:[#allocation5 + $0xb4] sm:$0xf0] }
 0x1fa   :  { %v2017_v62 = vmul.f32 %v6952_v13, %v1994_v57  ;;  %vm2023_vm7 = vweird.f32 %v6952_v13  ;;  %v5699_v57 = vor.u32 %v6734_v48, %v5696_v53  ;;  %v5611_v48 = vor.u32 %v6713_v31, %v5608_v12  ;;  %v6714_v53 = vld [vmem:[#allocation5 + $0x2c] sm:$0xf]  ;;  %v6759_v31 = vld [vmem:[#allocation7 + $0x90] sm:$0xff] }
 0x1fb   :  { %6953 = vrsqrt.f32 %v1995_v50  ;;  %vm2024_vm9 = vmor %vm2022_vm8, %vm2023_vm7  ;;  %vm2032_vm11 = vweird.f32 %v1995_v50  ;;  %v5619_v46 = vor.u32 %v6714_v53, %v5616_v45  ;;  %v6803_v45 = vld [vmem:[%s9547_s3 + $0xec] sm:$0xf0] }
 0x1fc   :  { %v2018_v18 = vmul.f32 %v6952_v13, %v2017_v62  ;;  %v5679_v62 = vor.u32 %v6732_v19, %v5678_v5  ;;  %v6709_v5 = vld [vmem:[#allocation5 + $0x4] sm:$0xf]  ;;  %v5592_v19 = vld [vmem:[#allocation5 + $0x10] sm:$0xf0] }
 0x1fe   :  { %v2019_v11 = vmul.f32 0.5, %v2018_v18  ;;  %v5654_v18 = vld [vmem:[#allocation5 + $0x80] sm:$0xf]  ;;  %2609 = vmatpush.bf16.msrb.mxu2 %v5679_v62 }
 0x200   :  { %v2020_v21 = vsub.f32 1.5, %v2019_v11  ;;  %v6727_v11 = vld [vmem:[#allocation5 + $0x8c] sm:$0xf0] }
 0x201   :  { %v6954_v40 = vpop.eup %6953 }
 0x202   :  { %v2027_v15 = vmul.f32 %v6954_v40, %v1995_v50  ;;  %v2021_v63 = vmul.f32 %v6952_v13, %v2020_v21  ;;  %vm2033_vm10 = vweird.f32 %v6954_v40  ;;  %v5680_v50 = vld [vmem:[#allocation5 + $0xb8] sm:$0xf0] }
 0x203   :  { %vm2034_vm12 = vmor %vm2032_vm11, %vm2033_vm10  ;;  %v5683_v21 = vor.u32 %v6730_v26, %v5680_v50  ;;  %v5598_v26 = vld [vmem:[#allocation5 + $0x8] sm:$0xf]  ;;  %v6712_v50 = vld [vmem:[#allocation5 + $0x14] sm:$0xf0] }
 0x204   :  { %v2028_v25 = vmul.f32 %v6954_v40, %v2027_v15  ;;  %v2025_v14 = vsel %vm2024_vm9, %v6952_v13, %v2021_v63  ;;  %v5675_v13 = vor.u32 %v6729_v44, %v5672_v58  ;;  %v5656_v15 = vld [vmem:[#allocation5 + $0x90] sm:$0xf0]  ;;  %v5662_v63 = vld [vmem:[#allocation5 + $0x88] sm:$0xf]  ;;  %v5590_v44 = vld [vmem:[#allocation5] sm:$0xf]  ;;  %v5599_v62 = vor.u32 %v6712_v50, %v5598_v26 }
 0x205   :  { %v2038_v23 = vmul.f32 %v2025_v14, %v8944_v47  ;;  %v5664_v14 = vld [vmem:[#allocation5 + $0x98] sm:$0xf0]  ;;  %v6711_v58 = vld [vmem:[#allocation5 + $0xc] sm:$0xf0]  ;;  %v5942_v50 = vld [vmem:[%s9547_s3 + $0xc0] sm:$0xf] }
 0x206   :  { %v2029_v33 = vmul.f32 0.5, %v2028_v25  ;;  %v6728_v25 = vld [vmem:[#allocation5 + $0x94] sm:$0xf0]  ;;  %2596 = vmatpush.bf16.msrb.mxu1 %v5675_v13  ;;  %v5591_v42 = vor.u32 %v6711_v58, %v5590_v44  ;;  %v5595_v13 = vor.u32 %v6709_v5, %v5592_v19  ;;  %v6758_v5 = vld [vmem:[#allocation7 + $0x88] sm:$0xff] }
 0x207   :  { %v2051_v35 = vmul.f32 %v2043_v6, %v2038_v23  ;;  %v6726_v6 = vld [vmem:[#allocation5 + $0x8c] sm:$0xf] }
 0x208   :  { %v2030_v28 = vsub.f32 1.5, %v2029_v33  ;;  %v5655_v33 = vor.u32 %v6727_v11, %v5654_v18  ;;  %v6710_v18 = vld [vmem:[#allocation5 + $0xc] sm:$0xf]  ;;  %v5600_v11 = vld [vmem:[#allocation5 + $0x18] sm:$0xf0] }
 0x209   :  { %v2064_v52 = vadd.f32 %v2056_v27, %v2051_v35  ;;  %v5663_v27 = vor.u32 %v6728_v25, %v5662_v63  ;;  %v6723_v35 = vld [vmem:[#allocation5 + $0x6c] sm:$0xf0] }
 0x20a   :  { %v2031_v43 = vmul.f32 %v6954_v40, %v2030_v28  ;;  %v5638_v28 = vld [vmem:[#allocation5 + $0x60] sm:$0xf]  ;;  %2584 = vmatpush.bf16.msrb.mxu0 %v5655_v33 }
 0x20b   :  { %v2068_v61 = vmax.f32 %v2064_v52, 0.0  ;;  %v5640_v52 = vld [vmem:[#allocation5 + $0x70] sm:$0xf0]  ;;  %2610 = vmatpush.bf16.msrb.mxu2 %v5663_v27 }
 0x20c   :  { %v2035_v41 = vsel %vm2034_vm12, %v6954_v40, %v2031_v43  ;;  %v6725_v40 = vld [vmem:[#allocation5 + $0x84] sm:$0xf] }
 0x20d   :  { %v2039_v1 = vmul.f32 %v2035_v41, %v8956_v59  ;;  %v2072_v10 = vpack.c.bf16 %v2068_v61, %v2068_v61  ;;  %v6738_v59 = vld [vmem:[#allocation5 + $0xec] sm:$0xf]  ;;  %v5659_v23 = vor.u32 %v6725_v40, %v5656_v15  ;;  %v6721_v43 = vld [vmem:[#allocation5 + $0x64] sm:$0xf]  ;;  %v5646_v41 = vld [vmem:[#allocation5 + $0x68] sm:$0xf]  ;;  %v5603_v40 = vor.u32 %v6710_v18, %v5600_v11 }
 0x20e   :  { %v5715_v60 = vor.u32 %v6738_v59, %v5712_v39  ;;  %v6722_v61 = vld [vmem:[#allocation5 + $0x6c] sm:$0xf]  ;;  %v5632_v39 = vld [vmem:[#allocation5 + $0x58] sm:$0xf0]  ;;  %v6941_v15 = vld [vmem:[%s9551_s7] ss:$0 sm:$0xff] }
 0x20f   :  { %v2052_v4 = vmul.f32 %v2044_v51, %v2039_v1  ;;  %2303 = vmatmul.bf16.vlgmr.msra.gmra.mxu2 %v2072_v10  ;;  %v5667_v51 = vor.u32 %v6726_v6, %v5664_v14  ;;  %v6724_v1 = vld [vmem:[#allocation5 + $0x74] sm:$0xf0]  ;;  %2597 = vmatpush.bf16.msrb.mxu1 %v5659_v23  ;;  %v5643_v10 = vor.u32 %v6721_v43, %v5640_v52  ;;  %v6718_v59 = vld [vmem:[#allocation5 + $0x4c] sm:$0xf]  ;;  %v6747_v52 = vld [vmem:[#allocation7 + $0x30] sm:$0xff] }
 0x210   :  { %2620 = vmatpush.bf16.msrb.mxu3 %v5715_v60  ;;  %v5635_v3 = vor.u32 %v6718_v59, %v5632_v39  ;;  %v5606_v60 = vld [vmem:[#allocation5 + $0x20] sm:$0xf]  ;;  %v6748_v43 = vld [vmem:[#allocation7 + $0x38] sm:$0xff]  ;;  %v6742_v39 = vld [vmem:[#allocation7 + $0x8] sm:$0xff] }
 0x211   :  { %v2065_v47 = vadd.f32 %v2057_v9, %v2052_v4  ;;  %v5648_v9 = vld [vmem:[#allocation5 + $0x78] sm:$0xf0]  ;;  %v5639_v4 = vor.u32 %v6723_v35, %v5638_v28  ;;  %v5607_v8 = vor.u32 %v6715_v7, %v5606_v60 }
 0x212   :  { %v6768_v59 = vld [vmem:[#allocation7 + $0xd8] sm:$0xff] }
 0x213   :  { %v2069_v20 = vmax.f32 %v2065_v47, 0.0  ;;  %v5647_v47 = vor.u32 %v6724_v1, %v5646_v41  ;;  %2585 = vmatpush.bf16.msrb.mxu0 %v5639_v4  ;;  %2598 = vmatpush.bf16.msrb.mxu1 %v5643_v10  ;;  %v6755_v41 = vld [vmem:[#allocation7 + $0x70] sm:$0xff]  ;;  %v6764_v1 = vld [vmem:[#allocation7 + $0xb8] sm:$0xff]  ;;  %v6754_v4 = vld [vmem:[#allocation7 + $0x68] sm:$0xff] }
 0x214   :  { %2621 = vmatpush.bf16.msrb.mxu3 %v5699_v57  ;;  %v6763_v10 = vld [vmem:[#allocation7 + $0xb0] sm:$0xff] }
 0x215   :  { %v2073_v24 = vpack.c.bf16 %v2069_v20, %v2069_v20  ;;  %v5651_v20 = vor.u32 %v6722_v61, %v5648_v9  ;;  %2611 = vmatpush.bf16.msrb.mxu2 %v5647_v47  ;;  %v6772_v61 = vld [vmem:[#allocation7 + $0xf8] sm:$0xff]  ;;  %v6746_v9 = vld [vmem:[#allocation7 + $0x28] sm:$0xff]  ;;  %v6771_v47 = vld [vmem:[#allocation7 + $0xf0] sm:$0xff] }
 0x217   :  { %2316 = vmatmul.bf16.vlgmr.msra.gmra.mxu3 %v2073_v24  ;;  %2586 = vmatpush.bf16.msrb.mxu0 %v5623_v36  ;;  %v6752_v36 = vld [vmem:[#allocation7 + $0x58] sm:$0xff] }
 0x218   :  { %2622 = vmatpush.bf16.msrb.mxu3 %v5683_v21  ;;  %2599 = vmatpush.bf16.msrb.mxu1 %v5627_v56  ;;  %v6751_v56 = vld [vmem:[#allocation7 + $0x50] sm:$0xff] }
 0x219   :  { %2612 = vmatpush.bf16.msrb.mxu2 %v5631_v54  ;;  %v6760_v54 = vld [vmem:[#allocation7 + $0x98] sm:$0xff] }
 0x21b   :  { %2587 = vmatpush.bf16.msrb.mxu0 %v5607_v8  ;;  %v6767_v8 = vld [vmem:[#allocation7 + $0xd0] sm:$0xff] }
 0x21c   :  { %2623 = vmatpush.bf16.msrb.mxu3 %v5667_v51  ;;  %2600 = vmatpush.bf16.msrb.mxu1 %v5611_v48  ;;  %v6756_v51 = vld [vmem:[#allocation7 + $0x78] sm:$0xff]  ;;  %v5958_v48 = vld [vmem:[%s9547_s3 + $0xe0] sm:$0xf] }
 0x21d   :  { %2613 = vmatpush.bf16.msrb.mxu2 %v5615_v34  ;;  %v5959_v44 = vor.u32 %v6803_v45, %v5958_v48  ;;  %v6791_v48 = vld [vmem:[%s9547_s3 + $0x8c] sm:$0xf0] }
 0x21f   :  { %2588 = vmatpush.bf16.msrb.mxu0 %v5591_v42  ;;  %v6766_v42 = vld [vmem:[#allocation7 + $0xc8] sm:$0xff] }
 0x220   :  { %2624 = vmatpush.bf16.msrb.mxu3 %v5651_v20  ;;  %2601 = vmatpush.bf16.msrb.mxu1 %v5595_v13  ;;  %v6745_v20 = vld [vmem:[#allocation7 + $0x20] sm:$0xff]  ;;  %v6799_v13 = vld [vmem:[%s9547_s3 + $0xcc] sm:$0xf0] }
 0x221   :  { %2614 = vmatpush.bf16.msrb.mxu2 %v5599_v62  ;;  %v6070_v62 = vld [vmem:[%s9547_s3 + $0x1c0] sm:$0xf] }
 0x223   :  { %2974 = vmatpush.bf16.msra.mxu0 %v6748_v43 }
 0x224   :  { %2625 = vmatpush.bf16.msrb.mxu3 %v5635_v3  ;;  %2987 = vmatpush.bf16.msra.mxu1 %v6756_v51  ;;  %v6750_v3 = vld [vmem:[#allocation7 + $0x48] sm:$0xff] }
 0x225   :  { %3000 = vmatpush.bf16.msra.mxu2 %v6764_v1 }
 0x227   :  { %2975 = vmatpush.bf16.msra.mxu0 %v6747_v52  ;;  %v5960_v52 = vld [vmem:[%s9547_s3 + $0xf0] sm:$0xf0] }
 0x228   :  { %2626 = vmatpush.bf16.msrb.mxu3 %v5619_v46  ;;  %2988 = vmatpush.bf16.msra.mxu1 %v6755_v41  ;;  %v6086_v46 = vld [vmem:[%s9547_s3 + $0x1e0] sm:$0xf]  ;;  %v6833_v41 = vld [vmem:[%s9547_s3 + $0x1e4] sm:$0xf] }
 0x229   :  { %3001 = vmatpush.bf16.msra.mxu2 %v6763_v10  ;;  %v5926_v10 = vld [vmem:[%s9547_s3 + $0xa0] sm:$0xf] }
 0x22b   :  { %2976 = vmatpush.bf16.msra.mxu0 %v6746_v9 }
 0x22c   :  { %2627 = vmatpush.bf16.msrb.mxu3 %v5603_v40  ;;  %2989 = vmatpush.bf16.msra.mxu1 %v6754_v4  ;;  %v6088_v4 = vld [vmem:[%s9547_s3 + $0x1f0] sm:$0xf0] }
 0x22d   :  { %3002 = vmatpush.bf16.msra.mxu2 %v6762_v2  ;;  %v6091_v2 = vor.u32 %v6833_v41, %v6088_v4  ;;  %v5912_v41 = vld [vmem:[%s9547_s3 + $0x90] sm:$0xf0] }
 0x22f   :  { %2977 = vmatpush.bf16.msra.mxu0 %v6745_v20 }
 0x230   :  { %3013 = vmatpush.bf16.msra.mxu3 %v6772_v61 }
 0x231   :  { %3003 = vmatpush.bf16.msra.mxu2 %v6761_v49 }
 0x233   :  { %2978 = vmatpush.bf16.msra.mxu0 %v6744_v30  ;;  %v6827_v30 = vld [vmem:[%s9547_s3 + $0x1ac] sm:$0xf0] }
 0x234   :  { %3014 = vmatpush.bf16.msra.mxu3 %v6771_v47  ;;  %v6795_v47 = vld [vmem:[%s9547_s3 + $0xac] sm:$0xf0] }
 0x235   :  { %3004 = vmatpush.bf16.msra.mxu2 %v6760_v54  ;;  %v5944_v54 = vld [vmem:[%s9547_s3 + $0xd0] sm:$0xf0] }
 0x237   :  { %2979 = vmatpush.bf16.msra.mxu0 %v6743_v37 }
 0x238   :  { %3015 = vmatpush.bf16.msra.mxu3 %v6770_v32  ;;  %v6054_v32 = vld [vmem:[%s9547_s3 + $0x1a0] sm:$0xf] }
 0x239   :  { %3005 = vmatpush.bf16.msra.mxu2 %v6759_v31  ;;  %v6055_v37 = vor.u32 %v6827_v30, %v6054_v32  ;;  %v6829_v31 = vld [vmem:[%s9547_s3 + $0x1c4] sm:$0xf]  ;;  %v6783_v32 = vld [vmem:[%s9547_s3 + $0x4c] sm:$0xf0] }
 0x23b   :  { %2980 = vmatpush.bf16.msra.mxu0 %v6742_v39 }
 0x23c   :  { %3016 = vmatpush.bf16.msra.mxu3 %v6769_v29  ;;  %v5927_v29 = vor.u32 %v6795_v47, %v5926_v10  ;;  %v6040_v10 = vld [vmem:[%s9547_s3 + $0x190] sm:$0xf0] }
 0x23d   :  { %3006 = vmatpush.bf16.msra.mxu2 %v6758_v5 }
 0x23f   :  { %2981 = vmatpush.bf16.msra.mxu0 %v6741_v17 }
 0x240   :  { %3017 = vmatpush.bf16.msra.mxu3 %v6768_v59 }
 0x244   :  { %3018 = vmatpush.bf16.msra.mxu3 %v6767_v8  ;;  %v6072_v8 = vld [vmem:[%s9547_s3 + $0x1d0] sm:$0xf0] }
 0x245   :  { %v6075_v17 = vor.u32 %v6829_v31, %v6072_v8  ;;  %v6817_v31 = vld [vmem:[%s9547_s3 + $0x164] sm:$0xf]  ;;  %v6024_v8 = vld [vmem:[%s9547_s3 + $0x170] sm:$0xf0] }
 0x248   :  { %3019 = vmatpush.bf16.msra.mxu3 %v6766_v42 }
 0x26c   :  { %v2278_v24 = vpop.f32.mrf.mxu0 }
 0x26d   :  { %v2279_v25 = vadd.f32 %v6941_v15, %v2278_v24  ;;  %v6753_v24 = vld [vmem:[#allocation7 + $0x60] sm:$0xff]  ;;  %v5943_v15 = vor.u32 %v6799_v13, %v5942_v50 }
 0x26e   :  { %2990 = vmatpush.bf16.msra.mxu1 %v6753_v24 }
 0x272   :  { %2991 = vmatpush.bf16.msra.mxu1 %v6752_v36 }
 0x274   :  { %v2291_v22 = vpop.f32.mrf.mxu1  ;;  %v2280_v57 = vpop.f32.mrf.mxu0 }
 0x275   :  { %v2292_v6 = vadd.f32 %v2291_v22, %v2279_v25  ;;  %v6749_v22 = vld [vmem:[#allocation7 + $0x40] sm:$0xff]  ;;  %v6835_v57 = vld [vmem:[%s9547_s3 + $0x1ec] sm:$0xf0] }
 0x276   :  { %2992 = vmatpush.bf16.msra.mxu1 %v6751_v56  ;;  %v6087_v58 = vor.u32 %v6835_v57, %v6086_v46  ;;  %v6797_v56 = vld [vmem:[%s9547_s3 + $0xc4] sm:$0xf] }
 0x27a   :  { %2993 = vmatpush.bf16.msra.mxu1 %v6750_v3  ;;  %v5947_v3 = vor.u32 %v6797_v56, %v5944_v54  ;;  %v6785_v56 = vld [vmem:[%s9547_s3 + $0x64] sm:$0xf] }
 0x27c   :  { %v2293_v21 = vpop.f32.mrf.mxu1 }
 0x27e   :  { %2994 = vmatpush.bf16.msra.mxu1 %v6749_v22  ;;  %v5910_v22 = vld [vmem:[%s9547_s3 + $0x80] sm:$0xf] }
 0x292   :  { %v2304_v63 = vpop.f32.mrf.mxu2 }
 0x293   :  { %v2305_v14 = vadd.f32 %v2304_v63, %v2292_v6  ;;  %v6831_v63 = vld [vmem:[%s9547_s3 + $0x1cc] sm:$0xf0] }
 0x29a   :  { %v2317_v33 = vpop.f32.mrf.mxu3  ;;  %v2306_v27 = vpop.f32.mrf.mxu2 }
 0x29b   :  { %v2318_v23 = vadd.f32 %v2317_v33, %v2305_v14  ;;  %v6757_v27 = vld [vmem:[#allocation7 + $0x80] sm:$0xff] }
 0x29c   :  { %3007 = vmatpush.bf16.msra.mxu2 %v6757_v27 }
 0x29d   :  { %v2420_v28 = vpack.c.bf16 %v2318_v23, %v2318_v23  ;;  %v6071_v23 = vor.u32 %v6831_v63, %v6070_v62  ;;  %v6825_v62 = vld [vmem:[%s9547_s3 + $0x1a4] sm:$0xf] }
 0x29f   :  { %2589 = vmatmul.bf16.vlgmr.msrb.gmra.mxu0 %v2420_v28  ;;  %2602 = vmatmul.bf16.vlgmr.msrb.gmra.mxu1 %v2420_v28 }
 0x2a0   :  { %2615 = vmatmul.bf16.vlgmr.msrb.gmra.mxu2 %v2420_v28  ;;  %2628 = vmatmul.bf16.vlgmr.msrb.gmra.mxu3 %v2420_v28  ;;  %v6765_v28 = vld [vmem:[#allocation7 + $0xc0] sm:$0xff] }
 0x2a1   :  { %3482 = vmatpush.bf16.msrb.mxu0 %v5959_v44  ;;  %3495 = vmatpush.bf16.msrb.mxu1 %v6087_v58  ;;  %v5911_v44 = vor.u32 %v6791_v48, %v5910_v22  ;;  %v6823_v58 = vld [vmem:[%s9547_s3 + $0x18c] sm:$0xf0]  ;;  %v6027_v22 = vor.u32 %v6817_v31, %v6024_v8  ;;  %v5862_v48 = vld [vmem:[%s9547_s3 + $0x20] sm:$0xf] }
 0x2a2   :  { %v2319_v35 = vpop.f32.mrf.mxu3  ;;  %3020 = vmatpush.bf16.msra.mxu3 %v6765_v28  ;;  %v6819_v28 = vld [vmem:[%s9547_s3 + $0x16c] sm:$0xf0] }
 0x2a3   :  { %v6801_v35 = vld [vmem:[%s9547_s3 + $0xe4] sm:$0xf] }
 0x2a4   :  { %v5963_v9 = vor.u32 %v6801_v35, %v5960_v52  ;;  %v6789_v52 = vld [vmem:[%s9547_s3 + $0x84] sm:$0xf] }
 0x2a5   :  { %3483 = vmatpush.bf16.msrb.mxu0 %v5943_v15  ;;  %3496 = vmatpush.bf16.msrb.mxu1 %v6071_v23  ;;  %v5915_v4 = vor.u32 %v6789_v52, %v5912_v41 }
 0x2a6   :  { %3508 = vmatpush.bf16.msrb.mxu2 %v5963_v9  ;;  %3521 = vmatpush.bf16.msrb.mxu3 %v6091_v2  ;;  %v5878_v2 = vld [vmem:[%s9547_s3 + $0x40] sm:$0xf] }
 0x2a9   :  { %3484 = vmatpush.bf16.msrb.mxu0 %v5927_v29  ;;  %3497 = vmatpush.bf16.msrb.mxu1 %v6055_v37  ;;  %v6815_v37 = vld [vmem:[%s9547_s3 + $0x14c] sm:$0xf0] }
 0x2aa   :  { %3509 = vmatpush.bf16.msrb.mxu2 %v5947_v3  ;;  %3522 = vmatpush.bf16.msrb.mxu3 %v6075_v17  ;;  %v5896_v3 = vld [vmem:[%s9547_s3 + $0x70] sm:$0xf0] }
 0x2ab   :  { %v5899_v17 = vor.u32 %v6785_v56, %v5896_v3 }
 0x2ad   :  { %3485 = vmatpush.bf16.msrb.mxu0 %v5911_v44 }
 0x31c   :  { %v8982_v60 = vpop.f32.mrf.mxu0  ;;  %v8984_v7 = vpop.f32.mrf.mxu1 }
 0x31d   :  { %v2633_v12 = vrot.slane %v8982_v60, 4  ;;  %v2639_v16 = vrot.slane %v8984_v7, 4 }
 0x31f   :  { %v2634_v34 = vadd.f32 %v2633_v12, %v8982_v60  ;;  %v2640_v53 = vadd.f32 %v2639_v16, %v8984_v7 }
 0x321   :  { %v2635_v19 = vrot.slane %v2634_v34, 2  ;;  %v2641_v26 = vrot.slane %v2640_v53, 2 }
 0x323   :  { %v2636_v18 = vadd.f32 %v2635_v19, %v2634_v34  ;;  %v2642_v11 = vadd.f32 %v2641_v26, %v2640_v53  ;;  %v9011_v40 = vpop.f32.mrf.mxu2  ;;  %v9013_v21 = vpop.f32.mrf.mxu3  ;;  %v6038_v34 = vld [vmem:[%s9547_s3 + $0x180] sm:$0xf]  ;;  %v6793_v26 = vld [vmem:[%s9547_s3 + $0xa4] sm:$0xf] }
 0x324   :  { %v2645_v25 = vrot.slane %v9011_v40, 4  ;;  %v2651_v6 = vrot.slane %v9013_v21, 4  ;;  %v2592_v14 = vpop.f32.mrf.mxu0  ;;  %v2605_v33 = vpop.f32.mrf.mxu1  ;;  %v6039_v19 = vor.u32 %v6823_v58, %v6038_v34  ;;  %v6779_v34 = vld [vmem:[%s9547_s3 + $0x2c] sm:$0xf0]  ;;  %v5990_v58 = vld [vmem:[%s9547_s3 + $0x120] sm:$0xf] }
 0x325   :  { %v2637_v43 = vrot.slane %v2636_v18, 1  ;;  %v2643_v51 = vrot.slane %v2642_v11, 1  ;;  %v6022_v14 = vld [vmem:[%s9547_s3 + $0x160] sm:$0xf]  ;;  %v5863_v44 = vor.u32 %v6779_v34, %v5862_v48 }
 0x326   :  { %v2646_v1 = vadd.f32 %v2645_v25, %v9011_v40  ;;  %v2652_v61 = vadd.f32 %v2651_v6, %v9013_v21  ;;  %3498 = vmatpush.bf16.msrb.mxu1 %v6039_v19  ;;  %v5894_v25 = vld [vmem:[%s9547_s3 + $0x60] sm:$0xf]  ;;  %v6787_v6 = vld [vmem:[%s9547_s3 + $0x6c] sm:$0xf0] }
 0x327   :  { %v2638_v20 = vadd.f32 %v2637_v43, %v2636_v18  ;;  %v2644_v24 = vadd.f32 %v2643_v51, %v2642_v11  ;;  %v6056_v18 = vld [vmem:[%s9547_s3 + $0x1b0] sm:$0xf0]  ;;  %v5895_v27 = vor.u32 %v6787_v6, %v5894_v25  ;;  %v6023_v51 = vor.u32 %v6819_v28, %v6022_v14  ;;  %v5846_v6 = vld [vmem:[%s9547_s3] sm:$0xf] }
 0x328   :  { %v2647_v36 = vrot.slane %v2646_v1, 2  ;;  %v2653_v49 = vrot.slane %v2652_v61, 2  ;;  %v6059_v63 = vor.u32 %v6825_v62, %v6056_v18  ;;  %v6813_v18 = vld [vmem:[%s9547_s3 + $0x144] sm:$0xf] }
 0x329   :  { %v2657_v59 = vmul.f32 %v2638_v20, %v8926_v38  ;;  %v2658_v39 = vmul.f32 %v2644_v24, %v8926_v38  ;;  %3486 = vmatpush.bf16.msrb.mxu0 %v5895_v27  ;;  %v5974_v27 = vld [vmem:[%s9547_s3 + $0x100] sm:$0xf] }
 0x32a   :  { %v2648_v12 = vadd.f32 %v2647_v36, %v2646_v1  ;;  %v2654_v16 = vadd.f32 %v2653_v49, %v2652_v61  ;;  %v6821_v1 = vld [vmem:[%s9547_s3 + $0x184] sm:$0xf]  ;;  %3523 = vmatpush.bf16.msrb.mxu3 %v6059_v63  ;;  %3499 = vmatpush.bf16.msrb.mxu1 %v6023_v51  ;;  %v5879_v49 = vor.u32 %v6783_v32, %v5878_v2  ;;  %v6807_v51 = vld [vmem:[%s9547_s3 + $0x10c] sm:$0xf0]  ;;  %v5992_v2 = vld [vmem:[%s9547_s3 + $0x130] sm:$0xf0] }
 0x32b   :  { %v9070_v53 = vsub.f32 %v8982_v60, %v2657_v59  ;;  %v9073_v45 = vsub.f32 %v8984_v7, %v2658_v39  ;;  %v2618_v46 = vpop.f32.mrf.mxu2  ;;  %v2631_v57 = vpop.f32.mrf.mxu3  ;;  %v5928_v60 = vld [vmem:[%s9547_s3 + $0xb0] sm:$0xf0]  ;;  %v6043_v24 = vor.u32 %v6821_v1, %v6040_v10  ;;  %v5975_v1 = vor.u32 %v6807_v51, %v5974_v27 }
 0x32c   :  { %v2649_v5 = vrot.slane %v2648_v12, 1  ;;  %v2655_v42 = vrot.slane %v2654_v16, 1  ;;  %v5931_v13 = vor.u32 %v6793_v26, %v5928_v60  ;;  %v6781_v60 = vld [vmem:[%s9547_s3 + $0x44] sm:$0xf]  ;;  %v5864_v10 = vld [vmem:[%s9547_s3 + $0x30] sm:$0xf0] }
 0x32d   :  { %v2665_v7 = vmul.f32 %v9070_v53, %v9070_v53  ;;  %v2666_v50 = vmul.f32 %v9073_v45, %v9073_v45  ;;  %3487 = vmatpush.bf16.msrb.mxu0 %v5879_v49 }
 0x32e   :  { %v2650_v11 = vadd.f32 %v2649_v5, %v2648_v12  ;;  %v2656_v15 = vadd.f32 %v2655_v42, %v2654_v16  ;;  %3510 = vmatpush.bf16.msrb.mxu2 %v5931_v13  ;;  %3524 = vmatpush.bf16.msrb.mxu3 %v6043_v24  ;;  %v6811_v5 = vld [vmem:[%s9547_s3 + $0x12c] sm:$0xf0]  ;;  %v6809_v24 = vld [vmem:[%s9547_s3 + $0x124] sm:$0xf] }
 0x32f   :  { %v2669_v33 = vrot.slane %v2665_v7, 4  ;;  %v2675_v23 = vrot.slane %v2666_v50, 4  ;;  %v5991_v26 = vor.u32 %v6811_v5, %v5990_v58  ;;  %v5995_v49 = vor.u32 %v6809_v24, %v5992_v2 }
 0x330   :  { %v2659_v35 = vmul.f32 %v2650_v11, %v8926_v38  ;;  %v2660_v43 = vmul.f32 %v2656_v15, %v8926_v38  ;;  %v6008_v11 = vld [vmem:[%s9547_s3 + $0x150] sm:$0xf0] }
 0x331   :  { %v2670_v61 = vadd.f32 %v2669_v33, %v2665_v7  ;;  %v2676_v9 = vadd.f32 %v2675_v23, %v2666_v50  ;;  %v5880_v7 = vld [vmem:[%s9547_s3 + $0x50] sm:$0xf0]  ;;  %3488 = vmatpush.bf16.msrb.mxu0 %v5863_v44  ;;  %v6011_v25 = vor.u32 %v6813_v18, %v6008_v11  ;;  %v6775_v23 = vld [vmem:[%s9547_s3 + $0xc] sm:$0xf0]  ;;  %v9221_v44 = vld [vmem:[%s9553_s9] sm:$0xf] }
 0x332   :  { %v9121_v47 = vsub.f32 %v9011_v40, %v2659_v35  ;;  %v9124_v20 = vsub.f32 %v9013_v21, %v2660_v43  ;;  %v6006_v40 = vld [vmem:[%s9547_s3 + $0x140] sm:$0xf]  ;;  %3511 = vmatpush.bf16.msrb.mxu2 %v5915_v4  ;;  %3525 = vmatpush.bf16.msrb.mxu3 %v6027_v22  ;;  %v5883_v62 = vor.u32 %v6781_v60, %v5880_v7  ;;  %v6777_v4 = vld [vmem:[%s9547_s3 + $0x24] sm:$0xf]  ;;  %v2747_v11 = vperm.slane %v9221_v44, 1 }
 0x333   :  { %v2671_v30 = vrot.slane %v2670_v61, 2  ;;  %v2677_v36 = vrot.slane %v2676_v9, 2  ;;  %v6007_v39 = vor.u32 %v6815_v37, %v6006_v40  ;;  %v5847_v43 = vor.u32 %v6775_v23, %v5846_v6  ;;  %v6773_v40 = vld [vmem:[%s9547_s3 + $0x4] sm:$0xf] }
 0x334   :  { %v2667_v21 = vmul.f32 %v9121_v47, %v9121_v47  ;;  %v2668_v29 = vmul.f32 %v9124_v20, %v9124_v20 }
 0x335   :  { %v2672_v54 = vadd.f32 %v2671_v30, %v2670_v61  ;;  %v2678_v59 = vadd.f32 %v2677_v36, %v2676_v9  ;;  %3500 = vmatpush.bf16.msrb.mxu1 %v6007_v39  ;;  %3489 = vmatpush.bf16.msrb.mxu0 %v5847_v43  ;;  %v5867_v36 = vor.u32 %v6777_v4, %v5864_v10  ;;  %v6094_v4 = vld [vmem:[%s9547_s3 + $0x1e8] sm:$0xf]  ;;  %v6836_v10 = vld [vmem:[%s9547_s3 + $0x1f4] sm:$0xf0] }
 0x336   :  { %v2681_v12 = vrot.slane %v2667_v21, 4  ;;  %v2687_v16 = vrot.slane %v2668_v29, 4  ;;  %3512 = vmatpush.bf16.msrb.mxu2 %v5899_v17  ;;  %3526 = vmatpush.bf16.msrb.mxu3 %v6011_v25 }
 0x337   :  { %v2673_v46 = vrot.slane %v2672_v54, 1  ;;  %v2679_v57 = vrot.slane %v2678_v59, 1 }
 0x338   :  { %v2682_v42 = vadd.f32 %v2681_v12, %v2667_v21  ;;  %v2688_v19 = vadd.f32 %v2687_v16, %v2668_v29  ;;  %v5848_v21 = vld [vmem:[%s9547_s3 + $0x10] sm:$0xf0] }
 0x339   :  { %v2674_v50 = vadd.f32 %v2673_v46, %v2672_v54  ;;  %v2680_v13 = vadd.f32 %v2679_v57, %v2678_v59  ;;  %3501 = vmatpush.bf16.msrb.mxu1 %v5991_v26  ;;  %v5851_v56 = vor.u32 %v6773_v40, %v5848_v21  ;;  %v6805_v54 = vld [vmem:[%s9547_s3 + $0x104] sm:$0xf]  ;;  %v5976_v59 = vld [vmem:[%s9547_s3 + $0x110] sm:$0xf0]  ;;  %v9226_v26 = vld [vmem:[%s9554_s10] sm:$0xf] }
 0x33a   :  { %v2683_v15 = vrot.slane %v2682_v42, 2  ;;  %v2689_v63 = vrot.slane %v2688_v19, 2  ;;  %3513 = vmatpush.bf16.msrb.mxu2 %v5883_v62  ;;  %3527 = vmatpush.bf16.msrb.mxu3 %v5995_v49  ;;  %v5979_v39 = vor.u32 %v6805_v54, %v5976_v59  ;;  %v2759_v25 = vperm.slane %v9226_v26, 0  ;;  %v5950_v59 = vld [vmem:[%s9547_s3 + $0xc8] sm:$0xf] }
 0x33b   :  { %v2693_v14 = vmul.f32 %v2674_v50, %v8926_v38  ;;  %v2694_v33 = vmul.f32 %v2680_v13, %v8926_v38  ;;  %v2746_v50 = vperm.slane %v9221_v44, 0  ;;  %v2760_v23 = vperm.slane %v9226_v26, 1 }
 0x33c   :  { %v2684_v28 = vadd.f32 %v2683_v15, %v2682_v42  ;;  %v2690_v35 = vadd.f32 %v2689_v63, %v2688_v19  ;;  %v6095_v54 = vor.u32 %v6836_v10, %v6094_v4 }
 0x33d   :  { %v2697_v52 = vadd.f32 1e-05, %v2693_v14  ;;  %v2698_v41 = vadd.f32 1e-05, %v2694_v33  ;;  %3502 = vmatpush.bf16.msrb.mxu1 %v5975_v1 }
 0x33e   :  { %v2685_v61 = vrot.slane %v2684_v28, 1  ;;  %v2691_v9 = vrot.slane %v2690_v35, 1  ;;  %3514 = vmatpush.bf16.msrb.mxu2 %v5867_v36  ;;  %3528 = vmatpush.bf16.msrb.mxu3 %v5979_v39  ;;  %v6800_v39 = vld [vmem:[%s9547_s3 + $0xd4] sm:$0xf0] }
 0x33f   :  { %6955 = vrsqrt.f32 %v2697_v52  ;;  %vm2707_vm15 = vweird.f32 %v2697_v52  ;;  %vm2717_vm1 = vweird.f32 %v2698_v41 }
 0x340   :  { %6957 = vrsqrt.f32 %v2698_v41  ;;  %v2686_v32 = vadd.f32 %v2685_v61, %v2684_v28  ;;  %v2692_v30 = vadd.f32 %v2691_v9, %v2690_v35  ;;  %v2748_v61 = vperm.slane %v9221_v44, 2 }
 0x342   :  { %v2695_v29 = vmul.f32 %v2686_v32, %v8926_v38  ;;  %v2696_v37 = vmul.f32 %v2692_v30, %v8926_v38  ;;  %3515 = vmatpush.bf16.msrb.mxu2 %v5851_v56  ;;  %v2761_v32 = vperm.slane %v9226_v26, 2  ;;  %v2749_v30 = vperm.slane %v9221_v44, 3  ;;  %v5934_v44 = vld [vmem:[%s9547_s3 + $0xa8] sm:$0xf] }
 0x343   :  { %v2762_v56 = vperm.slane %v9226_v26, 3 }
 0x344   :  { %v2699_v3 = vadd.f32 1e-05, %v2695_v29  ;;  %v2700_v31 = vadd.f32 1e-05, %v2696_v37 }
 0x345   :  { %v6956_v8 = vpop.eup %6955 }
 0x346   :  { %v6958_v12 = vpop.eup %6957  ;;  %v2702_v16 = vmul.f32 %v6956_v8, %v2697_v52  ;;  %6959 = vrsqrt.f32 %v2699_v3  ;;  %vm2708_vm13 = vweird.f32 %v6956_v8  ;;  %vm2727_vm5 = vweird.f32 %v2699_v3 }
 0x347   :  { %v2712_v17 = vmul.f32 %v6958_v12, %v2698_v41  ;;  %6961 = vrsqrt.f32 %v2700_v31  ;;  %vm2718_vm14 = vweird.f32 %v6958_v12  ;;  %vm2709_vm0 = vmor %vm2707_vm15, %vm2708_vm13  ;;  %vm2737_vm7 = vweird.f32 %v2700_v31 }
 0x348   :  { %v2703_v22 = vmul.f32 %v6956_v8, %v2702_v16  ;;  %vm2719_vm2 = vmor %vm2717_vm1, %vm2718_vm14  ;;  %v5951_v16 = vor.u32 %v6800_v39, %v5950_v59  ;;  %v6786_v59 = vld [vmem:[%s9547_s3 + $0x6c] sm:$0xf]  ;;  %v5904_v39 = vld [vmem:[%s9547_s3 + $0x78] sm:$0xf0] }
 0x349   :  { %v2713_v48 = vmul.f32 %v6958_v12, %v2712_v17  ;;  %v6802_v17 = vld [vmem:[%s9547_s3 + $0xec] sm:$0xf] }
 0x34a   :  { %v2704_v34 = vmul.f32 0.5, %v2703_v22  ;;  %v5968_v22 = vld [vmem:[%s9547_s3 + $0xf8] sm:$0xf0] }
 0x34b   :  { %v2714_v46 = vmul.f32 0.5, %v2713_v48  ;;  %v6834_v48 = vld [vmem:[%s9547_s3 + $0x1ec] sm:$0xf] }
 0x34c   :  { %v6960_v57 = vpop.eup %6959  ;;  %v2705_v58 = vsub.f32 1.5, %v2704_v34 }
 0x34d   :  { %v6962_v5 = vpop.eup %6961  ;;  %v2715_v42 = vsub.f32 1.5, %v2714_v46  ;;  %v2722_v19 = vmul.f32 %v6960_v57, %v2699_v3  ;;  %vm2728_vm3 = vweird.f32 %v6960_v57 }
 0x34e   :  { %v2706_v60 = vmul.f32 %v6956_v8, %v2705_v58  ;;  %v2732_v7 = vmul.f32 %v6962_v5, %v2700_v31  ;;  %vm2738_vm4 = vweird.f32 %v6962_v5  ;;  %vm2729_vm6 = vmor %vm2727_vm5, %vm2728_vm3  ;;  %v6796_v58 = vld [vmem:[%s9547_s3 + $0xb4] sm:$0xf0] }
 0x34f   :  { %v2716_v13 = vmul.f32 %v6958_v12, %v2715_v42  ;;  %v2723_v62 = vmul.f32 %v6960_v57, %v2722_v19  ;;  %vm2739_vm8 = vmor %vm2737_vm7, %vm2738_vm4  ;;  %v6062_v42 = vld [vmem:[%s9547_s3 + $0x1a8] sm:$0xf]  ;;  %v6828_v19 = vld [vmem:[%s9547_s3 + $0x1b4] sm:$0xf0] }
 0x350   :  { %v2710_v18 = vsel %vm2709_vm0, %v6956_v8, %v2706_v60  ;;  %v2733_v15 = vmul.f32 %v6962_v5, %v2732_v7  ;;  %v5971_v60 = vor.u32 %v6802_v17, %v5968_v22  ;;  %v6812_v17 = vld [vmem:[%s9547_s3 + $0x134] sm:$0xf0]  ;;  %v5907_v22 = vor.u32 %v6786_v59, %v5904_v39  ;;  %v6842_v59 = vld [vmem:[#allocation3 + $0x28] sm:$0xff] }
 0x351   :  { %v2741_v63 = vmul.f32 %v2710_v18, %v9070_v53  ;;  %v2720_v6 = vsel %vm2719_vm2, %v6958_v12, %v2716_v13  ;;  %v2724_v14 = vmul.f32 0.5, %v2723_v62  ;;  %v5966_v53 = vld [vmem:[%s9547_s3 + $0xe8] sm:$0xf]  ;;  %v5935_v13 = vor.u32 %v6796_v58, %v5934_v44  ;;  %v6798_v62 = vld [vmem:[%s9547_s3 + $0xcc] sm:$0xf] }
 0x352   :  { %v2742_v33 = vmul.f32 %v2720_v6, %v9073_v45  ;;  %v2734_v27 = vmul.f32 0.5, %v2733_v15  ;;  %v6804_v45 = vld [vmem:[%s9547_s3 + $0xf4] sm:$0xf0]  ;;  %v5952_v18 = vld [vmem:[%s9547_s3 + $0xd8] sm:$0xf0] }
 0x353   :  { %v2754_v28 = vmul.f32 %v2746_v50, %v2741_v63  ;;  %v2725_v35 = vsub.f32 1.5, %v2724_v14  ;;  %v5967_v21 = vor.u32 %v6804_v45, %v5966_v53  ;;  %v6063_v63 = vor.u32 %v6828_v19, %v6062_v42  ;;  %v5918_v6 = vld [vmem:[%s9547_s3 + $0x88] sm:$0xf]  ;;  %v6792_v14 = vld [vmem:[%s9547_s3 + $0x94] sm:$0xf0] }
 0x354   :  { %v2755_v43 = vmul.f32 %v2747_v11, %v2742_v33  ;;  %v2735_v51 = vsub.f32 1.5, %v2734_v27  ;;  %v6830_v11 = vld [vmem:[%s9547_s3 + $0x1cc] sm:$0xf]  ;;  %v6046_v33 = vld [vmem:[%s9547_s3 + $0x188] sm:$0xf]  ;;  %v5955_v27 = vor.u32 %v6798_v62, %v5952_v18 }
 0x355   :  { %v2767_v52 = vadd.f32 %v2759_v25, %v2754_v28  ;;  %v2726_v41 = vmul.f32 %v6960_v57, %v2725_v35  ;;  %v6080_v25 = vld [vmem:[%s9547_s3 + $0x1d8] sm:$0xf0]  ;;  %v5919_v35 = vor.u32 %v6792_v14, %v5918_v6  ;;  %v5902_v45 = vld [vmem:[%s9547_s3 + $0x68] sm:$0xf]  ;;  %v6814_v58 = vld [vmem:[%s9547_s3 + $0x14c] sm:$0xf] }
 0x356   :  { %v2768_v1 = vadd.f32 %v2760_v23, %v2755_v43  ;;  %v2736_v9 = vmul.f32 %v6962_v5, %v2735_v51  ;;  %v6824_v23 = vld [vmem:[%s9547_s3 + $0x194] sm:$0xf0]  ;;  %v6083_v28 = vor.u32 %v6830_v11, %v6080_v25  ;;  %v6794_v43 = vld [vmem:[%s9547_s3 + $0xac] sm:$0xf]  ;;  %v5936_v51 = vld [vmem:[%s9547_s3 + $0xb8] sm:$0xf0] }
 0x357   :  { %v2771_v24 = vmax.f32 %v2767_v52, 0.0  ;;  %v2730_v2 = vsel %vm2729_vm6, %v6960_v57, %v2726_v41  ;;  %v6096_v57 = vld [vmem:[%s9547_s3 + $0x1f8] sm:$0xf0]  ;;  %v6047_v52 = vor.u32 %v6824_v23, %v6046_v33  ;;  %v6826_v41 = vld [vmem:[%s9547_s3 + $0x1ac] sm:$0xf]  ;;  %v5939_v4 = vor.u32 %v6794_v43, %v5936_v51 }
 0x358   :  { %v2772_v36 = vmax.f32 %v2768_v1, 0.0  ;;  %v2743_v49 = vmul.f32 %v2730_v2, %v9121_v47  ;;  %v2740_v40 = vsel %vm2739_vm8, %v6962_v5, %v2736_v9  ;;  %v6078_v47 = vld [vmem:[%s9547_s3 + $0x1c8] sm:$0xf]  ;;  %v6099_v50 = vor.u32 %v6834_v48, %v6096_v57  ;;  %v6064_v53 = vld [vmem:[%s9547_s3 + $0x1b8] sm:$0xf0] }
 0x359   :  { %v2775_v29 = vpack.c.bf16 %v2771_v24, %v2771_v24  ;;  %v2744_v37 = vmul.f32 %v2740_v40, %v9124_v20  ;;  %v6832_v20 = vld [vmem:[%s9547_s3 + $0x1d4] sm:$0xf0]  ;;  %v6067_v10 = vor.u32 %v6826_v41, %v6064_v53  ;;  %v6790_v24 = vld [vmem:[%s9547_s3 + $0x8c] sm:$0xf]  ;;  %v5920_v2 = vld [vmem:[%s9547_s3 + $0x98] sm:$0xf0] }
 0x35a   :  { %v2776_v3 = vpack.c.bf16 %v2772_v36, %v2772_v36  ;;  %v2756_v31 = vmul.f32 %v2748_v61, %v2743_v49  ;;  %v6079_v46 = vor.u32 %v6832_v20, %v6078_v47  ;;  %v6788_v1 = vld [vmem:[%s9547_s3 + $0x74] sm:$0xf0]  ;;  %v6030_v61 = vld [vmem:[%s9547_s3 + $0x168] sm:$0xf]  ;;  %v6822_v49 = vld [vmem:[%s9547_s3 + $0x18c] sm:$0xf] }
 0x35b   :  { %v2757_v8 = vmul.f32 %v2749_v30, %v2744_v37  ;;  %2982 = vmatmul.bf16.vlgmr.msra.gmra.mxu0 %v2775_v29  ;;  %v6820_v9 = vld [vmem:[%s9547_s3 + $0x174] sm:$0xf0]  ;;  %v5903_v30 = vor.u32 %v6788_v1, %v5902_v45  ;;  %v6048_v40 = vld [vmem:[%s9547_s3 + $0x198] sm:$0xf0]  ;;  %v9358_v29 = vpack.c.bf16 %v8924_v55, %v8924_v55  ;;  %v6014_v37 = vld [vmem:[%s9547_s3 + $0x148] sm:$0xf] }
 0x35c   :  { %v2769_v12 = vadd.f32 %v2761_v32, %v2756_v31  ;;  %2995 = vmatmul.bf16.vlgmr.msra.gmra.mxu1 %v2776_v3  ;;  %3534 = vmatpush.bf16.msra.mxu0 %v5967_v21  ;;  %v9345_v32 = vpack.c.bf16 %v8922_v0, %v8922_v0  ;;  %v6031_v36 = vor.u32 %v6820_v9, %v6030_v61  ;;  %v5886_v21 = vld [vmem:[%s9547_s3 + $0x48] sm:$0xf]  ;;  %v6784_v0 = vld [vmem:[%s9547_s3 + $0x54] sm:$0xf0]  ;;  %v6818_v47 = vld [vmem:[%s9547_s3 + $0x16c] sm:$0xf] }
 0x35d   :  { %v2770_v34 = vadd.f32 %v2762_v56, %v2757_v8  ;;  %3547 = vmatpush.bf16.msra.mxu1 %v6095_v54  ;;  %v6816_v56 = vld [vmem:[%s9547_s3 + $0x154] sm:$0xf0]  ;;  %v5923_v54 = vor.u32 %v6790_v24, %v5920_v2  ;;  %v6051_v55 = vor.u32 %v6822_v49, %v6048_v40  ;;  %v5887_v3 = vor.u32 %v6784_v0, %v5886_v21  ;;  %v6032_v20 = vld [vmem:[%s9547_s3 + $0x178] sm:$0xf0]  ;;  %v5870_v8 = vld [vmem:[%s9547_s3 + $0x28] sm:$0xf] }
 0x35e   :  { %v2773_v5 = vmax.f32 %v2769_v12, 0.0  ;;  %v6015_v31 = vor.u32 %v6816_v56, %v6014_v37  ;;  %v6780_v12 = vld [vmem:[%s9547_s3 + $0x34] sm:$0xf0]  ;;  %v6035_v48 = vor.u32 %v6818_v47, %v6032_v20  ;;  %v5854_v42 = vld [vmem:[%s9547_s3 + $0x8] sm:$0xf]  ;;  %v6843_v37 = vld [vmem:[#allocation3 + $0x30] sm:$0xff] }
 0x35f   :  { %v2774_v26 = vmax.f32 %v2770_v34, 0.0  ;;  %v6782_v34 = vld [vmem:[%s9547_s3 + $0x4c] sm:$0xf]  ;;  %v5871_v57 = vor.u32 %v6780_v12, %v5870_v8  ;;  %v6776_v19 = vld [vmem:[%s9547_s3 + $0x14] sm:$0xf0]  ;;  %v6841_v8 = vld [vmem:[#allocation3 + $0x20] sm:$0xff] }
 0x360   :  { %v2777_v7 = vpack.c.bf16 %v2773_v5, %v2773_v5  ;;  %3535 = vmatpush.bf16.msra.mxu0 %v5951_v16  ;;  %v5998_v16 = vld [vmem:[%s9547_s3 + $0x128] sm:$0xf]  ;;  %v6016_v5 = vld [vmem:[%s9547_s3 + $0x158] sm:$0xf0]  ;;  %v5855_v18 = vor.u32 %v6776_v19, %v5854_v42  ;;  %v6774_v14 = vld [vmem:[%s9547_s3 + $0xc] sm:$0xf] }
 0x361   :  { %v2778_v15 = vpack.c.bf16 %v2774_v26, %v2774_v26  ;;  %3548 = vmatpush.bf16.msra.mxu1 %v6079_v46  ;;  %v5888_v46 = vld [vmem:[%s9547_s3 + $0x58] sm:$0xf0]  ;;  %v5999_v44 = vor.u32 %v6812_v17, %v5998_v16  ;;  %v5982_v26 = vld [vmem:[%s9547_s3 + $0x108] sm:$0xf]  ;;  %v6806_v23 = vld [vmem:[%s9547_s3 + $0x10c] sm:$0xf] }
 0x362   :  { %3008 = vmatmul.bf16.vlgmr.msra.gmra.mxu2 %v2777_v7  ;;  %v5891_v7 = vor.u32 %v6782_v34, %v5888_v46  ;;  %v5872_v62 = vld [vmem:[%s9547_s3 + $0x38] sm:$0xf0] }
 0x363   :  { %3021 = vmatmul.bf16.vlgmr.msra.gmra.mxu3 %v2778_v15  ;;  %3560 = vmatpush.bf16.msra.mxu2 %v5971_v60  ;;  %v6808_v60 = vld [vmem:[%s9547_s3 + $0x114] sm:$0xf0]  ;;  %v6810_v15 = vld [vmem:[%s9547_s3 + $0x12c] sm:$0xf]  ;;  %v5856_v33 = vld [vmem:[%s9547_s3 + $0x18] sm:$0xf0] }
 0x364   :  { %3573 = vmatpush.bf16.msra.mxu3 %v6099_v50  ;;  %3536 = vmatpush.bf16.msra.mxu0 %v5935_v13  ;;  %v6019_v50 = vor.u32 %v6814_v58, %v6016_v5  ;;  %v6778_v13 = vld [vmem:[%s9547_s3 + $0x2c] sm:$0xf]  ;;  %v5983_v11 = vor.u32 %v6808_v60, %v5982_v26  ;;  %v6852_v12 = vld [vmem:[#allocation3 + $0x78] sm:$0xff]  ;;  %v6851_v58 = vld [vmem:[#allocation3 + $0x70] sm:$0xff] }
 0x365   :  { %3549 = vmatpush.bf16.msra.mxu1 %v6063_v63  ;;  %v6000_v63 = vld [vmem:[%s9547_s3 + $0x138] sm:$0xf0]  ;;  %v5875_v25 = vor.u32 %v6778_v13, %v5872_v62 }
 0x366   :  { %v6003_v6 = vor.u32 %v6810_v15, %v6000_v63  ;;  %v6860_v5 = vld [vmem:[#allocation3 + $0xb8] sm:$0xff]  ;;  %v6859_v15 = vld [vmem:[#allocation3 + $0xb0] sm:$0xff] }
 0x367   :  { %3561 = vmatpush.bf16.msra.mxu2 %v5955_v27  ;;  %v5984_v27 = vld [vmem:[%s9547_s3 + $0x118] sm:$0xf0] }
 0x368   :  { %3574 = vmatpush.bf16.msra.mxu3 %v6083_v28  ;;  %3537 = vmatpush.bf16.msra.mxu0 %v5919_v35  ;;  %v5859_v28 = vor.u32 %v6774_v14, %v5856_v33  ;;  %v5987_v35 = vor.u32 %v6806_v23, %v5984_v27 }
 0x369   :  { %3550 = vmatpush.bf16.msra.mxu1 %v6047_v52  ;;  %v6942_v52 = vld [vmem:[%s9556_s12] ss:$0 sm:$0xff] }
 0x36b   :  { %3562 = vmatpush.bf16.msra.mxu2 %v5939_v4  ;;  %3490 = vmatmul.bf16.vlgmr.msrb.gmra.mxu0 %v9345_v32 }
 0x36c   :  { %3575 = vmatpush.bf16.msra.mxu3 %v6067_v10  ;;  %3503 = vmatmul.bf16.vlgmr.msrb.gmra.mxu1 %v9358_v29 }
 0x36d   :  { %3538 = vmatpush.bf16.msra.mxu0 %v5903_v30  ;;  %3551 = vmatpush.bf16.msra.mxu1 %v6031_v36  ;;  %v6844_v36 = vld [vmem:[#allocation3 + $0x38] sm:$0xff] }
 0x36f   :  { %3563 = vmatpush.bf16.msra.mxu2 %v5923_v54 }
 0x370   :  { %3576 = vmatpush.bf16.msra.mxu3 %v6051_v55 }
 0x371   :  { %3539 = vmatpush.bf16.msra.mxu0 %v5887_v3  ;;  %3552 = vmatpush.bf16.msra.mxu1 %v6015_v31 }
 0x372   :  { %3516 = vmatmul.bf16.vlgmr.msrb.gmra.mxu2 %v9345_v32 }
 0x373   :  { %3529 = vmatmul.bf16.vlgmr.msrb.gmra.mxu3 %v9358_v29  ;;  %3564 = vmatpush.bf16.msra.mxu2 %v5907_v22 }
 0x374   :  { %3577 = vmatpush.bf16.msra.mxu3 %v6035_v48 }
 0x375   :  { %3540 = vmatpush.bf16.msra.mxu0 %v5871_v57  ;;  %3553 = vmatpush.bf16.msra.mxu1 %v5999_v44  ;;  %v6840_v44 = vld [vmem:[#allocation3 + $0x18] sm:$0xff] }
 0x377   :  { %3565 = vmatpush.bf16.msra.mxu2 %v5891_v7 }
 0x378   :  { %3578 = vmatpush.bf16.msra.mxu3 %v6019_v50 }
 0x379   :  { %3541 = vmatpush.bf16.msra.mxu0 %v5855_v18  ;;  %3554 = vmatpush.bf16.msra.mxu1 %v5983_v11  ;;  %v6839_v18 = vld [vmem:[#allocation3 + $0x10] sm:$0xff]  ;;  %v6850_v11 = vld [vmem:[#allocation3 + $0x68] sm:$0xff] }
 0x37b   :  { %3566 = vmatpush.bf16.msra.mxu2 %v5875_v25 }
 0x37c   :  { %3579 = vmatpush.bf16.msra.mxu3 %v6003_v6  ;;  %3542 = vmatmul.bf16.vlgmr.msra.gmra.mxu0 %v9345_v32 }
 0x37d   :  { %3555 = vmatmul.bf16.vlgmr.msra.gmra.mxu1 %v9358_v29  ;;  %3927 = vmatpush.bf16.msrb.mxu0 %v6844_v36 }
 0x37e   :  { %3940 = vmatpush.bf16.msrb.mxu1 %v6852_v12 }
 0x37f   :  { %3567 = vmatpush.bf16.msra.mxu2 %v5859_v28 }
 0x380   :  { %3580 = vmatpush.bf16.msra.mxu3 %v5987_v35  ;;  %v6838_v35 = vld [vmem:[#allocation3 + $0x8] sm:$0xff] }
 0x381   :  { %3928 = vmatpush.bf16.msrb.mxu0 %v6843_v37 }
 0x382   :  { %3568 = vmatmul.bf16.vlgmr.msra.gmra.mxu2 %v9345_v32  ;;  %3941 = vmatpush.bf16.msrb.mxu1 %v6851_v58 }
 0x383   :  { %3581 = vmatmul.bf16.vlgmr.msra.gmra.mxu3 %v9358_v29  ;;  %3953 = vmatpush.bf16.msrb.mxu2 %v6860_v5 }
 0x385   :  { %3929 = vmatpush.bf16.msrb.mxu0 %v6842_v59  ;;  %v6867_v59 = vld [vmem:[#allocation3 + $0xf0] sm:$0xff] }
 0x386   :  { %3942 = vmatpush.bf16.msrb.mxu1 %v6850_v11 }
 0x387   :  { %3954 = vmatpush.bf16.msrb.mxu2 %v6859_v15 }
 0x389   :  { %3930 = vmatpush.bf16.msrb.mxu0 %v6841_v8 }
 0x38d   :  { %3931 = vmatpush.bf16.msrb.mxu0 %v6840_v44 }
 0x391   :  { %3932 = vmatpush.bf16.msrb.mxu0 %v6839_v18 }
 0x395   :  { %3933 = vmatpush.bf16.msrb.mxu0 %v6838_v35  ;;  %v9480_v35 = vld [vmem:[%s9548_s4] sm:$0xf] }
 0x3d8   :  { %v2983_v43 = vpop.f32.mrf.mxu0 }
 0x3d9   :  { %v2996_v51 = vpop.f32.mrf.mxu1  ;;  %v2984_v41 = vadd.f32 %v6942_v52, %v2983_v43  ;;  %v6849_v43 = vld [vmem:[#allocation3 + $0x60] sm:$0xff] }
 0x3da   :  { %3943 = vmatpush.bf16.msrb.mxu1 %v6849_v43 }
 0x3db   :  { %v2997_v1 = vadd.f32 %v2996_v51, %v2984_v41  ;;  %v6858_v51 = vld [vmem:[#allocation3 + $0xa8] sm:$0xff] }
 0x3dc   :  { %3955 = vmatpush.bf16.msrb.mxu2 %v6858_v51 }
 0x3e0   :  { %v2985_v53 = vpop.f32.mrf.mxu0 }
 0x3e1   :  { %v2998_v45 = vpop.f32.mrf.mxu1 }
 0x3e5   :  { %v3009_v61 = vpop.f32.mrf.mxu2 }
 0x3e6   :  { %v3010_v9 = vadd.f32 %v3009_v61, %v2997_v1  ;;  %v3022_v4 = vpop.f32.mrf.mxu3 }
 0x3e8   :  { %v3023_v10 = vadd.f32 %v3022_v4, %v3010_v9  ;;  %v3491_v24 = vpop.f32.mrf.mxu0 }
 0x3e9   :  { %v3504_v2 = vpop.f32.mrf.mxu1 }
 0x3ea   :  { %3026 = vst [vmem:[%s9557_s13] sm:$0xff] %v3023_v10  ;;  %v3505_v32 = vadd.f32 %v3504_v2, %v3491_v24  ;;  %v6837_v24 = vld [vmem:[#allocation3] sm:$0xff]  ;;  %v6848_v2 = vld [vmem:[#allocation3 + $0x58] sm:$0xff] }
 0x3eb   :  { %3934 = vmatpush.bf16.msrb.mxu0 %v6837_v24  ;;  %3944 = vmatpush.bf16.msrb.mxu1 %v6848_v2 }
 0x3ec   :  { %v3586_v30 = vrot.slane %v3505_v32, 4 }
 0x3ed   :  { %v3011_v49 = vpop.f32.mrf.mxu2 }
 0x3ee   :  { %v3587_v40 = vadd.f32 %v3586_v30, %v3505_v32  ;;  %v3024_v21 = vpop.f32.mrf.mxu3 }
 0x3f0   :  { %v3588_v29 = vrot.slane %v3587_v40, 2  ;;  %v3493_v0 = vpop.f32.mrf.mxu0 }
 0x3f1   :  { %v3506_v56 = vpop.f32.mrf.mxu1 }
 0x3f2   :  { %v3589_v54 = vadd.f32 %v3588_v29, %v3587_v40  ;;  %v6868_v40 = vld [vmem:[#allocation3 + $0xf8] sm:$0xff] }
 0x3f3   :  { %3966 = vmatpush.bf16.msrb.mxu3 %v6868_v40 }
 0x3f4   :  { %v3590_v55 = vrot.slane %v3589_v54, 1 }
 0x3f5   :  { %v3517_v39 = vpop.f32.mrf.mxu2 }
 0x3f6   :  { %v3591_v3 = vadd.f32 %v3590_v55, %v3589_v54  ;;  %v3530_v31 = vpop.f32.mrf.mxu3  ;;  %v6847_v54 = vld [vmem:[#allocation3 + $0x50] sm:$0xff]  ;;  %v6856_v55 = vld [vmem:[#allocation3 + $0x98] sm:$0xff] }
 0x3f7   :  { %v3531_v47 = vadd.f32 %v3530_v31, %v3517_v39  ;;  %3945 = vmatpush.bf16.msrb.mxu1 %v6847_v54  ;;  %3967 = vmatpush.bf16.msrb.mxu3 %v6867_v59  ;;  %v6861_v54 = vld [vmem:[#allocation3 + $0xc0] sm:$0xff] }
 0x3f8   :  { %v3610_v20 = vmul.f32 %v3591_v3, %v8926_v38 }
 0x3f9   :  { %v3592_v16 = vrot.slane %v3531_v47, 4  ;;  %v3543_v17 = vpop.f32.mrf.mxu0 }
 0x3fa   :  { %v9456_v22 = vsub.f32 %v3505_v32, %v3610_v20  ;;  %v3556_v48 = vpop.f32.mrf.mxu1  ;;  %v6857_v32 = vld [vmem:[#allocation3 + $0xa0] sm:$0xff] }
 0x3fb   :  { %v3593_v34 = vadd.f32 %v3592_v16, %v3531_v47  ;;  %v3557_v46 = vadd.f32 %v3556_v48, %v3543_v17  ;;  %3956 = vmatpush.bf16.msrb.mxu2 %v6857_v32  ;;  %v6846_v17 = vld [vmem:[#allocation3 + $0x48] sm:$0xff]  ;;  %v6855_v48 = vld [vmem:[#allocation3 + $0x90] sm:$0xff] }
 0x3fc   :  { %v3618_v57 = vmul.f32 %v9456_v22, %v9456_v22  ;;  %3946 = vmatpush.bf16.msrb.mxu1 %v6846_v17  ;;  %v3700_v17 = vperm.slane %v9480_v35, 1 }
 0x3fd   :  { %v3594_v42 = vrot.slane %v3593_v34, 2  ;;  %v3598_v19 = vrot.slane %v3557_v46, 4  ;;  %v3519_v26 = vpop.f32.mrf.mxu2 }
 0x3fe   :  { %v3622_v60 = vrot.slane %v3618_v57, 4  ;;  %v3532_v7 = vpop.f32.mrf.mxu3  ;;  %v6845_v26 = vld [vmem:[#allocation3 + $0x40] sm:$0xff] }
 0x3ff   :  { %v3595_v50 = vadd.f32 %v3594_v42, %v3593_v34  ;;  %v3599_v13 = vadd.f32 %v3598_v19, %v3557_v46  ;;  %3957 = vmatpush.bf16.msrb.mxu2 %v6856_v55  ;;  %v6866_v34 = vld [vmem:[#allocation3 + $0xe8] sm:$0xff]  ;;  %v6865_v7 = vld [vmem:[#allocation3 + $0xe0] sm:$0xff] }
 0x400   :  { %v3623_v62 = vadd.f32 %v3622_v60, %v3618_v57  ;;  %3968 = vmatpush.bf16.msrb.mxu3 %v6866_v34  ;;  %v6854_v60 = vld [vmem:[#allocation3 + $0x88] sm:$0xff]  ;;  %3947 = vmatpush.bf16.msrb.mxu1 %v6845_v26 }
 0x401   :  { %v3596_v63 = vrot.slane %v3595_v50, 1  ;;  %v3600_v25 = vrot.slane %v3599_v13, 2  ;;  %v3545_v6 = vpop.f32.mrf.mxu0 }
 0x402   :  { %v3624_v14 = vrot.slane %v3623_v62, 2  ;;  %v3558_v33 = vpop.f32.mrf.mxu1  ;;  %v6853_v6 = vld [vmem:[#allocation3 + $0x80] sm:$0xff] }
 0x403   :  { %v3597_v23 = vadd.f32 %v3596_v63, %v3595_v50  ;;  %v3601_v27 = vadd.f32 %v3600_v25, %v3599_v13  ;;  %3958 = vmatpush.bf16.msrb.mxu2 %v6855_v48 }
 0x404   :  { %v3625_v28 = vadd.f32 %v3624_v14, %v3623_v62  ;;  %3969 = vmatpush.bf16.msrb.mxu3 %v6865_v7  ;;  %v6864_v14 = vld [vmem:[#allocation3 + $0xd8] sm:$0xff] }
 0x405   :  { %v3611_v52 = vmul.f32 %v3597_v23, %v8926_v38  ;;  %v3602_v41 = vrot.slane %v3601_v27, 1  ;;  %v3569_v53 = vpop.f32.mrf.mxu2 }
 0x406   :  { %v3626_v45 = vrot.slane %v3625_v28, 1  ;;  %v3582_v1 = vpop.f32.mrf.mxu3 }
 0x407   :  { %v9461_v61 = vsub.f32 %v3531_v47, %v3611_v52  ;;  %v3603_v9 = vadd.f32 %v3602_v41, %v3601_v27  ;;  %v3583_v4 = vadd.f32 %v3582_v1, %v3569_v53  ;;  %3959 = vmatpush.bf16.msrb.mxu2 %v6854_v60  ;;  %v6863_v41 = vld [vmem:[#allocation3 + $0xd0] sm:$0xff]  ;;  %v9486_v53 = vld [vmem:[%s9549_s5] sm:$0xf] }
 0x408   :  { %v3627_v10 = vadd.f32 %v3626_v45, %v3625_v28  ;;  %3970 = vmatpush.bf16.msrb.mxu3 %v6864_v14  ;;  %v3712_v2 = vperm.slane %v9486_v53, 0  ;;  %v3714_v7 = vperm.slane %v9486_v53, 2 }
 0x409   :  { %v3619_v30 = vmul.f32 %v9461_v61, %v9461_v61  ;;  %v3612_v36 = vmul.f32 %v3603_v9, %v8926_v38  ;;  %v3604_v49 = vrot.slane %v3583_v4, 4  ;;  %v3699_v9 = vperm.slane %v9480_v35, 0 }
 0x40a   :  { %v3646_v21 = vmul.f32 %v3627_v10, %v8926_v38 }
 0x40b   :  { %v3628_v29 = vrot.slane %v3619_v30, 4  ;;  %v9467_v0 = vsub.f32 %v3557_v46, %v3612_v36  ;;  %v3605_v37 = vadd.f32 %v3604_v49, %v3583_v4  ;;  %3960 = vmatpush.bf16.msrb.mxu2 %v6853_v6 }
 0x40c   :  { %v3650_v56 = vadd.f32 1e-05, %v3646_v21  ;;  %3971 = vmatpush.bf16.msrb.mxu3 %v6863_v41 }
 0x40d   :  { %v3629_v39 = vadd.f32 %v3628_v29, %v3619_v30  ;;  %v3620_v3 = vmul.f32 %v9467_v0, %v9467_v0  ;;  %v3606_v31 = vrot.slane %v3605_v37, 2  ;;  %v3571_v47 = vpop.f32.mrf.mxu2  ;;  %v6862_v30 = vld [vmem:[#allocation3 + $0xc8] sm:$0xff] }
 0x40e   :  { %6963 = vrsqrt.f32 %v3650_v56  ;;  %v3584_v20 = vpop.f32.mrf.mxu3  ;;  %vm3660_vm10 = vweird.f32 %v3650_v56 }
 0x40f   :  { %v3630_v8 = vrot.slane %v3629_v39, 2  ;;  %v3634_v12 = vrot.slane %v3620_v3, 4  ;;  %v3607_v16 = vadd.f32 %v3606_v31, %v3605_v37 }
 0x410   :  { %3972 = vmatpush.bf16.msrb.mxu3 %v6862_v30 }
 0x411   :  { %v3631_v46 = vadd.f32 %v3630_v8, %v3629_v39  ;;  %v3635_v57 = vadd.f32 %v3634_v12, %v3620_v3  ;;  %v3608_v44 = vrot.slane %v3607_v16, 1 }
 0x413   :  { %v3632_v58 = vrot.slane %v3631_v46, 1  ;;  %v3636_v5 = vrot.slane %v3635_v57, 2  ;;  %v3609_v42 = vadd.f32 %v3608_v44, %v3607_v16  ;;  %v3713_v44 = vperm.slane %v9486_v53, 1 }
 0x414   :  { %v6964_v19 = vpop.eup %6963  ;;  %3973 = vmatpush.bf16.msrb.mxu3 %v6861_v54  ;;  %v6896_v54 = vld [vmem:[#allocation5 + $0xd4] sm:$0xf0] }
 0x415   :  { %v3655_v50 = vmul.f32 %v6964_v19, %v3650_v56  ;;  %v3633_v13 = vadd.f32 %v3632_v58, %v3631_v46  ;;  %v3637_v62 = vadd.f32 %v3636_v5, %v3635_v57  ;;  %v3613_v18 = vmul.f32 %v3609_v42, %v8926_v38 }
 0x416   :  { %vm3661_vm9 = vweird.f32 %v6964_v19  ;;  %v3701_v42 = vperm.slane %v9480_v35, 2 }
 0x417   :  { %v3656_v11 = vmul.f32 %v6964_v19, %v3655_v50  ;;  %v3647_v15 = vmul.f32 %v3633_v13, %v8926_v38  ;;  %v3638_v63 = vrot.slane %v3637_v62, 1  ;;  %v9473_v25 = vsub.f32 %v3583_v4, %v3613_v18  ;;  %vm3662_vm11 = vmor %vm3660_vm10, %vm3661_vm9 }
 0x419   :  { %v3657_v33 = vmul.f32 0.5, %v3656_v11  ;;  %v3651_v23 = vadd.f32 1e-05, %v3647_v15  ;;  %v3639_v27 = vadd.f32 %v3638_v63, %v3637_v62  ;;  %v3621_v28 = vmul.f32 %v9473_v25, %v9473_v25 }
 0x41b   :  { %v3658_v43 = vsub.f32 1.5, %v3657_v33  ;;  %6965 = vrsqrt.f32 %v3651_v23  ;;  %v3648_v51 = vmul.f32 %v3639_v27, %v8926_v38  ;;  %v3640_v52 = vrot.slane %v3621_v28, 4 }
 0x41c   :  { %vm3670_vm13 = vweird.f32 %v3651_v23 }
 0x41d   :  { %v3659_v45 = vmul.f32 %v6964_v19, %v3658_v43  ;;  %v3652_v1 = vadd.f32 1e-05, %v3648_v51  ;;  %v3641_v4 = vadd.f32 %v3640_v52, %v3621_v28  ;;  %v3715_v43 = vperm.slane %v9486_v53, 3  ;;  %v6326_v53 = vld [vmem:[#allocation5 + $0xc0] sm:$0xf] }
 0x41f   :  { %v3663_v10 = vsel %vm3662_vm11, %v6964_v19, %v3659_v45  ;;  %6967 = vrsqrt.f32 %v3652_v1  ;;  %v3642_v32 = vrot.slane %v3641_v4, 2  ;;  %vm3680_vm0 = vweird.f32 %v3652_v1 }
 0x420   :  { %v3694_v24 = vmul.f32 %v3663_v10, %v9456_v22 }
 0x421   :  { %v6966_v36 = vpop.eup %6965  ;;  %v3643_v21 = vadd.f32 %v3642_v32, %v3641_v4  ;;  %v6897_v4 = vld [vmem:[#allocation5 + $0xe4] sm:$0xf]  ;;  %v6900_v32 = vld [vmem:[#allocation5 + $0xf4] sm:$0xf0] }
 0x422   :  { %v3707_v49 = vmul.f32 %v3699_v9, %v3694_v24  ;;  %v3665_v40 = vmul.f32 %v6966_v36, %v3651_v23  ;;  %vm3671_vm12 = vweird.f32 %v6966_v36  ;;  %v6899_v9 = vld [vmem:[#allocation5 + $0xec] sm:$0xf0]  ;;  %v6344_v24 = vld [vmem:[#allocation5 + $0xf0] sm:$0xf0] }
 0x423   :  { %v3644_v56 = vrot.slane %v3643_v21, 1  ;;  %vm3672_vm14 = vmor %vm3670_vm13, %vm3671_vm12  ;;  %v6347_v30 = vor.u32 %v6897_v4, %v6344_v24  ;;  %v6880_v24 = vld [vmem:[#allocation5 + $0x54] sm:$0xf0] }
 0x424   :  { %v3720_v29 = vadd.f32 %v3712_v2, %v3707_v49  ;;  %v3666_v37 = vmul.f32 %v6966_v36, %v3665_v40  ;;  %v6350_v2 = vld [vmem:[#allocation5 + $0xe8] sm:$0xf]  ;;  %v6352_v49 = vld [vmem:[#allocation5 + $0xf8] sm:$0xf0]  ;;  %v6895_v40 = vld [vmem:[#allocation5 + $0xcc] sm:$0xf0] }
 0x425   :  { %v6968_v55 = vpop.eup %6967  ;;  %v3645_v31 = vadd.f32 %v3644_v56, %v3643_v21  ;;  %4252 = vmatpush.bf16.msra.mxu1 %v6347_v30  ;;  %v6893_v21 = vld [vmem:[#allocation5 + $0xc4] sm:$0xf]  ;;  %v6334_v56 = vld [vmem:[#allocation5 + $0xc8] sm:$0xf]  ;;  %v6272_v30 = vld [vmem:[#allocation5 + $0x58] sm:$0xf0] }
 0x426   :  { %v3724_v59 = vmax.f32 %v3720_v29, 0.0  ;;  %v3667_v39 = vmul.f32 0.5, %v3666_v37  ;;  %v3675_v3 = vmul.f32 %v6968_v55, %v3652_v1  ;;  %vm3681_vm15 = vweird.f32 %v6968_v55  ;;  %v6342_v1 = vld [vmem:[#allocation5 + $0xe0] sm:$0xf]  ;;  %v6328_v37 = vld [vmem:[#allocation5 + $0xd0] sm:$0xf0] }
 0x427   :  { %v3649_v8 = vmul.f32 %v3645_v31, %v8926_v38  ;;  %vm3682_vm1 = vmor %vm3680_vm0, %vm3681_vm15  ;;  %v6343_v10 = vor.u32 %v6899_v9, %v6342_v1  ;;  %v6327_v29 = vor.u32 %v6895_v40, %v6326_v53  ;;  %v6310_v31 = vld [vmem:[#allocation5 + $0xa0] sm:$0xf]  ;;  %v6264_v1 = vld [vmem:[#allocation5 + $0x50] sm:$0xf0] }
 0x428   :  { %v3668_v22 = vsub.f32 1.5, %v3667_v39  ;;  %v3676_v47 = vmul.f32 %v6968_v55, %v3675_v3  ;;  %v3728_v20 = vpack.c.bf16 %v3724_v59, %v3724_v59  ;;  %v6335_v59 = vor.u32 %v6896_v54, %v6334_v56  ;;  %v6894_v39 = vld [vmem:[#allocation5 + $0xcc] sm:$0xf]  ;;  %v6336_v3 = vld [vmem:[#allocation5 + $0xd8] sm:$0xf0] }
 0x429   :  { %v3653_v48 = vadd.f32 1e-05, %v3649_v8  ;;  %4239 = vmatpush.bf16.msra.mxu0 %v6343_v10  ;;  %v6312_v8 = vld [vmem:[#allocation5 + $0xb0] sm:$0xf0]  ;;  %v6270_v10 = vld [vmem:[#allocation5 + $0x48] sm:$0xf] }
 0x42a   :  { %v3669_v12 = vmul.f32 %v6966_v36, %v3668_v22  ;;  %v3677_v16 = vmul.f32 0.5, %v3676_v47  ;;  %3935 = vmatmul.bf16.vlgmr.msrb.gmra.mxu0 %v3728_v20  ;;  %v6339_v22 = vor.u32 %v6894_v39, %v6336_v3  ;;  %v6891_v47 = vld [vmem:[#allocation5 + $0xac] sm:$0xf0]  ;;  %v6889_v20 = vld [vmem:[#allocation5 + $0xa4] sm:$0xf] }
 0x42b   :  { %6969 = vrsqrt.f32 %v3653_v48  ;;  %vm3690_vm3 = vweird.f32 %v3653_v48  ;;  %v6230_v3 = vld [vmem:[#allocation5] sm:$0xf] }
 0x42c   :  { %v3673_v34 = vsel %vm3672_vm14, %v6966_v36, %v3669_v12  ;;  %v3678_v46 = vsub.f32 1.5, %v3677_v16  ;;  %v6351_v36 = vor.u32 %v6900_v32, %v6350_v2  ;;  %v6311_v12 = vor.u32 %v6891_v47, %v6310_v31  ;;  %v6878_v2 = vld [vmem:[#allocation5 + $0x4c] sm:$0xf]  ;;  %v6871_v31 = vld [vmem:[#allocation5 + $0xc] sm:$0xf0] }
 0x42d   :  { %v3695_v57 = vmul.f32 %v3673_v34, %v9461_v61  ;;  %4240 = vmatpush.bf16.msra.mxu0 %v6327_v29  ;;  %v6315_v16 = vor.u32 %v6889_v20, %v6312_v8  ;;  %v6890_v34 = vld [vmem:[#allocation5 + $0xac] sm:$0xf]  ;;  %v6271_v32 = vor.u32 %v6880_v24, %v6270_v10  ;;  %v6254_v29 = vld [vmem:[#allocation5 + $0x28] sm:$0xf]  ;;  %v6231_v47 = vor.u32 %v6871_v31, %v6230_v3  ;;  %v6232_v20 = vld [vmem:[#allocation5 + $0x10] sm:$0xf0] }
 0x42e   :  { %v3679_v58 = vmul.f32 %v6968_v55, %v3678_v46  ;;  %4265 = vmatpush.bf16.msra.mxu2 %v6351_v36  ;;  %v6275_v36 = vor.u32 %v6878_v2, %v6272_v30  ;;  %v6238_v8 = vld [vmem:[#allocation5 + $0x8] sm:$0xf] }
 0x42f   :  { %v3708_v5 = vmul.f32 %v3700_v17, %v3695_v57  ;;  %v6318_v17 = vld [vmem:[#allocation5 + $0xa8] sm:$0xf]  ;;  %v6320_v57 = vld [vmem:[#allocation5 + $0xb8] sm:$0xf0] }
 0x430   :  { %v3683_v19 = vsel %vm3682_vm1, %v6968_v55, %v3679_v58  ;;  %v6331_v55 = vor.u32 %v6893_v21, %v6328_v37  ;;  %v6294_v58 = vld [vmem:[#allocation5 + $0x80] sm:$0xf]  ;;  %v6248_v21 = vld [vmem:[#allocation5 + $0x30] sm:$0xf0]  ;;  %v6876_v37 = vld [vmem:[#allocation5 + $0x34] sm:$0xf0] }
 0x431   :  { %v3721_v26 = vadd.f32 %v3713_v44, %v3708_v5  ;;  %v3696_v60 = vmul.f32 %v3683_v19, %v9467_v0  ;;  %v6970_v50 = vpop.eup %6969  ;;  %v3702_v0 = vperm.slane %v9480_v35, 3  ;;  %v6898_v35 = vld [vmem:[#allocation5 + $0xec] sm:$0xf]  ;;  %v6323_v44 = vor.u32 %v6890_v34, %v6320_v57  ;;  %4241 = vmatpush.bf16.msra.mxu0 %v6311_v12  ;;  %v6887_v5 = vld [vmem:[#allocation5 + $0x8c] sm:$0xf0] }
 0x432   :  { %v3685_v18 = vmul.f32 %v6970_v50, %v3653_v48  ;;  %vm3691_vm2 = vweird.f32 %v6970_v50  ;;  %4253 = vmatpush.bf16.msra.mxu1 %v6331_v55  ;;  %4266 = vmatpush.bf16.msra.mxu2 %v6335_v59  ;;  %v6892_v48 = vld [vmem:[#allocation5 + $0xb4] sm:$0xf0]  ;;  %v6295_v19 = vor.u32 %v6887_v5, %v6294_v58  ;;  %v6255_v54 = vor.u32 %v6876_v37, %v6254_v29  ;;  %v6874_v55 = vld [vmem:[#allocation5 + $0x2c] sm:$0xf]  ;;  %v6256_v59 = vld [vmem:[#allocation5 + $0x38] sm:$0xf0] }
 0x433   :  { %v3725_v13 = vmax.f32 %v3721_v26, 0.0  ;;  %v3709_v62 = vmul.f32 %v3701_v42, %v3696_v60  ;;  %vm3692_vm4 = vmor %vm3690_vm3, %vm3691_vm2  ;;  %v6319_v46 = vor.u32 %v6892_v48, %v6318_v17  ;;  %v6885_v42 = vld [vmem:[#allocation5 + $0x84] sm:$0xf]  ;;  %v6296_v26 = vld [vmem:[#allocation5 + $0x90] sm:$0xf0]  ;;  %v6259_v39 = vor.u32 %v6874_v55, %v6256_v59 }
 0x434   :  { %v3686_v15 = vmul.f32 %v6970_v50, %v3685_v18  ;;  %v6302_v60 = vld [vmem:[#allocation5 + $0x88] sm:$0xf]  ;;  %v6304_v18 = vld [vmem:[#allocation5 + $0x98] sm:$0xf0]  ;;  %v6872_v12 = vld [vmem:[#allocation5 + $0x14] sm:$0xf0] }
 0x435   :  { %v3722_v61 = vadd.f32 %v3714_v7, %v3709_v62  ;;  %v3729_v11 = vpack.c.bf16 %v3725_v13, %v3725_v13  ;;  %v6888_v7 = vld [vmem:[#allocation5 + $0x94] sm:$0xf0]  ;;  %v6886_v62 = vld [vmem:[#allocation5 + $0x8c] sm:$0xf]  ;;  %4242 = vmatpush.bf16.msra.mxu0 %v6295_v19  ;;  %v6239_v17 = vor.u32 %v6872_v12, %v6238_v8  ;;  %v6240_v34 = vld [vmem:[#allocation5 + $0x18] sm:$0xf0] }
 0x436   :  { %v3687_v6 = vmul.f32 0.5, %v3686_v15  ;;  %4254 = vmatpush.bf16.msra.mxu1 %v6315_v16  ;;  %4267 = vmatpush.bf16.msra.mxu2 %v6319_v46  ;;  %v6303_v13 = vor.u32 %v6888_v7, %v6302_v60  ;;  %v6883_v15 = vld [vmem:[#allocation5 + $0x6c] sm:$0xf0]  ;;  %v6870_v48 = vld [vmem:[#allocation5 + $0xc] sm:$0xf]  ;;  %v6913_v55 = vld [vmem:[#allocation7 + $0x60] sm:$0xff] }
 0x437   :  { %v3726_v63 = vmax.f32 %v3722_v61, 0.0  ;;  %3948 = vmatmul.bf16.vlgmr.msrb.gmra.mxu1 %v3729_v11  ;;  %v6307_v61 = vor.u32 %v6886_v62, %v6304_v18  ;;  %v6278_v11 = vld [vmem:[#allocation5 + $0x60] sm:$0xf]  ;;  %v6243_v46 = vor.u32 %v6870_v48, %v6240_v34  ;;  %v6914_v30 = vld [vmem:[#allocation7 + $0x68] sm:$0xff]  ;;  %v6904_v34 = vld [vmem:[#allocation7 + $0x18] sm:$0xff] }
 0x438   :  { %v3688_v33 = vsub.f32 1.5, %v3687_v6  ;;  %v6279_v6 = vor.u32 %v6883_v15, %v6278_v11  ;;  %v6908_v15 = vld [vmem:[#allocation7 + $0x38] sm:$0xff] }
 0x439   :  { %v3730_v14 = vpack.c.bf16 %v3726_v63, %v3726_v63  ;;  %v6881_v63 = vld [vmem:[#allocation5 + $0x64] sm:$0xf] }
 0x43a   :  { %v3689_v23 = vmul.f32 %v6970_v50, %v3688_v33  ;;  %4268 = vmatpush.bf16.msra.mxu2 %v6303_v13  ;;  %v6286_v33 = vld [vmem:[#allocation5 + $0x68] sm:$0xf]  ;;  %4243 = vmatpush.bf16.msra.mxu0 %v6279_v6 }
 0x43b   :  { %3961 = vmatmul.bf16.vlgmr.msrb.gmra.mxu2 %v3730_v14  ;;  %v6280_v14 = vld [vmem:[#allocation5 + $0x70] sm:$0xf0] }
 0x43c   :  { %v3693_v27 = vsel %vm3692_vm4, %v6970_v50, %v3689_v23  ;;  %v6299_v50 = vor.u32 %v6885_v42, %v6296_v26  ;;  %v6884_v23 = vld [vmem:[#allocation5 + $0x74] sm:$0xf0]  ;;  %v6943_v42 = vld [vmem:[%s9551_s7] ss:$0 sm:$0xff] }
 0x43d   :  { %v3697_v28 = vmul.f32 %v3693_v27, %v9473_v25  ;;  %v6355_v25 = vor.u32 %v6898_v35, %v6352_v49  ;;  %v6287_v27 = vor.u32 %v6884_v23, %v6286_v33  ;;  %v6246_v35 = vld [vmem:[#allocation5 + $0x20] sm:$0xf]  ;;  %v6875_v49 = vld [vmem:[#allocation5 + $0x2c] sm:$0xf0] }
 0x43e   :  { %4255 = vmatpush.bf16.msra.mxu1 %v6299_v50  ;;  %v6247_v40 = vor.u32 %v6875_v49, %v6246_v35 }
 0x43f   :  { %v3710_v51 = vmul.f32 %v3702_v0, %v3697_v28  ;;  %4278 = vmatpush.bf16.msra.mxu3 %v6355_v25  ;;  %v6283_v0 = vor.u32 %v6881_v63, %v6280_v14  ;;  %v6882_v28 = vld [vmem:[#allocation5 + $0x6c] sm:$0xf]  ;;  %4269 = vmatpush.bf16.msra.mxu2 %v6287_v27  ;;  %v6873_v25 = vld [vmem:[#allocation5 + $0x24] sm:$0xf]  ;;  %v6916_v63 = vld [vmem:[#allocation7 + $0x78] sm:$0xff] }
 0x440   :  { %v6251_v56 = vor.u32 %v6873_v25, %v6248_v21  ;;  %v6915_v27 = vld [vmem:[#allocation7 + $0x70] sm:$0xff] }
 0x441   :  { %v3723_v52 = vadd.f32 %v3715_v43, %v3710_v51  ;;  %v6288_v43 = vld [vmem:[#allocation5 + $0x78] sm:$0xf0]  ;;  %v6262_v51 = vld [vmem:[#allocation5 + $0x40] sm:$0xf] }
 0x442   :  { %4256 = vmatpush.bf16.msra.mxu1 %v6283_v0  ;;  %v6907_v0 = vld [vmem:[#allocation7 + $0x30] sm:$0xff] }
 0x443   :  { %v3727_v41 = vmax.f32 %v3723_v52, 0.0  ;;  %4279 = vmatpush.bf16.msra.mxu3 %v6339_v22  ;;  %v6291_v52 = vor.u32 %v6882_v28, %v6288_v43  ;;  %4270 = vmatpush.bf16.msra.mxu2 %v6271_v32  ;;  %v6869_v22 = vld [vmem:[#allocation5 + $0x4] sm:$0xf]  ;;  %v6906_v32 = vld [vmem:[#allocation7 + $0x28] sm:$0xff] }
 0x444   :  { %v6235_v16 = vor.u32 %v6869_v22, %v6232_v20  ;;  %v6922_v22 = vld [vmem:[#allocation7 + $0xa8] sm:$0xff] }
 0x445   :  { %v3731_v45 = vpack.c.bf16 %v3727_v41, %v3727_v41  ;;  %v6879_v41 = vld [vmem:[#allocation5 + $0x4c] sm:$0xf0] }
 0x446   :  { %v6263_v9 = vor.u32 %v6879_v41, %v6262_v51  ;;  %v6924_v51 = vld [vmem:[#allocation7 + $0xb8] sm:$0xff] }
 0x447   :  { %3974 = vmatmul.bf16.vlgmr.msrb.gmra.mxu3 %v3731_v45  ;;  %v6877_v45 = vld [vmem:[#allocation5 + $0x44] sm:$0xf]  ;;  %4271 = vmatpush.bf16.msra.mxu2 %v6255_v54 }
 0x448   :  { %4280 = vmatpush.bf16.msra.mxu3 %v6323_v44  ;;  %v6267_v4 = vor.u32 %v6877_v45, %v6264_v1  ;;  %4244 = vmatpush.bf16.msra.mxu0 %v6263_v9  ;;  %v6905_v54 = vld [vmem:[#allocation7 + $0x20] sm:$0xff] }
 0x44a   :  { %4257 = vmatpush.bf16.msra.mxu1 %v6267_v4 }
 0x44b   :  { %4272 = vmatpush.bf16.msra.mxu2 %v6239_v17 }
 0x44c   :  { %4281 = vmatpush.bf16.msra.mxu3 %v6307_v61  ;;  %4245 = vmatpush.bf16.msra.mxu0 %v6247_v40  ;;  %v6931_v40 = vld [vmem:[#allocation7 + $0xf0] sm:$0xff] }
 0x44e   :  { %4258 = vmatpush.bf16.msra.mxu1 %v6251_v56 }
 0x44f   :  { %4658 = vmatpush.bf16.msrb.mxu2 %v6924_v51 }
 0x450   :  { %4282 = vmatpush.bf16.msra.mxu3 %v6291_v52  ;;  %4246 = vmatpush.bf16.msra.mxu0 %v6231_v47  ;;  %v6932_v52 = vld [vmem:[#allocation7 + $0xf8] sm:$0xff]  ;;  %v6930_v47 = vld [vmem:[#allocation7 + $0xe8] sm:$0xff] }
 0x452   :  { %4259 = vmatpush.bf16.msra.mxu1 %v6235_v16 }
 0x454   :  { %4283 = vmatpush.bf16.msra.mxu3 %v6275_v36  ;;  %4632 = vmatpush.bf16.msrb.mxu0 %v6908_v15 }
 0x456   :  { %4645 = vmatpush.bf16.msrb.mxu1 %v6916_v63  ;;  %v6920_v63 = vld [vmem:[#allocation7 + $0x98] sm:$0xff] }
 0x458   :  { %4284 = vmatpush.bf16.msra.mxu3 %v6259_v39  ;;  %4633 = vmatpush.bf16.msrb.mxu0 %v6907_v0 }
 0x45a   :  { %4646 = vmatpush.bf16.msrb.mxu1 %v6915_v27  ;;  %v6902_v27 = vld [vmem:[#allocation7 + $0x8] sm:$0xff] }
 0x45c   :  { %4285 = vmatpush.bf16.msra.mxu3 %v6243_v46  ;;  %4634 = vmatpush.bf16.msrb.mxu0 %v6906_v32  ;;  %v6912_v46 = vld [vmem:[#allocation7 + $0x58] sm:$0xff]  ;;  %v6909_v32 = vld [vmem:[#allocation7 + $0x40] sm:$0xff] }
 0x45e   :  { %4647 = vmatpush.bf16.msrb.mxu1 %v6914_v30 }
 0x460   :  { %4671 = vmatpush.bf16.msrb.mxu3 %v6932_v52  ;;  %4635 = vmatpush.bf16.msrb.mxu0 %v6905_v54 }
 0x462   :  { %4648 = vmatpush.bf16.msrb.mxu1 %v6913_v55 }
 0x464   :  { %4672 = vmatpush.bf16.msrb.mxu3 %v6931_v40  ;;  %4636 = vmatpush.bf16.msrb.mxu0 %v6904_v34 }
 0x466   :  { %4649 = vmatpush.bf16.msrb.mxu1 %v6912_v46 }
 0x468   :  { %4673 = vmatpush.bf16.msrb.mxu3 %v6930_v47 }
 0x4a7   :  { %v3936_v53 = vpop.f32.mrf.mxu0 }
 0x4a8   :  { %v3937_v26 = vadd.f32 %v6943_v42, %v3936_v53  ;;  %v6923_v53 = vld [vmem:[#allocation7 + $0xb0] sm:$0xff]  ;;  %v6921_v42 = vld [vmem:[#allocation7 + $0xa0] sm:$0xff] }
 0x4a9   :  { %4659 = vmatpush.bf16.msrb.mxu2 %v6923_v53  ;;  %v6926_v53 = vld [vmem:[#allocation7 + $0xc8] sm:$0xff] }
 0x4ad   :  { %4660 = vmatpush.bf16.msrb.mxu2 %v6922_v22 }
 0x4af   :  { %v3938_v57 = vpop.f32.mrf.mxu0 }
 0x4b1   :  { %4661 = vmatpush.bf16.msrb.mxu2 %v6921_v42 }
 0x4b4   :  { %v3949_v44 = vpop.f32.mrf.mxu1 }
 0x4b5   :  { %v3950_v60 = vadd.f32 %v3949_v44, %v3937_v26  ;;  %4662 = vmatpush.bf16.msrb.mxu2 %v6920_v63 }
 0x4bc   :  { %v3951_v58 = vpop.f32.mrf.mxu1 }
 0x4be   :  { %v3962_v5 = vpop.f32.mrf.mxu2 }
 0x4bf   :  { %v3963_v7 = vadd.f32 %v3962_v5, %v3950_v60 }
 0x4c6   :  { %v3964_v19 = vpop.f32.mrf.mxu2 }
 0x4c7   :  { %v6929_v19 = vld [vmem:[#allocation7 + $0xe0] sm:$0xff] }
 0x4c8   :  { %4674 = vmatpush.bf16.msrb.mxu3 %v6929_v19 }
 0x4ca   :  { %v3975_v50 = vpop.f32.mrf.mxu3 }
 0x4cb   :  { %v3976_v13 = vadd.f32 %v3975_v50, %v3963_v7 }
 0x4cd   :  { %v4078_v62 = vpack.c.bf16 %v3976_v13, %v3976_v13  ;;  %v6903_v13 = vld [vmem:[#allocation7 + $0x10] sm:$0xff] }
 0x4ce   :  { %4637 = vmatpush.bf16.msrb.mxu0 %v6903_v13  ;;  %v4012_v13 = vld [vmem:[%s9554_s10] sm:$0xf] }
 0x4cf   :  { %4247 = vmatmul.bf16.vlgmr.msra.gmra.mxu0 %v4078_v62  ;;  %4260 = vmatmul.bf16.vlgmr.msra.gmra.mxu1 %v4078_v62 }
 0x4d0   :  { %4273 = vmatmul.bf16.vlgmr.msra.gmra.mxu2 %v4078_v62  ;;  %4286 = vmatmul.bf16.vlgmr.msra.gmra.mxu3 %v4078_v62  ;;  %v6911_v62 = vld [vmem:[#allocation7 + $0x50] sm:$0xff] }
 0x4d1   :  { %4650 = vmatpush.bf16.msrb.mxu1 %v6911_v62 }
 0x4d2   :  { %v3977_v18 = vpop.f32.mrf.mxu3  ;;  %4638 = vmatpush.bf16.msrb.mxu0 %v6902_v27  ;;  %v4417_v27 = vperm.slane %v4012_v13, 0 }
 0x54c   :  { %v4248_v61 = vpop.f32.mrf.mxu0  ;;  %v4261_v11 = vpop.f32.mrf.mxu1 }
 0x54d   :  { %v4291_v6 = vrot.slane %v4248_v61, 4  ;;  %v4297_v14 = vrot.slane %v4261_v11, 4 }
 0x54f   :  { %v4292_v33 = vadd.f32 %v4291_v6, %v4248_v61  ;;  %v4298_v23 = vadd.f32 %v4297_v14, %v4261_v11  ;;  %v6928_v6 = vld [vmem:[#allocation7 + $0xd8] sm:$0xff] }
 0x550   :  { %4675 = vmatpush.bf16.msrb.mxu3 %v6928_v6 }
 0x551   :  { %v4293_v28 = vrot.slane %v4292_v33, 2  ;;  %v4299_v43 = vrot.slane %v4298_v23, 2 }
 0x553   :  { %v4294_v41 = vadd.f32 %v4293_v28, %v4292_v33  ;;  %v4300_v45 = vadd.f32 %v4299_v43, %v4298_v23  ;;  %v4274_v1 = vpop.f32.mrf.mxu2  ;;  %v4287_v9 = vpop.f32.mrf.mxu3  ;;  %v6910_v28 = vld [vmem:[#allocation7 + $0x48] sm:$0xff] }
 0x554   :  { %v4303_v4 = vrot.slane %v4274_v1, 4  ;;  %v4309_v10 = vrot.slane %v4287_v9, 4  ;;  %v4250_v24 = vpop.f32.mrf.mxu0  ;;  %v4263_v2 = vpop.f32.mrf.mxu1  ;;  %4651 = vmatpush.bf16.msrb.mxu1 %v6910_v28 }
 0x555   :  { %v4295_v36 = vrot.slane %v4294_v41, 1  ;;  %v4301_v35 = vrot.slane %v4300_v45, 1  ;;  %v6901_v2 = vld [vmem:[#allocation7] sm:$0xff] }
 0x556   :  { %v4304_v49 = vadd.f32 %v4303_v4, %v4274_v1  ;;  %v4310_v25 = vadd.f32 %v4309_v10, %v4287_v9  ;;  %4639 = vmatpush.bf16.msrb.mxu0 %v6901_v2 }
 0x557   :  { %v4296_v21 = vadd.f32 %v4295_v36, %v4294_v41  ;;  %v4302_v29 = vadd.f32 %v4301_v35, %v4300_v45  ;;  %v6919_v45 = vld [vmem:[#allocation7 + $0x90] sm:$0xff] }
 0x558   :  { %v4305_v37 = vrot.slane %v4304_v49, 2  ;;  %v4311_v56 = vrot.slane %v4310_v25, 2  ;;  %4663 = vmatpush.bf16.msrb.mxu2 %v6919_v45  ;;  %4652 = vmatpush.bf16.msrb.mxu1 %v6909_v32 }
 0x559   :  { %v4315_v59 = vmul.f32 %v4296_v21, %v8926_v38  ;;  %v4316_v39 = vmul.f32 %v4302_v29, %v8926_v38 }
 0x55a   :  { %v4306_v3 = vadd.f32 %v4305_v37, %v4304_v49  ;;  %v4312_v31 = vadd.f32 %v4311_v56, %v4310_v25  ;;  %v6918_v25 = vld [vmem:[#allocation7 + $0x88] sm:$0xff] }
 0x55b   :  { %v9506_v20 = vsub.f32 %v4248_v61, %v4315_v59  ;;  %v9508_v8 = vsub.f32 %v4261_v11, %v4316_v39  ;;  %v4276_v12 = vpop.f32.mrf.mxu2  ;;  %v4289_v16 = vpop.f32.mrf.mxu3  ;;  %v6917_v39 = vld [vmem:[#allocation7 + $0x80] sm:$0xff] }
 0x55c   :  { %v4307_v17 = vrot.slane %v4306_v3, 1  ;;  %v4313_v48 = vrot.slane %v4312_v31, 1  ;;  %4664 = vmatpush.bf16.msrb.mxu2 %v6918_v25  ;;  %v4419_v25 = vperm.slane %v4012_v13, 2 }
 0x55d   :  { %v4323_v57 = vmul.f32 %v9506_v20, %v9506_v20  ;;  %v4324_v44 = vmul.f32 %v9508_v8, %v9508_v8 }
 0x55e   :  { %v4308_v58 = vadd.f32 %v4307_v17, %v4306_v3  ;;  %v4314_v5 = vadd.f32 %v4313_v48, %v4312_v31  ;;  %v6925_v3 = vld [vmem:[#allocation7 + $0xc0] sm:$0xff] }
 0x55f   :  { %v4327_v26 = vrot.slane %v4323_v57, 4  ;;  %v4333_v60 = vrot.slane %v4324_v44, 4 }
 0x560   :  { %v4317_v7 = vmul.f32 %v4308_v58, %v8926_v38  ;;  %v4318_v50 = vmul.f32 %v4314_v5, %v8926_v38  ;;  %4665 = vmatpush.bf16.msrb.mxu2 %v6917_v39 }
 0x561   :  { %v4328_v18 = vadd.f32 %v4327_v26, %v4323_v57  ;;  %v4334_v61 = vadd.f32 %v4333_v60, %v4324_v44  ;;  %v4011_v26 = vld [vmem:[%s9553_s9] sm:$0xf] }
 0x562   :  { %v9516_v11 = vsub.f32 %v4274_v1, %v4317_v7  ;;  %v9518_v15 = vsub.f32 %v4287_v9, %v4318_v50  ;;  %v6927_v1 = vld [vmem:[#allocation7 + $0xd0] sm:$0xff]  ;;  %v4406_v32 = vperm.slane %v4011_v26, 2 }
 0x563   :  { %v4329_v14 = vrot.slane %v4328_v18, 2  ;;  %v4335_v33 = vrot.slane %v4334_v61, 2  ;;  %4676 = vmatpush.bf16.msrb.mxu3 %v6927_v1 }
 0x564   :  { %v4325_v23 = vmul.f32 %v9516_v11, %v9516_v11  ;;  %v4326_v0 = vmul.f32 %v9518_v15, %v9518_v15 }
 0x565   :  { %v4330_v43 = vadd.f32 %v4329_v14, %v4328_v18  ;;  %v4336_v51 = vadd.f32 %v4335_v33, %v4334_v61  ;;  %v4404_v61 = vperm.slane %v4011_v26, 0  ;;  %v4405_v33 = vperm.slane %v4011_v26, 1 }
 0x566   :  { %v4339_v52 = vrot.slane %v4325_v23, 4  ;;  %v4345_v41 = vrot.slane %v4326_v0, 4 }
 0x567   :  { %v4331_v9 = vrot.slane %v4330_v43, 1  ;;  %v4337_v4 = vrot.slane %v4336_v51, 1  ;;  %4677 = vmatpush.bf16.msrb.mxu3 %v6926_v53 }
 0x568   :  { %v4340_v10 = vadd.f32 %v4339_v52, %v4325_v23  ;;  %v4346_v24 = vadd.f32 %v4345_v41, %v4326_v0  ;;  %v4418_v52 = vperm.slane %v4012_v13, 1 }
 0x569   :  { %v4332_v30 = vadd.f32 %v4331_v9, %v4330_v43  ;;  %v4338_v36 = vadd.f32 %v4337_v4, %v4336_v51 }
 0x56a   :  { %v4341_v35 = vrot.slane %v4340_v10, 2  ;;  %v4347_v49 = vrot.slane %v4346_v24, 2 }
 0x56b   :  { %v4351_v40 = vmul.f32 %v4332_v30, %v8926_v38  ;;  %v4352_v21 = vmul.f32 %v4338_v36, %v8926_v38  ;;  %4678 = vmatpush.bf16.msrb.mxu3 %v6925_v3 }
 0x56c   :  { %v4342_v29 = vadd.f32 %v4341_v35, %v4340_v10  ;;  %v4348_v37 = vadd.f32 %v4347_v49, %v4346_v24 }
 0x56d   :  { %v4355_v56 = vadd.f32 1e-05, %v4351_v40  ;;  %v4356_v54 = vadd.f32 1e-05, %v4352_v21 }
 0x56e   :  { %v4343_v55 = vrot.slane %v4342_v29, 1  ;;  %v4349_v59 = vrot.slane %v4348_v37, 1 }
 0x56f   :  { %6971 = vrsqrt.f32 %v4355_v56  ;;  %vm4365_vm7 = vweird.f32 %v4355_v56  ;;  %vm4375_vm9 = vweird.f32 %v4356_v54 }
 0x570   :  { %6973 = vrsqrt.f32 %v4356_v54  ;;  %v4344_v31 = vadd.f32 %v4343_v55, %v4342_v29  ;;  %v4350_v22 = vadd.f32 %v4349_v59, %v4348_v37  ;;  %v4420_v29 = vperm.slane %v4012_v13, 3 }
 0x572   :  { %v4353_v47 = vmul.f32 %v4344_v31, %v8926_v38  ;;  %v4354_v12 = vmul.f32 %v4350_v22, %v8926_v38 }
 0x574   :  { %v4357_v16 = vadd.f32 1e-05, %v4353_v47  ;;  %v4358_v17 = vadd.f32 1e-05, %v4354_v12 }
 0x575   :  { %v6972_v48 = vpop.eup %6971 }
 0x576   :  { %v6974_v34 = vpop.eup %6973  ;;  %v4360_v46 = vmul.f32 %v6972_v48, %v4355_v56  ;;  %6975 = vrsqrt.f32 %v4357_v16  ;;  %vm4366_vm5 = vweird.f32 %v6972_v48  ;;  %vm4385_vm13 = vweird.f32 %v4357_v16 }
 0x577   :  { %v4370_v57 = vmul.f32 %v6974_v34, %v4356_v54  ;;  %6977 = vrsqrt.f32 %v4358_v17  ;;  %vm4376_vm6 = vweird.f32 %v6974_v34  ;;  %vm4367_vm8 = vmor %vm4365_vm7, %vm4366_vm5  ;;  %vm4395_vm15 = vweird.f32 %v4358_v17 }
 0x578   :  { %v4361_v44 = vmul.f32 %v6972_v48, %v4360_v46  ;;  %vm4377_vm10 = vmor %vm4375_vm9, %vm4376_vm6 }
 0x579   :  { %v4371_v58 = vmul.f32 %v6974_v34, %v4370_v57 }
 0x57a   :  { %v4362_v5 = vmul.f32 0.5, %v4361_v44 }
 0x57b   :  { %v4372_v42 = vmul.f32 0.5, %v4371_v58 }
 0x57c   :  { %v6976_v19 = vpop.eup %6975  ;;  %v4363_v60 = vsub.f32 1.5, %v4362_v5 }
 0x57d   :  { %v6978_v38 = vpop.eup %6977  ;;  %v4373_v7 = vsub.f32 1.5, %v4372_v42  ;;  %v4380_v50 = vmul.f32 %v6976_v19, %v4357_v16  ;;  %vm4386_vm11 = vweird.f32 %v6976_v19 }
 0x57e   :  { %v4364_v62 = vmul.f32 %v6972_v48, %v4363_v60  ;;  %v4390_v18 = vmul.f32 %v6978_v38, %v4358_v17  ;;  %vm4396_vm12 = vweird.f32 %v6978_v38  ;;  %vm4387_vm14 = vmor %vm4385_vm13, %vm4386_vm11 }
 0x57f   :  { %v4374_v63 = vmul.f32 %v6974_v34, %v4373_v7  ;;  %v4381_v6 = vmul.f32 %v6976_v19, %v4380_v50  ;;  %vm4397_vm0 = vmor %vm4395_vm15, %vm4396_vm12 }
 0x580   :  { %v4368_v14 = vsel %vm4367_vm8, %v6972_v48, %v4364_v62  ;;  %v4391_v23 = vmul.f32 %v6978_v38, %v4390_v18 }
 0x581   :  { %v4399_v0 = vmul.f32 %v4368_v14, %v9506_v20  ;;  %v4378_v28 = vsel %vm4377_vm10, %v6974_v34, %v4374_v63  ;;  %v4382_v43 = vmul.f32 0.5, %v4381_v6 }
 0x582   :  { %v4400_v51 = vmul.f32 %v4378_v28, %v9508_v8  ;;  %v4392_v41 = vmul.f32 0.5, %v4391_v23  ;;  %v4407_v8 = vperm.slane %v4011_v26, 3 }
 0x583   :  { %v4412_v45 = vmul.f32 %v4404_v61, %v4399_v0  ;;  %v4383_v1 = vsub.f32 1.5, %v4382_v43 }
 0x584   :  { %v4413_v9 = vmul.f32 %v4405_v33, %v4400_v51  ;;  %v4393_v4 = vsub.f32 1.5, %v4392_v41 }
 0x585   :  { %v4425_v10 = vadd.f32 %v4417_v27, %v4412_v45  ;;  %v4384_v24 = vmul.f32 %v6976_v19, %v4383_v1 }
 0x586   :  { %v4426_v2 = vadd.f32 %v4418_v52, %v4413_v9  ;;  %v4394_v20 = vmul.f32 %v6978_v38, %v4393_v4 }
 0x587   :  { %v4429_v30 = vmax.f32 %v4425_v10, 0.0  ;;  %v4388_v36 = vsel %vm4387_vm14, %v6976_v19, %v4384_v24 }
 0x588   :  { %v4430_v35 = vmax.f32 %v4426_v2, 0.0  ;;  %v4401_v49 = vmul.f32 %v4388_v36, %v9516_v11  ;;  %v4398_v53 = vsel %vm4397_vm0, %v6978_v38, %v4394_v20 }
 0x589   :  { %v4433_v40 = vpack.c.bf16 %v4429_v30, %v4429_v30  ;;  %v4402_v21 = vmul.f32 %v4398_v53, %v9518_v15  ;;  %v6944_v15 = vld [vmem:[%s9556_s12] ss:$0 sm:$0xff] }
 0x58a   :  { %v4434_v37 = vpack.c.bf16 %v4430_v35, %v4430_v35  ;;  %v4414_v56 = vmul.f32 %v4406_v32, %v4401_v49 }
 0x58b   :  { %v4415_v54 = vmul.f32 %v4407_v8, %v4402_v21  ;;  %4640 = vmatmul.bf16.vlgmr.msrb.gmra.mxu0 %v4433_v40 }
 0x58c   :  { %v4427_v55 = vadd.f32 %v4419_v25, %v4414_v56  ;;  %4653 = vmatmul.bf16.vlgmr.msrb.gmra.mxu1 %v4434_v37 }
 0x58d   :  { %v4428_v59 = vadd.f32 %v4420_v29, %v4415_v54 }
 0x58e   :  { %v4431_v39 = vmax.f32 %v4427_v55, 0.0 }
 0x58f   :  { %v4432_v3 = vmax.f32 %v4428_v59, 0.0 }
 0x590   :  { %v4435_v31 = vpack.c.bf16 %v4431_v39, %v4431_v39 }
 0x591   :  { %v4436_v22 = vpack.c.bf16 %v4432_v3, %v4432_v3 }
 0x592   :  { %4666 = vmatmul.bf16.vlgmr.msrb.gmra.mxu2 %v4435_v31 }
 0x593   :  { %4679 = vmatmul.bf16.vlgmr.msrb.gmra.mxu3 %v4436_v22 }
 0x608   :  { %v4641_v11 = vpop.f32.mrf.mxu0 }
 0x609   :  { %v4654_v47 = vpop.f32.mrf.mxu1  ;;  %v4642_v12 = vadd.f32 %v6944_v15, %v4641_v11 }
 0x60b   :  { %v4655_v48 = vadd.f32 %v4654_v47, %v4642_v12 }
 0x610   :  { %v4643_v16 = vpop.f32.mrf.mxu0 }
 0x611   :  { %v4656_v17 = vpop.f32.mrf.mxu1 }
 0x615   :  { %v4667_v34 = vpop.f32.mrf.mxu2 }
 0x616   :  { %v4668_v46 = vadd.f32 %v4667_v34, %v4655_v48  ;;  %v4680_v57 = vpop.f32.mrf.mxu3 }
 0x618   :  { %v4681_v44 = vadd.f32 %v4680_v57, %v4668_v46 }
 0x61a   :  { %6484 = vst [vmem:[%s9557_s13 + $0x8] sm:$0xff] %v4681_v44 }
 0x61d   :  { %v4669_v58 = vpop.f32.mrf.mxu2 }
 0x61e   :  { %v4682_v5 = vpop.f32.mrf.mxu3 }
 0x61f   :  { %4690 = vsyncpa [#allocation4], 1 }
 0x620   :  { %4691 = vsyncpa [#allocation6], 1 }

</bundles_post_ra>
